<compile_context>
chip_gen: v5e
topology: v5e:2x2
jax: 0.10.0
libtpu: 0.0.40
codegen_flags: <defaults>
</compile_context>

<pallas_src>
import numpy as np
import jax
import jax.numpy as jnp
from jax import lax
from jax.experimental import pallas as pl
from jax.experimental.pallas import tpu as pltpu

EMBED = 32          # embedding_size
FC_DIM = 512        # fc_output_dim
CM = 16             # channel_mult
EPS = 1e-5

# (Cin, Cout, K, stride, pad, Hin, Hout) for the 4 ConvTranspose2d layers
LAYERS = [
    (FC_DIM, CM * 4, 4, 1, 0, 1, 4),     # 1x1   -> 4x4   (scatter == identity)
    (CM * 4, CM * 2, 3, 2, 1, 4, 7),     # 4x4   -> 7x7
    (CM * 2, CM * 1, 4, 2, 1, 7, 14),    # 7x7   -> 14x14
    (CM * 1, 1,      4, 2, 1, 14, 28),   # 14x14 -> 28x28 (no scatter matrix)
]

P1 = 16        # layer-1 output spatial (4*4) = layer-2 input spatial (unpadded)
QPAD2 = 128    # layer-2 output spatial 49  -> 128 lanes (zero-padded columns)
QPAD3 = 256    # layer-3 output spatial 196 -> 256 lanes (zero-padded columns)
PPAD3 = 128    # layer-3 per-batch input block width (49 valid lanes)


# ---------------------------------------------------------------------------
# Host-side (glue) parameter / geometry setup
# ---------------------------------------------------------------------------
def build_scatter_stacked(hin, win, k, stride, pad, q_pad=None):
    """Stacked 0/1 scatter matrix S[(t*P + p), q] (q zero-padded to q_pad)."""
    hout = (hin - 1) * stride - 2 * pad + k
    wout = (win - 1) * stride - 2 * pad + k
    q = hout * wout
    qp = q if q_pad is None else q_pad
    s = np.zeros((k * k, hin * win, qp), np.float32)
    for ky in range(k):
        for kx in range(k):
            t = ky * k + kx
            for iy in range(hin):
                for ix in range(win):
                    oy = iy * stride - pad + ky
                    ox = ix * stride - pad + kx
                    if 0 <= oy < hout and 0 <= ox < wout:
                        s[t, iy * win + ix, oy * wout + ox] = 1.0
    return s.reshape(k * k * hin * win, qp)


def _l4_taps():
    # Layer 4: 14x14 -> 28x28, K=4, stride=2, pad=1, Cout=1.
    # Each tap (ky,kx) feeds exactly one of the 4 (py,px) output parity classes
    # via a pure (dy,dx) shift: iy = yh - dy, ix = xh - dx.
    taps = []
    for ky in range(4):
        py = (ky + 1) % 2
        dy = (ky - 1 - py) // 2
        for kx in range(4):
            px = (kx + 1) % 2
            dx = (kx - 1 - px) // 2
            taps.append((ky * 4 + kx, py * 2 + px, dy, dx))
    return taps


L4_TAPS = _l4_taps()
L4_BY_CLASS = [[(t, dy, dx) for (t, c, dy, dx) in L4_TAPS if c == cls]
               for cls in range(4)]


def _build_mask4(q_pad):
    """(16, q_pad) validity mask per tap (zero in padded / out-of-range lanes)."""
    m = np.zeros((16, 14, 14), np.float32)
    for t, _, dy, dx in L4_TAPS:
        m[t, max(0, dy):14 + min(0, dy), max(0, dx):14 + min(0, dx)] = 1.0
    out = np.zeros((16, q_pad), np.float32)
    out[:, :196] = m.reshape(16, 196)
    return out


def init_params(key):
    ks = jax.random.split(key, 16)
    p = {}
    p["fc_w"] = 0.1 * jax.random.normal(ks[0], (FC_DIM, EMBED), jnp.float32)
    p["fc_b"] = 0.1 * jax.random.normal(ks[1], (FC_DIM,), jnp.float32)
    p["bn0_g"] = 1.0 + 0.1 * jax.random.normal(ks[2], (FC_DIM,), jnp.float32)
    p["bn0_b"] = 0.1 * jax.random.normal(ks[3], (FC_DIM,), jnp.float32)
    scales = [0.05, 0.05, 0.1, 0.1]
    qpads = {1: QPAD2, 2: QPAD3}
    for li, (cin, cout, k, st, pd, hin, hout) in enumerate(LAYERS):
        w = scales[li] * jax.random.normal(
            ks[4 + 3 * li], (cin, cout, k, k), jnp.float32)  # PyTorch (Cin,Cout,K,K)
        p[f"w{li+1}"] = w                                    # f32, for the reference
        # rows ordered t*Cout + co (t = ky*K + kx); bf16 for DMA + MXU.
        # TODO(synk): int8 (v5e/v6e) / fp8 (v7x) per-row quantization of w1_t
        # would halve the dominant DMA item; kept bf16 for accuracy headroom.
        p[f"w{li+1}_t"] = jnp.transpose(w, (2, 3, 1, 0)).reshape(
            k * k * cout, cin).astype(jnp.bfloat16)
        if li < 3:
            p[f"bn{li+1}_g"] = 1.0 + 0.1 * jax.random.normal(
                ks[5 + 3 * li], (cout,), jnp.float32)
            p[f"bn{li+1}_b"] = 0.1 * jax.random.normal(
                ks[6 + 3 * li], (cout,), jnp.float32)
        if li in qpads:
            p[f"s{li+1}"] = jnp.asarray(
                build_scatter_stacked(hin, hin, k, st, pd, qpads[li]), jnp.bfloat16)
    p["mask4"] = jnp.asarray(_build_mask4(QPAD3))            # (16, 256) f32
    return p


# ---------------------------------------------------------------------------
# In-kernel helpers (operate on values)
# ---------------------------------------------------------------------------
def _bn_relu_rows(x, g, b, inv_n):
    """Training-mode BN + ReLU; per-row (channel) stats over the lane axis."""
    s = jnp.sum(x, axis=1, keepdims=True) * inv_n
    q = jnp.sum(x * x, axis=1, keepdims=True) * inv_n
    var = jnp.maximum(q - s * s, 0.0)
    sc = g * lax.rsqrt(var + EPS)
    return jnp.maximum((x - s) * sc + b, 0.0)


def _bn_relu_folded(x, g, b, nb, cout, true_n):
    """BN + ReLU on x: (nb*cout, Qpad); padded lanes of x are exactly zero."""
    blk = x[0:cout, :]
    xs, xq = blk, blk * blk
    for i in range(1, nb):
        blk = x[i * cout:(i + 1) * cout, :]
        xs = xs + blk
        xq = xq + blk * blk
    inv_n = 1.0 / true_n
    mean = jnp.sum(xs, axis=1, keepdims=True) * inv_n
    ex2 = jnp.sum(xq, axis=1, keepdims=True) * inv_n
    var = jnp.maximum(ex2 - mean * mean, 0.0)
    sc = g * lax.rsqrt(var + EPS)                 # (cout, 1)
    sh = b - mean * sc
    sc_f = jnp.tile(sc, (nb, 1))                  # (nb*cout, 1)
    sh_f = jnp.tile(sh, (nb, 1))
    return jnp.maximum(x * sc_f + sh_f, 0.0)


def _roll_lanes(row, s):
    """Circular lane roll by s (== jnp.roll semantics), static slices only."""
    n = row.shape[1]
    i = (-s) % n
    if i == 0:
        return row
    return jnp.concatenate([row[:, i:], row[:, :i]], axis=1)


# ---------------------------------------------------------------------------
# Pallas kernel
# ---------------------------------------------------------------------------
def _make_kernel(nb):
    cout2, kk2, q2 = CM * 2, 9, 49
    cout3, kk3, q3, p3 = CM, 16, 196, 49

    def kernel(x_ref, fcw_ref, fcb_ref, g0_ref, b0_ref,
               w1_ref, g1_ref, b1_ref,
               w2_ref, s2_ref, g2_ref, b2_ref,
               w3_ref, s3_ref, g3_ref, b3_ref,
               w4_ref, m4_ref,
               out_ref,
               a1_ref, asm2_ref, a2_ref, asm3_ref, a3_ref):

        # ---- fc + BatchNorm1d + ReLU (lane-dense: batch on sublanes) -------
        h = jnp.dot(x_ref[...], fcw_ref[...],
                    preferred_element_type=jnp.float32) + fcb_ref[...]   # (B, 512)
        inv_b = 1.0 / nb
        m0 = jnp.sum(h, axis=0, keepdims=True) * inv_b
        e0 = jnp.sum(h * h, axis=0, keepdims=True) * inv_b
        v0 = jnp.maximum(e0 - m0 * m0, 0.0)
        h = jnp.maximum(
            (h - m0) * (g0_ref[...] * lax.rsqrt(v0 + EPS)) + b0_ref[...], 0.0)

        # ---- layer 1: 1x1 -> 4x4 (identity scatter eliminated) -------------
        # NT channel mix: (1024, 512) x (B, 512)^T -> (1024, B), rows (t, co).
        u = lax.dot_general(w1_ref[...], h.astype(jnp.bfloat16),
                            dimension_numbers=(((1,), (1,)), ((), ())),
                            preferred_element_type=jnp.float32)          # (1024, B)
        for bb in range(nb):
            for t in range(P1):                 # tap t == output spatial position
                col = bb * P1 + t
                a1_ref[:, col:col + 1] = u[t * 64:(t + 1) * 64, bb:bb + 1]
        a1 = _bn_relu_rows(a1_ref[...], g1_ref[...], b1_ref[...],
                           1.0 / (nb * P1))                              # (64, B*16)

        # ---- layer 2: 4x4 -> 7x7  (one channel-mix + one scatter matmul) ---
        t2 = jnp.dot(w2_ref[...], a1.astype(jnp.bfloat16),
                     preferred_element_type=jnp.float32)                 # (288, B*16)
        for bb in range(nb):
            for t in range(kk2):
                asm2_ref[bb * cout2:(bb + 1) * cout2, t * P1:(t + 1) * P1] = (
                    t2[t * cout2:(t + 1) * cout2,
                       bb * P1:(bb + 1) * P1].astype(jnp.bfloat16))
        scat2 = jnp.dot(asm2_ref[...], s2_ref[...],
                        preferred_element_type=jnp.float32)              # (B*32, 128)
        bn2 = _bn_relu_folded(scat2, g2_ref[...], b2_ref[...], nb, cout2, nb * q2)
        for bb in range(nb):                      # aligned 128-lane block stores
            a2_ref[:, bb * PPAD3:(bb + 1) * PPAD3] = bn2[bb * cout2:(bb + 1) * cout2, :]

        # ---- layer 3: 7x7 -> 14x14 ------------------------------------------
        t3 = jnp.dot(w3_ref[...], a2_ref[...].astype(jnp.bfloat16),
                     preferred_element_type=jnp.float32)                 # (256, B*128)
        for bb in range(nb):
            for t in range(kk3):
                asm3_ref[bb * cout3:(bb + 1) * cout3, t * p3:(t + 1) * p3] = (
                    t3[t * cout3:(t + 1) * cout3,
                       bb * PPAD3:bb * PPAD3 + p3].astype(jnp.bfloat16))
        scat3 = jnp.dot(asm3_ref[...], s3_ref[...],
                        preferred_element_type=jnp.float32)              # (B*16, 256)
        bn3 = _bn_relu_folded(scat3, g3_ref[...], b3_ref[...], nb, cout3, nb * q3)
        for bb in range(nb):                      # aligned 256-lane block stores
            a3_ref[:, bb * QPAD3:(bb + 1) * QPAD3] = bn3[bb * cout3:(bb + 1) * cout3, :]

        # ---- layer 4: 14x14 -> 28x28 (Cout=1) + Sigmoid ---------------------
        # tap channel mix, then circular lane shifts + 0/1 masks per stride-
        # parity class, accumulated straight into out_ref rows.
        v = jnp.dot(w4_ref[...], a3_ref[...].astype(jnp.bfloat16),
                    preferred_element_type=jnp.float32)                  # (16, B*256)
        mfull = jnp.tile(m4_ref[...], (1, nb))                           # (16, B*256)
        for cls in range(4):
            acc = None
            for (t, dy, dx) in L4_BY_CLASS[cls]:
                s = dy * 14 + dx
                row = _roll_lanes(v[t:t + 1, :], s)
                term = mfull[t:t + 1, :] * row
                acc = term if acc is None else acc + term
            # sigmoid: reciprocal on the EUP slot
            out_ref[cls:cls + 1, :] = pl.reciprocal(1.0 + jnp.exp(-acc), approx=True)

    return kernel


def cnn_decoder_forward(x, params):
    """x: (B, EMBED) f32  ->  (B, 784) f32 (matches PyTorch CNN_Decoder.forward)."""
    b = x.shape[0]

    flat = [
        x,                                                    # (B, 32)
        params["fc_w"].T,                                     # (32, 512)
        params["fc_b"].reshape(1, FC_DIM),
        params["bn0_g"].reshape(1, FC_DIM),
        params["bn0_b"].reshape(1, FC_DIM),
        params["w1_t"],                                       # (1024, 512) bf16
        params["bn1_g"].reshape(CM * 4, 1), params["bn1_b"].reshape(CM * 4, 1),
        params["w2_t"], params["s2"],                         # (288,64), (144,128)
        params["bn2_g"].reshape(CM * 2, 1), params["bn2_b"].reshape(CM * 2, 1),
        params["w3_t"], params["s3"],                         # (256,32), (784,256)
        params["bn3_g"].reshape(CM, 1), params["bn3_b"].reshape(CM, 1),
        params["w4_t"], params["mask4"],                      # (16,16), (16,256)
    ]

    macs = b * (EMBED * FC_DIM + FC_DIM * 1024 + 288 * 64 * 16
                + 32 * 144 * QPAD2 + 256 * 32 * PPAD3
                + 16 * 784 * QPAD3 + 16 * 16 * QPAD3)
    bytes_accessed = int(sum(int(np.prod(a.shape)) * a.dtype.itemsize for a in flat)
                         + 4 * b * QPAD3 * 4)

    out4 = pl.pallas_call(
        _make_kernel(b),
        out_shape=jax.ShapeDtypeStruct((4, b * QPAD3), jnp.float32),
        in_specs=[pl.BlockSpec(memory_space=pltpu.MemorySpace.VMEM)] * len(flat),
        out_specs=pl.BlockSpec(memory_space=pltpu.MemorySpace.VMEM),
        scratch_shapes=[
            pltpu.VMEM((CM * 4, b * P1), jnp.float32),     # a1:   (64, B*16)
            pltpu.VMEM((b * CM * 2, 144), jnp.bfloat16),   # asm2: (B*32, 144)
            pltpu.VMEM((CM * 2, b * PPAD3), jnp.float32),  # a2:   (32, B*128)
            pltpu.VMEM((b * CM, 784), jnp.bfloat16),       # asm3: (B*16, 784)
            pltpu.VMEM((CM, b * QPAD3), jnp.float32),      # a3:   (16, B*256)
        ],
        compiler_params=pltpu.CompilerParams(vmem_limit_bytes=32 * 1024 * 1024),
        cost_estimate=pl.CostEstimate(flops=2 * macs,
                                      transcendentals=4 * b * QPAD3 + 1024,
                                      bytes_accessed=bytes_accessed),
    )(*flat)

    # De-interleave the stride-2 parity classes (pure layout glue):
    # out4[py*2+px, b*256 + yh*14 + xh]  ->  img[b, 2*yh+py, 2*xh+px]
    blk = out4.reshape(2, 2, b, QPAD3)[..., :196].reshape(2, 2, b, 14, 14)
    return blk.transpose(2, 3, 0, 4, 1).reshape(b, 28 * 28)


# ---------------------------------------------------------------------------
# Pure-JAX reference (independent formulation, for validation only)
# ---------------------------------------------------------------------------
def _bn_ref(a, g, b, axes):
    m = jnp.mean(a, axis=axes, keepdims=True)
    v = jnp.mean((a - m) ** 2, axis=axes, keepdims=True)
    return (a - m) / jnp.sqrt(v + EPS) * g + b


def _convt_ref(x, w, stride, pad):
    k = w.shape[2]
    wh = jnp.transpose(jnp.flip(w, (2, 3)), (1, 0, 2, 3))      # (Cout,Cin,K,K)
    return jax.lax.conv_general_dilated(
        x, wh, window_strides=(1, 1),
        padding=[(k - 1 - pad, k - 1 - pad)] * 2,
        lhs_dilation=(stride, stride),
        dimension_numbers=("NCHW", "OIHW", "NCHW"),
        preferred_element_type=jnp.float32,
        precision=jax.lax.Precision.HIGHEST)


def reference_forward(x, p):
    h = x @ p["fc_w"].T + p["fc_b"]
    h = jax.nn.relu(_bn_ref(h, p["bn0_g"], p["bn0_b"], (0,)))
    a = h.reshape(-1, FC_DIM, 1, 1)
    for li, (cin, cout, k, st, pd, hin, hout) in enumerate(LAYERS):
        a = _convt_ref(a, p[f"w{li+1}"], st, pd)
        if li < 3:
            g = p[f"bn{li+1}_g"].reshape(1, cout, 1, 1)
            b = p[f"bn{li+1}_b"].reshape(1, cout, 1, 1)
            a = jax.nn.relu(_bn_ref(a, g, b, (0, 2, 3)))
    return jax.nn.sigmoid(a).reshape(-1, 28 * 28)


# TODO(synk): running-mean/var buffer updates of BatchNorm (a training-mode side
# effect that does not affect the forward output) are not modeled.

if __name__ == "__main__":
    key = jax.random.PRNGKey(0)
    pkey, xkey = jax.random.split(key)
    params = init_params(pkey)

    B = 2
    x = jax.random.normal(xkey, (B, EMBED), jnp.float32)

    out = jax.block_until_ready(cnn_decoder_forward(x, params))
    assert out.shape == (B, 28 * 28)
    assert bool(jnp.all(jnp.isfinite(out)))

    ref = jax.block_until_ready(reference_forward(x, params))
    err = float(jnp.max(jnp.abs(out - ref)))
    # Deconv weights / scatter are bf16 (f32 accumulation), so allow a slightly
    # looser tolerance than a pure-f32 kernel.
    assert err < 2e-2, f"max abs error vs reference: {err}"

    print("KERNEL_OK")
</pallas_src>

<mosaic_0001>
module attributes {stable_mosaic.version = 11 : i64} {
  func.func @kernel(%arg0: memref<2x32xf32, #tpu.memory_space<vmem>>, %arg1: memref<32x512xf32, #tpu.memory_space<vmem>>, %arg2: memref<1x512xf32, #tpu.memory_space<vmem>>, %arg3: memref<1x512xf32, #tpu.memory_space<vmem>>, %arg4: memref<1x512xf32, #tpu.memory_space<vmem>>, %arg5: memref<1024x512xbf16, #tpu.memory_space<vmem>>, %arg6: memref<64x1xf32, #tpu.memory_space<vmem>>, %arg7: memref<64x1xf32, #tpu.memory_space<vmem>>, %arg8: memref<288x64xbf16, #tpu.memory_space<vmem>>, %arg9: memref<144x128xbf16, #tpu.memory_space<vmem>>, %arg10: memref<32x1xf32, #tpu.memory_space<vmem>>, %arg11: memref<32x1xf32, #tpu.memory_space<vmem>>, %arg12: memref<256x32xbf16, #tpu.memory_space<vmem>>, %arg13: memref<784x256xbf16, #tpu.memory_space<vmem>>, %arg14: memref<16x1xf32, #tpu.memory_space<vmem>>, %arg15: memref<16x1xf32, #tpu.memory_space<vmem>>, %arg16: memref<16x16xbf16, #tpu.memory_space<vmem>>, %arg17: memref<16x256xf32, #tpu.memory_space<vmem>>, %arg18: memref<4x512xf32, #tpu.memory_space<vmem>>, %arg19: memref<64x32xf32, #tpu.memory_space<vmem>>, %arg20: memref<64x144xbf16, #tpu.memory_space<vmem>>, %arg21: memref<32x256xf32, #tpu.memory_space<vmem>>, %arg22: memref<32x784xbf16, #tpu.memory_space<vmem>>, %arg23: memref<16x512xf32, #tpu.memory_space<vmem>>) attributes {dimension_semantics = [], scalar_prefetch = 0 : i64, scratch_operands = 5 : i64, tpu.core_type = #tpu.core_type<tc>} {
    %c0 = arith.constant 0 : index
    %c0_0 = arith.constant 0 : index
    %0 = vector.load %arg0[%c0, %c0_0] : memref<2x32xf32, #tpu.memory_space<vmem>>, vector<2x32xf32>
    %c0_1 = arith.constant 0 : index
    %c0_2 = arith.constant 0 : index
    %1 = vector.load %arg1[%c0_1, %c0_2] : memref<32x512xf32, #tpu.memory_space<vmem>>, vector<32x512xf32>
    %cst = arith.constant dense<0.000000e+00> : vector<2x512xf32>
    %2 = tpu.matmul %0, %1, %cst {dimension_numbers = #tpu.dot_dimension_numbers<[1], [0], [0], [1], [0, 0, 1, 1], [], []>} : vector<2x32xf32>, vector<32x512xf32>, vector<2x512xf32> -> vector<2x512xf32>
    %c0_3 = arith.constant 0 : index
    %c0_4 = arith.constant 0 : index
    %3 = vector.load %arg2[%c0_3, %c0_4] : memref<1x512xf32, #tpu.memory_space<vmem>>, vector<1x512xf32>
    %4 = vector.broadcast %3 : vector<1x512xf32> to vector<2x512xf32>
    %5 = arith.addf %2, %4 : vector<2x512xf32>
    %cst_5 = arith.constant dense<0.000000e+00> : vector<512xf32>
    %6 = vector.multi_reduction <add>, %5, %cst_5 [0] : vector<2x512xf32> to vector<512xf32>
    %7 = vector.shape_cast %6 : vector<512xf32> to vector<1x512xf32>
    %cst_6 = arith.constant 5.000000e-01 : f32
    %8 = vector.broadcast %cst_6 : f32 to vector<1x512xf32>
    %9 = arith.mulf %7, %8 : vector<1x512xf32>
    %10 = arith.mulf %5, %5 : vector<2x512xf32>
    %cst_7 = arith.constant dense<0.000000e+00> : vector<512xf32>
    %11 = vector.multi_reduction <add>, %10, %cst_7 [0] : vector<2x512xf32> to vector<512xf32>
    %12 = vector.shape_cast %11 : vector<512xf32> to vector<1x512xf32>
    %cst_8 = arith.constant 5.000000e-01 : f32
    %13 = vector.broadcast %cst_8 : f32 to vector<1x512xf32>
    %14 = arith.mulf %12, %13 : vector<1x512xf32>
    %15 = arith.mulf %9, %9 : vector<1x512xf32>
    %16 = arith.subf %14, %15 : vector<1x512xf32>
    %cst_9 = arith.constant 0.000000e+00 : f32
    %17 = vector.broadcast %cst_9 : f32 to vector<1x512xf32>
    %18 = arith.maximumf %16, %17 : vector<1x512xf32>
    %19 = vector.broadcast %9 : vector<1x512xf32> to vector<2x512xf32>
    %20 = arith.subf %5, %19 : vector<2x512xf32>
    %c0_10 = arith.constant 0 : index
    %c0_11 = arith.constant 0 : index
    %21 = vector.load %arg3[%c0_10, %c0_11] : memref<1x512xf32, #tpu.memory_space<vmem>>, vector<1x512xf32>
    %cst_12 = arith.constant 9.99999974E-6 : f32
    %22 = vector.broadcast %cst_12 : f32 to vector<1x512xf32>
    %23 = arith.addf %18, %22 : vector<1x512xf32>
    %24 = math.rsqrt %23 : vector<1x512xf32>
    %25 = arith.mulf %21, %24 : vector<1x512xf32>
    %26 = vector.broadcast %25 : vector<1x512xf32> to vector<2x512xf32>
    %27 = arith.mulf %20, %26 : vector<2x512xf32>
    %c0_13 = arith.constant 0 : index
    %c0_14 = arith.constant 0 : index
    %28 = vector.load %arg4[%c0_13, %c0_14] : memref<1x512xf32, #tpu.memory_space<vmem>>, vector<1x512xf32>
    %29 = vector.broadcast %28 : vector<1x512xf32> to vector<2x512xf32>
    %30 = arith.addf %27, %29 : vector<2x512xf32>
    %cst_15 = arith.constant 0.000000e+00 : f32
    %31 = vector.broadcast %cst_15 : f32 to vector<2x512xf32>
    %32 = arith.maximumf %30, %31 : vector<2x512xf32>
    %c0_16 = arith.constant 0 : index
    %c0_17 = arith.constant 0 : index
    %33 = vector.load %arg5[%c0_16, %c0_17] : memref<1024x512xbf16, #tpu.memory_space<vmem>>, vector<1024x512xbf16>
    %34 = arith.truncf %32 : vector<2x512xf32> to vector<2x512xbf16>
    %cst_18 = arith.constant dense<0.000000e+00> : vector<1024x2xf32>
    %35 = tpu.matmul %33, %34, %cst_18 {dimension_numbers = #tpu.dot_dimension_numbers<[1], [1], [0], [0], [0, 0, 1, 0], [], []>} : vector<1024x512xbf16>, vector<2x512xbf16>, vector<1024x2xf32> -> vector<1024x2xf32>
    %36 = vector.extract_strided_slice %35 {offsets = [0, 0], sizes = [64, 1], strides = [1, 1]} : vector<1024x2xf32> to vector<64x1xf32>
    %c0_19 = arith.constant 0 : index
    %c0_20 = arith.constant 0 : index
    %37 = vector.load %arg19[%c0_19, %c0_20] : memref<64x32xf32, #tpu.memory_space<vmem>>, vector<64x1xf32>
    tpu.vector_store %arg19[%c0_19, %c0_20], %36 {strides = array<i32>} : memref<64x32xf32, #tpu.memory_space<vmem>>, vector<64x1xf32>,
    %38 = vector.extract_strided_slice %35 {offsets = [64, 0], sizes = [64, 1], strides = [1, 1]} : vector<1024x2xf32> to vector<64x1xf32>
    %c0_21 = arith.constant 0 : index
    %c1 = arith.constant 1 : index
    %39 = vector.load %arg19[%c0_21, %c1] : memref<64x32xf32, #tpu.memory_space<vmem>>, vector<64x1xf32>
    tpu.vector_store %arg19[%c0_21, %c1], %38 {strides = array<i32>} : memref<64x32xf32, #tpu.memory_space<vmem>>, vector<64x1xf32>,
    %40 = vector.extract_strided_slice %35 {offsets = [128, 0], sizes = [64, 1], strides = [1, 1]} : vector<1024x2xf32> to vector<64x1xf32>
    %c0_22 = arith.constant 0 : index
    %c2 = arith.constant 2 : index
    %41 = vector.load %arg19[%c0_22, %c2] : memref<64x32xf32, #tpu.memory_space<vmem>>, vector<64x1xf32>
    tpu.vector_store %arg19[%c0_22, %c2], %40 {strides = array<i32>} : memref<64x32xf32, #tpu.memory_space<vmem>>, vector<64x1xf32>,
    %42 = vector.extract_strided_slice %35 {offsets = [192, 0], sizes = [64, 1], strides = [1, 1]} : vector<1024x2xf32> to vector<64x1xf32>
    %c0_23 = arith.constant 0 : index
    %c3 = arith.constant 3 : index
    %43 = vector.load %arg19[%c0_23, %c3] : memref<64x32xf32, #tpu.memory_space<vmem>>, vector<64x1xf32>
    tpu.vector_store %arg19[%c0_23, %c3], %42 {strides = array<i32>} : memref<64x32xf32, #tpu.memory_space<vmem>>, vector<64x1xf32>,
    %44 = vector.extract_strided_slice %35 {offsets = [256, 0], sizes = [64, 1], strides = [1, 1]} : vector<1024x2xf32> to vector<64x1xf32>
    %c0_24 = arith.constant 0 : index
    %c4 = arith.constant 4 : index
    %45 = vector.load %arg19[%c0_24, %c4] : memref<64x32xf32, #tpu.memory_space<vmem>>, vector<64x1xf32>
    tpu.vector_store %arg19[%c0_24, %c4], %44 {strides = array<i32>} : memref<64x32xf32, #tpu.memory_space<vmem>>, vector<64x1xf32>,
    %46 = vector.extract_strided_slice %35 {offsets = [320, 0], sizes = [64, 1], strides = [1, 1]} : vector<1024x2xf32> to vector<64x1xf32>
    %c0_25 = arith.constant 0 : index
    %c5 = arith.constant 5 : index
    %47 = vector.load %arg19[%c0_25, %c5] : memref<64x32xf32, #tpu.memory_space<vmem>>, vector<64x1xf32>
    tpu.vector_store %arg19[%c0_25, %c5], %46 {strides = array<i32>} : memref<64x32xf32, #tpu.memory_space<vmem>>, vector<64x1xf32>,
    %48 = vector.extract_strided_slice %35 {offsets = [384, 0], sizes = [64, 1], strides = [1, 1]} : vector<1024x2xf32> to vector<64x1xf32>
    %c0_26 = arith.constant 0 : index
    %c6 = arith.constant 6 : index
    %49 = vector.load %arg19[%c0_26, %c6] : memref<64x32xf32, #tpu.memory_space<vmem>>, vector<64x1xf32>
    tpu.vector_store %arg19[%c0_26, %c6], %48 {strides = array<i32>} : memref<64x32xf32, #tpu.memory_space<vmem>>, vector<64x1xf32>,
    %50 = vector.extract_strided_slice %35 {offsets = [448, 0], sizes = [64, 1], strides = [1, 1]} : vector<1024x2xf32> to vector<64x1xf32>
    %c0_27 = arith.constant 0 : index
    %c7 = arith.constant 7 : index
    %51 = vector.load %arg19[%c0_27, %c7] : memref<64x32xf32, #tpu.memory_space<vmem>>, vector<64x1xf32>
    tpu.vector_store %arg19[%c0_27, %c7], %50 {strides = array<i32>} : memref<64x32xf32, #tpu.memory_space<vmem>>, vector<64x1xf32>,
    %52 = vector.extract_strided_slice %35 {offsets = [512, 0], sizes = [64, 1], strides = [1, 1]} : vector<1024x2xf32> to vector<64x1xf32>
    %c0_28 = arith.constant 0 : index
    %c8 = arith.constant 8 : index
    %53 = vector.load %arg19[%c0_28, %c8] : memref<64x32xf32, #tpu.memory_space<vmem>>, vector<64x1xf32>
    tpu.vector_store %arg19[%c0_28, %c8], %52 {strides = array<i32>} : memref<64x32xf32, #tpu.memory_space<vmem>>, vector<64x1xf32>,
    %54 = vector.extract_strided_slice %35 {offsets = [576, 0], sizes = [64, 1], strides = [1, 1]} : vector<1024x2xf32> to vector<64x1xf32>
    %c0_29 = arith.constant 0 : index
    %c9 = arith.constant 9 : index
    %55 = vector.load %arg19[%c0_29, %c9] : memref<64x32xf32, #tpu.memory_space<vmem>>, vector<64x1xf32>
    tpu.vector_store %arg19[%c0_29, %c9], %54 {strides = array<i32>} : memref<64x32xf32, #tpu.memory_space<vmem>>, vector<64x1xf32>,
    %56 = vector.extract_strided_slice %35 {offsets = [640, 0], sizes = [64, 1], strides = [1, 1]} : vector<1024x2xf32> to vector<64x1xf32>
    %c0_30 = arith.constant 0 : index
    %c10 = arith.constant 10 : index
    %57 = vector.load %arg19[%c0_30, %c10] : memref<64x32xf32, #tpu.memory_space<vmem>>, vector<64x1xf32>
    tpu.vector_store %arg19[%c0_30, %c10], %56 {strides = array<i32>} : memref<64x32xf32, #tpu.memory_space<vmem>>, vector<64x1xf32>,
    %58 = vector.extract_strided_slice %35 {offsets = [704, 0], sizes = [64, 1], strides = [1, 1]} : vector<1024x2xf32> to vector<64x1xf32>
    %c0_31 = arith.constant 0 : index
    %c11 = arith.constant 11 : index
    %59 = vector.load %arg19[%c0_31, %c11] : memref<64x32xf32, #tpu.memory_space<vmem>>, vector<64x1xf32>
    tpu.vector_store %arg19[%c0_31, %c11], %58 {strides = array<i32>} : memref<64x32xf32, #tpu.memory_space<vmem>>, vector<64x1xf32>,
    %60 = vector.extract_strided_slice %35 {offsets = [768, 0], sizes = [64, 1], strides = [1, 1]} : vector<1024x2xf32> to vector<64x1xf32>
    %c0_32 = arith.constant 0 : index
    %c12 = arith.constant 12 : index
    %61 = vector.load %arg19[%c0_32, %c12] : memref<64x32xf32, #tpu.memory_space<vmem>>, vector<64x1xf32>
    tpu.vector_store %arg19[%c0_32, %c12], %60 {strides = array<i32>} : memref<64x32xf32, #tpu.memory_space<vmem>>, vector<64x1xf32>,
    %62 = vector.extract_strided_slice %35 {offsets = [832, 0], sizes = [64, 1], strides = [1, 1]} : vector<1024x2xf32> to vector<64x1xf32>
    %c0_33 = arith.constant 0 : index
    %c13 = arith.constant 13 : index
    %63 = vector.load %arg19[%c0_33, %c13] : memref<64x32xf32, #tpu.memory_space<vmem>>, vector<64x1xf32>
    tpu.vector_store %arg19[%c0_33, %c13], %62 {strides = array<i32>} : memref<64x32xf32, #tpu.memory_space<vmem>>, vector<64x1xf32>,
    %64 = vector.extract_strided_slice %35 {offsets = [896, 0], sizes = [64, 1], strides = [1, 1]} : vector<1024x2xf32> to vector<64x1xf32>
    %c0_34 = arith.constant 0 : index
    %c14 = arith.constant 14 : index
    %65 = vector.load %arg19[%c0_34, %c14] : memref<64x32xf32, #tpu.memory_space<vmem>>, vector<64x1xf32>
    tpu.vector_store %arg19[%c0_34, %c14], %64 {strides = array<i32>} : memref<64x32xf32, #tpu.memory_space<vmem>>, vector<64x1xf32>,
    %66 = vector.extract_strided_slice %35 {offsets = [960, 0], sizes = [64, 1], strides = [1, 1]} : vector<1024x2xf32> to vector<64x1xf32>
    %c0_35 = arith.constant 0 : index
    %c15 = arith.constant 15 : index
    %67 = vector.load %arg19[%c0_35, %c15] : memref<64x32xf32, #tpu.memory_space<vmem>>, vector<64x1xf32>
    tpu.vector_store %arg19[%c0_35, %c15], %66 {strides = array<i32>} : memref<64x32xf32, #tpu.memory_space<vmem>>, vector<64x1xf32>,
    %68 = vector.extract_strided_slice %35 {offsets = [0, 1], sizes = [64, 1], strides = [1, 1]} : vector<1024x2xf32> to vector<64x1xf32>
    %c0_36 = arith.constant 0 : index
    %c16 = arith.constant 16 : index
    %69 = vector.load %arg19[%c0_36, %c16] : memref<64x32xf32, #tpu.memory_space<vmem>>, vector<64x1xf32>
    tpu.vector_store %arg19[%c0_36, %c16], %68 {strides = array<i32>} : memref<64x32xf32, #tpu.memory_space<vmem>>, vector<64x1xf32>,
    %70 = vector.extract_strided_slice %35 {offsets = [64, 1], sizes = [64, 1], strides = [1, 1]} : vector<1024x2xf32> to vector<64x1xf32>
    %c0_37 = arith.constant 0 : index
    %c17 = arith.constant 17 : index
    %71 = vector.load %arg19[%c0_37, %c17] : memref<64x32xf32, #tpu.memory_space<vmem>>, vector<64x1xf32>
    tpu.vector_store %arg19[%c0_37, %c17], %70 {strides = array<i32>} : memref<64x32xf32, #tpu.memory_space<vmem>>, vector<64x1xf32>,
    %72 = vector.extract_strided_slice %35 {offsets = [128, 1], sizes = [64, 1], strides = [1, 1]} : vector<1024x2xf32> to vector<64x1xf32>
    %c0_38 = arith.constant 0 : index
    %c18 = arith.constant 18 : index
    %73 = vector.load %arg19[%c0_38, %c18] : memref<64x32xf32, #tpu.memory_space<vmem>>, vector<64x1xf32>
    tpu.vector_store %arg19[%c0_38, %c18], %72 {strides = array<i32>} : memref<64x32xf32, #tpu.memory_space<vmem>>, vector<64x1xf32>,
    %74 = vector.extract_strided_slice %35 {offsets = [192, 1], sizes = [64, 1], strides = [1, 1]} : vector<1024x2xf32> to vector<64x1xf32>
    %c0_39 = arith.constant 0 : index
    %c19 = arith.constant 19 : index
    %75 = vector.load %arg19[%c0_39, %c19] : memref<64x32xf32, #tpu.memory_space<vmem>>, vector<64x1xf32>
    tpu.vector_store %arg19[%c0_39, %c19], %74 {strides = array<i32>} : memref<64x32xf32, #tpu.memory_space<vmem>>, vector<64x1xf32>,
    %76 = vector.extract_strided_slice %35 {offsets = [256, 1], sizes = [64, 1], strides = [1, 1]} : vector<1024x2xf32> to vector<64x1xf32>
    %c0_40 = arith.constant 0 : index
    %c20 = arith.constant 20 : index
    %77 = vector.load %arg19[%c0_40, %c20] : memref<64x32xf32, #tpu.memory_space<vmem>>, vector<64x1xf32>
    tpu.vector_store %arg19[%c0_40, %c20], %76 {strides = array<i32>} : memref<64x32xf32, #tpu.memory_space<vmem>>, vector<64x1xf32>,
    %78 = vector.extract_strided_slice %35 {offsets = [320, 1], sizes = [64, 1], strides = [1, 1]} : vector<1024x2xf32> to vector<64x1xf32>
    %c0_41 = arith.constant 0 : index
    %c21 = arith.constant 21 : index
    %79 = vector.load %arg19[%c0_41, %c21] : memref<64x32xf32, #tpu.memory_space<vmem>>, vector<64x1xf32>
    tpu.vector_store %arg19[%c0_41, %c21], %78 {strides = array<i32>} : memref<64x32xf32, #tpu.memory_space<vmem>>, vector<64x1xf32>,
    %80 = vector.extract_strided_slice %35 {offsets = [384, 1], sizes = [64, 1], strides = [1, 1]} : vector<1024x2xf32> to vector<64x1xf32>
    %c0_42 = arith.constant 0 : index
    %c22 = arith.constant 22 : index
    %81 = vector.load %arg19[%c0_42, %c22] : memref<64x32xf32, #tpu.memory_space<vmem>>, vector<64x1xf32>
    tpu.vector_store %arg19[%c0_42, %c22], %80 {strides = array<i32>} : memref<64x32xf32, #tpu.memory_space<vmem>>, vector<64x1xf32>,
    %82 = vector.extract_strided_slice %35 {offsets = [448, 1], sizes = [64, 1], strides = [1, 1]} : vector<1024x2xf32> to vector<64x1xf32>
    %c0_43 = arith.constant 0 : index
    %c23 = arith.constant 23 : index
    %83 = vector.load %arg19[%c0_43, %c23] : memref<64x32xf32, #tpu.memory_space<vmem>>, vector<64x1xf32>
    tpu.vector_store %arg19[%c0_43, %c23], %82 {strides = array<i32>} : memref<64x32xf32, #tpu.memory_space<vmem>>, vector<64x1xf32>,
    %84 = vector.extract_strided_slice %35 {offsets = [512, 1], sizes = [64, 1], strides = [1, 1]} : vector<1024x2xf32> to vector<64x1xf32>
    %c0_44 = arith.constant 0 : index
    %c24 = arith.constant 24 : index
    %85 = vector.load %arg19[%c0_44, %c24] : memref<64x32xf32, #tpu.memory_space<vmem>>, vector<64x1xf32>
    tpu.vector_store %arg19[%c0_44, %c24], %84 {strides = array<i32>} : memref<64x32xf32, #tpu.memory_space<vmem>>, vector<64x1xf32>,
    %86 = vector.extract_strided_slice %35 {offsets = [576, 1], sizes = [64, 1], strides = [1, 1]} : vector<1024x2xf32> to vector<64x1xf32>
    %c0_45 = arith.constant 0 : index
    %c25 = arith.constant 25 : index
    %87 = vector.load %arg19[%c0_45, %c25] : memref<64x32xf32, #tpu.memory_space<vmem>>, vector<64x1xf32>
    tpu.vector_store %arg19[%c0_45, %c25], %86 {strides = array<i32>} : memref<64x32xf32, #tpu.memory_space<vmem>>, vector<64x1xf32>,
    %88 = vector.extract_strided_slice %35 {offsets = [640, 1], sizes = [64, 1], strides = [1, 1]} : vector<1024x2xf32> to vector<64x1xf32>
    %c0_46 = arith.constant 0 : index
    %c26 = arith.constant 26 : index
    %89 = vector.load %arg19[%c0_46, %c26] : memref<64x32xf32, #tpu.memory_space<vmem>>, vector<64x1xf32>
    tpu.vector_store %arg19[%c0_46, %c26], %88 {strides = array<i32>} : memref<64x32xf32, #tpu.memory_space<vmem>>, vector<64x1xf32>,
    %90 = vector.extract_strided_slice %35 {offsets = [704, 1], sizes = [64, 1], strides = [1, 1]} : vector<1024x2xf32> to vector<64x1xf32>
    %c0_47 = arith.constant 0 : index
    %c27 = arith.constant 27 : index
    %91 = vector.load %arg19[%c0_47, %c27] : memref<64x32xf32, #tpu.memory_space<vmem>>, vector<64x1xf32>
    tpu.vector_store %arg19[%c0_47, %c27], %90 {strides = array<i32>} : memref<64x32xf32, #tpu.memory_space<vmem>>, vector<64x1xf32>,
    %92 = vector.extract_strided_slice %35 {offsets = [768, 1], sizes = [64, 1], strides = [1, 1]} : vector<1024x2xf32> to vector<64x1xf32>
    %c0_48 = arith.constant 0 : index
    %c28 = arith.constant 28 : index
    %93 = vector.load %arg19[%c0_48, %c28] : memref<64x32xf32, #tpu.memory_space<vmem>>, vector<64x1xf32>
    tpu.vector_store %arg19[%c0_48, %c28], %92 {strides = array<i32>} : memref<64x32xf32, #tpu.memory_space<vmem>>, vector<64x1xf32>,
    %94 = vector.extract_strided_slice %35 {offsets = [832, 1], sizes = [64, 1], strides = [1, 1]} : vector<1024x2xf32> to vector<64x1xf32>
    %c0_49 = arith.constant 0 : index
    %c29 = arith.constant 29 : index
    %95 = vector.load %arg19[%c0_49, %c29] : memref<64x32xf32, #tpu.memory_space<vmem>>, vector<64x1xf32>
    tpu.vector_store %arg19[%c0_49, %c29], %94 {strides = array<i32>} : memref<64x32xf32, #tpu.memory_space<vmem>>, vector<64x1xf32>,
    %96 = vector.extract_strided_slice %35 {offsets = [896, 1], sizes = [64, 1], strides = [1, 1]} : vector<1024x2xf32> to vector<64x1xf32>
    %c0_50 = arith.constant 0 : index
    %c30 = arith.constant 30 : index
    %97 = vector.load %arg19[%c0_50, %c30] : memref<64x32xf32, #tpu.memory_space<vmem>>, vector<64x1xf32>
    tpu.vector_store %arg19[%c0_50, %c30], %96 {strides = array<i32>} : memref<64x32xf32, #tpu.memory_space<vmem>>, vector<64x1xf32>,
    %98 = vector.extract_strided_slice %35 {offsets = [960, 1], sizes = [64, 1], strides = [1, 1]} : vector<1024x2xf32> to vector<64x1xf32>
    %c0_51 = arith.constant 0 : index
    %c31 = arith.constant 31 : index
    %99 = vector.load %arg19[%c0_51, %c31] : memref<64x32xf32, #tpu.memory_space<vmem>>, vector<64x1xf32>
    tpu.vector_store %arg19[%c0_51, %c31], %98 {strides = array<i32>} : memref<64x32xf32, #tpu.memory_space<vmem>>, vector<64x1xf32>,
    %c0_52 = arith.constant 0 : index
    %c0_53 = arith.constant 0 : index
    %100 = vector.load %arg19[%c0_52, %c0_53] : memref<64x32xf32, #tpu.memory_space<vmem>>, vector<64x32xf32>
    %c0_54 = arith.constant 0 : index
    %c0_55 = arith.constant 0 : index
    %101 = vector.load %arg6[%c0_54, %c0_55] : memref<64x1xf32, #tpu.memory_space<vmem>>, vector<64x1xf32>
    %c0_56 = arith.constant 0 : index
    %c0_57 = arith.constant 0 : index
    %102 = vector.load %arg7[%c0_56, %c0_57] : memref<64x1xf32, #tpu.memory_space<vmem>>, vector<64x1xf32>
    %cst_58 = arith.constant dense<0.000000e+00> : vector<64xf32>
    %103 = vector.multi_reduction <add>, %100, %cst_58 [1] : vector<64x32xf32> to vector<64xf32>
    %104 = vector.shape_cast %103 : vector<64xf32> to vector<64x1xf32>
    %cst_59 = arith.constant 3.125000e-02 : f32
    %105 = vector.broadcast %cst_59 : f32 to vector<64x1xf32>
    %106 = arith.mulf %104, %105 : vector<64x1xf32>
    %107 = arith.mulf %100, %100 : vector<64x32xf32>
    %cst_60 = arith.constant dense<0.000000e+00> : vector<64xf32>
    %108 = vector.multi_reduction <add>, %107, %cst_60 [1] : vector<64x32xf32> to vector<64xf32>
    %109 = vector.shape_cast %108 : vector<64xf32> to vector<64x1xf32>
    %cst_61 = arith.constant 3.125000e-02 : f32
    %110 = vector.broadcast %cst_61 : f32 to vector<64x1xf32>
    %111 = arith.mulf %109, %110 : vector<64x1xf32>
    %112 = arith.mulf %106, %106 : vector<64x1xf32>
    %113 = arith.subf %111, %112 : vector<64x1xf32>
    %cst_62 = arith.constant 0.000000e+00 : f32
    %114 = vector.broadcast %cst_62 : f32 to vector<64x1xf32>
    %115 = arith.maximumf %113, %114 : vector<64x1xf32>
    %cst_63 = arith.constant 9.99999974E-6 : f32
    %116 = vector.broadcast %cst_63 : f32 to vector<64x1xf32>
    %117 = arith.addf %115, %116 : vector<64x1xf32>
    %118 = math.rsqrt %117 : vector<64x1xf32>
    %119 = arith.mulf %101, %118 : vector<64x1xf32>
    %120 = vector.broadcast %106 : vector<64x1xf32> to vector<64x32xf32>
    %121 = arith.subf %100, %120 : vector<64x32xf32>
    %122 = vector.broadcast %119 : vector<64x1xf32> to vector<64x32xf32>
    %123 = arith.mulf %121, %122 : vector<64x32xf32>
    %124 = vector.broadcast %102 : vector<64x1xf32> to vector<64x32xf32>
    %125 = arith.addf %123, %124 : vector<64x32xf32>
    %cst_64 = arith.constant 0.000000e+00 : f32
    %126 = vector.broadcast %cst_64 : f32 to vector<64x32xf32>
    %127 = arith.maximumf %125, %126 : vector<64x32xf32>
    %c0_65 = arith.constant 0 : index
    %c0_66 = arith.constant 0 : index
    %128 = vector.load %arg8[%c0_65, %c0_66] : memref<288x64xbf16, #tpu.memory_space<vmem>>, vector<288x64xbf16>
    %129 = arith.truncf %127 : vector<64x32xf32> to vector<64x32xbf16>
    %cst_67 = arith.constant dense<0.000000e+00> : vector<288x32xf32>
    %130 = tpu.matmul %128, %129, %cst_67 {dimension_numbers = #tpu.dot_dimension_numbers<[1], [0], [0], [1], [0, 0, 1, 1], [], []>} : vector<288x64xbf16>, vector<64x32xbf16>, vector<288x32xf32> -> vector<288x32xf32>
    %131 = vector.extract_strided_slice %130 {offsets = [0, 0], sizes = [32, 16], strides = [1, 1]} : vector<288x32xf32> to vector<32x16xf32>
    %132 = arith.truncf %131 : vector<32x16xf32> to vector<32x16xbf16>
    %c0_68 = arith.constant 0 : index
    %c0_69 = arith.constant 0 : index
    %133 = vector.load %arg20[%c0_68, %c0_69] : memref<64x144xbf16, #tpu.memory_space<vmem>>, vector<32x16xbf16>
    tpu.vector_store %arg20[%c0_68, %c0_69], %132 {strides = array<i32>} : memref<64x144xbf16, #tpu.memory_space<vmem>>, vector<32x16xbf16>,
    %134 = vector.extract_strided_slice %130 {offsets = [32, 0], sizes = [32, 16], strides = [1, 1]} : vector<288x32xf32> to vector<32x16xf32>
    %135 = arith.truncf %134 : vector<32x16xf32> to vector<32x16xbf16>
    %c0_70 = arith.constant 0 : index
    %c16_71 = arith.constant 16 : index
    %136 = vector.load %arg20[%c0_70, %c16_71] : memref<64x144xbf16, #tpu.memory_space<vmem>>, vector<32x16xbf16>
    tpu.vector_store %arg20[%c0_70, %c16_71], %135 {strides = array<i32>} : memref<64x144xbf16, #tpu.memory_space<vmem>>, vector<32x16xbf16>,
    %137 = vector.extract_strided_slice %130 {offsets = [64, 0], sizes = [32, 16], strides = [1, 1]} : vector<288x32xf32> to vector<32x16xf32>
    %138 = arith.truncf %137 : vector<32x16xf32> to vector<32x16xbf16>
    %c0_72 = arith.constant 0 : index
    %c32 = arith.constant 32 : index
    %139 = vector.load %arg20[%c0_72, %c32] : memref<64x144xbf16, #tpu.memory_space<vmem>>, vector<32x16xbf16>
    tpu.vector_store %arg20[%c0_72, %c32], %138 {strides = array<i32>} : memref<64x144xbf16, #tpu.memory_space<vmem>>, vector<32x16xbf16>,
    %140 = vector.extract_strided_slice %130 {offsets = [96, 0], sizes = [32, 16], strides = [1, 1]} : vector<288x32xf32> to vector<32x16xf32>
    %141 = arith.truncf %140 : vector<32x16xf32> to vector<32x16xbf16>
    %c0_73 = arith.constant 0 : index
    %c48 = arith.constant 48 : index
    %142 = vector.load %arg20[%c0_73, %c48] : memref<64x144xbf16, #tpu.memory_space<vmem>>, vector<32x16xbf16>
    tpu.vector_store %arg20[%c0_73, %c48], %141 {strides = array<i32>} : memref<64x144xbf16, #tpu.memory_space<vmem>>, vector<32x16xbf16>,
    %143 = vector.extract_strided_slice %130 {offsets = [128, 0], sizes = [32, 16], strides = [1, 1]} : vector<288x32xf32> to vector<32x16xf32>
    %144 = arith.truncf %143 : vector<32x16xf32> to vector<32x16xbf16>
    %c0_74 = arith.constant 0 : index
    %c64 = arith.constant 64 : index
    %145 = vector.load %arg20[%c0_74, %c64] : memref<64x144xbf16, #tpu.memory_space<vmem>>, vector<32x16xbf16>
    tpu.vector_store %arg20[%c0_74, %c64], %144 {strides = array<i32>} : memref<64x144xbf16, #tpu.memory_space<vmem>>, vector<32x16xbf16>,
    %146 = vector.extract_strided_slice %130 {offsets = [160, 0], sizes = [32, 16], strides = [1, 1]} : vector<288x32xf32> to vector<32x16xf32>
    %147 = arith.truncf %146 : vector<32x16xf32> to vector<32x16xbf16>
    %c0_75 = arith.constant 0 : index
    %c80 = arith.constant 80 : index
    %148 = vector.load %arg20[%c0_75, %c80] : memref<64x144xbf16, #tpu.memory_space<vmem>>, vector<32x16xbf16>
    tpu.vector_store %arg20[%c0_75, %c80], %147 {strides = array<i32>} : memref<64x144xbf16, #tpu.memory_space<vmem>>, vector<32x16xbf16>,
    %149 = vector.extract_strided_slice %130 {offsets = [192, 0], sizes = [32, 16], strides = [1, 1]} : vector<288x32xf32> to vector<32x16xf32>
    %150 = arith.truncf %149 : vector<32x16xf32> to vector<32x16xbf16>
    %c0_76 = arith.constant 0 : index
    %c96 = arith.constant 96 : index
    %151 = vector.load %arg20[%c0_76, %c96] : memref<64x144xbf16, #tpu.memory_space<vmem>>, vector<32x16xbf16>
    tpu.vector_store %arg20[%c0_76, %c96], %150 {strides = array<i32>} : memref<64x144xbf16, #tpu.memory_space<vmem>>, vector<32x16xbf16>,
    %152 = vector.extract_strided_slice %130 {offsets = [224, 0], sizes = [32, 16], strides = [1, 1]} : vector<288x32xf32> to vector<32x16xf32>
    %153 = arith.truncf %152 : vector<32x16xf32> to vector<32x16xbf16>
    %c0_77 = arith.constant 0 : index
    %c112 = arith.constant 112 : index
    %154 = vector.load %arg20[%c0_77, %c112] : memref<64x144xbf16, #tpu.memory_space<vmem>>, vector<32x16xbf16>
    tpu.vector_store %arg20[%c0_77, %c112], %153 {strides = array<i32>} : memref<64x144xbf16, #tpu.memory_space<vmem>>, vector<32x16xbf16>,
    %155 = vector.extract_strided_slice %130 {offsets = [256, 0], sizes = [32, 16], strides = [1, 1]} : vector<288x32xf32> to vector<32x16xf32>
    %156 = arith.truncf %155 : vector<32x16xf32> to vector<32x16xbf16>
    %c0_78 = arith.constant 0 : index
    %c128 = arith.constant 128 : index
    %157 = vector.load %arg20[%c0_78, %c128] : memref<64x144xbf16, #tpu.memory_space<vmem>>, vector<32x16xbf16>
    tpu.vector_store %arg20[%c0_78, %c128], %156 {strides = array<i32>} : memref<64x144xbf16, #tpu.memory_space<vmem>>, vector<32x16xbf16>,
    %158 = vector.extract_strided_slice %130 {offsets = [0, 16], sizes = [32, 16], strides = [1, 1]} : vector<288x32xf32> to vector<32x16xf32>
    %159 = arith.truncf %158 : vector<32x16xf32> to vector<32x16xbf16>
    %c32_79 = arith.constant 32 : index
    %c0_80 = arith.constant 0 : index
    %160 = vector.load %arg20[%c32_79, %c0_80] : memref<64x144xbf16, #tpu.memory_space<vmem>>, vector<32x16xbf16>
    tpu.vector_store %arg20[%c32_79, %c0_80], %159 {strides = array<i32>} : memref<64x144xbf16, #tpu.memory_space<vmem>>, vector<32x16xbf16>,
    %161 = vector.extract_strided_slice %130 {offsets = [32, 16], sizes = [32, 16], strides = [1, 1]} : vector<288x32xf32> to vector<32x16xf32>
    %162 = arith.truncf %161 : vector<32x16xf32> to vector<32x16xbf16>
    %c32_81 = arith.constant 32 : index
    %c16_82 = arith.constant 16 : index
    %163 = vector.load %arg20[%c32_81, %c16_82] : memref<64x144xbf16, #tpu.memory_space<vmem>>, vector<32x16xbf16>
    tpu.vector_store %arg20[%c32_81, %c16_82], %162 {strides = array<i32>} : memref<64x144xbf16, #tpu.memory_space<vmem>>, vector<32x16xbf16>,
    %164 = vector.extract_strided_slice %130 {offsets = [64, 16], sizes = [32, 16], strides = [1, 1]} : vector<288x32xf32> to vector<32x16xf32>
    %165 = arith.truncf %164 : vector<32x16xf32> to vector<32x16xbf16>
    %c32_83 = arith.constant 32 : index
    %c32_84 = arith.constant 32 : index
    %166 = vector.load %arg20[%c32_83, %c32_84] : memref<64x144xbf16, #tpu.memory_space<vmem>>, vector<32x16xbf16>
    tpu.vector_store %arg20[%c32_83, %c32_84], %165 {strides = array<i32>} : memref<64x144xbf16, #tpu.memory_space<vmem>>, vector<32x16xbf16>,
    %167 = vector.extract_strided_slice %130 {offsets = [96, 16], sizes = [32, 16], strides = [1, 1]} : vector<288x32xf32> to vector<32x16xf32>
    %168 = arith.truncf %167 : vector<32x16xf32> to vector<32x16xbf16>
    %c32_85 = arith.constant 32 : index
    %c48_86 = arith.constant 48 : index
    %169 = vector.load %arg20[%c32_85, %c48_86] : memref<64x144xbf16, #tpu.memory_space<vmem>>, vector<32x16xbf16>
    tpu.vector_store %arg20[%c32_85, %c48_86], %168 {strides = array<i32>} : memref<64x144xbf16, #tpu.memory_space<vmem>>, vector<32x16xbf16>,
    %170 = vector.extract_strided_slice %130 {offsets = [128, 16], sizes = [32, 16], strides = [1, 1]} : vector<288x32xf32> to vector<32x16xf32>
    %171 = arith.truncf %170 : vector<32x16xf32> to vector<32x16xbf16>
    %c32_87 = arith.constant 32 : index
    %c64_88 = arith.constant 64 : index
    %172 = vector.load %arg20[%c32_87, %c64_88] : memref<64x144xbf16, #tpu.memory_space<vmem>>, vector<32x16xbf16>
    tpu.vector_store %arg20[%c32_87, %c64_88], %171 {strides = array<i32>} : memref<64x144xbf16, #tpu.memory_space<vmem>>, vector<32x16xbf16>,
    %173 = vector.extract_strided_slice %130 {offsets = [160, 16], sizes = [32, 16], strides = [1, 1]} : vector<288x32xf32> to vector<32x16xf32>
    %174 = arith.truncf %173 : vector<32x16xf32> to vector<32x16xbf16>
    %c32_89 = arith.constant 32 : index
    %c80_90 = arith.constant 80 : index
    %175 = vector.load %arg20[%c32_89, %c80_90] : memref<64x144xbf16, #tpu.memory_space<vmem>>, vector<32x16xbf16>
    tpu.vector_store %arg20[%c32_89, %c80_90], %174 {strides = array<i32>} : memref<64x144xbf16, #tpu.memory_space<vmem>>, vector<32x16xbf16>,
    %176 = vector.extract_strided_slice %130 {offsets = [192, 16], sizes = [32, 16], strides = [1, 1]} : vector<288x32xf32> to vector<32x16xf32>
    %177 = arith.truncf %176 : vector<32x16xf32> to vector<32x16xbf16>
    %c32_91 = arith.constant 32 : index
    %c96_92 = arith.constant 96 : index
    %178 = vector.load %arg20[%c32_91, %c96_92] : memref<64x144xbf16, #tpu.memory_space<vmem>>, vector<32x16xbf16>
    tpu.vector_store %arg20[%c32_91, %c96_92], %177 {strides = array<i32>} : memref<64x144xbf16, #tpu.memory_space<vmem>>, vector<32x16xbf16>,
    %179 = vector.extract_strided_slice %130 {offsets = [224, 16], sizes = [32, 16], strides = [1, 1]} : vector<288x32xf32> to vector<32x16xf32>
    %180 = arith.truncf %179 : vector<32x16xf32> to vector<32x16xbf16>
    %c32_93 = arith.constant 32 : index
    %c112_94 = arith.constant 112 : index
    %181 = vector.load %arg20[%c32_93, %c112_94] : memref<64x144xbf16, #tpu.memory_space<vmem>>, vector<32x16xbf16>
    tpu.vector_store %arg20[%c32_93, %c112_94], %180 {strides = array<i32>} : memref<64x144xbf16, #tpu.memory_space<vmem>>, vector<32x16xbf16>,
    %182 = vector.extract_strided_slice %130 {offsets = [256, 16], sizes = [32, 16], strides = [1, 1]} : vector<288x32xf32> to vector<32x16xf32>
    %183 = arith.truncf %182 : vector<32x16xf32> to vector<32x16xbf16>
    %c32_95 = arith.constant 32 : index
    %c128_96 = arith.constant 128 : index
    %184 = vector.load %arg20[%c32_95, %c128_96] : memref<64x144xbf16, #tpu.memory_space<vmem>>, vector<32x16xbf16>
    tpu.vector_store %arg20[%c32_95, %c128_96], %183 {strides = array<i32>} : memref<64x144xbf16, #tpu.memory_space<vmem>>, vector<32x16xbf16>,
    %c0_97 = arith.constant 0 : index
    %c0_98 = arith.constant 0 : index
    %185 = vector.load %arg20[%c0_97, %c0_98] : memref<64x144xbf16, #tpu.memory_space<vmem>>, vector<64x144xbf16>
    %c0_99 = arith.constant 0 : index
    %c0_100 = arith.constant 0 : index
    %186 = vector.load %arg9[%c0_99, %c0_100] : memref<144x128xbf16, #tpu.memory_space<vmem>>, vector<144x128xbf16>
    %cst_101 = arith.constant dense<0.000000e+00> : vector<64x128xf32>
    %187 = tpu.matmul %185, %186, %cst_101 {dimension_numbers = #tpu.dot_dimension_numbers<[1], [0], [0], [1], [0, 0, 1, 1], [], []>} : vector<64x144xbf16>, vector<144x128xbf16>, vector<64x128xf32> -> vector<64x128xf32>
    %c0_102 = arith.constant 0 : index
    %c0_103 = arith.constant 0 : index
    %188 = vector.load %arg10[%c0_102, %c0_103] : memref<32x1xf32, #tpu.memory_space<vmem>>, vector<32x1xf32>
    %c0_104 = arith.constant 0 : index
    %c0_105 = arith.constant 0 : index
    %189 = vector.load %arg11[%c0_104, %c0_105] : memref<32x1xf32, #tpu.memory_space<vmem>>, vector<32x1xf32>
    %190 = vector.extract_strided_slice %187 {offsets = [0, 0], sizes = [32, 128], strides = [1, 1]} : vector<64x128xf32> to vector<32x128xf32>
    %191 = arith.mulf %190, %190 : vector<32x128xf32>
    %192 = vector.extract_strided_slice %187 {offsets = [32, 0], sizes = [32, 128], strides = [1, 1]} : vector<64x128xf32> to vector<32x128xf32>
    %193 = arith.addf %190, %192 : vector<32x128xf32>
    %194 = arith.mulf %192, %192 : vector<32x128xf32>
    %195 = arith.addf %191, %194 : vector<32x128xf32>
    %cst_106 = arith.constant dense<0.000000e+00> : vector<32xf32>
    %196 = vector.multi_reduction <add>, %193, %cst_106 [1] : vector<32x128xf32> to vector<32xf32>
    %197 = vector.shape_cast %196 : vector<32xf32> to vector<32x1xf32>
    %cst_107 = arith.constant 0.0102040814 : f32
    %198 = vector.broadcast %cst_107 : f32 to vector<32x1xf32>
    %199 = arith.mulf %197, %198 : vector<32x1xf32>
    %cst_108 = arith.constant dense<0.000000e+00> : vector<32xf32>
    %200 = vector.multi_reduction <add>, %195, %cst_108 [1] : vector<32x128xf32> to vector<32xf32>
    %201 = vector.shape_cast %200 : vector<32xf32> to vector<32x1xf32>
    %cst_109 = arith.constant 0.0102040814 : f32
    %202 = vector.broadcast %cst_109 : f32 to vector<32x1xf32>
    %203 = arith.mulf %201, %202 : vector<32x1xf32>
    %204 = arith.mulf %199, %199 : vector<32x1xf32>
    %205 = arith.subf %203, %204 : vector<32x1xf32>
    %cst_110 = arith.constant 0.000000e+00 : f32
    %206 = vector.broadcast %cst_110 : f32 to vector<32x1xf32>
    %207 = arith.maximumf %205, %206 : vector<32x1xf32>
    %cst_111 = arith.constant 9.99999974E-6 : f32
    %208 = vector.broadcast %cst_111 : f32 to vector<32x1xf32>
    %209 = arith.addf %207, %208 : vector<32x1xf32>
    %210 = math.rsqrt %209 : vector<32x1xf32>
    %211 = arith.mulf %188, %210 : vector<32x1xf32>
    %212 = arith.mulf %199, %211 : vector<32x1xf32>
    %213 = arith.subf %189, %212 : vector<32x1xf32>
    %214 = tpu.concatenate %211, %211 in 0 : vector<32x1xf32>, vector<32x1xf32> -> vector<64x1xf32>
    %215 = tpu.concatenate %213, %213 in 0 : vector<32x1xf32>, vector<32x1xf32> -> vector<64x1xf32>
    %216 = vector.broadcast %214 : vector<64x1xf32> to vector<64x128xf32>
    %217 = arith.mulf %187, %216 : vector<64x128xf32>
    %218 = vector.broadcast %215 : vector<64x1xf32> to vector<64x128xf32>
    %219 = arith.addf %217, %218 : vector<64x128xf32>
    %cst_112 = arith.constant 0.000000e+00 : f32
    %220 = vector.broadcast %cst_112 : f32 to vector<64x128xf32>
    %221 = arith.maximumf %219, %220 : vector<64x128xf32>
    %222 = vector.extract_strided_slice %221 {offsets = [0, 0], sizes = [32, 128], strides = [1, 1]} : vector<64x128xf32> to vector<32x128xf32>
    %c0_113 = arith.constant 0 : index
    %c0_114 = arith.constant 0 : index
    %223 = vector.load %arg21[%c0_113, %c0_114] : memref<32x256xf32, #tpu.memory_space<vmem>>, vector<32x128xf32>
    tpu.vector_store %arg21[%c0_113, %c0_114], %222 {strides = array<i32>} : memref<32x256xf32, #tpu.memory_space<vmem>>, vector<32x128xf32>,
    %224 = vector.extract_strided_slice %221 {offsets = [32, 0], sizes = [32, 128], strides = [1, 1]} : vector<64x128xf32> to vector<32x128xf32>
    %c0_115 = arith.constant 0 : index
    %c128_116 = arith.constant 128 : index
    %225 = vector.load %arg21[%c0_115, %c128_116] : memref<32x256xf32, #tpu.memory_space<vmem>>, vector<32x128xf32>
    tpu.vector_store %arg21[%c0_115, %c128_116], %224 {strides = array<i32>} : memref<32x256xf32, #tpu.memory_space<vmem>>, vector<32x128xf32>,
    %c0_117 = arith.constant 0 : index
    %c0_118 = arith.constant 0 : index
    %226 = vector.load %arg12[%c0_117, %c0_118] : memref<256x32xbf16, #tpu.memory_space<vmem>>, vector<256x32xbf16>
    %c0_119 = arith.constant 0 : index
    %c0_120 = arith.constant 0 : index
    %227 = vector.load %arg21[%c0_119, %c0_120] : memref<32x256xf32, #tpu.memory_space<vmem>>, vector<32x256xf32>
    %228 = arith.truncf %227 : vector<32x256xf32> to vector<32x256xbf16>
    %cst_121 = arith.constant dense<0.000000e+00> : vector<256x256xf32>
    %229 = tpu.matmul %226, %228, %cst_121 {dimension_numbers = #tpu.dot_dimension_numbers<[1], [0], [0], [1], [0, 0, 1, 1], [], []>} : vector<256x32xbf16>, vector<32x256xbf16>, vector<256x256xf32> -> vector<256x256xf32>
    %230 = vector.extract_strided_slice %229 {offsets = [0, 0], sizes = [16, 49], strides = [1, 1]} : vector<256x256xf32> to vector<16x49xf32>
    %231 = arith.truncf %230 : vector<16x49xf32> to vector<16x49xbf16>
    %c0_122 = arith.constant 0 : index
    %c0_123 = arith.constant 0 : index
    %232 = vector.load %arg22[%c0_122, %c0_123] : memref<32x784xbf16, #tpu.memory_space<vmem>>, vector<16x49xbf16>
    tpu.vector_store %arg22[%c0_122, %c0_123], %231 {strides = array<i32>} : memref<32x784xbf16, #tpu.memory_space<vmem>>, vector<16x49xbf16>,
    %233 = vector.extract_strided_slice %229 {offsets = [16, 0], sizes = [16, 49], strides = [1, 1]} : vector<256x256xf32> to vector<16x49xf32>
    %234 = arith.truncf %233 : vector<16x49xf32> to vector<16x49xbf16>
    %c0_124 = arith.constant 0 : index
    %c49 = arith.constant 49 : index
    %235 = vector.load %arg22[%c0_124, %c49] : memref<32x784xbf16, #tpu.memory_space<vmem>>, vector<16x49xbf16>
    tpu.vector_store %arg22[%c0_124, %c49], %234 {strides = array<i32>} : memref<32x784xbf16, #tpu.memory_space<vmem>>, vector<16x49xbf16>,
    %236 = vector.extract_strided_slice %229 {offsets = [32, 0], sizes = [16, 49], strides = [1, 1]} : vector<256x256xf32> to vector<16x49xf32>
    %237 = arith.truncf %236 : vector<16x49xf32> to vector<16x49xbf16>
    %c0_125 = arith.constant 0 : index
    %c98 = arith.constant 98 : index
    %238 = vector.load %arg22[%c0_125, %c98] : memref<32x784xbf16, #tpu.memory_space<vmem>>, vector<16x49xbf16>
    tpu.vector_store %arg22[%c0_125, %c98], %237 {strides = array<i32>} : memref<32x784xbf16, #tpu.memory_space<vmem>>, vector<16x49xbf16>,
    %239 = vector.extract_strided_slice %229 {offsets = [48, 0], sizes = [16, 49], strides = [1, 1]} : vector<256x256xf32> to vector<16x49xf32>
    %240 = arith.truncf %239 : vector<16x49xf32> to vector<16x49xbf16>
    %c0_126 = arith.constant 0 : index
    %c147 = arith.constant 147 : index
    %241 = vector.load %arg22[%c0_126, %c147] : memref<32x784xbf16, #tpu.memory_space<vmem>>, vector<16x49xbf16>
    tpu.vector_store %arg22[%c0_126, %c147], %240 {strides = array<i32>} : memref<32x784xbf16, #tpu.memory_space<vmem>>, vector<16x49xbf16>,
    %242 = vector.extract_strided_slice %229 {offsets = [64, 0], sizes = [16, 49], strides = [1, 1]} : vector<256x256xf32> to vector<16x49xf32>
    %243 = arith.truncf %242 : vector<16x49xf32> to vector<16x49xbf16>
    %c0_127 = arith.constant 0 : index
    %c196 = arith.constant 196 : index
    %244 = vector.load %arg22[%c0_127, %c196] : memref<32x784xbf16, #tpu.memory_space<vmem>>, vector<16x49xbf16>
    tpu.vector_store %arg22[%c0_127, %c196], %243 {strides = array<i32>} : memref<32x784xbf16, #tpu.memory_space<vmem>>, vector<16x49xbf16>,
    %245 = vector.extract_strided_slice %229 {offsets = [80, 0], sizes = [16, 49], strides = [1, 1]} : vector<256x256xf32> to vector<16x49xf32>
    %246 = arith.truncf %245 : vector<16x49xf32> to vector<16x49xbf16>
    %c0_128 = arith.constant 0 : index
    %c245 = arith.constant 245 : index
    %247 = vector.load %arg22[%c0_128, %c245] : memref<32x784xbf16, #tpu.memory_space<vmem>>, vector<16x49xbf16>
    tpu.vector_store %arg22[%c0_128, %c245], %246 {strides = array<i32>} : memref<32x784xbf16, #tpu.memory_space<vmem>>, vector<16x49xbf16>,
    %248 = vector.extract_strided_slice %229 {offsets = [96, 0], sizes = [16, 49], strides = [1, 1]} : vector<256x256xf32> to vector<16x49xf32>
    %249 = arith.truncf %248 : vector<16x49xf32> to vector<16x49xbf16>
    %c0_129 = arith.constant 0 : index
    %c294 = arith.constant 294 : index
    %250 = vector.load %arg22[%c0_129, %c294] : memref<32x784xbf16, #tpu.memory_space<vmem>>, vector<16x49xbf16>
    tpu.vector_store %arg22[%c0_129, %c294], %249 {strides = array<i32>} : memref<32x784xbf16, #tpu.memory_space<vmem>>, vector<16x49xbf16>,
    %251 = vector.extract_strided_slice %229 {offsets = [112, 0], sizes = [16, 49], strides = [1, 1]} : vector<256x256xf32> to vector<16x49xf32>
    %252 = arith.truncf %251 : vector<16x49xf32> to vector<16x49xbf16>
    %c0_130 = arith.constant 0 : index
    %c343 = arith.constant 343 : index
    %253 = vector.load %arg22[%c0_130, %c343] : memref<32x784xbf16, #tpu.memory_space<vmem>>, vector<16x49xbf16>
    tpu.vector_store %arg22[%c0_130, %c343], %252 {strides = array<i32>} : memref<32x784xbf16, #tpu.memory_space<vmem>>, vector<16x49xbf16>,
    %254 = vector.extract_strided_slice %229 {offsets = [128, 0], sizes = [16, 49], strides = [1, 1]} : vector<256x256xf32> to vector<16x49xf32>
    %255 = arith.truncf %254 : vector<16x49xf32> to vector<16x49xbf16>
    %c0_131 = arith.constant 0 : index
    %c392 = arith.constant 392 : index
    %256 = vector.load %arg22[%c0_131, %c392] : memref<32x784xbf16, #tpu.memory_space<vmem>>, vector<16x49xbf16>
    tpu.vector_store %arg22[%c0_131, %c392], %255 {strides = array<i32>} : memref<32x784xbf16, #tpu.memory_space<vmem>>, vector<16x49xbf16>,
    %257 = vector.extract_strided_slice %229 {offsets = [144, 0], sizes = [16, 49], strides = [1, 1]} : vector<256x256xf32> to vector<16x49xf32>
    %258 = arith.truncf %257 : vector<16x49xf32> to vector<16x49xbf16>
    %c0_132 = arith.constant 0 : index
    %c441 = arith.constant 441 : index
    %259 = vector.load %arg22[%c0_132, %c441] : memref<32x784xbf16, #tpu.memory_space<vmem>>, vector<16x49xbf16>
    tpu.vector_store %arg22[%c0_132, %c441], %258 {strides = array<i32>} : memref<32x784xbf16, #tpu.memory_space<vmem>>, vector<16x49xbf16>,
    %260 = vector.extract_strided_slice %229 {offsets = [160, 0], sizes = [16, 49], strides = [1, 1]} : vector<256x256xf32> to vector<16x49xf32>
    %261 = arith.truncf %260 : vector<16x49xf32> to vector<16x49xbf16>
    %c0_133 = arith.constant 0 : index
    %c490 = arith.constant 490 : index
    %262 = vector.load %arg22[%c0_133, %c490] : memref<32x784xbf16, #tpu.memory_space<vmem>>, vector<16x49xbf16>
    tpu.vector_store %arg22[%c0_133, %c490], %261 {strides = array<i32>} : memref<32x784xbf16, #tpu.memory_space<vmem>>, vector<16x49xbf16>,
    %263 = vector.extract_strided_slice %229 {offsets = [176, 0], sizes = [16, 49], strides = [1, 1]} : vector<256x256xf32> to vector<16x49xf32>
    %264 = arith.truncf %263 : vector<16x49xf32> to vector<16x49xbf16>
    %c0_134 = arith.constant 0 : index
    %c539 = arith.constant 539 : index
    %265 = vector.load %arg22[%c0_134, %c539] : memref<32x784xbf16, #tpu.memory_space<vmem>>, vector<16x49xbf16>
    tpu.vector_store %arg22[%c0_134, %c539], %264 {strides = array<i32>} : memref<32x784xbf16, #tpu.memory_space<vmem>>, vector<16x49xbf16>,
    %266 = vector.extract_strided_slice %229 {offsets = [192, 0], sizes = [16, 49], strides = [1, 1]} : vector<256x256xf32> to vector<16x49xf32>
    %267 = arith.truncf %266 : vector<16x49xf32> to vector<16x49xbf16>
    %c0_135 = arith.constant 0 : index
    %c588 = arith.constant 588 : index
    %268 = vector.load %arg22[%c0_135, %c588] : memref<32x784xbf16, #tpu.memory_space<vmem>>, vector<16x49xbf16>
    tpu.vector_store %arg22[%c0_135, %c588], %267 {strides = array<i32>} : memref<32x784xbf16, #tpu.memory_space<vmem>>, vector<16x49xbf16>,
    %269 = vector.extract_strided_slice %229 {offsets = [208, 0], sizes = [16, 49], strides = [1, 1]} : vector<256x256xf32> to vector<16x49xf32>
    %270 = arith.truncf %269 : vector<16x49xf32> to vector<16x49xbf16>
    %c0_136 = arith.constant 0 : index
    %c637 = arith.constant 637 : index
    %271 = vector.load %arg22[%c0_136, %c637] : memref<32x784xbf16, #tpu.memory_space<vmem>>, vector<16x49xbf16>
    tpu.vector_store %arg22[%c0_136, %c637], %270 {strides = array<i32>} : memref<32x784xbf16, #tpu.memory_space<vmem>>, vector<16x49xbf16>,
    %272 = vector.extract_strided_slice %229 {offsets = [224, 0], sizes = [16, 49], strides = [1, 1]} : vector<256x256xf32> to vector<16x49xf32>
    %273 = arith.truncf %272 : vector<16x49xf32> to vector<16x49xbf16>
    %c0_137 = arith.constant 0 : index
    %c686 = arith.constant 686 : index
    %274 = vector.load %arg22[%c0_137, %c686] : memref<32x784xbf16, #tpu.memory_space<vmem>>, vector<16x49xbf16>
    tpu.vector_store %arg22[%c0_137, %c686], %273 {strides = array<i32>} : memref<32x784xbf16, #tpu.memory_space<vmem>>, vector<16x49xbf16>,
    %275 = vector.extract_strided_slice %229 {offsets = [240, 0], sizes = [16, 49], strides = [1, 1]} : vector<256x256xf32> to vector<16x49xf32>
    %276 = arith.truncf %275 : vector<16x49xf32> to vector<16x49xbf16>
    %c0_138 = arith.constant 0 : index
    %c735 = arith.constant 735 : index
    %277 = vector.load %arg22[%c0_138, %c735] : memref<32x784xbf16, #tpu.memory_space<vmem>>, vector<16x49xbf16>
    tpu.vector_store %arg22[%c0_138, %c735], %276 {strides = array<i32>} : memref<32x784xbf16, #tpu.memory_space<vmem>>, vector<16x49xbf16>,
    %278 = vector.extract_strided_slice %229 {offsets = [0, 128], sizes = [16, 49], strides = [1, 1]} : vector<256x256xf32> to vector<16x49xf32>
    %279 = arith.truncf %278 : vector<16x49xf32> to vector<16x49xbf16>
    %c16_139 = arith.constant 16 : index
    %c0_140 = arith.constant 0 : index
    %280 = vector.load %arg22[%c16_139, %c0_140] : memref<32x784xbf16, #tpu.memory_space<vmem>>, vector<16x49xbf16>
    tpu.vector_store %arg22[%c16_139, %c0_140], %279 {strides = array<i32>} : memref<32x784xbf16, #tpu.memory_space<vmem>>, vector<16x49xbf16>,
    %281 = vector.extract_strided_slice %229 {offsets = [16, 128], sizes = [16, 49], strides = [1, 1]} : vector<256x256xf32> to vector<16x49xf32>
    %282 = arith.truncf %281 : vector<16x49xf32> to vector<16x49xbf16>
    %c16_141 = arith.constant 16 : index
    %c49_142 = arith.constant 49 : index
    %283 = vector.load %arg22[%c16_141, %c49_142] : memref<32x784xbf16, #tpu.memory_space<vmem>>, vector<16x49xbf16>
    tpu.vector_store %arg22[%c16_141, %c49_142], %282 {strides = array<i32>} : memref<32x784xbf16, #tpu.memory_space<vmem>>, vector<16x49xbf16>,
    %284 = vector.extract_strided_slice %229 {offsets = [32, 128], sizes = [16, 49], strides = [1, 1]} : vector<256x256xf32> to vector<16x49xf32>
    %285 = arith.truncf %284 : vector<16x49xf32> to vector<16x49xbf16>
    %c16_143 = arith.constant 16 : index
    %c98_144 = arith.constant 98 : index
    %286 = vector.load %arg22[%c16_143, %c98_144] : memref<32x784xbf16, #tpu.memory_space<vmem>>, vector<16x49xbf16>
    tpu.vector_store %arg22[%c16_143, %c98_144], %285 {strides = array<i32>} : memref<32x784xbf16, #tpu.memory_space<vmem>>, vector<16x49xbf16>,
    %287 = vector.extract_strided_slice %229 {offsets = [48, 128], sizes = [16, 49], strides = [1, 1]} : vector<256x256xf32> to vector<16x49xf32>
    %288 = arith.truncf %287 : vector<16x49xf32> to vector<16x49xbf16>
    %c16_145 = arith.constant 16 : index
    %c147_146 = arith.constant 147 : index
    %289 = vector.load %arg22[%c16_145, %c147_146] : memref<32x784xbf16, #tpu.memory_space<vmem>>, vector<16x49xbf16>
    tpu.vector_store %arg22[%c16_145, %c147_146], %288 {strides = array<i32>} : memref<32x784xbf16, #tpu.memory_space<vmem>>, vector<16x49xbf16>,
    %290 = vector.extract_strided_slice %229 {offsets = [64, 128], sizes = [16, 49], strides = [1, 1]} : vector<256x256xf32> to vector<16x49xf32>
    %291 = arith.truncf %290 : vector<16x49xf32> to vector<16x49xbf16>
    %c16_147 = arith.constant 16 : index
    %c196_148 = arith.constant 196 : index
    %292 = vector.load %arg22[%c16_147, %c196_148] : memref<32x784xbf16, #tpu.memory_space<vmem>>, vector<16x49xbf16>
    tpu.vector_store %arg22[%c16_147, %c196_148], %291 {strides = array<i32>} : memref<32x784xbf16, #tpu.memory_space<vmem>>, vector<16x49xbf16>,
    %293 = vector.extract_strided_slice %229 {offsets = [80, 128], sizes = [16, 49], strides = [1, 1]} : vector<256x256xf32> to vector<16x49xf32>
    %294 = arith.truncf %293 : vector<16x49xf32> to vector<16x49xbf16>
    %c16_149 = arith.constant 16 : index
    %c245_150 = arith.constant 245 : index
    %295 = vector.load %arg22[%c16_149, %c245_150] : memref<32x784xbf16, #tpu.memory_space<vmem>>, vector<16x49xbf16>
    tpu.vector_store %arg22[%c16_149, %c245_150], %294 {strides = array<i32>} : memref<32x784xbf16, #tpu.memory_space<vmem>>, vector<16x49xbf16>,
    %296 = vector.extract_strided_slice %229 {offsets = [96, 128], sizes = [16, 49], strides = [1, 1]} : vector<256x256xf32> to vector<16x49xf32>
    %297 = arith.truncf %296 : vector<16x49xf32> to vector<16x49xbf16>
    %c16_151 = arith.constant 16 : index
    %c294_152 = arith.constant 294 : index
    %298 = vector.load %arg22[%c16_151, %c294_152] : memref<32x784xbf16, #tpu.memory_space<vmem>>, vector<16x49xbf16>
    tpu.vector_store %arg22[%c16_151, %c294_152], %297 {strides = array<i32>} : memref<32x784xbf16, #tpu.memory_space<vmem>>, vector<16x49xbf16>,
    %299 = vector.extract_strided_slice %229 {offsets = [112, 128], sizes = [16, 49], strides = [1, 1]} : vector<256x256xf32> to vector<16x49xf32>
    %300 = arith.truncf %299 : vector<16x49xf32> to vector<16x49xbf16>
    %c16_153 = arith.constant 16 : index
    %c343_154 = arith.constant 343 : index
    %301 = vector.load %arg22[%c16_153, %c343_154] : memref<32x784xbf16, #tpu.memory_space<vmem>>, vector<16x49xbf16>
    tpu.vector_store %arg22[%c16_153, %c343_154], %300 {strides = array<i32>} : memref<32x784xbf16, #tpu.memory_space<vmem>>, vector<16x49xbf16>,
    %302 = vector.extract_strided_slice %229 {offsets = [128, 128], sizes = [16, 49], strides = [1, 1]} : vector<256x256xf32> to vector<16x49xf32>
    %303 = arith.truncf %302 : vector<16x49xf32> to vector<16x49xbf16>
    %c16_155 = arith.constant 16 : index
    %c392_156 = arith.constant 392 : index
    %304 = vector.load %arg22[%c16_155, %c392_156] : memref<32x784xbf16, #tpu.memory_space<vmem>>, vector<16x49xbf16>
    tpu.vector_store %arg22[%c16_155, %c392_156], %303 {strides = array<i32>} : memref<32x784xbf16, #tpu.memory_space<vmem>>, vector<16x49xbf16>,
    %305 = vector.extract_strided_slice %229 {offsets = [144, 128], sizes = [16, 49], strides = [1, 1]} : vector<256x256xf32> to vector<16x49xf32>
    %306 = arith.truncf %305 : vector<16x49xf32> to vector<16x49xbf16>
    %c16_157 = arith.constant 16 : index
    %c441_158 = arith.constant 441 : index
    %307 = vector.load %arg22[%c16_157, %c441_158] : memref<32x784xbf16, #tpu.memory_space<vmem>>, vector<16x49xbf16>
    tpu.vector_store %arg22[%c16_157, %c441_158], %306 {strides = array<i32>} : memref<32x784xbf16, #tpu.memory_space<vmem>>, vector<16x49xbf16>,
    %308 = vector.extract_strided_slice %229 {offsets = [160, 128], sizes = [16, 49], strides = [1, 1]} : vector<256x256xf32> to vector<16x49xf32>
    %309 = arith.truncf %308 : vector<16x49xf32> to vector<16x49xbf16>
    %c16_159 = arith.constant 16 : index
    %c490_160 = arith.constant 490 : index
    %310 = vector.load %arg22[%c16_159, %c490_160] : memref<32x784xbf16, #tpu.memory_space<vmem>>, vector<16x49xbf16>
    tpu.vector_store %arg22[%c16_159, %c490_160], %309 {strides = array<i32>} : memref<32x784xbf16, #tpu.memory_space<vmem>>, vector<16x49xbf16>,
    %311 = vector.extract_strided_slice %229 {offsets = [176, 128], sizes = [16, 49], strides = [1, 1]} : vector<256x256xf32> to vector<16x49xf32>
    %312 = arith.truncf %311 : vector<16x49xf32> to vector<16x49xbf16>
    %c16_161 = arith.constant 16 : index
    %c539_162 = arith.constant 539 : index
    %313 = vector.load %arg22[%c16_161, %c539_162] : memref<32x784xbf16, #tpu.memory_space<vmem>>, vector<16x49xbf16>
    tpu.vector_store %arg22[%c16_161, %c539_162], %312 {strides = array<i32>} : memref<32x784xbf16, #tpu.memory_space<vmem>>, vector<16x49xbf16>,
    %314 = vector.extract_strided_slice %229 {offsets = [192, 128], sizes = [16, 49], strides = [1, 1]} : vector<256x256xf32> to vector<16x49xf32>
    %315 = arith.truncf %314 : vector<16x49xf32> to vector<16x49xbf16>
    %c16_163 = arith.constant 16 : index
    %c588_164 = arith.constant 588 : index
    %316 = vector.load %arg22[%c16_163, %c588_164] : memref<32x784xbf16, #tpu.memory_space<vmem>>, vector<16x49xbf16>
    tpu.vector_store %arg22[%c16_163, %c588_164], %315 {strides = array<i32>} : memref<32x784xbf16, #tpu.memory_space<vmem>>, vector<16x49xbf16>,
    %317 = vector.extract_strided_slice %229 {offsets = [208, 128], sizes = [16, 49], strides = [1, 1]} : vector<256x256xf32> to vector<16x49xf32>
    %318 = arith.truncf %317 : vector<16x49xf32> to vector<16x49xbf16>
    %c16_165 = arith.constant 16 : index
    %c637_166 = arith.constant 637 : index
    %319 = vector.load %arg22[%c16_165, %c637_166] : memref<32x784xbf16, #tpu.memory_space<vmem>>, vector<16x49xbf16>
    tpu.vector_store %arg22[%c16_165, %c637_166], %318 {strides = array<i32>} : memref<32x784xbf16, #tpu.memory_space<vmem>>, vector<16x49xbf16>,
    %320 = vector.extract_strided_slice %229 {offsets = [224, 128], sizes = [16, 49], strides = [1, 1]} : vector<256x256xf32> to vector<16x49xf32>
    %321 = arith.truncf %320 : vector<16x49xf32> to vector<16x49xbf16>
    %c16_167 = arith.constant 16 : index
    %c686_168 = arith.constant 686 : index
    %322 = vector.load %arg22[%c16_167, %c686_168] : memref<32x784xbf16, #tpu.memory_space<vmem>>, vector<16x49xbf16>
    tpu.vector_store %arg22[%c16_167, %c686_168], %321 {strides = array<i32>} : memref<32x784xbf16, #tpu.memory_space<vmem>>, vector<16x49xbf16>,
    %323 = vector.extract_strided_slice %229 {offsets = [240, 128], sizes = [16, 49], strides = [1, 1]} : vector<256x256xf32> to vector<16x49xf32>
    %324 = arith.truncf %323 : vector<16x49xf32> to vector<16x49xbf16>
    %c16_169 = arith.constant 16 : index
    %c735_170 = arith.constant 735 : index
    %325 = vector.load %arg22[%c16_169, %c735_170] : memref<32x784xbf16, #tpu.memory_space<vmem>>, vector<16x49xbf16>
    tpu.vector_store %arg22[%c16_169, %c735_170], %324 {strides = array<i32>} : memref<32x784xbf16, #tpu.memory_space<vmem>>, vector<16x49xbf16>,
    %c0_171 = arith.constant 0 : index
    %c0_172 = arith.constant 0 : index
    %326 = vector.load %arg22[%c0_171, %c0_172] : memref<32x784xbf16, #tpu.memory_space<vmem>>, vector<32x784xbf16>
    %c0_173 = arith.constant 0 : index
    %c0_174 = arith.constant 0 : index
    %327 = vector.load %arg13[%c0_173, %c0_174] : memref<784x256xbf16, #tpu.memory_space<vmem>>, vector<784x256xbf16>
    %cst_175 = arith.constant dense<0.000000e+00> : vector<32x256xf32>
    %328 = tpu.matmul %326, %327, %cst_175 {dimension_numbers = #tpu.dot_dimension_numbers<[1], [0], [0], [1], [0, 0, 1, 1], [], []>} : vector<32x784xbf16>, vector<784x256xbf16>, vector<32x256xf32> -> vector<32x256xf32>
    %c0_176 = arith.constant 0 : index
    %c0_177 = arith.constant 0 : index
    %329 = vector.load %arg14[%c0_176, %c0_177] : memref<16x1xf32, #tpu.memory_space<vmem>>, vector<16x1xf32>
    %c0_178 = arith.constant 0 : index
    %c0_179 = arith.constant 0 : index
    %330 = vector.load %arg15[%c0_178, %c0_179] : memref<16x1xf32, #tpu.memory_space<vmem>>, vector<16x1xf32>
    %331 = vector.extract_strided_slice %328 {offsets = [0, 0], sizes = [16, 256], strides = [1, 1]} : vector<32x256xf32> to vector<16x256xf32>
    %332 = arith.mulf %331, %331 : vector<16x256xf32>
    %333 = vector.extract_strided_slice %328 {offsets = [16, 0], sizes = [16, 256], strides = [1, 1]} : vector<32x256xf32> to vector<16x256xf32>
    %334 = arith.addf %331, %333 : vector<16x256xf32>
    %335 = arith.mulf %333, %333 : vector<16x256xf32>
    %336 = arith.addf %332, %335 : vector<16x256xf32>
    %cst_180 = arith.constant dense<0.000000e+00> : vector<16xf32>
    %337 = vector.multi_reduction <add>, %334, %cst_180 [1] : vector<16x256xf32> to vector<16xf32>
    %338 = vector.shape_cast %337 : vector<16xf32> to vector<16x1xf32>
    %cst_181 = arith.constant 0.00255102036 : f32
    %339 = vector.broadcast %cst_181 : f32 to vector<16x1xf32>
    %340 = arith.mulf %338, %339 : vector<16x1xf32>
    %cst_182 = arith.constant dense<0.000000e+00> : vector<16xf32>
    %341 = vector.multi_reduction <add>, %336, %cst_182 [1] : vector<16x256xf32> to vector<16xf32>
    %342 = vector.shape_cast %341 : vector<16xf32> to vector<16x1xf32>
    %cst_183 = arith.constant 0.00255102036 : f32
    %343 = vector.broadcast %cst_183 : f32 to vector<16x1xf32>
    %344 = arith.mulf %342, %343 : vector<16x1xf32>
    %345 = arith.mulf %340, %340 : vector<16x1xf32>
    %346 = arith.subf %344, %345 : vector<16x1xf32>
    %cst_184 = arith.constant 0.000000e+00 : f32
    %347 = vector.broadcast %cst_184 : f32 to vector<16x1xf32>
    %348 = arith.maximumf %346, %347 : vector<16x1xf32>
    %cst_185 = arith.constant 9.99999974E-6 : f32
    %349 = vector.broadcast %cst_185 : f32 to vector<16x1xf32>
    %350 = arith.addf %348, %349 : vector<16x1xf32>
    %351 = math.rsqrt %350 : vector<16x1xf32>
    %352 = arith.mulf %329, %351 : vector<16x1xf32>
    %353 = arith.mulf %340, %352 : vector<16x1xf32>
    %354 = arith.subf %330, %353 : vector<16x1xf32>
    %355 = tpu.concatenate %352, %352 in 0 : vector<16x1xf32>, vector<16x1xf32> -> vector<32x1xf32>
    %356 = tpu.concatenate %354, %354 in 0 : vector<16x1xf32>, vector<16x1xf32> -> vector<32x1xf32>
    %357 = vector.broadcast %355 : vector<32x1xf32> to vector<32x256xf32>
    %358 = arith.mulf %328, %357 : vector<32x256xf32>
    %359 = vector.broadcast %356 : vector<32x1xf32> to vector<32x256xf32>
    %360 = arith.addf %358, %359 : vector<32x256xf32>
    %cst_186 = arith.constant 0.000000e+00 : f32
    %361 = vector.broadcast %cst_186 : f32 to vector<32x256xf32>
    %362 = arith.maximumf %360, %361 : vector<32x256xf32>
    %363 = vector.extract_strided_slice %362 {offsets = [0, 0], sizes = [16, 256], strides = [1, 1]} : vector<32x256xf32> to vector<16x256xf32>
    %c0_187 = arith.constant 0 : index
    %c0_188 = arith.constant 0 : index
    %364 = vector.load %arg23[%c0_187, %c0_188] : memref<16x512xf32, #tpu.memory_space<vmem>>, vector<16x256xf32>
    tpu.vector_store %arg23[%c0_187, %c0_188], %363 {strides = array<i32>} : memref<16x512xf32, #tpu.memory_space<vmem>>, vector<16x256xf32>,
    %365 = vector.extract_strided_slice %362 {offsets = [16, 0], sizes = [16, 256], strides = [1, 1]} : vector<32x256xf32> to vector<16x256xf32>
    %c0_189 = arith.constant 0 : index
    %c256 = arith.constant 256 : index
    %366 = vector.load %arg23[%c0_189, %c256] : memref<16x512xf32, #tpu.memory_space<vmem>>, vector<16x256xf32>
    tpu.vector_store %arg23[%c0_189, %c256], %365 {strides = array<i32>} : memref<16x512xf32, #tpu.memory_space<vmem>>, vector<16x256xf32>,
    %c0_190 = arith.constant 0 : index
    %c0_191 = arith.constant 0 : index
    %367 = vector.load %arg16[%c0_190, %c0_191] : memref<16x16xbf16, #tpu.memory_space<vmem>>, vector<16x16xbf16>
    %c0_192 = arith.constant 0 : index
    %c0_193 = arith.constant 0 : index
    %368 = vector.load %arg23[%c0_192, %c0_193] : memref<16x512xf32, #tpu.memory_space<vmem>>, vector<16x512xf32>
    %369 = arith.truncf %368 : vector<16x512xf32> to vector<16x512xbf16>
    %cst_194 = arith.constant dense<0.000000e+00> : vector<16x512xf32>
    %370 = tpu.matmul %367, %369, %cst_194 {dimension_numbers = #tpu.dot_dimension_numbers<[1], [0], [0], [1], [0, 0, 1, 1], [], []>} : vector<16x16xbf16>, vector<16x512xbf16>, vector<16x512xf32> -> vector<16x512xf32>
    %c0_195 = arith.constant 0 : index
    %c0_196 = arith.constant 0 : index
    %371 = vector.load %arg17[%c0_195, %c0_196] : memref<16x256xf32, #tpu.memory_space<vmem>>, vector<16x256xf32>
    %372 = tpu.concatenate %371, %371 in 1 : vector<16x256xf32>, vector<16x256xf32> -> vector<16x512xf32>
    %373 = vector.extract_strided_slice %370 {offsets = [5, 0], sizes = [1, 512], strides = [1, 1]} : vector<16x512xf32> to vector<1x512xf32>
    %374 = vector.extract_strided_slice %372 {offsets = [5, 0], sizes = [1, 512], strides = [1, 1]} : vector<16x512xf32> to vector<1x512xf32>
    %375 = arith.mulf %374, %373 : vector<1x512xf32>
    %376 = vector.extract_strided_slice %370 {offsets = [7, 0], sizes = [1, 512], strides = [1, 1]} : vector<16x512xf32> to vector<1x512xf32>
    %377 = vector.extract_strided_slice %376 {offsets = [0, 511], sizes = [1, 1], strides = [1, 1]} : vector<1x512xf32> to vector<1x1xf32>
    %378 = vector.extract_strided_slice %376 {offsets = [0, 0], sizes = [1, 511], strides = [1, 1]} : vector<1x512xf32> to vector<1x511xf32>
    %379 = tpu.concatenate %377, %378 in 1 : vector<1x1xf32>, vector<1x511xf32> -> vector<1x512xf32>
    %380 = vector.extract_strided_slice %372 {offsets = [7, 0], sizes = [1, 512], strides = [1, 1]} : vector<16x512xf32> to vector<1x512xf32>
    %381 = arith.mulf %380, %379 : vector<1x512xf32>
    %382 = arith.addf %375, %381 : vector<1x512xf32>
    %383 = vector.extract_strided_slice %370 {offsets = [13, 0], sizes = [1, 512], strides = [1, 1]} : vector<16x512xf32> to vector<1x512xf32>
    %384 = vector.extract_strided_slice %383 {offsets = [0, 498], sizes = [1, 14], strides = [1, 1]} : vector<1x512xf32> to vector<1x14xf32>
    %385 = vector.extract_strided_slice %383 {offsets = [0, 0], sizes = [1, 498], strides = [1, 1]} : vector<1x512xf32> to vector<1x498xf32>
    %386 = tpu.concatenate %384, %385 in 1 : vector<1x14xf32>, vector<1x498xf32> -> vector<1x512xf32>
    %387 = vector.extract_strided_slice %372 {offsets = [13, 0], sizes = [1, 512], strides = [1, 1]} : vector<16x512xf32> to vector<1x512xf32>
    %388 = arith.mulf %387, %386 : vector<1x512xf32>
    %389 = arith.addf %382, %388 : vector<1x512xf32>
    %390 = vector.extract_strided_slice %370 {offsets = [15, 0], sizes = [1, 512], strides = [1, 1]} : vector<16x512xf32> to vector<1x512xf32>
    %391 = vector.extract_strided_slice %390 {offsets = [0, 497], sizes = [1, 15], strides = [1, 1]} : vector<1x512xf32> to vector<1x15xf32>
    %392 = vector.extract_strided_slice %390 {offsets = [0, 0], sizes = [1, 497], strides = [1, 1]} : vector<1x512xf32> to vector<1x497xf32>
    %393 = tpu.concatenate %391, %392 in 1 : vector<1x15xf32>, vector<1x497xf32> -> vector<1x512xf32>
    %394 = vector.extract_strided_slice %372 {offsets = [15, 0], sizes = [1, 512], strides = [1, 1]} : vector<16x512xf32> to vector<1x512xf32>
    %395 = arith.mulf %394, %393 : vector<1x512xf32>
    %396 = arith.addf %389, %395 : vector<1x512xf32>
    %cst_197 = arith.constant 0.000000e+00 : f32
    %397 = vector.broadcast %cst_197 : f32 to vector<1x512xf32>
    %398 = arith.subf %397, %396 : vector<1x512xf32>
    %399 = math.exp %398 : vector<1x512xf32>
    %cst_198 = arith.constant 1.000000e+00 : f32
    %400 = vector.broadcast %cst_198 : f32 to vector<1x512xf32>
    %401 = arith.addf %400, %399 : vector<1x512xf32>
    %402 = tpu.reciprocal %401 {approx = true} : vector<1x512xf32> -> vector<1x512xf32>
    %c0_199 = arith.constant 0 : index
    %c0_200 = arith.constant 0 : index
    %403 = vector.load %arg18[%c0_199, %c0_200] : memref<4x512xf32, #tpu.memory_space<vmem>>, vector<1x512xf32>
    tpu.vector_store %arg18[%c0_199, %c0_200], %402 {strides = array<i32>} : memref<4x512xf32, #tpu.memory_space<vmem>>, vector<1x512xf32>,
    %404 = vector.extract_strided_slice %370 {offsets = [4, 0], sizes = [1, 512], strides = [1, 1]} : vector<16x512xf32> to vector<1x512xf32>
    %405 = vector.extract_strided_slice %404 {offsets = [0, 1], sizes = [1, 511], strides = [1, 1]} : vector<1x512xf32> to vector<1x511xf32>
    %406 = vector.extract_strided_slice %404 {offsets = [0, 0], sizes = [1, 1], strides = [1, 1]} : vector<1x512xf32> to vector<1x1xf32>
    %407 = tpu.concatenate %405, %406 in 1 : vector<1x511xf32>, vector<1x1xf32> -> vector<1x512xf32>
    %408 = vector.extract_strided_slice %372 {offsets = [4, 0], sizes = [1, 512], strides = [1, 1]} : vector<16x512xf32> to vector<1x512xf32>
    %409 = arith.mulf %408, %407 : vector<1x512xf32>
    %410 = vector.extract_strided_slice %370 {offsets = [6, 0], sizes = [1, 512], strides = [1, 1]} : vector<16x512xf32> to vector<1x512xf32>
    %411 = vector.extract_strided_slice %372 {offsets = [6, 0], sizes = [1, 512], strides = [1, 1]} : vector<16x512xf32> to vector<1x512xf32>
    %412 = arith.mulf %411, %410 : vector<1x512xf32>
    %413 = arith.addf %409, %412 : vector<1x512xf32>
    %414 = vector.extract_strided_slice %370 {offsets = [12, 0], sizes = [1, 512], strides = [1, 1]} : vector<16x512xf32> to vector<1x512xf32>
    %415 = vector.extract_strided_slice %414 {offsets = [0, 499], sizes = [1, 13], strides = [1, 1]} : vector<1x512xf32> to vector<1x13xf32>
    %416 = vector.extract_strided_slice %414 {offsets = [0, 0], sizes = [1, 499], strides = [1, 1]} : vector<1x512xf32> to vector<1x499xf32>
    %417 = tpu.concatenate %415, %416 in 1 : vector<1x13xf32>, vector<1x499xf32> -> vector<1x512xf32>
    %418 = vector.extract_strided_slice %372 {offsets = [12, 0], sizes = [1, 512], strides = [1, 1]} : vector<16x512xf32> to vector<1x512xf32>
    %419 = arith.mulf %418, %417 : vector<1x512xf32>
    %420 = arith.addf %413, %419 : vector<1x512xf32>
    %421 = vector.extract_strided_slice %370 {offsets = [14, 0], sizes = [1, 512], strides = [1, 1]} : vector<16x512xf32> to vector<1x512xf32>
    %422 = vector.extract_strided_slice %421 {offsets = [0, 498], sizes = [1, 14], strides = [1, 1]} : vector<1x512xf32> to vector<1x14xf32>
    %423 = vector.extract_strided_slice %421 {offsets = [0, 0], sizes = [1, 498], strides = [1, 1]} : vector<1x512xf32> to vector<1x498xf32>
    %424 = tpu.concatenate %422, %423 in 1 : vector<1x14xf32>, vector<1x498xf32> -> vector<1x512xf32>
    %425 = vector.extract_strided_slice %372 {offsets = [14, 0], sizes = [1, 512], strides = [1, 1]} : vector<16x512xf32> to vector<1x512xf32>
    %426 = arith.mulf %425, %424 : vector<1x512xf32>
    %427 = arith.addf %420, %426 : vector<1x512xf32>
    %cst_201 = arith.constant 0.000000e+00 : f32
    %428 = vector.broadcast %cst_201 : f32 to vector<1x512xf32>
    %429 = arith.subf %428, %427 : vector<1x512xf32>
    %430 = math.exp %429 : vector<1x512xf32>
    %cst_202 = arith.constant 1.000000e+00 : f32
    %431 = vector.broadcast %cst_202 : f32 to vector<1x512xf32>
    %432 = arith.addf %431, %430 : vector<1x512xf32>
    %433 = tpu.reciprocal %432 {approx = true} : vector<1x512xf32> -> vector<1x512xf32>
    %c1_203 = arith.constant 1 : index
    %c0_204 = arith.constant 0 : index
    %434 = vector.load %arg18[%c1_203, %c0_204] : memref<4x512xf32, #tpu.memory_space<vmem>>, vector<1x512xf32>
    tpu.vector_store %arg18[%c1_203, %c0_204], %433 {strides = array<i32>} : memref<4x512xf32, #tpu.memory_space<vmem>>, vector<1x512xf32>,
    %435 = vector.extract_strided_slice %370 {offsets = [1, 0], sizes = [1, 512], strides = [1, 1]} : vector<16x512xf32> to vector<1x512xf32>
    %436 = vector.extract_strided_slice %435 {offsets = [0, 14], sizes = [1, 498], strides = [1, 1]} : vector<1x512xf32> to vector<1x498xf32>
    %437 = vector.extract_strided_slice %435 {offsets = [0, 0], sizes = [1, 14], strides = [1, 1]} : vector<1x512xf32> to vector<1x14xf32>
    %438 = tpu.concatenate %436, %437 in 1 : vector<1x498xf32>, vector<1x14xf32> -> vector<1x512xf32>
    %439 = vector.extract_strided_slice %372 {offsets = [1, 0], sizes = [1, 512], strides = [1, 1]} : vector<16x512xf32> to vector<1x512xf32>
    %440 = arith.mulf %439, %438 : vector<1x512xf32>
    %441 = vector.extract_strided_slice %370 {offsets = [3, 0], sizes = [1, 512], strides = [1, 1]} : vector<16x512xf32> to vector<1x512xf32>
    %442 = vector.extract_strided_slice %441 {offsets = [0, 13], sizes = [1, 499], strides = [1, 1]} : vector<1x512xf32> to vector<1x499xf32>
    %443 = vector.extract_strided_slice %441 {offsets = [0, 0], sizes = [1, 13], strides = [1, 1]} : vector<1x512xf32> to vector<1x13xf32>
    %444 = tpu.concatenate %442, %443 in 1 : vector<1x499xf32>, vector<1x13xf32> -> vector<1x512xf32>
    %445 = vector.extract_strided_slice %372 {offsets = [3, 0], sizes = [1, 512], strides = [1, 1]} : vector<16x512xf32> to vector<1x512xf32>
    %446 = arith.mulf %445, %444 : vector<1x512xf32>
    %447 = arith.addf %440, %446 : vector<1x512xf32>
    %448 = vector.extract_strided_slice %370 {offsets = [9, 0], sizes = [1, 512], strides = [1, 1]} : vector<16x512xf32> to vector<1x512xf32>
    %449 = vector.extract_strided_slice %372 {offsets = [9, 0], sizes = [1, 512], strides = [1, 1]} : vector<16x512xf32> to vector<1x512xf32>
    %450 = arith.mulf %449, %448 : vector<1x512xf32>
    %451 = arith.addf %447, %450 : vector<1x512xf32>
    %452 = vector.extract_strided_slice %370 {offsets = [11, 0], sizes = [1, 512], strides = [1, 1]} : vector<16x512xf32> to vector<1x512xf32>
    %453 = vector.extract_strided_slice %452 {offsets = [0, 511], sizes = [1, 1], strides = [1, 1]} : vector<1x512xf32> to vector<1x1xf32>
    %454 = vector.extract_strided_slice %452 {offsets = [0, 0], sizes = [1, 511], strides = [1, 1]} : vector<1x512xf32> to vector<1x511xf32>
    %455 = tpu.concatenate %453, %454 in 1 : vector<1x1xf32>, vector<1x511xf32> -> vector<1x512xf32>
    %456 = vector.extract_strided_slice %372 {offsets = [11, 0], sizes = [1, 512], strides = [1, 1]} : vector<16x512xf32> to vector<1x512xf32>
    %457 = arith.mulf %456, %455 : vector<1x512xf32>
    %458 = arith.addf %451, %457 : vector<1x512xf32>
    %cst_205 = arith.constant 0.000000e+00 : f32
    %459 = vector.broadcast %cst_205 : f32 to vector<1x512xf32>
    %460 = arith.subf %459, %458 : vector<1x512xf32>
    %461 = math.exp %460 : vector<1x512xf32>
    %cst_206 = arith.constant 1.000000e+00 : f32
    %462 = vector.broadcast %cst_206 : f32 to vector<1x512xf32>
    %463 = arith.addf %462, %461 : vector<1x512xf32>
    %464 = tpu.reciprocal %463 {approx = true} : vector<1x512xf32> -> vector<1x512xf32>
    %c2_207 = arith.constant 2 : index
    %c0_208 = arith.constant 0 : index
    %465 = vector.load %arg18[%c2_207, %c0_208] : memref<4x512xf32, #tpu.memory_space<vmem>>, vector<1x512xf32>
    tpu.vector_store %arg18[%c2_207, %c0_208], %464 {strides = array<i32>} : memref<4x512xf32, #tpu.memory_space<vmem>>, vector<1x512xf32>,
    %466 = vector.extract_strided_slice %370 {offsets = [0, 0], sizes = [1, 512], strides = [1, 1]} : vector<16x512xf32> to vector<1x512xf32>
    %467 = vector.extract_strided_slice %466 {offsets = [0, 15], sizes = [1, 497], strides = [1, 1]} : vector<1x512xf32> to vector<1x497xf32>
    %468 = vector.extract_strided_slice %466 {offsets = [0, 0], sizes = [1, 15], strides = [1, 1]} : vector<1x512xf32> to vector<1x15xf32>
    %469 = tpu.concatenate %467, %468 in 1 : vector<1x497xf32>, vector<1x15xf32> -> vector<1x512xf32>
    %470 = vector.extract_strided_slice %372 {offsets = [0, 0], sizes = [1, 512], strides = [1, 1]} : vector<16x512xf32> to vector<1x512xf32>
    %471 = arith.mulf %470, %469 : vector<1x512xf32>
    %472 = vector.extract_strided_slice %370 {offsets = [2, 0], sizes = [1, 512], strides = [1, 1]} : vector<16x512xf32> to vector<1x512xf32>
    %473 = vector.extract_strided_slice %472 {offsets = [0, 14], sizes = [1, 498], strides = [1, 1]} : vector<1x512xf32> to vector<1x498xf32>
    %474 = vector.extract_strided_slice %472 {offsets = [0, 0], sizes = [1, 14], strides = [1, 1]} : vector<1x512xf32> to vector<1x14xf32>
    %475 = tpu.concatenate %473, %474 in 1 : vector<1x498xf32>, vector<1x14xf32> -> vector<1x512xf32>
    %476 = vector.extract_strided_slice %372 {offsets = [2, 0], sizes = [1, 512], strides = [1, 1]} : vector<16x512xf32> to vector<1x512xf32>
    %477 = arith.mulf %476, %475 : vector<1x512xf32>
    %478 = arith.addf %471, %477 : vector<1x512xf32>
    %479 = vector.extract_strided_slice %370 {offsets = [8, 0], sizes = [1, 512], strides = [1, 1]} : vector<16x512xf32> to vector<1x512xf32>
    %480 = vector.extract_strided_slice %479 {offsets = [0, 1], sizes = [1, 511], strides = [1, 1]} : vector<1x512xf32> to vector<1x511xf32>
    %481 = vector.extract_strided_slice %479 {offsets = [0, 0], sizes = [1, 1], strides = [1, 1]} : vector<1x512xf32> to vector<1x1xf32>
    %482 = tpu.concatenate %480, %481 in 1 : vector<1x511xf32>, vector<1x1xf32> -> vector<1x512xf32>
    %483 = vector.extract_strided_slice %372 {offsets = [8, 0], sizes = [1, 512], strides = [1, 1]} : vector<16x512xf32> to vector<1x512xf32>
    %484 = arith.mulf %483, %482 : vector<1x512xf32>
    %485 = arith.addf %478, %484 : vector<1x512xf32>
    %486 = vector.extract_strided_slice %370 {offsets = [10, 0], sizes = [1, 512], strides = [1, 1]} : vector<16x512xf32> to vector<1x512xf32>
    %487 = vector.extract_strided_slice %372 {offsets = [10, 0], sizes = [1, 512], strides = [1, 1]} : vector<16x512xf32> to vector<1x512xf32>
    %488 = arith.mulf %487, %486 : vector<1x512xf32>
    %489 = arith.addf %485, %488 : vector<1x512xf32>
    %cst_209 = arith.constant 0.000000e+00 : f32
    %490 = vector.broadcast %cst_209 : f32 to vector<1x512xf32>
    %491 = arith.subf %490, %489 : vector<1x512xf32>
    %492 = math.exp %491 : vector<1x512xf32>
    %cst_210 = arith.constant 1.000000e+00 : f32
    %493 = vector.broadcast %cst_210 : f32 to vector<1x512xf32>
    %494 = arith.addf %493, %492 : vector<1x512xf32>
    %495 = tpu.reciprocal %494 {approx = true} : vector<1x512xf32> -> vector<1x512xf32>
    %c3_211 = arith.constant 3 : index
    %c0_212 = arith.constant 0 : index
    %496 = vector.load %arg18[%c3_211, %c0_212] : memref<4x512xf32, #tpu.memory_space<vmem>>, vector<1x512xf32>
    tpu.vector_store %arg18[%c3_211, %c0_212], %495 {strides = array<i32>} : memref<4x512xf32, #tpu.memory_space<vmem>>, vector<1x512xf32>,
    return
  }
}

</mosaic_0001>

<bundles_post_ra>
// kernel: tpu_custom_call.1
= control target key start
LH: loop header
LB: loop body
LE: loop exit
PB: predicated region body
PF: predicated region fallthrough
CT: control target
= control target key end

     0   :  { %s13126_s0 = inlined_call_operand.vmem [shape: f32[2,32], index: 0, kind: input, shape index: {}]   ;;  %s13127_s1 = inlined_call_operand.vmem [shape: f32[32,512], index: 1, kind: input, shape index: {}]   ;;  %s13128_s2 = inlined_call_operand.vmem [shape: f32[1,512], index: 2, kind: input, shape index: {}]   ;;  %s13129_s3 = inlined_call_operand.vmem [shape: f32[1,512], index: 3, kind: input, shape index: {}]   ;;  %s13130_s4 = inlined_call_operand.vmem [shape: f32[1,512], index: 4, kind: input, shape index: {}]   ;;  %s13131_s5 = inlined_call_operand.hbm [shape: bf16[1024,512], index: 5, kind: input, shape index: {}]   ;;  %s13132_s6 = inlined_call_operand.vmem [shape: f32[64,1], index: 6, kind: input, shape index: {}]   ;;  %s13133_s7 = inlined_call_operand.vmem [shape: f32[64,1], index: 7, kind: input, shape index: {}]   ;;  %s13134_s8 = inlined_call_operand.vmem [shape: bf16[288,64], index: 8, kind: input, shape index: {}]   ;;  %s13135_s9 = inlined_call_operand.vmem [shape: bf16[144,128], index: 9, kind: input, shape index: {}]   ;;  %s13136_s10 = inlined_call_operand.vmem [shape: f32[32,1], index: 10, kind: input, shape index: {}]   ;;  %s13137_s11 = inlined_call_operand.vmem [shape: f32[32,1], index: 11, kind: input, shape index: {}]   ;;  %s13138_s12 = inlined_call_operand.vmem [shape: bf16[256,32], index: 12, kind: input, shape index: {}]   ;;  %s13139_s13 = inlined_call_operand.hbm [shape: bf16[784,256], index: 13, kind: input, shape index: {}]   ;;  %s13140_s14 = inlined_call_operand.vmem [shape: f32[16,1], index: 14, kind: input, shape index: {}]   ;;  %s13141_s15 = inlined_call_operand.vmem [shape: f32[16,1], index: 15, kind: input, shape index: {}]   ;;  %s13142_s16 = inlined_call_operand.vmem [shape: bf16[16,16], index: 16, kind: input, shape index: {}]   ;;  %s13143_s17 = inlined_call_operand.vmem [shape: f32[16,256], index: 17, kind: input, shape index: {}]   ;;  %s13144_s18 = inlined_call_operand.hbm [shape: f32[4,512], index: 18, kind: output, shape index: {}]  }
   0x1   :  { %13156 = sst [smem:[#allocation82_spill]] %s13126_s0 }
   0x2   :  { %13157 = sst [smem:[#allocation83_spill]] %s13127_s1 }
   0x3   :  { %13158 = sst [smem:[#allocation84_spill]] %s13128_s2 }
   0x4   :  { %23 = vsyncpa [#allocation8], 0 }
   0x5   :  { %24 = vsyncpa [#allocation11], 0 }
   0x6   :  { %25 = vsyncpa [#allocation9], 0  ;;  %s40_s29 = sshll.u32 %s13131_s5, 4  ;;  %s10599_s30 = smov [#allocation7]   ;;  %s41_s29 = int_to_ptr.hbm [resolvable:$true] %s40_s29 }
   0x7   :  { %s42_s0 = sshll.u32 %s10599_s30, 4  ;;  %s67_s20 = sshll.u32 %s13139_s13, 4  ;;  %s43_s0 = int_to_ptr.vmem [resolvable:$true] %s42_s0  ;;  %s68_s20 = int_to_ptr.hbm [resolvable:$true] %s67_s20 }
   0x8   :  { %s10600_s21 = smov 256   ;;  %s10601_s22 = smov 16  }
   0x9   :  { %48 = dma.hbm_to_vmem [thread:$0]  %s41_s29, 32768, %s43_s0, [#allocation8], %s10600_s21, %s10600_s21, %s10601_s22  }
   0xa   :  { %s10602_s2 = smov [#allocation10]   ;;  %s10603_s24 = smov 128  }
   0xb   :  { %s69_s23 = sshll.u32 %s10602_s2, 4  ;;  %s10604_s25 = smov 8   ;;  %s70_s23 = int_to_ptr.vmem [resolvable:$true] %s69_s23 }
   0xc   :  { %75 = dma.hbm_to_vmem [thread:$0]  %s68_s20, 12544, %s70_s23, [#allocation11], %s10603_s24, %s10603_s24, %s10604_s25  }
   0xd   :  { %10593 = dma.done.wait [#allocation8], 32768  }
   0xe   :  { %10594 = vsyncadd [#allocation8], 4294934528 }
   0xf   :  { %10595 = dma.done.wait [#allocation11], 12544  }
  0x10   :  { %10596 = vsyncadd [#allocation11], 4294954752  ;;  %s13159_s27 = sld [smem:[#allocation83_spill]]  ;;  %vm13150_vm0 = vcmask 261120   ;;  %vm13146_vm1 = vcmask 1041408   ;;  %vm13148_vm12 = vcmask 1040384  }
  0x11   :  { %s13160_s29 = sld [smem:[#allocation82_spill]]  ;;  %vm13147_vm14 = vcmask 1042434   ;;  %s10607_s24 = smov 17  }
  0x12   :  { %s13161_s20 = sld [smem:[#allocation84_spill]]  ;;  %s10608_s5 = smov 2  }
  0x13   :  { %s10609_s26 = smov 18   ;;  %s10610_s13 = smov 3  }
  0x14   :  { %s10611_s28 = smov 19   ;;  %s10613_s30 = smov 5  }
  0x15   :  { %s10614_s0 = smov 20   ;;  %s10615_s19 = smov 6  }
  0x16   :  { %v106_v0 = vld [vmem:[%s13159_s27 + $0x60] sm:$0xff]  ;;  %v107_v1 = vld [vmem:[%s13159_s27 + $0x68] sm:$0xff]  ;;  %v108_v9 = vld [vmem:[%s13159_s27 + $0x70] sm:$0xff]  ;;  %s10616_s1 = smov 21   ;;  %s10619_s21 = smov 23  }
  0x17   :  { %v102_v2 = vld [vmem:[%s13159_s27 + $0x40] sm:$0xff]  ;;  %136 = vmatpush.msra.mxu2 %v106_v0  ;;  %156 = vmatpush.msra.mxu3 %v107_v1  ;;  %v103_v3 = vld [vmem:[%s13159_s27 + $0x48] sm:$0xff]  ;;  %v109_v10 = vld [vmem:[%s13159_s27 + $0x78] sm:$0xff]  ;;  %s10620_s2 = smov 24   ;;  %s10621_s23 = smov 9  }
  0x18   :  { %v98_v4 = vld [vmem:[%s13159_s27 + $0x20] sm:$0xff]  ;;  %v99_v5 = vld [vmem:[%s13159_s27 + $0x28] sm:$0xff]  ;;  %v104_v11 = vld [vmem:[%s13159_s27 + $0x50] sm:$0xff] }
  0x19   :  { %137 = vmatpush.msra.mxu2 %v102_v2  ;;  %157 = vmatpush.msra.mxu3 %v103_v3  ;;  %v94_v6 = vld [vmem:[%s13159_s27] sm:$0xff]  ;;  %v95_v7 = vld [vmem:[%s13159_s27 + $0x8] sm:$0xff]  ;;  %v105_v12 = vld [vmem:[%s13159_s27 + $0x58] sm:$0xff] }
  0x1a   :  { %v93_v8 = vld [vmem:[%s13160_s29] sm:$0x3]  ;;  %v100_v13 = vld [vmem:[%s13159_s27 + $0x30] sm:$0xff]  ;;  %v101_v14 = vld [vmem:[%s13159_s27 + $0x38] sm:$0xff]  ;;  %s10612_s29 = smov 4  }
  0x1b   :  { %138 = vmatpush.msra.mxu2 %v98_v4  ;;  %158 = vmatpush.msra.mxu3 %v99_v5  ;;  %v96_v15 = vld [vmem:[%s13159_s27 + $0x10] sm:$0xff]  ;;  %v97_v16 = vld [vmem:[%s13159_s27 + $0x18] sm:$0xff]  ;;  %v110_v17 = vld [vmem:[%s13161_s20] sm:$0xf]  ;;  %s10617_s20 = smov 22   ;;  %s10618_s27 = smov 7  }
  0x1c   :  { %v112_v18 = vperm.slane %v110_v17, 0  ;;  %v113_v19 = vperm.slane %v110_v17, 1  ;;  %v114_v32 = vperm.slane %v110_v17, 2  ;;  %v115_v33 = vperm.slane %v110_v17, 3 }
  0x1d   :  { %139 = vmatpush.msra.mxu2 %v94_v6  ;;  %159 = vmatpush.msra.mxu3 %v95_v7 }
  0x1e   :  { %8194 = vmatmul.msk.f32.vlgmr.msra.gmra.mxu2 %vm13150_vm0, %v93_v8  ;;  %8195 = vmatmul.msk.f32.vlgmr.msra.gmra.mxu3 %vm13150_vm0, %v93_v8 }
  0x1f   :  { %176 = vmatpush.msrb.mxu2 %v108_v9  ;;  %196 = vmatpush.msrb.mxu3 %v109_v10 }
  0x21   :  { %177 = vmatpush.msrb.mxu2 %v104_v11  ;;  %197 = vmatpush.msrb.mxu3 %v105_v12 }
  0x23   :  { %178 = vmatpush.msrb.mxu2 %v100_v13  ;;  %198 = vmatpush.msrb.mxu3 %v101_v14 }
  0x25   :  { %179 = vmatpush.msrb.mxu2 %v96_v15  ;;  %199 = vmatpush.msrb.mxu3 %v97_v16 }
  0x26   :  { %8196 = vmatmul.msk.f32.vlgmr.msrb.gmra.mxu2 %vm13150_vm0, %v93_v8  ;;  %8197 = vmatmul.msk.f32.vlgmr.msrb.gmra.mxu3 %vm13150_vm0, %v93_v8  ;;  %vm13153_vm0 = vcmask 253168  }
  0xa1   :  { %v141_v20 = vpop.f32.mrf.mxu2  ;;  %v161_v21 = vpop.f32.mrf.mxu3 }
  0xa2   :  { %v10818_v22 = vadd.f32 %v141_v20, %v112_v18  ;;  %v10820_v23 = vadd.f32 %v161_v21, %v113_v19 }
  0xa4   :  { %v205_v24 = vsel %vm13146_vm1, %v10818_v22, 0.0  ;;  %v237_v25 = vmul.f32 %v10818_v22, %v10818_v22  ;;  %v212_v26 = vsel %vm13146_vm1, %v10820_v23, 0.0  ;;  %v238_v27 = vmul.f32 %v10820_v23, %v10820_v23 }
  0xa5   :  { %v206_v28 = vrot.slane %v205_v24, 4  ;;  %v213_v29 = vrot.slane %v212_v26, 4 }
  0xa6   :  { %v241_v30 = vsel %vm13146_vm1, %v237_v25, 0.0  ;;  %v248_v31 = vsel %vm13146_vm1, %v238_v27, 0.0 }
  0xa7   :  { %v207_v34 = vadd.f32 %v206_v28, %v205_v24  ;;  %v242_v35 = vrot.slane %v241_v30, 4  ;;  %v214_v36 = vadd.f32 %v213_v29, %v212_v26  ;;  %v249_v37 = vrot.slane %v248_v31, 4 }
  0xa9   :  { %v208_v38 = vrot.slane %v207_v34, 2  ;;  %v243_v39 = vadd.f32 %v242_v35, %v241_v30  ;;  %v215_v40 = vrot.slane %v214_v36, 2  ;;  %v250_v41 = vadd.f32 %v249_v37, %v248_v31  ;;  %v181_v42 = vpop.f32.mrf.mxu2  ;;  %v201_v43 = vpop.f32.mrf.mxu3 }
  0xaa   :  { %v10832_v44 = vadd.f32 %v181_v42, %v114_v32  ;;  %v10834_v45 = vadd.f32 %v201_v43, %v115_v33 }
  0xab   :  { %v209_v46 = vadd.f32 %v208_v38, %v207_v34  ;;  %v244_v47 = vrot.slane %v243_v39, 2  ;;  %v216_v48 = vadd.f32 %v215_v40, %v214_v36  ;;  %v251_v49 = vrot.slane %v250_v41, 2 }
  0xac   :  { %v219_v50 = vsel %vm13146_vm1, %v10832_v44, 0.0  ;;  %v239_v51 = vmul.f32 %v10832_v44, %v10832_v44  ;;  %v226_v52 = vsel %vm13146_vm1, %v10834_v45, 0.0  ;;  %v240_v53 = vmul.f32 %v10834_v45, %v10834_v45 }
  0xad   :  { %v245_v54 = vadd.f32 %v244_v47, %v243_v39  ;;  %v217_v55 = vrot.slane %v216_v48, 1  ;;  %v252_v56 = vadd.f32 %v251_v49, %v250_v41  ;;  %v220_v57 = vrot.slane %v219_v50, 4 }
  0xae   :  { %v255_v58 = vsel %vm13146_vm1, %v239_v51, 0.0  ;;  %v227_v59 = vrot.slane %v226_v52, 4  ;;  %v262_v60 = vsel %vm13146_vm1, %v240_v53, 0.0  ;;  %v210_v61 = vrot.slane %v209_v46, 1 }
  0xaf   :  { %v246_v62 = vrot.slane %v245_v54, 1  ;;  %v218_v63 = vadd.f32 %v217_v55, %v216_v48  ;;  %v253_v0 = vrot.slane %v252_v56, 1  ;;  %v221_v1 = vadd.f32 %v220_v57, %v219_v50 }
  0xb0   :  { %v256_v2 = vrot.slane %v255_v58, 4  ;;  %v228_v3 = vadd.f32 %v227_v59, %v226_v52  ;;  %v263_v4 = vrot.slane %v262_v60, 4  ;;  %v211_v5 = vadd.f32 %v210_v61, %v209_v46 }
  0xb1   :  { %v247_v6 = vadd.f32 %v246_v62, %v245_v54  ;;  %v10846_v7 = vmul.f32 0.5, %v218_v63  ;;  %v254_v8 = vadd.f32 %v253_v0, %v252_v56  ;;  %v222_v9 = vrot.slane %v221_v1, 2 }
  0xb2   :  { %v257_v10 = vadd.f32 %v256_v2, %v255_v58  ;;  %v229_v11 = vrot.slane %v228_v3, 2  ;;  %v264_v12 = vadd.f32 %v263_v4, %v262_v60  ;;  %v10848_v13 = vmul.f32 0.5, %v211_v5 }
  0xb3   :  { %v269_v14 = vmul.f32 0.5, %v247_v6  ;;  %v270_v15 = vmul.f32 0.5, %v254_v8  ;;  %v274_v16 = vmul.f32 %v10846_v7, %v10846_v7  ;;  %v223_v17 = vadd.f32 %v222_v9, %v221_v1 }
  0xb4   :  { %v258_v18 = vrot.slane %v257_v10, 2  ;;  %v230_v19 = vadd.f32 %v229_v11, %v228_v3  ;;  %v265_v20 = vrot.slane %v264_v12, 2  ;;  %v273_v21 = vmul.f32 %v10848_v13, %v10848_v13 }
  0xb5   :  { %v278_v24 = vsub.f32 %v270_v15, %v274_v16  ;;  %v224_v25 = vrot.slane %v223_v17, 1 }
  0xb6   :  { %v259_v26 = vadd.f32 %v258_v18, %v257_v10  ;;  %v231_v27 = vrot.slane %v230_v19, 1  ;;  %v266_v28 = vadd.f32 %v265_v20, %v264_v12  ;;  %v277_v29 = vsub.f32 %v269_v14, %v273_v21 }
  0xb7   :  { %v282_v30 = vmax.f32 %v278_v24, 0.0  ;;  %v225_v31 = vadd.f32 %v224_v25, %v223_v17  ;;  %v289_v24 = vld [vmem:[%s13129_s3] sm:$0xf]  ;;  %s10605_s3 = smov 15  }
  0xb8   :  { %v260_v32 = vrot.slane %v259_v26, 1  ;;  %v232_v33 = vadd.f32 %v231_v27, %v230_v19  ;;  %v267_v34 = vrot.slane %v266_v28, 1  ;;  %v281_v35 = vmax.f32 %v277_v29, 0.0 }
  0xb9   :  { %v291_v36 = vadd.f32 1e-05, %v282_v30  ;;  %v10854_v37 = vmul.f32 0.5, %v225_v31  ;;  %v285_v29 = vsub.f32 %v10818_v22, %v10848_v13 }
  0xba   :  { %v261_v38 = vadd.f32 %v260_v32, %v259_v26  ;;  %v10856_v39 = vmul.f32 0.5, %v232_v33  ;;  %v268_v40 = vadd.f32 %v267_v34, %v266_v28  ;;  %v290_v41 = vadd.f32 1e-05, %v281_v35  ;;  %v361_v28 = vld [vmem:[%s13130_s4] sm:$0xf]  ;;  %s10606_s4 = smov 1  }
  0xbb   :  { %10421 = vrsqrt.f32 %v291_v36  ;;  %v275_v42 = vmul.f32 %v10854_v37, %v10854_v37  ;;  %vm310_vm3 = vweird.f32 %v291_v36  ;;  %v287_v31 = vsub.f32 %v10832_v44, %v10854_v37 }
  0xbc   :  { %v271_v43 = vmul.f32 0.5, %v261_v38  ;;  %v272_v46 = vmul.f32 0.5, %v268_v40  ;;  %v276_v47 = vmul.f32 %v10856_v39, %v10856_v39  ;;  %10423 = vrsqrt.f32 %v290_v41 }
  0xbd   :  { %vm300_vm13 = vweird.f32 %v290_v41  ;;  %v288_v32 = vsub.f32 %v10834_v45, %v10856_v39  ;;  %v286_v34 = vsub.f32 %v10820_v23, %v10846_v7  ;;  %v363_v35 = vperm.slane %v361_v28, 0 }
  0xbe   :  { %v279_v48 = vsub.f32 %v271_v43, %v275_v42  ;;  %v280_v49 = vsub.f32 %v272_v46, %v276_v47  ;;  %v365_v38 = vperm.slane %v361_v28, 2  ;;  %v366_v40 = vperm.slane %v361_v28, 3 }
  0xc0   :  { %v283_v50 = vmax.f32 %v279_v48, 0.0  ;;  %v284_v51 = vmax.f32 %v280_v49, 0.0 }
  0xc1   :  { %v10422_v52 = vpop.eup %10421 }
  0xc2   :  { %v305_v53 = vmul.f32 %v10422_v52, %v291_v36  ;;  %v292_v54 = vadd.f32 1e-05, %v283_v50  ;;  %v293_v55 = vadd.f32 1e-05, %v284_v51  ;;  %v10424_v56 = vpop.eup %10423  ;;  %vm311_vm2 = vweird.f32 %v10422_v52 }
  0xc3   :  { %v295_v58 = vmul.f32 %v10424_v56, %v290_v41  ;;  %vm312_vm4 = vmor %vm310_vm3, %vm311_vm2  ;;  %vm301_vm10 = vweird.f32 %v10424_v56  ;;  %v364_v36 = vperm.slane %v361_v28, 1  ;;  %vm13149_vm2 = vcmask 7168  }
  0xc4   :  { %v306_v57 = vmul.f32 %v10422_v52, %v305_v53  ;;  %10425 = vrsqrt.f32 %v292_v54  ;;  %vm320_vm7 = vweird.f32 %v292_v54  ;;  %vm330_vm9 = vweird.f32 %v293_v55  ;;  %vm302_vm15 = vmor %vm300_vm13, %vm301_vm10 }
  0xc5   :  { %10427 = vrsqrt.f32 %v293_v55  ;;  %v296_v60 = vmul.f32 %v10424_v56, %v295_v58  ;;  %v8202_v58 = vld [vmem:[#allocation7 + $0x10] sm:$0xf0]  ;;  %vm3276_vm3 = vcmask 15368   ;;  %vm3563_vm10 = vcmask 72768  }
  0xc6   :  { %v307_v59 = vmul.f32 0.5, %v306_v57  ;;  %v9940_v57 = vld [vmem:[#allocation7 + $0x4] sm:$0xf]  ;;  %vm3645_vm13 = vcmask 89168  }
  0xc7   :  { %v297_v2 = vmul.f32 0.5, %v296_v60  ;;  %v9943_v60 = vld [vmem:[#allocation7 + $0x14] sm:$0xf0] }
  0xc8   :  { %v308_v62 = vsub.f32 1.5, %v307_v59  ;;  %v8208_v59 = vld [vmem:[#allocation7 + $0x8] sm:$0xf] }
  0xc9   :  { %v298_v9 = vsub.f32 1.5, %v297_v2 }
  0xca   :  { %v10426_v61 = vpop.eup %10425  ;;  %v309_v4 = vmul.f32 %v10422_v52, %v308_v62  ;;  %v8210_v62 = vld [vmem:[#allocation7 + $0x18] sm:$0xf0] }
  0xcb   :  { %v10428_v63 = vpop.eup %10427  ;;  %v315_v0 = vmul.f32 %v10426_v61, %v292_v54  ;;  %vm321_vm5 = vweird.f32 %v10426_v61  ;;  %v299_v16 = vmul.f32 %v10424_v56, %v298_v9  ;;  %v9947_v9 = vld [vmem:[#allocation7 + $0x34] sm:$0xf0] }
  0xcc   :  { %v325_v1 = vmul.f32 %v10428_v63, %v293_v55  ;;  %vm331_vm6 = vweird.f32 %v10428_v63  ;;  %v313_v12 = vsel %vm312_vm4, %v10422_v52, %v309_v4  ;;  %vm322_vm8 = vmor %vm320_vm7, %vm321_vm5  ;;  %v8200_v55 = vld [vmem:[#allocation7] sm:$0xf]  ;;  %v9946_v4 = vld [vmem:[#allocation7 + $0x2c] sm:$0xf0]  ;;  %vm3317_vm4 = vcmask 23568  }
  0xcd   :  { %v316_v3 = vmul.f32 %v10426_v61, %v315_v0  ;;  %vm332_vm11 = vmor %vm330_vm9, %vm331_vm6  ;;  %v338_v18 = vrot.slane %v313_v12, 7  ;;  %v303_v25 = vsel %vm302_vm15, %v10424_v56, %v299_v16  ;;  %v9942_v56 = vld [vmem:[#allocation7 + $0xc] sm:$0xf0]  ;;  %v8205_v0 = vor.u32 %v9940_v57, %v8202_v58  ;;  %v9961_v57 = vld [vmem:[#allocation7 + $0xac] sm:$0xf] }
  0xce   :  { %v326_v5 = vmul.f32 %v10428_v63, %v325_v1  ;;  %v8209_v1 = vor.u32 %v9943_v60, %v8208_v59  ;;  %v8290_v58 = vld [vmem:[#allocation7 + $0xb8] sm:$0xf0]  ;;  %vm3358_vm5 = vcmask 31768   ;;  %vm3399_vm6 = vcmask 39968  }
  0xcf   :  { %v317_v6 = vmul.f32 0.5, %v316_v3  ;;  %v342_v26 = vsel %vm13148_vm12, %v303_v25, %v338_v18  ;;  %v8216_v3 = vld [vmem:[#allocation7 + $0x20] sm:$0xf]  ;;  %v9950_v18 = vld [vmem:[#allocation7 + $0x4c] sm:$0xf0]  ;;  %vm3440_vm7 = vcmask 48168  }
  0xd0   :  { %v327_v8 = vmul.f32 0.5, %v326_v5  ;;  %v9944_v5 = vld [vmem:[#allocation7 + $0x24] sm:$0xf]  ;;  %v8217_v12 = vor.u32 %v9946_v4, %v8216_v3  ;;  %v9949_v25 = vld [vmem:[#allocation7 + $0x4c] sm:$0xf]  ;;  %vm3522_vm9 = vcmask 64568  }
  0xd1   :  { %v318_v10 = vsub.f32 1.5, %v317_v6  ;;  %v8218_v6 = vld [vmem:[#allocation7 + $0x30] sm:$0xf0]  ;;  %v8304_v3 = vld [vmem:[#allocation7 + $0xc8] sm:$0xf]  ;;  %vm3686_vm15 = vcmask 97368  }
  0xd2   :  { %v328_v11 = vsub.f32 1.5, %v327_v8  ;;  %v8224_v8 = vld [vmem:[#allocation7 + $0x28] sm:$0xf]  ;;  %v9967_v4 = vld [vmem:[#allocation7 + $0xd4] sm:$0xf0]  ;;  %vm4254_vm12 = vcmask 228568  }
  0xd3   :  { %v319_v14 = vmul.f32 %v10426_v61, %v318_v10  ;;  %v9945_v10 = vld [vmem:[#allocation7 + $0x2c] sm:$0xf] }
  0xd4   :  { %v329_v15 = vmul.f32 %v10428_v63, %v328_v11  ;;  %v8226_v11 = vld [vmem:[#allocation7 + $0x38] sm:$0xf0] }
  0xd5   :  { %v323_v17 = vsel %vm322_vm8, %v10426_v61, %v319_v14  ;;  %v9941_v61 = vld [vmem:[#allocation7 + $0xc] sm:$0xf]  ;;  %v8221_v14 = vor.u32 %v9944_v5, %v8218_v6  ;;  %v8229_v16 = vor.u32 %v9945_v10, %v8226_v11  ;;  %v8306_v6 = vld [vmem:[#allocation7 + $0xd8] sm:$0xf0]  ;;  %v8305_v10 = vor.u32 %v9967_v4, %v8304_v3 }
  0xd6   :  { %v333_v19 = vsel %vm332_vm11, %v10428_v63, %v329_v15  ;;  %v339_v20 = vrot.slane %v323_v17, 6  ;;  %v8201_v63 = vor.u32 %v9942_v56, %v8200_v55  ;;  %v8213_v2 = vor.u32 %v9941_v61, %v8210_v62  ;;  %v8232_v17 = vld [vmem:[#allocation7 + $0x40] sm:$0xf]  ;;  %v8288_v55 = vld [vmem:[#allocation7 + $0xa8] sm:$0xf] }
  0xd7   :  { %v340_v21 = vrot.slane %v333_v19, 5  ;;  %v8225_v15 = vor.u32 %v9947_v9, %v8224_v8  ;;  %v9948_v19 = vld [vmem:[#allocation7 + $0x44] sm:$0xf]  ;;  %v9963_v56 = vld [vmem:[#allocation7 + $0xb4] sm:$0xf0]  ;;  %v8293_v62 = vor.u32 %v9961_v57, %v8290_v58  ;;  %vm3481_vm8 = vcmask 56368  }
  0xd8   :  { %v8289_v61 = vor.u32 %v9963_v56, %v8288_v55  ;;  %v9965_v5 = vld [vmem:[#allocation7 + $0xcc] sm:$0xf]  ;;  %vm3604_vm11 = vcmask 80968  }
  0xd9   :  { %v344_v27 = vsel %vm13147_vm14, %v339_v20, %v340_v21  ;;  %v8234_v20 = vld [vmem:[#allocation7 + $0x50] sm:$0xf0]  ;;  %v8240_v21 = vld [vmem:[#allocation7 + $0x48] sm:$0xf]  ;;  %v8309_v11 = vor.u32 %v9965_v5, %v8306_v6  ;;  %v8360_v6 = vld [vmem:[#allocation7 + $0x140] sm:$0xf] }
  0xda   :  { %v345_v30 = vsel %vm13146_vm1, %v342_v26, %v344_v27  ;;  %v8242_v26 = vld [vmem:[#allocation7 + $0x58] sm:$0xf0]  ;;  %v8233_v27 = vor.u32 %v9950_v18, %v8232_v17  ;;  %v8237_v28 = vor.u32 %v9948_v19, %v8234_v20  ;;  %v8320_v17 = vld [vmem:[#allocation7 + $0xe8] sm:$0xf]  ;;  %v9971_v18 = vld [vmem:[#allocation7 + $0xf4] sm:$0xf0] }
  0xdb   :  { %v347_v33 = vmul.f32 %v345_v30, %v289_v24  ;;  %v9951_v24 = vld [vmem:[#allocation7 + $0x54] sm:$0xf0]  ;;  %v8245_v30 = vor.u32 %v9949_v25, %v8242_v26  ;;  %v9969_v19 = vld [vmem:[#allocation7 + $0xec] sm:$0xf]  ;;  %v8322_v20 = vld [vmem:[#allocation7 + $0xf8] sm:$0xf0]  ;;  %v8321_v25 = vor.u32 %v9971_v18, %v8320_v17 }
  0xdc   :  { %v8325_v26 = vor.u32 %v9969_v19, %v8322_v20  ;;  %vm4188_vm1 = vcmask 212168   ;;  %vm4221_vm14 = vcmask 220368  }
  0xdd   :  { %v349_v41 = vperm.slane %v347_v33, 0  ;;  %v350_v42 = vperm.slane %v347_v33, 1  ;;  %v351_v43 = vperm.slane %v347_v33, 2  ;;  %v352_v22 = vperm.slane %v347_v33, 3  ;;  %v9952_v33 = vld [vmem:[#allocation7 + $0x64] sm:$0xf] }
  0xdf   :  { %v357_v13 = vmul.f32 %v349_v41, %v285_v29  ;;  %v358_v46 = vmul.f32 %v350_v42, %v286_v34  ;;  %v359_v47 = vmul.f32 %v351_v43, %v287_v31  ;;  %v360_v48 = vmul.f32 %v352_v22, %v288_v32  ;;  %v8248_v31 = vld [vmem:[#allocation7 + $0x60] sm:$0xf]  ;;  %v9954_v32 = vld [vmem:[#allocation7 + $0x6c] sm:$0xf0]  ;;  %v8250_v34 = vld [vmem:[#allocation7 + $0x70] sm:$0xf0] }
  0xe0   :  { %v8241_v29 = vor.u32 %v9951_v24, %v8240_v21  ;;  %v8249_v41 = vor.u32 %v9954_v32, %v8248_v31  ;;  %v8253_v42 = vor.u32 %v9952_v33, %v8250_v34  ;;  %v8336_v31 = vld [vmem:[#allocation7 + $0x108] sm:$0xf]  ;;  %v9975_v32 = vld [vmem:[#allocation7 + $0x114] sm:$0xf0]  ;;  %v9973_v33 = vld [vmem:[#allocation7 + $0x10c] sm:$0xf] }
  0xe1   :  { %v371_v44 = vadd.f32 %v363_v35, %v357_v13  ;;  %v372_v37 = vadd.f32 %v364_v36, %v358_v46  ;;  %v373_v49 = vadd.f32 %v365_v38, %v359_v47  ;;  %v374_v45 = vadd.f32 %v366_v40, %v360_v48  ;;  %v8256_v35 = vld [vmem:[#allocation7 + $0x68] sm:$0xf]  ;;  %v9955_v36 = vld [vmem:[#allocation7 + $0x74] sm:$0xf0]  ;;  %v9953_v38 = vld [vmem:[#allocation7 + $0x6c] sm:$0xf] }
  0xe2   :  { %v8258_v40 = vld [vmem:[#allocation7 + $0x78] sm:$0xf0]  ;;  %v8257_v43 = vor.u32 %v9955_v36, %v8256_v35  ;;  %v8264_v13 = vld [vmem:[#allocation7 + $0x80] sm:$0xf]  ;;  %v9958_v46 = vld [vmem:[#allocation7 + $0x8c] sm:$0xf0] }
  0xe3   :  { %v375_v39 = vmax.f32 %v371_v44, 0.0  ;;  %v376_v50 = vmax.f32 %v372_v37, 0.0  ;;  %v377_v51 = vmax.f32 %v373_v49, 0.0  ;;  %v378_v23 = vmax.f32 %v374_v45, 0.0  ;;  %v9956_v47 = vld [vmem:[#allocation7 + $0x84] sm:$0xf] }
  0xe4   :  { %v8261_v22 = vor.u32 %v9953_v38, %v8258_v40  ;;  %v8266_v48 = vld [vmem:[#allocation7 + $0x90] sm:$0xf0]  ;;  %v8272_v44 = vld [vmem:[#allocation7 + $0x88] sm:$0xf]  ;;  %v9959_v37 = vld [vmem:[#allocation7 + $0x94] sm:$0xf0] }
  0xe5   :  { %v635_v7 = vpack.c.bf16 %v375_v39, %v375_v39  ;;  %v636_v52 = vpack.c.bf16 %v376_v50, %v376_v50  ;;  %v637_v53 = vpack.c.bf16 %v377_v51, %v377_v51  ;;  %v638_v54 = vpack.c.bf16 %v378_v23, %v378_v23  ;;  %v9957_v49 = vld [vmem:[#allocation7 + $0x8c] sm:$0xf]  ;;  %v8274_v45 = vld [vmem:[#allocation7 + $0x98] sm:$0xf0] }
  0xe6   :  { %v8265_v39 = vor.u32 %v9958_v46, %v8264_v13  ;;  %v8269_v50 = vor.u32 %v9956_v47, %v8266_v48  ;;  %v8273_v51 = vor.u32 %v9959_v37, %v8272_v44  ;;  %v8277_v23 = vor.u32 %v9957_v49, %v8274_v45  ;;  %v8338_v34 = vld [vmem:[#allocation7 + $0x118] sm:$0xf0]  ;;  %v8344_v37 = vld [vmem:[#allocation7 + $0x120] sm:$0xf]  ;;  %v9978_v49 = vld [vmem:[#allocation7 + $0x12c] sm:$0xf0] }
  0xe7   :  { %1926 = vmatpush.bf16.xpose.msra.mxu0 %v635_v7  ;;  %2255 = vmatpush.bf16.xpose.msra.mxu1 %v636_v52  ;;  %v8280_v7 = vld [vmem:[#allocation7 + $0xa0] sm:$0xf]  ;;  %v9962_v52 = vld [vmem:[#allocation7 + $0xac] sm:$0xf0]  ;;  %v9976_v45 = vld [vmem:[#allocation7 + $0x124] sm:$0xf]  ;;  %v8345_v55 = vor.u32 %v9978_v49, %v8344_v37 }
  0xe8   :  { %2584 = vmatpush.bf16.xpose.msra.mxu2 %v637_v53  ;;  %2913 = vmatpush.bf16.xpose.msra.mxu3 %v638_v54  ;;  %v9960_v53 = vld [vmem:[#allocation7 + $0xa4] sm:$0xf]  ;;  %v8282_v54 = vld [vmem:[#allocation7 + $0xb0] sm:$0xf0]  ;;  %v8281_v59 = vor.u32 %v9962_v52, %v8280_v7  ;;  %v8354_v7 = vld [vmem:[#allocation7 + $0x138] sm:$0xf0] }
  0xe9   :  { %v8285_v60 = vor.u32 %v9960_v53, %v8282_v54 }
  0xee   :  { %1927 = vmatmul.bf16.vlgmr.msra.gmra.mxu0 %v8201_v63  ;;  %2256 = vmatmul.bf16.vlgmr.msra.gmra.mxu1 %v8205_v0  ;;  %v8296_v63 = vld [vmem:[#allocation7 + $0xc0] sm:$0xf]  ;;  %v9966_v0 = vld [vmem:[#allocation7 + $0xcc] sm:$0xf0] }
  0xef   :  { %2585 = vmatmul.bf16.vlgmr.msra.gmra.mxu2 %v8209_v1  ;;  %2914 = vmatmul.bf16.vlgmr.msra.gmra.mxu3 %v8213_v2  ;;  %v9964_v1 = vld [vmem:[#allocation7 + $0xc4] sm:$0xf]  ;;  %v8298_v2 = vld [vmem:[#allocation7 + $0xd0] sm:$0xf0]  ;;  %v8297_v8 = vor.u32 %v9966_v0, %v8296_v63 }
  0xf0   :  { %v8301_v9 = vor.u32 %v9964_v1, %v8298_v2 }
  0xfe   :  { %1932 = vmatmul.bf16.gmra.mxu0 %v8217_v12  ;;  %2261 = vmatmul.bf16.gmra.mxu1 %v8221_v14  ;;  %v8312_v12 = vld [vmem:[#allocation7 + $0xe0] sm:$0xf]  ;;  %v9970_v14 = vld [vmem:[#allocation7 + $0xec] sm:$0xf0] }
  0xff   :  { %2590 = vmatmul.bf16.gmra.mxu2 %v8225_v15  ;;  %2919 = vmatmul.bf16.gmra.mxu3 %v8229_v16  ;;  %v9968_v15 = vld [vmem:[#allocation7 + $0xe4] sm:$0xf]  ;;  %v8314_v16 = vld [vmem:[#allocation7 + $0xf0] sm:$0xf0]  ;;  %v8313_v21 = vor.u32 %v9970_v14, %v8312_v12  ;;  %v9983_v12 = vld [vmem:[#allocation7 + $0x154] sm:$0xf0] }
 0x100   :  { %v8317_v24 = vor.u32 %v9968_v15, %v8314_v16  ;;  %v9981_v14 = vld [vmem:[#allocation7 + $0x14c] sm:$0xf]  ;;  %v8370_v15 = vld [vmem:[#allocation7 + $0x158] sm:$0xf0] }
 0x10e   :  { %1937 = vmatmul.bf16.gmra.mxu0 %v8233_v27  ;;  %2266 = vmatmul.bf16.gmra.mxu1 %v8237_v28  ;;  %v8328_v27 = vld [vmem:[#allocation7 + $0x100] sm:$0xf]  ;;  %v9974_v28 = vld [vmem:[#allocation7 + $0x10c] sm:$0xf0] }
 0x10f   :  { %2595 = vmatmul.bf16.gmra.mxu2 %v8241_v29  ;;  %2924 = vmatmul.bf16.gmra.mxu3 %v8245_v30  ;;  %v9972_v29 = vld [vmem:[#allocation7 + $0x104] sm:$0xf]  ;;  %v8330_v30 = vld [vmem:[#allocation7 + $0x110] sm:$0xf0]  ;;  %v8329_v35 = vor.u32 %v9974_v28, %v8328_v27  ;;  %v8373_v27 = vor.u32 %v9981_v14, %v8370_v15 }
 0x110   :  { %v8333_v36 = vor.u32 %v9972_v29, %v8330_v30 }
 0x11e   :  { %1942 = vmatmul.bf16.gmra.mxu0 %v8249_v41  ;;  %2271 = vmatmul.bf16.gmra.mxu1 %v8253_v42  ;;  %v8337_v41 = vor.u32 %v9975_v32, %v8336_v31  ;;  %v8341_v42 = vor.u32 %v9973_v33, %v8338_v34 }
 0x11f   :  { %2600 = vmatmul.bf16.gmra.mxu2 %v8257_v43  ;;  %2929 = vmatmul.bf16.gmra.mxu3 %v8261_v22 }
 0x12e   :  { %1947 = vmatmul.bf16.gmra.mxu0 %v8265_v39  ;;  %2276 = vmatmul.bf16.gmra.mxu1 %v8269_v50  ;;  %v8346_v39 = vld [vmem:[#allocation7 + $0x130] sm:$0xf0]  ;;  %v8352_v50 = vld [vmem:[#allocation7 + $0x128] sm:$0xf] }
 0x12f   :  { %2605 = vmatmul.bf16.gmra.mxu2 %v8273_v51  ;;  %2934 = vmatmul.bf16.gmra.mxu3 %v8277_v23  ;;  %v9979_v51 = vld [vmem:[#allocation7 + $0x134] sm:$0xf0]  ;;  %v9977_v23 = vld [vmem:[#allocation7 + $0x12c] sm:$0xf]  ;;  %v8349_v56 = vor.u32 %v9976_v45, %v8346_v39 }
 0x13e   :  { %1952 = vmatmul.bf16.gmra.mxu0 %v8281_v59  ;;  %2281 = vmatmul.bf16.gmra.mxu1 %v8285_v60  ;;  %v8353_v60 = vor.u32 %v9979_v51, %v8352_v50 }
 0x13f   :  { %2610 = vmatmul.bf16.gmra.mxu2 %v8289_v61  ;;  %2939 = vmatmul.bf16.gmra.mxu3 %v8293_v62  ;;  %v8357_v61 = vor.u32 %v9977_v23, %v8354_v7 }
 0x14e   :  { %1957 = vmatmul.bf16.gmra.mxu0 %v8297_v8  ;;  %2286 = vmatmul.bf16.gmra.mxu1 %v8301_v9  ;;  %v9982_v8 = vld [vmem:[#allocation7 + $0x14c] sm:$0xf0]  ;;  %v9980_v9 = vld [vmem:[#allocation7 + $0x144] sm:$0xf] }
 0x14f   :  { %2615 = vmatmul.bf16.gmra.mxu2 %v8305_v10  ;;  %2944 = vmatmul.bf16.gmra.mxu3 %v8309_v11  ;;  %v8362_v10 = vld [vmem:[#allocation7 + $0x150] sm:$0xf0]  ;;  %v8368_v11 = vld [vmem:[#allocation7 + $0x148] sm:$0xf]  ;;  %v8361_v19 = vor.u32 %v9982_v8, %v8360_v6 }
 0x150   :  { %v8365_v20 = vor.u32 %v9980_v9, %v8362_v10 }
 0x15e   :  { %1962 = vmatmul.bf16.gmra.mxu0 %v8313_v21  ;;  %2291 = vmatmul.bf16.gmra.mxu1 %v8317_v24 }
 0x15f   :  { %2620 = vmatmul.bf16.gmra.mxu2 %v8321_v25  ;;  %2949 = vmatmul.bf16.gmra.mxu3 %v8325_v26  ;;  %v8369_v26 = vor.u32 %v9983_v12, %v8368_v11 }
 0x16b   :  { %v1928_v38 = vpop.f32.mrf.mxu0  ;;  %v2257_v40 = vpop.f32.mrf.mxu1 }
 0x16c   :  { %v2258_v43 = vadd.f32 %v2257_v40, %v1928_v38  ;;  %v9986_v38 = vld [vmem:[#allocation7 + $0x16c] sm:$0xf0]  ;;  %v9984_v40 = vld [vmem:[#allocation7 + $0x164] sm:$0xf] }
 0x16e   :  { %1967 = vmatmul.bf16.gmra.mxu0 %v8329_v35  ;;  %2296 = vmatmul.bf16.gmra.mxu1 %v8333_v36  ;;  %v8376_v36 = vld [vmem:[#allocation7 + $0x160] sm:$0xf] }
 0x16f   :  { %2625 = vmatmul.bf16.gmra.mxu2 %v8337_v41  ;;  %2954 = vmatmul.bf16.gmra.mxu3 %v8341_v42  ;;  %v8378_v41 = vld [vmem:[#allocation7 + $0x170] sm:$0xf0]  ;;  %v8384_v42 = vld [vmem:[#allocation7 + $0x168] sm:$0xf] }
 0x170   :  { %v8381_v37 = vor.u32 %v9984_v40, %v8378_v41 }
 0x172   :  { %v2586_v22 = vpop.f32.mrf.mxu2  ;;  %v2915_v13 = vpop.f32.mrf.mxu3 }
 0x173   :  { %v2587_v46 = vadd.f32 %v2586_v22, %v2258_v43  ;;  %v1930_v47 = vpop.f32.mrf.mxu0  ;;  %v2259_v48 = vpop.f32.mrf.mxu1  ;;  %v9987_v43 = vld [vmem:[#allocation7 + $0x174] sm:$0xf0]  ;;  %v9985_v22 = vld [vmem:[#allocation7 + $0x16c] sm:$0xf] }
 0x174   :  { %v2260_v52 = vadd.f32 %v2259_v48, %v1930_v47  ;;  %v8385_v50 = vor.u32 %v9987_v43, %v8384_v42 }
 0x175   :  { %v2916_v44 = vadd.f32 %v2915_v13, %v2587_v46  ;;  %v8386_v13 = vld [vmem:[#allocation7 + $0x178] sm:$0xf0] }
 0x176   :  { %v8389_v51 = vor.u32 %v9985_v22, %v8386_v13 }
 0x177   :  { %3236 = vst.msk [vmem:[#allocation2] sm:$0xff] %vm13149_vm2, %v2916_v44  ;;  %3867 = vrot.lane.b32.xlu0 %v2916_v44, %s10605_s3  ;;  %v8377_v44 = vor.u32 %v9986_v38, %v8376_v36 }
 0x17a   :  { %v2588_v53 = vpop.f32.mrf.mxu2  ;;  %v2917_v54 = vpop.f32.mrf.mxu3 }
 0x17b   :  { %v2589_v57 = vadd.f32 %v2588_v53, %v2260_v52  ;;  %v1933_v58 = vpop.f32.mrf.mxu0  ;;  %v2262_v59 = vpop.f32.mrf.mxu1 }
 0x17c   :  { %v2263_v63 = vadd.f32 %v2262_v59, %v1933_v58  ;;  %v8392_v58 = vld [vmem:[#allocation7 + $0x180] sm:$0xf]  ;;  %v9990_v59 = vld [vmem:[#allocation7 + $0x18c] sm:$0xf0] }
 0x17d   :  { %v2918_v62 = vadd.f32 %v2917_v54, %v2589_v57 }
 0x17e   :  { %1972 = vmatmul.bf16.gmra.mxu0 %v8345_v55  ;;  %2301 = vmatmul.bf16.gmra.mxu1 %v8349_v56 }
 0x17f   :  { %2630 = vmatmul.bf16.gmra.mxu2 %v8353_v60  ;;  %2959 = vmatmul.bf16.gmra.mxu3 %v8357_v61  ;;  %3237 = vst.msk [vmem:[#allocation2 + $0x8] sm:$0xff] %vm13149_vm2, %v2918_v62  ;;  %v9988_v60 = vld [vmem:[#allocation7 + $0x184] sm:$0xf]  ;;  %v8394_v61 = vld [vmem:[#allocation7 + $0x190] sm:$0xf0] }
 0x180   :  { %3869 = vrot.lane.b32.xlu1 %v2918_v62, %s10605_s3  ;;  %v8400_v62 = vld [vmem:[#allocation7 + $0x188] sm:$0xf]  ;;  %v8397_v6 = vor.u32 %v9988_v60, %v8394_v61 }
 0x182   :  { %v2591_v0 = vpop.f32.mrf.mxu2  ;;  %v2920_v1 = vpop.f32.mrf.mxu3 }
 0x183   :  { %v2592_v2 = vadd.f32 %v2591_v0, %v2263_v63  ;;  %v1935_v3 = vpop.f32.mrf.mxu0  ;;  %v2264_v4 = vpop.f32.mrf.mxu1  ;;  %v9991_v63 = vld [vmem:[#allocation7 + $0x194] sm:$0xf0]  ;;  %v9989_v0 = vld [vmem:[#allocation7 + $0x18c] sm:$0xf] }
 0x184   :  { %v2265_v16 = vadd.f32 %v2264_v4, %v1935_v3  ;;  %v8401_v11 = vor.u32 %v9991_v63, %v8400_v62 }
 0x185   :  { %v2921_v5 = vadd.f32 %v2920_v1, %v2592_v2  ;;  %v8402_v1 = vld [vmem:[#allocation7 + $0x198] sm:$0xf0] }
 0x186   :  { %v8405_v12 = vor.u32 %v9989_v0, %v8402_v1 }
 0x187   :  { %3238 = vst.msk [vmem:[#allocation2 + $0x10] sm:$0xff] %vm13149_vm2, %v2921_v5  ;;  %3871 = vrot.lane.b32.xlu0 %v2921_v5, %s10605_s3  ;;  %v8393_v5 = vor.u32 %v9990_v59, %v8392_v58 }
 0x18a   :  { %v2593_v17 = vpop.f32.mrf.mxu2  ;;  %v2922_v18 = vpop.f32.mrf.mxu3 }
 0x18b   :  { %v2594_v21 = vadd.f32 %v2593_v17, %v2265_v16  ;;  %v1938_v24 = vpop.f32.mrf.mxu0  ;;  %v2267_v25 = vpop.f32.mrf.mxu1 }
 0x18c   :  { %v2268_v29 = vadd.f32 %v2267_v25, %v1938_v24  ;;  %v8408_v24 = vld [vmem:[#allocation7 + $0x1a0] sm:$0xf]  ;;  %v9994_v25 = vld [vmem:[#allocation7 + $0x1ac] sm:$0xf0] }
 0x18d   :  { %v2923_v28 = vadd.f32 %v2922_v18, %v2594_v21 }
 0x18e   :  { %1977 = vmatmul.bf16.gmra.mxu0 %v8361_v19  ;;  %2306 = vmatmul.bf16.gmra.mxu1 %v8365_v20 }
 0x18f   :  { %3239 = vst.msk [vmem:[#allocation2 + $0x18] sm:$0xff] %vm13149_vm2, %v2923_v28  ;;  %2635 = vmatmul.bf16.gmra.mxu2 %v8369_v26  ;;  %2964 = vmatmul.bf16.gmra.mxu3 %v8373_v27  ;;  %v9992_v26 = vld [vmem:[#allocation7 + $0x1a4] sm:$0xf]  ;;  %v8410_v27 = vld [vmem:[#allocation7 + $0x1b0] sm:$0xf0] }
 0x190   :  { %3873 = vrot.lane.b32.xlu1 %v2923_v28, %s10605_s3  ;;  %v8416_v28 = vld [vmem:[#allocation7 + $0x1a8] sm:$0xf]  ;;  %v8413_v36 = vor.u32 %v9992_v26, %v8410_v27 }
 0x192   :  { %v2596_v30 = vpop.f32.mrf.mxu2  ;;  %v2925_v31 = vpop.f32.mrf.mxu3 }
 0x193   :  { %v2597_v32 = vadd.f32 %v2596_v30, %v2268_v29  ;;  %v1940_v33 = vpop.f32.mrf.mxu0  ;;  %v2269_v34 = vpop.f32.mrf.mxu1  ;;  %v9995_v29 = vld [vmem:[#allocation7 + $0x1b4] sm:$0xf0]  ;;  %v9993_v30 = vld [vmem:[#allocation7 + $0x1ac] sm:$0xf] }
 0x194   :  { %v2270_v46 = vadd.f32 %v2269_v34, %v1940_v33  ;;  %v8417_v42 = vor.u32 %v9995_v29, %v8416_v28 }
 0x195   :  { %v2926_v35 = vadd.f32 %v2925_v31, %v2597_v32  ;;  %v8418_v31 = vld [vmem:[#allocation7 + $0x1b8] sm:$0xf0] }
 0x196   :  { %v8421_v43 = vor.u32 %v9993_v30, %v8418_v31 }
 0x197   :  { %3240 = vst.msk [vmem:[#allocation2 + $0x20] sm:$0xff] %vm13149_vm2, %v2926_v35  ;;  %3875 = vrot.lane.b32.xlu0 %v2926_v35, %s10605_s3  ;;  %v8409_v35 = vor.u32 %v9994_v25, %v8408_v24 }
 0x19a   :  { %v2598_v47 = vpop.f32.mrf.mxu2  ;;  %v2927_v48 = vpop.f32.mrf.mxu3 }
 0x19b   :  { %v2599_v49 = vadd.f32 %v2598_v47, %v2270_v46  ;;  %v1943_v45 = vpop.f32.mrf.mxu0  ;;  %v2272_v39 = vpop.f32.mrf.mxu1 }
 0x19c   :  { %v2273_v7 = vadd.f32 %v2272_v39, %v1943_v45  ;;  %v8424_v45 = vld [vmem:[#allocation7 + $0x1c0] sm:$0xf]  ;;  %v9998_v39 = vld [vmem:[#allocation7 + $0x1cc] sm:$0xf0] }
 0x19d   :  { %v2928_v23 = vadd.f32 %v2927_v48, %v2599_v49 }
 0x19e   :  { %1982 = vmatmul.bf16.gmra.mxu0 %v8377_v44  ;;  %2311 = vmatmul.bf16.gmra.mxu1 %v8381_v37 }
 0x19f   :  { %3241 = vst.msk [vmem:[#allocation2 + $0x28] sm:$0xff] %vm13149_vm2, %v2928_v23  ;;  %2640 = vmatmul.bf16.gmra.mxu2 %v8385_v50  ;;  %2969 = vmatmul.bf16.gmra.mxu3 %v8389_v51  ;;  %v9996_v50 = vld [vmem:[#allocation7 + $0x1c4] sm:$0xf]  ;;  %v8426_v51 = vld [vmem:[#allocation7 + $0x1d0] sm:$0xf0] }
 0x1a0   :  { %3877 = vrot.lane.b32.xlu1 %v2928_v23, %s10605_s3  ;;  %v8432_v23 = vld [vmem:[#allocation7 + $0x1c8] sm:$0xf]  ;;  %v8429_v58 = vor.u32 %v9996_v50, %v8426_v51 }
 0x1a2   :  { %v2601_v52 = vpop.f32.mrf.mxu2  ;;  %v2930_v53 = vpop.f32.mrf.mxu3 }
 0x1a3   :  { %v2602_v54 = vadd.f32 %v2601_v52, %v2273_v7  ;;  %v1945_v55 = vpop.f32.mrf.mxu0  ;;  %v2274_v56 = vpop.f32.mrf.mxu1  ;;  %v9999_v7 = vld [vmem:[#allocation7 + $0x1d4] sm:$0xf0]  ;;  %v9997_v52 = vld [vmem:[#allocation7 + $0x1cc] sm:$0xf] }
 0x1a4   :  { %v2275_v2 = vadd.f32 %v2274_v56, %v1945_v55  ;;  %v8433_v62 = vor.u32 %v9999_v7, %v8432_v23 }
 0x1a5   :  { %v2931_v57 = vadd.f32 %v2930_v53, %v2602_v54  ;;  %v8434_v53 = vld [vmem:[#allocation7 + $0x1d8] sm:$0xf0] }
 0x1a6   :  { %v8437_v63 = vor.u32 %v9997_v52, %v8434_v53 }
 0x1a7   :  { %3242 = vst.msk [vmem:[#allocation2 + $0x30] sm:$0xff] %vm13149_vm2, %v2931_v57  ;;  %3879 = vrot.lane.b32.xlu0 %v2931_v57, %s10605_s3  ;;  %v8425_v57 = vor.u32 %v9998_v39, %v8424_v45 }
 0x1aa   :  { %v2603_v3 = vpop.f32.mrf.mxu2  ;;  %v2932_v4 = vpop.f32.mrf.mxu3 }
 0x1ab   :  { %v2604_v8 = vadd.f32 %v2603_v3, %v2275_v2  ;;  %v1948_v9 = vpop.f32.mrf.mxu0  ;;  %v2277_v10 = vpop.f32.mrf.mxu1 }
 0x1ac   :  { %v2278_v15 = vadd.f32 %v2277_v10, %v1948_v9  ;;  %v8440_v9 = vld [vmem:[#allocation7 + $0x1e0] sm:$0xf]  ;;  %v10002_v10 = vld [vmem:[#allocation7 + $0x1ec] sm:$0xf0] }
 0x1ad   :  { %v2933_v14 = vadd.f32 %v2932_v4, %v2604_v8 }
 0x1ae   :  { %1987 = vmatmul.bf16.gmra.mxu0 %v8393_v5  ;;  %2316 = vmatmul.bf16.gmra.mxu1 %v8397_v6 }
 0x1af   :  { %3243 = vst.msk [vmem:[#allocation2 + $0x38] sm:$0xff] %vm13149_vm2, %v2933_v14  ;;  %2645 = vmatmul.bf16.gmra.mxu2 %v8401_v11  ;;  %2974 = vmatmul.bf16.gmra.mxu3 %v8405_v12  ;;  %v10000_v11 = vld [vmem:[#allocation7 + $0x1e4] sm:$0xf]  ;;  %v8442_v12 = vld [vmem:[#allocation7 + $0x1f0] sm:$0xf0]  ;;  %vm4287_vm2 = vcmask 236768  }
 0x1b0   :  { %3881 = vrot.lane.b32.xlu1 %v2933_v14, %s10605_s3  ;;  %v8448_v14 = vld [vmem:[#allocation7 + $0x1e8] sm:$0xf]  ;;  %v8445_v24 = vor.u32 %v10000_v11, %v8442_v12 }
 0x1b2   :  { %v2606_v16 = vpop.f32.mrf.mxu2  ;;  %v2935_v17 = vpop.f32.mrf.mxu3 }
 0x1b3   :  { %v2607_v18 = vadd.f32 %v2606_v16, %v2278_v15  ;;  %v1950_v19 = vpop.f32.mrf.mxu0  ;;  %v2279_v20 = vpop.f32.mrf.mxu1  ;;  %v10003_v15 = vld [vmem:[#allocation7 + $0x1f4] sm:$0xf0]  ;;  %v10001_v16 = vld [vmem:[#allocation7 + $0x1ec] sm:$0xf] }
 0x1b4   :  { %v2280_v32 = vadd.f32 %v2279_v20, %v1950_v19  ;;  %v8449_v28 = vor.u32 %v10003_v15, %v8448_v14 }
 0x1b5   :  { %v2936_v21 = vadd.f32 %v2935_v17, %v2607_v18  ;;  %v8450_v17 = vld [vmem:[#allocation7 + $0x1f8] sm:$0xf0] }
 0x1b6   :  { %v8453_v29 = vor.u32 %v10001_v16, %v8450_v17 }
 0x1b7   :  { %3900 = vrot.lane.b32.xlu2 %v2936_v21, %s10601_s22  ;;  %3252 = vrot.lane.b32.xlu0 %v2936_v21, %s10606_s4  ;;  %v8441_v21 = vor.u32 %v10002_v10, %v8440_v9 }
 0x1ba   :  { %v2608_v33 = vpop.f32.mrf.mxu2  ;;  %v2937_v34 = vpop.f32.mrf.mxu3 }
 0x1bb   :  { %v2609_v38 = vadd.f32 %v2608_v33, %v2280_v32  ;;  %v1953_v40 = vpop.f32.mrf.mxu0  ;;  %v2282_v41 = vpop.f32.mrf.mxu1 }
 0x1bc   :  { %v2283_v13 = vadd.f32 %v2282_v41, %v1953_v40  ;;  %v8456_v40 = vld [vmem:[#allocation7 + $0x200] sm:$0xf]  ;;  %v10006_v41 = vld [vmem:[#allocation7 + $0x20c] sm:$0xf0] }
 0x1bd   :  { %v2938_v22 = vadd.f32 %v2937_v34, %v2609_v38 }
 0x1be   :  { %1992 = vmatmul.bf16.gmra.mxu0 %v8409_v35  ;;  %2321 = vmatmul.bf16.gmra.mxu1 %v8413_v36 }
 0x1bf   :  { %2650 = vmatmul.bf16.gmra.mxu2 %v8417_v42  ;;  %2979 = vmatmul.bf16.gmra.mxu3 %v8421_v43  ;;  %v10004_v42 = vld [vmem:[#allocation7 + $0x204] sm:$0xf]  ;;  %v8458_v43 = vld [vmem:[#allocation7 + $0x210] sm:$0xf0] }
 0x1c0   :  { %3902 = vrot.lane.b32.xlu0 %v2938_v22, %s10601_s22  ;;  %3254 = vrot.lane.b32.xlu1 %v2938_v22, %s10606_s4  ;;  %v8464_v22 = vld [vmem:[#allocation7 + $0x208] sm:$0xf] }
 0x1c2   :  { %v2611_v46 = vpop.f32.mrf.mxu2  ;;  %v2940_v47 = vpop.f32.mrf.mxu3 }
 0x1c3   :  { %v2612_v48 = vadd.f32 %v2611_v46, %v2283_v13  ;;  %v1955_v44 = vpop.f32.mrf.mxu0  ;;  %v2284_v37 = vpop.f32.mrf.mxu1  ;;  %v10007_v13 = vld [vmem:[#allocation7 + $0x214] sm:$0xf0]  ;;  %v10005_v46 = vld [vmem:[#allocation7 + $0x20c] sm:$0xf] }
 0x1c4   :  { %v2285_v54 = vadd.f32 %v2284_v37, %v1955_v44  ;;  %v8457_v37 = vor.u32 %v10006_v41, %v8456_v40  ;;  %v8465_v50 = vor.u32 %v10007_v13, %v8464_v22 }
 0x1c5   :  { %v2941_v49 = vadd.f32 %v2940_v47, %v2612_v48  ;;  %v8466_v47 = vld [vmem:[#allocation7 + $0x218] sm:$0xf0] }
 0x1c6   :  { %v8469_v51 = vor.u32 %v10005_v46, %v8466_v47 }
 0x1c7   :  { %3904 = vrot.lane.b32.xlu2 %v2941_v49, %s10601_s22 }
 0x1c8   :  { %3256 = vrot.lane.b32.xlu0 %v2941_v49, %s10606_s4  ;;  %v8461_v49 = vor.u32 %v10004_v42, %v8458_v43 }
 0x1ca   :  { %v2613_v55 = vpop.f32.mrf.mxu2  ;;  %v2942_v56 = vpop.f32.mrf.mxu3 }
 0x1cb   :  { %v2614_v59 = vadd.f32 %v2613_v55, %v2285_v54  ;;  %v1958_v60 = vpop.f32.mrf.mxu0  ;;  %v2287_v61 = vpop.f32.mrf.mxu1 }
 0x1cc   :  { %v2288_v1 = vadd.f32 %v2287_v61, %v1958_v60  ;;  %v8472_v60 = vld [vmem:[#allocation7 + $0x220] sm:$0xf]  ;;  %v10010_v61 = vld [vmem:[#allocation7 + $0x22c] sm:$0xf0] }
 0x1cd   :  { %v2943_v0 = vadd.f32 %v2942_v56, %v2614_v59 }
 0x1ce   :  { %1997 = vmatmul.bf16.gmra.mxu0 %v8425_v57  ;;  %2326 = vmatmul.bf16.gmra.mxu1 %v8429_v58 }
 0x1cf   :  { %2655 = vmatmul.bf16.gmra.mxu2 %v8433_v62  ;;  %2984 = vmatmul.bf16.gmra.mxu3 %v8437_v63  ;;  %v10008_v62 = vld [vmem:[#allocation7 + $0x224] sm:$0xf]  ;;  %v8474_v63 = vld [vmem:[#allocation7 + $0x230] sm:$0xf0] }
 0x1d0   :  { %3906 = vrot.lane.b32.xlu0 %v2943_v0, %s10601_s22  ;;  %3258 = vrot.lane.b32.xlu1 %v2943_v0, %s10606_s4  ;;  %v8480_v0 = vld [vmem:[#allocation7 + $0x228] sm:$0xf] }
 0x1d2   :  { %v2616_v2 = vpop.f32.mrf.mxu2  ;;  %v2945_v3 = vpop.f32.mrf.mxu3 }
 0x1d3   :  { %v2617_v4 = vadd.f32 %v2616_v2, %v2288_v1  ;;  %v1960_v5 = vpop.f32.mrf.mxu0  ;;  %v2289_v6 = vpop.f32.mrf.mxu1  ;;  %v10011_v1 = vld [vmem:[#allocation7 + $0x234] sm:$0xf0]  ;;  %v10009_v2 = vld [vmem:[#allocation7 + $0x22c] sm:$0xf] }
 0x1d4   :  { %v2290_v18 = vadd.f32 %v2289_v6, %v1960_v5  ;;  %v8473_v6 = vor.u32 %v10010_v61, %v8472_v60  ;;  %v8481_v12 = vor.u32 %v10011_v1, %v8480_v0 }
 0x1d5   :  { %v2946_v8 = vadd.f32 %v2945_v3, %v2617_v4  ;;  %v8482_v3 = vld [vmem:[#allocation7 + $0x238] sm:$0xf0] }
 0x1d6   :  { %v8485_v14 = vor.u32 %v10009_v2, %v8482_v3 }
 0x1d7   :  { %3260 = vrot.lane.b32.xlu2 %v2946_v8, %s10606_s4 }
 0x1da   :  { %v2618_v19 = vpop.f32.mrf.mxu2  ;;  %v2947_v20 = vpop.f32.mrf.mxu3 }
 0x1db   :  { %v2619_v25 = vadd.f32 %v2618_v19, %v2290_v18  ;;  %v1963_v26 = vpop.f32.mrf.mxu0  ;;  %v2292_v27 = vpop.f32.mrf.mxu1 }
 0x1dc   :  { %v2293_v31 = vadd.f32 %v2292_v27, %v1963_v26  ;;  %v8488_v26 = vld [vmem:[#allocation7 + $0x240] sm:$0xf]  ;;  %v10014_v27 = vld [vmem:[#allocation7 + $0x24c] sm:$0xf0] }
 0x1dd   :  { %v2948_v30 = vadd.f32 %v2947_v20, %v2619_v25 }
 0x1de   :  { %2002 = vmatmul.bf16.gmra.mxu0 %v8441_v21  ;;  %2331 = vmatmul.bf16.gmra.mxu1 %v8445_v24 }
 0x1df   :  { %2660 = vmatmul.bf16.gmra.mxu2 %v8449_v28  ;;  %2989 = vmatmul.bf16.gmra.mxu3 %v8453_v29  ;;  %v10012_v28 = vld [vmem:[#allocation7 + $0x244] sm:$0xf]  ;;  %v8490_v29 = vld [vmem:[#allocation7 + $0x250] sm:$0xf0] }
 0x1e0   :  { %3908 = vrot.lane.b32.xlu2 %v2946_v8, %s10601_s22  ;;  %3262 = vrot.lane.b32.xlu0 %v2948_v30, %s10606_s4  ;;  %v8477_v8 = vor.u32 %v10008_v62, %v8474_v63  ;;  %v8493_v40 = vor.u32 %v10012_v28, %v8490_v29  ;;  %v10021_v28 = vld [vmem:[#allocation7 + $0x28c] sm:$0xf]  ;;  %v8530_v29 = vld [vmem:[#allocation7 + $0x298] sm:$0xf0] }
 0x1e2   :  { %v2621_v32 = vpop.f32.mrf.mxu2  ;;  %v2950_v33 = vpop.f32.mrf.mxu3 }
 0x1e3   :  { %v2622_v34 = vadd.f32 %v2621_v32, %v2293_v31  ;;  %v1965_v35 = vpop.f32.mrf.mxu0  ;;  %v2294_v36 = vpop.f32.mrf.mxu1  ;;  %v10015_v31 = vld [vmem:[#allocation7 + $0x254] sm:$0xf0]  ;;  %v10013_v32 = vld [vmem:[#allocation7 + $0x24c] sm:$0xf] }
 0x1e4   :  { %v2295_v7 = vadd.f32 %v2294_v36, %v1965_v35 }
 0x1e5   :  { %v2951_v38 = vadd.f32 %v2950_v33, %v2622_v34  ;;  %v8498_v33 = vld [vmem:[#allocation7 + $0x258] sm:$0xf0] }
 0x1e6   :  { %v8501_v13 = vor.u32 %v10013_v32, %v8498_v33 }
 0x1e8   :  { %3910 = vrot.lane.b32.xlu0 %v2948_v30, %s10601_s22  ;;  %3912 = vrot.lane.b32.xlu2 %v2951_v38, %s10601_s22  ;;  %v8496_v30 = vld [vmem:[#allocation7 + $0x248] sm:$0xf] }
 0x1e9   :  { %v10916_v34 = vpop.permute.xlu0 %3867  ;;  %v8497_v22 = vor.u32 %v10015_v31, %v8496_v30 }
 0x1ea   :  { %v2623_v48 = vpop.f32.mrf.mxu2  ;;  %v2952_v44 = vpop.f32.mrf.mxu3 }
 0x1eb   :  { %v1968_v45 = vpop.f32.mrf.mxu0  ;;  %v2297_v39 = vpop.f32.mrf.mxu1  ;;  %v2624_v52 = vadd.f32 %v2623_v48, %v2295_v7  ;;  %v8504_v7 = vld [vmem:[#allocation7 + $0x260] sm:$0xf] }
 0x1ec   :  { %v2298_v23 = vadd.f32 %v2297_v39, %v1968_v45 }
 0x1ed   :  { %v2953_v59 = vadd.f32 %v2952_v44, %v2624_v52  ;;  %v10018_v52 = vld [vmem:[#allocation7 + $0x26c] sm:$0xf0] }
 0x1ee   :  { %2007 = vmatmul.bf16.gmra.mxu0 %v8457_v37  ;;  %2336 = vmatmul.bf16.gmra.mxu1 %v8461_v49  ;;  %v8505_v63 = vor.u32 %v10018_v52, %v8504_v7 }
 0x1ef   :  { %2665 = vmatmul.bf16.gmra.mxu2 %v8465_v50  ;;  %2994 = vmatmul.bf16.gmra.mxu3 %v8469_v51 }
 0x1f0   :  { %3264 = vrot.lane.b32.xlu0 %v2951_v38, %s10606_s4  ;;  %v8489_v38 = vor.u32 %v10014_v27, %v8488_v26  ;;  %v8528_v26 = vld [vmem:[#allocation7 + $0x288] sm:$0xf]  ;;  %v10023_v27 = vld [vmem:[#allocation7 + $0x294] sm:$0xf0] }
 0x1f2   :  { %v2626_v53 = vpop.f32.mrf.mxu2  ;;  %v2955_v55 = vpop.f32.mrf.mxu3 }
 0x1f3   :  { %v2627_v54 = vadd.f32 %v2626_v53, %v2298_v23  ;;  %v1970_v56 = vpop.f32.mrf.mxu0  ;;  %v2299_v57 = vpop.f32.mrf.mxu1  ;;  %v10016_v53 = vld [vmem:[#allocation7 + $0x264] sm:$0xf] }
 0x1f4   :  { %v2300_v4 = vadd.f32 %v2299_v57, %v1970_v56  ;;  %v10923_v37 = vpop.permute.xlu1 %3869  ;;  %v10019_v56 = vld [vmem:[#allocation7 + $0x274] sm:$0xf0]  ;;  %v10017_v57 = vld [vmem:[#allocation7 + $0x26c] sm:$0xf] }
 0x1f5   :  { %v2956_v58 = vadd.f32 %v2955_v55, %v2627_v54  ;;  %v8506_v54 = vld [vmem:[#allocation7 + $0x270] sm:$0xf0]  ;;  %v8512_v55 = vld [vmem:[#allocation7 + $0x268] sm:$0xf] }
 0x1f6   :  { %v8509_v0 = vor.u32 %v10016_v53, %v8506_v54  ;;  %v8536_v53 = vld [vmem:[#allocation7 + $0x2a0] sm:$0xf]  ;;  %v10026_v54 = vld [vmem:[#allocation7 + $0x2ac] sm:$0xf0] }
 0x1f7   :  { %3933 = vrot.lane.b32.xlu1 %v2956_v58, %s10607_s24  ;;  %3293 = vrot.lane.b32.xlu2 %v2956_v58, %s10608_s5  ;;  %v8514_v58 = vld [vmem:[#allocation7 + $0x278] sm:$0xf0] }
 0x1f8   :  { %3266 = vrot.lane.b32.xlu0 %v2953_v59, %s10606_s4 }
 0x1f9   :  { %v10920_v44 = vpop.permute.xlu0 %3871 }
 0x1fa   :  { %v2628_v5 = vpop.f32.mrf.mxu2  ;;  %v2957_v10 = vpop.f32.mrf.mxu3 }
 0x1fb   :  { %v2629_v9 = vadd.f32 %v2628_v5, %v2300_v4  ;;  %v1973_v11 = vpop.f32.mrf.mxu0  ;;  %v2302_v15 = vpop.f32.mrf.mxu1  ;;  %v8513_v4 = vor.u32 %v10019_v56, %v8512_v55  ;;  %v8517_v5 = vor.u32 %v10017_v57, %v8514_v58  ;;  %v10024_v55 = vld [vmem:[#allocation7 + $0x2a4] sm:$0xf]  ;;  %v8538_v56 = vld [vmem:[#allocation7 + $0x2b0] sm:$0xf0]  ;;  %v8544_v57 = vld [vmem:[#allocation7 + $0x2a8] sm:$0xf] }
 0x1fc   :  { %v2303_v17 = vadd.f32 %v2302_v15, %v1973_v11  ;;  %v10027_v58 = vld [vmem:[#allocation7 + $0x2b4] sm:$0xf0] }
 0x1fd   :  { %v2958_v16 = vadd.f32 %v2957_v10, %v2629_v9 }
 0x1fe   :  { %2012 = vmatmul.bf16.gmra.mxu0 %v8473_v6  ;;  %2341 = vmatmul.bf16.gmra.mxu1 %v8477_v8 }
 0x1ff   :  { %2670 = vmatmul.bf16.gmra.mxu2 %v8481_v12  ;;  %2999 = vmatmul.bf16.gmra.mxu3 %v8485_v14 }
 0x200   :  { %3914 = vrot.lane.b32.xlu0 %v2953_v59, %s10601_s22  ;;  %3935 = vrot.lane.b32.xlu2 %v2958_v16, %s10607_s24 }
 0x202   :  { %v2631_v18 = vpop.f32.mrf.mxu2  ;;  %v2960_v20 = vpop.f32.mrf.mxu3 }
 0x203   :  { %v2632_v19 = vadd.f32 %v2631_v18, %v2303_v17  ;;  %v1975_v21 = vpop.f32.mrf.mxu0  ;;  %v2304_v24 = vpop.f32.mrf.mxu1 }
 0x204   :  { %v2305_v35 = vadd.f32 %v2304_v24, %v1975_v21  ;;  %v10929_v61 = vpop.permute.xlu1 %3873  ;;  %v10022_v21 = vld [vmem:[#allocation7 + $0x28c] sm:$0xf0]  ;;  %v10020_v24 = vld [vmem:[#allocation7 + $0x284] sm:$0xf] }
 0x205   :  { %v2961_v25 = vadd.f32 %v2960_v20, %v2632_v19  ;;  %v8520_v20 = vld [vmem:[#allocation7 + $0x280] sm:$0xf] }
 0x207   :  { %3937 = vrot.lane.b32.xlu1 %v2961_v25, %s10607_s24 }
 0x208   :  { %3295 = vrot.lane.b32.xlu0 %v2958_v16, %s10608_s5 }
 0x209   :  { %v10926_v59 = vpop.permute.xlu0 %3875 }
 0x20a   :  { %v2633_v36 = vpop.f32.mrf.mxu2  ;;  %v2962_v42 = vpop.f32.mrf.mxu3  ;;  %13162 = vst [vmem:[#allocation16_spill] sm:$0xff] %v10926_v59 }
 0x20b   :  { %v2634_v41 = vadd.f32 %v2633_v36, %v2305_v35  ;;  %v1978_v43 = vpop.f32.mrf.mxu0  ;;  %v2307_v46 = vpop.f32.mrf.mxu1  ;;  %v8521_v36 = vor.u32 %v10022_v21, %v8520_v20 }
 0x20c   :  { %v2308_v48 = vadd.f32 %v2307_v46, %v1978_v43  ;;  %v8529_v43 = vor.u32 %v10023_v27, %v8528_v26  ;;  %v8552_v27 = vld [vmem:[#allocation7 + $0x2c0] sm:$0xf] }
 0x20d   :  { %v2963_v47 = vadd.f32 %v2962_v42, %v2634_v41 }
 0x20e   :  { %2017 = vmatmul.bf16.gmra.mxu0 %v8489_v38  ;;  %2346 = vmatmul.bf16.gmra.mxu1 %v8493_v40 }
 0x20f   :  { %2675 = vmatmul.bf16.gmra.mxu2 %v8497_v22  ;;  %3004 = vmatmul.bf16.gmra.mxu3 %v8501_v13  ;;  %v8533_v22 = vor.u32 %v10021_v28, %v8530_v29  ;;  %v10030_v28 = vld [vmem:[#allocation7 + $0x2cc] sm:$0xf0]  ;;  %v10028_v29 = vld [vmem:[#allocation7 + $0x2c4] sm:$0xf] }
 0x210   :  { %3297 = vrot.lane.b32.xlu0 %v2961_v25, %s10608_s5  ;;  %3939 = vrot.lane.b32.xlu2 %v2963_v47, %s10607_s24  ;;  %v8522_v25 = vld [vmem:[#allocation7 + $0x290] sm:$0xf0] }
 0x211   :  { %3299 = vrot.lane.b32.xlu1 %v2963_v47, %s10608_s5  ;;  %v10932_v10 = vpop.permute.xlu2 %3900  ;;  %v8525_v38 = vor.u32 %v10020_v24, %v8522_v25 }
 0x212   :  { %v2636_v49 = vpop.f32.mrf.mxu2  ;;  %v2965_v39 = vpop.f32.mrf.mxu3 }
 0x213   :  { %v2637_v45 = vadd.f32 %v2636_v49, %v2308_v48  ;;  %v1980_v50 = vpop.f32.mrf.mxu0  ;;  %v2309_v51 = vpop.f32.mrf.mxu1 }
 0x214   :  { %v2310_v60 = vadd.f32 %v2309_v51, %v1980_v50  ;;  %v10937_v12 = vpop.permute.xlu1 %3877 }
 0x215   :  { %v2966_v23 = vadd.f32 %v2965_v39, %v2637_v45  ;;  %13164 = vst [vmem:[#allocation18_spill] sm:$0xff] %v10937_v12 }
 0x218   :  { %3301 = vrot.lane.b32.xlu0 %v2966_v23, %s10608_s5 }
 0x219   :  { %3941 = vrot.lane.b32.xlu1 %v2966_v23, %s10607_s24  ;;  %v10934_v11 = vpop.permute.xlu0 %3879 }
 0x21a   :  { %v2638_v62 = vpop.f32.mrf.mxu2  ;;  %v2967_v2 = vpop.f32.mrf.mxu3  ;;  %13163 = vst [vmem:[#allocation17_spill] sm:$0xff] %v10934_v11 }
 0x21b   :  { %v2639_v1 = vadd.f32 %v2638_v62, %v2310_v60  ;;  %v1983_v3 = vpop.f32.mrf.mxu0  ;;  %v2312_v6 = vpop.f32.mrf.mxu1  ;;  %v10025_v60 = vld [vmem:[#allocation7 + $0x2ac] sm:$0xf]  ;;  %v8546_v62 = vld [vmem:[#allocation7 + $0x2b8] sm:$0xf0] }
 0x21c   :  { %v2313_v9 = vadd.f32 %v2312_v6, %v1983_v3  ;;  %v8549_v6 = vor.u32 %v10025_v60, %v8546_v62  ;;  %v8568_v60 = vld [vmem:[#allocation7 + $0x2e0] sm:$0xf]  ;;  %v10034_v62 = vld [vmem:[#allocation7 + $0x2ec] sm:$0xf0] }
 0x21d   :  { %v2968_v8 = vadd.f32 %v2967_v2, %v2639_v1  ;;  %v8537_v1 = vor.u32 %v10026_v54, %v8536_v53  ;;  %v8541_v2 = vor.u32 %v10024_v55, %v8538_v56 }
 0x21e   :  { %2022 = vmatmul.bf16.gmra.mxu0 %v8505_v63  ;;  %2351 = vmatmul.bf16.gmra.mxu1 %v8509_v0 }
 0x21f   :  { %2680 = vmatmul.bf16.gmra.mxu2 %v8513_v4  ;;  %3009 = vmatmul.bf16.gmra.mxu3 %v8517_v5  ;;  %v8545_v5 = vor.u32 %v10027_v58, %v8544_v57 }
 0x220   :  { %3943 = vrot.lane.b32.xlu2 %v2968_v8, %s10607_s24 }
 0x221   :  { %3303 = vrot.lane.b32.xlu1 %v2968_v8, %s10608_s5  ;;  %v10939_v30 = vpop.permute.xlu2 %3904 }
 0x222   :  { %v2641_v14 = vpop.f32.mrf.mxu2  ;;  %v2970_v16 = vpop.f32.mrf.mxu3 }
 0x223   :  { %v2642_v15 = vadd.f32 %v2641_v14, %v2313_v9  ;;  %v1985_v17 = vpop.f32.mrf.mxu0  ;;  %v2314_v18 = vpop.f32.mrf.mxu1 }
 0x224   :  { %v2315_v31 = vadd.f32 %v2314_v18, %v1985_v17  ;;  %v10942_v33 = vpop.permute.xlu1 %3881 }
 0x225   :  { %v2971_v19 = vadd.f32 %v2970_v16, %v2642_v15  ;;  %13165 = vst [vmem:[#allocation19_spill] sm:$0xff] %v10942_v33 }
 0x229   :  { %3305 = vrot.lane.b32.xlu1 %v2971_v19, %s10608_s5  ;;  %v3253_v32 = vpop.permute.xlu0 %3252 }
 0x22a   :  { %3277 = vst.msk [vmem:[#allocation2] sm:$0xff] %vm3276_vm3, %v3253_v32  ;;  %v2643_v35 = vpop.f32.mrf.mxu2  ;;  %v2972_v41 = vpop.f32.mrf.mxu3  ;;  %v8560_v32 = vld [vmem:[#allocation7 + $0x2c8] sm:$0xf] }
 0x22b   :  { %v2644_v40 = vadd.f32 %v2643_v35, %v2315_v31  ;;  %v1988_v42 = vpop.f32.mrf.mxu0  ;;  %v2317_v13 = vpop.f32.mrf.mxu1  ;;  %v8554_v31 = vld [vmem:[#allocation7 + $0x2d0] sm:$0xf0]  ;;  %v10031_v35 = vld [vmem:[#allocation7 + $0x2d4] sm:$0xf0] }
 0x22c   :  { %v2318_v47 = vadd.f32 %v2317_v13, %v1988_v42 }
 0x22d   :  { %v2973_v46 = vadd.f32 %v2972_v41, %v2644_v40 }
 0x22e   :  { %2027 = vmatmul.bf16.gmra.mxu0 %v8521_v36  ;;  %2356 = vmatmul.bf16.gmra.mxu1 %v8525_v38  ;;  %v10029_v36 = vld [vmem:[#allocation7 + $0x2cc] sm:$0xf]  ;;  %v8562_v38 = vld [vmem:[#allocation7 + $0x2d8] sm:$0xf0] }
 0x22f   :  { %2685 = vmatmul.bf16.gmra.mxu2 %v8529_v43  ;;  %3014 = vmatmul.bf16.gmra.mxu3 %v8533_v22  ;;  %v8553_v43 = vor.u32 %v10030_v28, %v8552_v27  ;;  %v8557_v22 = vor.u32 %v10028_v29, %v8554_v31 }
 0x230   :  { %3947 = vrot.lane.b32.xlu2 %v2973_v46, %s10607_s24 }
 0x231   :  { %3945 = vrot.lane.b32.xlu1 %v2971_v19, %s10607_s24  ;;  %v3261_v48 = vpop.permute.xlu2 %3260  ;;  %s10622_s24 = smov 10  }
 0x232   :  { %v10947_v49 = vpop.permute.xlu0 %3902  ;;  %v3255_v45 = vpop.permute.xlu1 %3254  ;;  %3281 = vst.msk [vmem:[#allocation2 + $0x20] sm:$0xff] %vm3276_vm3, %v3261_v48 }
 0x233   :  { %3278 = vst.msk [vmem:[#allocation2 + $0x8] sm:$0xff] %vm3276_vm3, %v3255_v45  ;;  %v2646_v39 = vpop.f32.mrf.mxu2  ;;  %v2975_v50 = vpop.f32.mrf.mxu3 }
 0x234   :  { %v2647_v51 = vadd.f32 %v2646_v39, %v2318_v47  ;;  %v1990_v23 = vpop.f32.mrf.mxu0  ;;  %v2319_v7 = vpop.f32.mrf.mxu1  ;;  %v8565_v47 = vor.u32 %v10029_v36, %v8562_v38  ;;  %v8584_v36 = vld [vmem:[#allocation7 + $0x300] sm:$0xf]  ;;  %v10038_v38 = vld [vmem:[#allocation7 + $0x30c] sm:$0xf0] }
 0x235   :  { %v2320_v63 = vadd.f32 %v2319_v7, %v1990_v23 }
 0x236   :  { %v2976_v52 = vadd.f32 %v2975_v50, %v2647_v51 }
 0x238   :  { %3966 = vrot.lane.b32.xlu0 %v2976_v52, %s10609_s26 }
 0x239   :  { %3307 = vrot.lane.b32.xlu1 %v2973_v46, %s10608_s5  ;;  %v8561_v46 = vor.u32 %v10031_v35, %v8560_v32  ;;  %s10623_s5 = smov 25  }
 0x23a   :  { %v3257_v0 = vpop.permute.xlu0 %3256  ;;  %v10954_v16 = vpop.permute.xlu2 %3908 }
 0x23b   :  { %3279 = vst.msk [vmem:[#allocation2 + $0x10] sm:$0xff] %vm3276_vm3, %v3257_v0  ;;  %v2648_v3 = vpop.f32.mrf.mxu2  ;;  %v2977_v4 = vpop.f32.mrf.mxu3  ;;  %v8570_v0 = vld [vmem:[#allocation7 + $0x2f0] sm:$0xf0] }
 0x23c   :  { %v2649_v8 = vadd.f32 %v2648_v3, %v2320_v63  ;;  %v1993_v9 = vpop.f32.mrf.mxu0  ;;  %v2322_v14 = vpop.f32.mrf.mxu1  ;;  %13166 = vst [vmem:[#allocation20_spill] sm:$0xff] %v10954_v16  ;;  %v10032_v63 = vld [vmem:[#allocation7 + $0x2e4] sm:$0xf]  ;;  %v10033_v3 = vld [vmem:[#allocation7 + $0x2ec] sm:$0xf] }
 0x23d   :  { %v2323_v17 = vadd.f32 %v2322_v14, %v1993_v9  ;;  %v8573_v9 = vor.u32 %v10032_v63, %v8570_v0 }
 0x23e   :  { %v2978_v15 = vadd.f32 %v2977_v4, %v2649_v8  ;;  %2032 = vmatmul.bf16.gmra.mxu0 %v8537_v1  ;;  %2361 = vmatmul.bf16.gmra.mxu1 %v8541_v2  ;;  %v8576_v1 = vld [vmem:[#allocation7 + $0x2e8] sm:$0xf]  ;;  %v10035_v2 = vld [vmem:[#allocation7 + $0x2f4] sm:$0xf0]  ;;  %v8578_v4 = vld [vmem:[#allocation7 + $0x2f8] sm:$0xf0]  ;;  %v8569_v8 = vor.u32 %v10034_v62, %v8568_v60 }
 0x23f   :  { %2690 = vmatmul.bf16.gmra.mxu2 %v8545_v5  ;;  %3019 = vmatmul.bf16.gmra.mxu3 %v8549_v6 }
 0x240   :  { %3336 = vrot.lane.b32.xlu2 %v2978_v15, %s10610_s13 }
 0x241   :  { %3334 = vrot.lane.b32.xlu1 %v2976_v52, %s10610_s13 }
 0x242   :  { %v3259_v18 = vpop.permute.xlu1 %3258  ;;  %v10960_v40 = vpop.permute.xlu2 %3912 }
 0x243   :  { %3280 = vst.msk [vmem:[#allocation2 + $0x18] sm:$0xff] %vm3276_vm3, %v3259_v18  ;;  %v2651_v19 = vpop.f32.mrf.mxu2  ;;  %v2980_v21 = vpop.f32.mrf.mxu3 }
 0x244   :  { %v2652_v20 = vadd.f32 %v2651_v19, %v2323_v17  ;;  %v1995_v24 = vpop.f32.mrf.mxu0  ;;  %v2324_v25 = vpop.f32.mrf.mxu1  ;;  %13167 = vst [vmem:[#allocation21_spill] sm:$0xff] %v10960_v40  ;;  %v8581_v17 = vor.u32 %v10033_v3, %v8578_v4  ;;  %v8600_v4 = vld [vmem:[#allocation7 + $0x320] sm:$0xf] }
 0x245   :  { %v10963_v41 = vpop.permute.xlu0 %3906  ;;  %v2325_v42 = vadd.f32 %v2324_v25, %v1995_v24 }
 0x246   :  { %v2981_v26 = vadd.f32 %v2980_v21, %v2652_v20 }
 0x248   :  { %3338 = vrot.lane.b32.xlu0 %v2981_v26, %s10610_s13 }
 0x249   :  { %3968 = vrot.lane.b32.xlu1 %v2978_v15, %s10609_s26  ;;  %v8577_v15 = vor.u32 %v10035_v2, %v8576_v1 }
 0x24b   :  { %v2653_v13 = vpop.f32.mrf.mxu2  ;;  %v2982_v45 = vpop.f32.mrf.mxu3 }
 0x24c   :  { %v2654_v48 = vadd.f32 %v2653_v13, %v2325_v42  ;;  %v1998_v39 = vpop.f32.mrf.mxu0  ;;  %v2327_v50 = vpop.f32.mrf.mxu1  ;;  %v10036_v42 = vld [vmem:[#allocation7 + $0x304] sm:$0xf]  ;;  %v10039_v13 = vld [vmem:[#allocation7 + $0x314] sm:$0xf0] }
 0x24d   :  { %v2328_v23 = vadd.f32 %v2327_v50, %v1998_v39  ;;  %v8585_v39 = vor.u32 %v10038_v38, %v8584_v36 }
 0x24e   :  { %v2983_v51 = vadd.f32 %v2982_v45, %v2654_v48  ;;  %2037 = vmatmul.bf16.gmra.mxu0 %v8553_v43  ;;  %2366 = vmatmul.bf16.gmra.mxu1 %v8557_v22  ;;  %v8586_v43 = vld [vmem:[#allocation7 + $0x310] sm:$0xf0]  ;;  %v8592_v22 = vld [vmem:[#allocation7 + $0x308] sm:$0xf] }
 0x24f   :  { %2695 = vmatmul.bf16.gmra.mxu2 %v8561_v46  ;;  %3024 = vmatmul.bf16.gmra.mxu3 %v8565_v47  ;;  %v10037_v46 = vld [vmem:[#allocation7 + $0x30c] sm:$0xf]  ;;  %v8594_v47 = vld [vmem:[#allocation7 + $0x318] sm:$0xf0]  ;;  %v8589_v50 = vor.u32 %v10036_v42, %v8586_v43 }
 0x250   :  { %3970 = vrot.lane.b32.xlu0 %v2981_v26, %s10609_s26 }
 0x251   :  { %3340 = vrot.lane.b32.xlu1 %v2983_v51, %s10610_s13  ;;  %v3294_v7 = vpop.permute.xlu2 %3293 }
 0x252   :  { %v3263_v52 = vpop.permute.xlu0 %3262  ;;  %3318 = vst.msk [vmem:[#allocation2] sm:$0xff] %vm3317_vm4, %v3294_v7  ;;  %v8597_v7 = vor.u32 %v10037_v46, %v8594_v47 }
 0x253   :  { %3282 = vst.msk [vmem:[#allocation2 + $0x28] sm:$0xff] %vm3276_vm3, %v3263_v52  ;;  %v2656_v53 = vpop.f32.mrf.mxu2  ;;  %v2985_v55 = vpop.f32.mrf.mxu3 }
 0x254   :  { %v2657_v54 = vadd.f32 %v2656_v53, %v2328_v23  ;;  %v2000_v56 = vpop.f32.mrf.mxu0  ;;  %v2329_v57 = vpop.f32.mrf.mxu1  ;;  %v8593_v23 = vor.u32 %v10039_v13, %v8592_v22 }
 0x255   :  { %v2330_v5 = vadd.f32 %v2329_v57, %v2000_v56 }
 0x256   :  { %v2986_v58 = vadd.f32 %v2985_v55, %v2657_v54 }
 0x258   :  { %3974 = vrot.lane.b32.xlu0 %v2986_v58, %s10609_s26 }
 0x259   :  { %3972 = vrot.lane.b32.xlu1 %v2983_v51, %s10609_s26 }
 0x25a   :  { %v10971_v6 = vpop.permute.xlu0 %3910 }
 0x25b   :  { %13168 = vst [vmem:[#allocation22_spill] sm:$0xff] %v10971_v6  ;;  %v2658_v14 = vpop.f32.mrf.mxu2  ;;  %v2987_v19 = vpop.f32.mrf.mxu3 }
 0x25c   :  { %v2659_v18 = vadd.f32 %v2658_v14, %v2330_v5  ;;  %v2003_v20 = vpop.f32.mrf.mxu0  ;;  %v2332_v21 = vpop.f32.mrf.mxu1  ;;  %v10042_v5 = vld [vmem:[#allocation7 + $0x32c] sm:$0xf0]  ;;  %v8608_v14 = vld [vmem:[#allocation7 + $0x328] sm:$0xf] }
 0x25d   :  { %v2333_v25 = vadd.f32 %v2332_v21, %v2003_v20  ;;  %v10990_v20 = vpop.permute.xlu2 %3935 }
 0x25e   :  { %v2988_v24 = vadd.f32 %v2987_v19, %v2659_v18  ;;  %2042 = vmatmul.bf16.gmra.mxu0 %v8569_v8  ;;  %2371 = vmatmul.bf16.gmra.mxu1 %v8573_v9  ;;  %v10040_v8 = vld [vmem:[#allocation7 + $0x324] sm:$0xf]  ;;  %v8602_v9 = vld [vmem:[#allocation7 + $0x330] sm:$0xf0]  ;;  %v8610_v18 = vld [vmem:[#allocation7 + $0x338] sm:$0xf0] }
 0x25f   :  { %2700 = vmatmul.bf16.gmra.mxu2 %v8577_v15  ;;  %3029 = vmatmul.bf16.gmra.mxu3 %v8581_v17  ;;  %v10043_v15 = vld [vmem:[#allocation7 + $0x334] sm:$0xf0]  ;;  %v10041_v17 = vld [vmem:[#allocation7 + $0x32c] sm:$0xf] }
 0x260   :  { %3344 = vrot.lane.b32.xlu2 %v2988_v24, %s10610_s13 }
 0x261   :  { %3342 = vrot.lane.b32.xlu1 %v2986_v58, %s10610_s13 }
 0x262   :  { %v3265_v26 = vpop.permute.xlu0 %3264 }
 0x263   :  { %3283 = vst.msk [vmem:[#allocation2 + $0x30] sm:$0xff] %vm3276_vm3, %v3265_v26  ;;  %v2661_v27 = vpop.f32.mrf.mxu2  ;;  %v2990_v29 = vpop.f32.mrf.mxu3  ;;  %v8605_v26 = vor.u32 %v10040_v8, %v8602_v9 }
 0x264   :  { %v2662_v28 = vadd.f32 %v2661_v27, %v2333_v25  ;;  %v2005_v31 = vpop.f32.mrf.mxu0  ;;  %v2334_v32 = vpop.f32.mrf.mxu1  ;;  %v8601_v25 = vor.u32 %v10042_v5, %v8600_v4 }
 0x265   :  { %v2335_v48 = vadd.f32 %v2334_v32, %v2005_v31 }
 0x266   :  { %v2991_v35 = vadd.f32 %v2990_v29, %v2662_v28  ;;  %v8609_v28 = vor.u32 %v10043_v15, %v8608_v14  ;;  %v8613_v29 = vor.u32 %v10041_v17, %v8610_v18 }
 0x268   :  { %3978 = vrot.lane.b32.xlu0 %v2991_v35, %s10609_s26  ;;  %3346 = vrot.lane.b32.xlu2 %v2991_v35, %s10610_s13 }
 0x269   :  { %3976 = vrot.lane.b32.xlu1 %v2988_v24, %s10609_s26  ;;  %v10981_v58 = vpop.permute.xlu1 %3933 }
 0x26a   :  { %v3267_v45 = vpop.permute.xlu0 %3266  ;;  %v10995_v43 = vpop.permute.xlu2 %3939 }
 0x26b   :  { %3284 = vst.msk [vmem:[#allocation2 + $0x38] sm:$0xff] %vm3276_vm3, %v3267_v45  ;;  %v2663_v51 = vpop.f32.mrf.mxu2  ;;  %v2992_v53 = vpop.f32.mrf.mxu3  ;;  %vm3727_vm3 = vcmask 105568  }
 0x26c   :  { %v2664_v52 = vadd.f32 %v2663_v51, %v2335_v48  ;;  %v2008_v54 = vpop.f32.mrf.mxu0  ;;  %v2337_v55 = vpop.f32.mrf.mxu1  ;;  %v8616_v51 = vld [vmem:[#allocation7 + $0x340] sm:$0xf] }
 0x26d   :  { %v2338_v57 = vadd.f32 %v2337_v55, %v2008_v54  ;;  %v10047_v54 = vld [vmem:[#allocation7 + $0x354] sm:$0xf0]  ;;  %v10045_v55 = vld [vmem:[#allocation7 + $0x34c] sm:$0xf] }
 0x26e   :  { %v2993_v56 = vadd.f32 %v2992_v53, %v2664_v52  ;;  %2047 = vmatmul.bf16.gmra.mxu0 %v8585_v39  ;;  %2376 = vmatmul.bf16.gmra.mxu1 %v8589_v50  ;;  %v8618_v52 = vld [vmem:[#allocation7 + $0x350] sm:$0xf0]  ;;  %v8624_v53 = vld [vmem:[#allocation7 + $0x348] sm:$0xf] }
 0x26f   :  { %2705 = vmatmul.bf16.gmra.mxu2 %v8593_v23  ;;  %3034 = vmatmul.bf16.gmra.mxu3 %v8597_v7  ;;  %v10046_v23 = vld [vmem:[#allocation7 + $0x34c] sm:$0xf0]  ;;  %v10044_v7 = vld [vmem:[#allocation7 + $0x344] sm:$0xf]  ;;  %v8625_v4 = vor.u32 %v10047_v54, %v8624_v53 }
 0x270   :  { %3348 = vrot.lane.b32.xlu2 %v2993_v56, %s10610_s13  ;;  %s10625_s13 = smov 26  }
 0x271   :  { %3980 = vrot.lane.b32.xlu1 %v2993_v56, %s10609_s26  ;;  %v8626_v56 = vld [vmem:[#allocation7 + $0x358] sm:$0xf0]  ;;  %s10624_s26 = smov 11  }
 0x272   :  { %v10984_v60 = vpop.permute.xlu0 %3914  ;;  %v8629_v5 = vor.u32 %v10045_v55, %v8626_v56 }
 0x273   :  { %13169 = vst [vmem:[#allocation23_spill] sm:$0xff] %v10984_v60  ;;  %v2666_v62 = vpop.f32.mrf.mxu2  ;;  %v2995_v0 = vpop.f32.mrf.mxu3 }
 0x274   :  { %v2667_v63 = vadd.f32 %v2666_v62, %v2338_v57  ;;  %v2010_v1 = vpop.f32.mrf.mxu0  ;;  %v2339_v2 = vpop.f32.mrf.mxu1 }
 0x275   :  { %v2340_v21 = vadd.f32 %v2339_v2, %v2010_v1  ;;  %v8621_v1 = vor.u32 %v10044_v7, %v8618_v52 }
 0x276   :  { %v2996_v3 = vadd.f32 %v2995_v0, %v2667_v63  ;;  %v8617_v0 = vor.u32 %v10046_v23, %v8616_v51 }
 0x278   :  { %3999 = vrot.lane.b32.xlu2 %v2996_v3, %s10611_s28  ;;  %3375 = vrot.lane.b32.xlu0 %v2996_v3, %s10612_s29 }
 0x279   :  { %v10988_v19 = vpop.permute.xlu1 %3937 }
 0x27a   :  { %v3296_v24 = vpop.permute.xlu0 %3295  ;;  %v11001_v57 = vpop.permute.xlu2 %3943 }
 0x27b   :  { %3319 = vst.msk [vmem:[#allocation2 + $0x8] sm:$0xff] %vm3317_vm4, %v3296_v24  ;;  %v2668_v27 = vpop.f32.mrf.mxu2  ;;  %v2997_v32 = vpop.f32.mrf.mxu3 }
 0x27c   :  { %v2669_v31 = vadd.f32 %v2668_v27, %v2340_v21  ;;  %v2013_v35 = vpop.f32.mrf.mxu0  ;;  %v2342_v36 = vpop.f32.mrf.mxu1  ;;  %13170 = vst [vmem:[#allocation24_spill] sm:$0xff] %v11001_v57 }
 0x27d   :  { %v2343_v42 = vadd.f32 %v2342_v36, %v2013_v35  ;;  %v10050_v35 = vld [vmem:[#allocation7 + $0x36c] sm:$0xf0]  ;;  %v10048_v36 = vld [vmem:[#allocation7 + $0x364] sm:$0xf] }
 0x27e   :  { %v2998_v38 = vadd.f32 %v2997_v32, %v2669_v31  ;;  %2052 = vmatmul.bf16.gmra.mxu0 %v8601_v25  ;;  %2381 = vmatmul.bf16.gmra.mxu1 %v8605_v26  ;;  %v8632_v32 = vld [vmem:[#allocation7 + $0x360] sm:$0xf] }
 0x27f   :  { %2710 = vmatmul.bf16.gmra.mxu2 %v8609_v28  ;;  %3039 = vmatmul.bf16.gmra.mxu3 %v8613_v29 }
 0x280   :  { %4001 = vrot.lane.b32.xlu0 %v2998_v38, %s10611_s28  ;;  %3377 = vrot.lane.b32.xlu1 %v2998_v38, %s10612_s29  ;;  %v8634_v38 = vld [vmem:[#allocation7 + $0x370] sm:$0xf0] }
 0x282   :  { %v3298_v22 = vpop.permute.xlu0 %3297 }
 0x283   :  { %3320 = vst.msk [vmem:[#allocation2 + $0x10] sm:$0xff] %vm3317_vm4, %v3298_v22  ;;  %v3300_v13 = vpop.permute.xlu1 %3299  ;;  %v2671_v46 = vpop.f32.mrf.mxu2  ;;  %v10051_v22 = vld [vmem:[#allocation7 + $0x374] sm:$0xf0] }
 0x284   :  { %3321 = vst.msk [vmem:[#allocation2 + $0x18] sm:$0xff] %vm3317_vm4, %v3300_v13  ;;  %v2672_v47 = vadd.f32 %v2671_v46, %v2343_v42  ;;  %v3000_v48 = vpop.f32.mrf.mxu3  ;;  %v2015_v45 = vpop.f32.mrf.mxu0  ;;  %v8640_v42 = vld [vmem:[#allocation7 + $0x368] sm:$0xf]  ;;  %v10049_v13 = vld [vmem:[#allocation7 + $0x36c] sm:$0xf] }
 0x285   :  { %v2344_v39 = vpop.f32.mrf.mxu1  ;;  %v8642_v46 = vld [vmem:[#allocation7 + $0x378] sm:$0xf0]  ;;  %v8641_v23 = vor.u32 %v10051_v22, %v8640_v42 }
 0x286   :  { %v3001_v50 = vadd.f32 %v3000_v48, %v2672_v47  ;;  %v2345_v62 = vadd.f32 %v2344_v39, %v2015_v45  ;;  %v8633_v45 = vor.u32 %v10050_v35, %v8632_v32  ;;  %v8637_v39 = vor.u32 %v10048_v36, %v8634_v38 }
 0x287   :  { %v8645_v7 = vor.u32 %v10049_v13, %v8642_v46 }
 0x288   :  { %4003 = vrot.lane.b32.xlu2 %v3001_v50, %s10611_s28  ;;  %3379 = vrot.lane.b32.xlu0 %v3001_v50, %s10612_s29 }
 0x28a   :  { %v3302_v63 = vpop.permute.xlu0 %3301  ;;  %v11008_v21 = vpop.permute.xlu2 %3947 }
 0x28b   :  { %v11003_v2 = vpop.permute.xlu1 %3941  ;;  %3322 = vst.msk [vmem:[#allocation2 + $0x20] sm:$0xff] %vm3317_vm4, %v3302_v63  ;;  %v2673_v3 = vpop.f32.mrf.mxu2 }
 0x28c   :  { %13171 = vst [vmem:[#allocation25_spill] sm:$0xff] %v11003_v2  ;;  %v2674_v8 = vadd.f32 %v2673_v3, %v2345_v62  ;;  %v3002_v9 = vpop.f32.mrf.mxu3  ;;  %v2018_v14 = vpop.f32.mrf.mxu0 }
 0x28d   :  { %v2347_v15 = vpop.f32.mrf.mxu1  ;;  %13172 = vst [vmem:[#allocation26_spill] sm:$0xff] %v11008_v21 }
 0x28e   :  { %v3003_v17 = vadd.f32 %v3002_v9, %v2674_v8  ;;  %2057 = vmatmul.bf16.gmra.mxu0 %v8617_v0  ;;  %2386 = vmatmul.bf16.gmra.mxu1 %v8621_v1  ;;  %v2348_v18 = vadd.f32 %v2347_v15, %v2018_v14  ;;  %v8648_v9 = vld [vmem:[#allocation7 + $0x380] sm:$0xf]  ;;  %v10054_v14 = vld [vmem:[#allocation7 + $0x38c] sm:$0xf0]  ;;  %v10052_v15 = vld [vmem:[#allocation7 + $0x384] sm:$0xf] }
 0x28f   :  { %2715 = vmatmul.bf16.gmra.mxu2 %v8625_v4  ;;  %3044 = vmatmul.bf16.gmra.mxu3 %v8629_v5 }
 0x290   :  { %4005 = vrot.lane.b32.xlu0 %v3003_v17, %s10611_s28  ;;  %3381 = vrot.lane.b32.xlu1 %v3003_v17, %s10612_s29  ;;  %v8650_v17 = vld [vmem:[#allocation7 + $0x390] sm:$0xf0] }
 0x293   :  { %v3304_v24 = vpop.permute.xlu1 %3303  ;;  %v2676_v25 = vpop.f32.mrf.mxu2 }
 0x294   :  { %3323 = vst.msk [vmem:[#allocation2 + $0x28] sm:$0xff] %vm3317_vm4, %v3304_v24  ;;  %v2677_v26 = vadd.f32 %v2676_v25, %v2348_v18  ;;  %v3005_v27 = vpop.f32.mrf.mxu3  ;;  %v2020_v28 = vpop.f32.mrf.mxu0  ;;  %v8656_v18 = vld [vmem:[#allocation7 + $0x388] sm:$0xf]  ;;  %v10055_v24 = vld [vmem:[#allocation7 + $0x394] sm:$0xf0] }
 0x295   :  { %v2349_v29 = vpop.f32.mrf.mxu1  ;;  %v10053_v25 = vld [vmem:[#allocation7 + $0x38c] sm:$0xf]  ;;  %v8657_v35 = vor.u32 %v10055_v24, %v8656_v18 }
 0x296   :  { %v3006_v31 = vadd.f32 %v3005_v27, %v2677_v26  ;;  %v2350_v47 = vadd.f32 %v2349_v29, %v2020_v28  ;;  %v8658_v26 = vld [vmem:[#allocation7 + $0x398] sm:$0xf0]  ;;  %v8649_v28 = vor.u32 %v10054_v14, %v8648_v9  ;;  %v8653_v29 = vor.u32 %v10052_v15, %v8650_v17 }
 0x297   :  { %v8661_v36 = vor.u32 %v10053_v25, %v8658_v26 }
 0x298   :  { %3383 = vrot.lane.b32.xlu2 %v3006_v31, %s10612_s29 }
 0x29a   :  { %v3337_v48 = vpop.permute.xlu2 %3336 }
 0x29b   :  { %v3306_v50 = vpop.permute.xlu1 %3305  ;;  %3360 = vst.msk [vmem:[#allocation2 + $0x8] sm:$0xff] %vm3358_vm5, %v3337_v48  ;;  %v2678_v51 = vpop.f32.mrf.mxu2 }
 0x29c   :  { %3324 = vst.msk [vmem:[#allocation2 + $0x30] sm:$0xff] %vm3317_vm4, %v3306_v50  ;;  %v2679_v52 = vadd.f32 %v2678_v51, %v2350_v47  ;;  %v3007_v53 = vpop.f32.mrf.mxu3  ;;  %v2023_v54 = vpop.f32.mrf.mxu0 }
 0x29d   :  { %v2352_v55 = vpop.f32.mrf.mxu1 }
 0x29e   :  { %v3008_v56 = vadd.f32 %v3007_v53, %v2679_v52  ;;  %2062 = vmatmul.bf16.gmra.mxu0 %v8633_v45  ;;  %2391 = vmatmul.bf16.gmra.mxu1 %v8637_v39  ;;  %v2353_v62 = vadd.f32 %v2352_v55, %v2023_v54  ;;  %v8664_v53 = vld [vmem:[#allocation7 + $0x3a0] sm:$0xf]  ;;  %v10058_v54 = vld [vmem:[#allocation7 + $0x3ac] sm:$0xf0]  ;;  %v10056_v55 = vld [vmem:[#allocation7 + $0x3a4] sm:$0xf] }
 0x29f   :  { %2720 = vmatmul.bf16.gmra.mxu2 %v8641_v23  ;;  %3049 = vmatmul.bf16.gmra.mxu3 %v8645_v7  ;;  %v8665_v9 = vor.u32 %v10058_v54, %v8664_v53 }
 0x2a0   :  { %4007 = vrot.lane.b32.xlu2 %v3006_v31, %s10611_s28  ;;  %3385 = vrot.lane.b32.xlu0 %v3008_v56, %s10612_s29 }
 0x2a3   :  { %v11016_v63 = vpop.permute.xlu1 %3945  ;;  %v2681_v0 = vpop.f32.mrf.mxu2 }
 0x2a4   :  { %13173 = vst [vmem:[#allocation27_spill] sm:$0xff] %v11016_v63  ;;  %v2682_v1 = vadd.f32 %v2681_v0, %v2353_v62  ;;  %v3010_v3 = vpop.f32.mrf.mxu3  ;;  %v2025_v4 = vpop.f32.mrf.mxu0  ;;  %v8672_v62 = vld [vmem:[#allocation7 + $0x3a8] sm:$0xf]  ;;  %v10059_v0 = vld [vmem:[#allocation7 + $0x3b4] sm:$0xf0] }
 0x2a5   :  { %v2354_v5 = vpop.f32.mrf.mxu1  ;;  %v8673_v18 = vor.u32 %v10059_v0, %v8672_v62 }
 0x2a6   :  { %v3011_v8 = vadd.f32 %v3010_v3, %v2682_v1  ;;  %v2355_v27 = vadd.f32 %v2354_v5, %v2025_v4  ;;  %v10057_v1 = vld [vmem:[#allocation7 + $0x3ac] sm:$0xf]  ;;  %v8674_v3 = vld [vmem:[#allocation7 + $0x3b8] sm:$0xf0] }
 0x2a7   :  { %v8677_v24 = vor.u32 %v10057_v1, %v8674_v3 }
 0x2a8   :  { %4009 = vrot.lane.b32.xlu0 %v3008_v56, %s10611_s28  ;;  %4011 = vrot.lane.b32.xlu2 %v3011_v8, %s10611_s28  ;;  %v8666_v56 = vld [vmem:[#allocation7 + $0x3b0] sm:$0xf0] }
 0x2a9   :  { %v8669_v14 = vor.u32 %v10056_v55, %v8666_v56 }
 0x2aa   :  { %v11023_v48 = vpop.permute.xlu0 %3966 }
 0x2ab   :  { %v3308_v31 = vpop.permute.xlu1 %3307  ;;  %v2683_v32 = vpop.f32.mrf.mxu2 }
 0x2ac   :  { %3325 = vst.msk [vmem:[#allocation2 + $0x38] sm:$0xff] %vm3317_vm4, %v3308_v31  ;;  %v2684_v38 = vadd.f32 %v2683_v32, %v2355_v27  ;;  %v3012_v42 = vpop.f32.mrf.mxu3  ;;  %v2028_v22 = vpop.f32.mrf.mxu0  ;;  %vm3768_vm4 = vcmask 113768  }
 0x2ad   :  { %v2357_v13 = vpop.f32.mrf.mxu1 }
 0x2ae   :  { %v3013_v46 = vadd.f32 %v3012_v42, %v2684_v38  ;;  %2067 = vmatmul.bf16.gmra.mxu0 %v8649_v28  ;;  %2396 = vmatmul.bf16.gmra.mxu1 %v8653_v29  ;;  %v2358_v47 = vadd.f32 %v2357_v13, %v2028_v22 }
 0x2af   :  { %2725 = vmatmul.bf16.gmra.mxu2 %v8657_v35  ;;  %3054 = vmatmul.bf16.gmra.mxu3 %v8661_v36 }
 0x2b0   :  { %3387 = vrot.lane.b32.xlu0 %v3011_v8, %s10612_s29  ;;  %3389 = vrot.lane.b32.xlu1 %v3013_v46, %s10612_s29  ;;  %s10626_s29 = smov 27  }
 0x2b3   :  { %v3335_v45 = vpop.permute.xlu1 %3334  ;;  %v2686_v39 = vpop.f32.mrf.mxu2 }
 0x2b4   :  { %3359 = vst.msk [vmem:[#allocation2] sm:$0xff] %vm3358_vm5, %v3335_v45  ;;  %v2687_v50 = vadd.f32 %v2686_v39, %v2358_v47  ;;  %v3015_v51 = vpop.f32.mrf.mxu3  ;;  %v2030_v23 = vpop.f32.mrf.mxu0  ;;  %v8680_v47 = vld [vmem:[#allocation7 + $0x3c0] sm:$0xf]  ;;  %v10062_v45 = vld [vmem:[#allocation7 + $0x3cc] sm:$0xf0] }
 0x2b5   :  { %v2359_v7 = vpop.f32.mrf.mxu1  ;;  %v10060_v39 = vld [vmem:[#allocation7 + $0x3c4] sm:$0xf]  ;;  %v8681_v55 = vor.u32 %v10062_v45, %v8680_v47 }
 0x2b6   :  { %v3016_v52 = vadd.f32 %v3015_v51, %v2687_v50  ;;  %v2360_v4 = vadd.f32 %v2359_v7, %v2030_v23  ;;  %v8682_v50 = vld [vmem:[#allocation7 + $0x3d0] sm:$0xf0]  ;;  %v8688_v51 = vld [vmem:[#allocation7 + $0x3c8] sm:$0xf]  ;;  %v10063_v23 = vld [vmem:[#allocation7 + $0x3d4] sm:$0xf0] }
 0x2b7   :  { %v10061_v7 = vld [vmem:[#allocation7 + $0x3cc] sm:$0xf]  ;;  %v8685_v56 = vor.u32 %v10060_v39, %v8682_v50  ;;  %v8689_v1 = vor.u32 %v10063_v23, %v8688_v51 }
 0x2b8   :  { %4013 = vrot.lane.b32.xlu0 %v3013_v46, %s10611_s28  ;;  %3416 = vrot.lane.b32.xlu2 %v3016_v52, %s10613_s30 }
 0x2ba   :  { %v3339_v5 = vpop.permute.xlu0 %3338  ;;  %v3345_v8 = vpop.permute.xlu2 %3344 }
 0x2bb   :  { %v11028_v15 = vpop.permute.xlu1 %3968  ;;  %3361 = vst.msk [vmem:[#allocation2 + $0x10] sm:$0xff] %vm3358_vm5, %v3339_v5  ;;  %v2688_v17 = vpop.f32.mrf.mxu2 }
 0x2bc   :  { %3364 = vst.msk [vmem:[#allocation2 + $0x28] sm:$0xff] %vm3358_vm5, %v3345_v8  ;;  %v2689_v25 = vadd.f32 %v2688_v17, %v2360_v4  ;;  %v3017_v26 = vpop.f32.mrf.mxu3  ;;  %v2033_v27 = vpop.f32.mrf.mxu0 }
 0x2bd   :  { %v2362_v28 = vpop.f32.mrf.mxu1 }
 0x2be   :  { %v3018_v29 = vadd.f32 %v3017_v26, %v2689_v25  ;;  %2072 = vmatmul.bf16.gmra.mxu0 %v8665_v9  ;;  %2401 = vmatmul.bf16.gmra.mxu1 %v8669_v14  ;;  %v2363_v31 = vadd.f32 %v2362_v28, %v2033_v27 }
 0x2bf   :  { %2730 = vmatmul.bf16.gmra.mxu2 %v8673_v18  ;;  %3059 = vmatmul.bf16.gmra.mxu3 %v8677_v24 }
 0x2c0   :  { %4032 = vrot.lane.b32.xlu2 %v3016_v52, %s10614_s0  ;;  %3418 = vrot.lane.b32.xlu0 %v3018_v29, %s10613_s30  ;;  %v8690_v52 = vld [vmem:[#allocation7 + $0x3d8] sm:$0xf0] }
 0x2c1   :  { %v8693_v3 = vor.u32 %v10061_v7, %v8690_v52 }
 0x2c2   :  { %v3347_v32 = vpop.permute.xlu2 %3346  ;;  %v11042_v17 = vpop.permute.xlu0 %3970 }
 0x2c3   :  { %v3341_v35 = vpop.permute.xlu1 %3340  ;;  %3365 = vst.msk [vmem:[#allocation2 + $0x30] sm:$0xff] %vm3358_vm5, %v3347_v32  ;;  %v2691_v36 = vpop.f32.mrf.mxu2  ;;  %v8696_v32 = vld [vmem:[#allocation7 + $0x3e0] sm:$0xf] }
 0x2c4   :  { %3362 = vst.msk [vmem:[#allocation2 + $0x18] sm:$0xff] %vm3358_vm5, %v3341_v35  ;;  %v2692_v38 = vadd.f32 %v2691_v36, %v2363_v31  ;;  %v3020_v42 = vpop.f32.mrf.mxu3  ;;  %v2035_v22 = vpop.f32.mrf.mxu0  ;;  %v10066_v35 = vld [vmem:[#allocation7 + $0x3ec] sm:$0xf0]  ;;  %v10064_v36 = vld [vmem:[#allocation7 + $0x3e4] sm:$0xf] }
 0x2c5   :  { %v2364_v13 = vpop.f32.mrf.mxu1  ;;  %v8697_v39 = vor.u32 %v10066_v35, %v8696_v32  ;;  %v10069_v32 = vld [vmem:[#allocation7 + $0x40c] sm:$0xf]  ;;  %v8722_v35 = vld [vmem:[#allocation7 + $0x418] sm:$0xf0] }
 0x2c6   :  { %v3021_v46 = vadd.f32 %v3020_v42, %v2692_v38  ;;  %v2365_v53 = vadd.f32 %v2364_v13, %v2035_v22  ;;  %v8698_v38 = vld [vmem:[#allocation7 + $0x3f0] sm:$0xf0]  ;;  %v8704_v42 = vld [vmem:[#allocation7 + $0x3e8] sm:$0xf]  ;;  %v10067_v22 = vld [vmem:[#allocation7 + $0x3f4] sm:$0xf0] }
 0x2c7   :  { %v10065_v13 = vld [vmem:[#allocation7 + $0x3ec] sm:$0xf]  ;;  %v8701_v50 = vor.u32 %v10064_v36, %v8698_v38  ;;  %v8705_v23 = vor.u32 %v10067_v22, %v8704_v42 }
 0x2c8   :  { %4034 = vrot.lane.b32.xlu0 %v3018_v29, %s10614_s0  ;;  %4036 = vrot.lane.b32.xlu1 %v3021_v46, %s10614_s0 }
 0x2c9   :  { %3420 = vrot.lane.b32.xlu2 %v3021_v46, %s10613_s30  ;;  %v8706_v46 = vld [vmem:[#allocation7 + $0x3f8] sm:$0xf0] }
 0x2ca   :  { %v3349_v54 = vpop.permute.xlu2 %3348  ;;  %v11049_v47 = vpop.permute.xlu0 %3974  ;;  %v8709_v7 = vor.u32 %v10065_v13, %v8706_v46 }
 0x2cb   :  { %v11039_v62 = vpop.permute.xlu1 %3972  ;;  %3366 = vst.msk [vmem:[#allocation2 + $0x38] sm:$0xff] %vm3358_vm5, %v3349_v54  ;;  %v2693_v0 = vpop.f32.mrf.mxu2 }
 0x2cc   :  { %v2694_v4 = vadd.f32 %v2693_v0, %v2365_v53  ;;  %v3022_v5 = vpop.f32.mrf.mxu3  ;;  %v2038_v8 = vpop.f32.mrf.mxu0  ;;  %13174 = vst [vmem:[#allocation28_spill] sm:$0xff] %v11049_v47 }
 0x2cd   :  { %v2367_v9 = vpop.f32.mrf.mxu1 }
 0x2ce   :  { %v3023_v14 = vadd.f32 %v3022_v5, %v2694_v4  ;;  %2077 = vmatmul.bf16.gmra.mxu0 %v8681_v55  ;;  %2406 = vmatmul.bf16.gmra.mxu1 %v8685_v56  ;;  %v2368_v18 = vadd.f32 %v2367_v9, %v2038_v8 }
 0x2cf   :  { %2735 = vmatmul.bf16.gmra.mxu2 %v8689_v1  ;;  %3064 = vmatmul.bf16.gmra.mxu3 %v8693_v3 }
 0x2d0   :  { %3422 = vrot.lane.b32.xlu0 %v3023_v14, %s10613_s30 }
 0x2d1   :  { %4038 = vrot.lane.b32.xlu2 %v3023_v14, %s10614_s0 }
 0x2d2   :  { %v11057_v4 = vpop.permute.xlu2 %3999 }
 0x2d3   :  { %v3343_v24 = vpop.permute.xlu1 %3342  ;;  %v2696_v25 = vpop.f32.mrf.mxu2 }
 0x2d4   :  { %3363 = vst.msk [vmem:[#allocation2 + $0x20] sm:$0xff] %vm3358_vm5, %v3343_v24  ;;  %v2697_v26 = vadd.f32 %v2696_v25, %v2368_v18  ;;  %v3025_v27 = vpop.f32.mrf.mxu3  ;;  %v2040_v28 = vpop.f32.mrf.mxu0  ;;  %v8712_v25 = vld [vmem:[#allocation7 + $0x400] sm:$0xf]  ;;  %vm3809_vm5 = vcmask 121968  }
 0x2d5   :  { %v2369_v29 = vpop.f32.mrf.mxu1 }
 0x2d6   :  { %v3026_v31 = vadd.f32 %v3025_v27, %v2697_v26  ;;  %v2370_v45 = vadd.f32 %v2369_v29, %v2040_v28  ;;  %v10070_v26 = vld [vmem:[#allocation7 + $0x40c] sm:$0xf0]  ;;  %v10068_v27 = vld [vmem:[#allocation7 + $0x404] sm:$0xf]  ;;  %v8714_v28 = vld [vmem:[#allocation7 + $0x410] sm:$0xf0] }
 0x2d7   :  { %v8720_v29 = vld [vmem:[#allocation7 + $0x408] sm:$0xf]  ;;  %v8713_v22 = vor.u32 %v10070_v26, %v8712_v25  ;;  %v8717_v13 = vor.u32 %v10068_v27, %v8714_v28  ;;  %v8728_v26 = vld [vmem:[#allocation7 + $0x420] sm:$0xf]  ;;  %v10074_v27 = vld [vmem:[#allocation7 + $0x42c] sm:$0xf0] }
 0x2d8   :  { %4040 = vrot.lane.b32.xlu1 %v3026_v31, %s10614_s0  ;;  %v10072_v28 = vld [vmem:[#allocation7 + $0x424] sm:$0xf] }
 0x2d9   :  { %3424 = vrot.lane.b32.xlu2 %v3026_v31, %s10613_s30  ;;  %v10071_v31 = vld [vmem:[#allocation7 + $0x414] sm:$0xf0] }
 0x2da   :  { %v11055_v3 = vpop.permute.xlu0 %3978 }
 0x2db   :  { %v2698_v51 = vpop.f32.mrf.mxu2  ;;  %v11051_v0 = vpop.permute.xlu1 %3976  ;;  %13176 = vst [vmem:[#allocation30_spill] sm:$0xff] %v11055_v3 }
 0x2dc   :  { %v2699_v52 = vadd.f32 %v2698_v51, %v2370_v45  ;;  %v3027_v53 = vpop.f32.mrf.mxu3  ;;  %v2043_v54 = vpop.f32.mrf.mxu0  ;;  %13175 = vst [vmem:[#allocation29_spill] sm:$0xff] %v11051_v0 }
 0x2dd   :  { %v2372_v55 = vpop.f32.mrf.mxu1 }
 0x2de   :  { %v3028_v56 = vadd.f32 %v3027_v53, %v2699_v52  ;;  %2082 = vmatmul.bf16.gmra.mxu0 %v8697_v39  ;;  %2411 = vmatmul.bf16.gmra.mxu1 %v8701_v50  ;;  %v2373_v1 = vadd.f32 %v2372_v55, %v2043_v54  ;;  %v8721_v39 = vor.u32 %v10071_v31, %v8720_v29  ;;  %v8736_v29 = vld [vmem:[#allocation7 + $0x428] sm:$0xf]  ;;  %v10075_v31 = vld [vmem:[#allocation7 + $0x434] sm:$0xf0] }
 0x2df   :  { %2740 = vmatmul.bf16.gmra.mxu2 %v8705_v23  ;;  %3069 = vmatmul.bf16.gmra.mxu3 %v8709_v7  ;;  %v8725_v50 = vor.u32 %v10069_v32, %v8722_v35  ;;  %v10073_v32 = vld [vmem:[#allocation7 + $0x42c] sm:$0xf]  ;;  %v8738_v35 = vld [vmem:[#allocation7 + $0x438] sm:$0xf0] }
 0x2e0   :  { %3426 = vrot.lane.b32.xlu0 %v3028_v56, %s10613_s30 }
 0x2e1   :  { %4042 = vrot.lane.b32.xlu2 %v3028_v56, %s10614_s0 }
 0x2e2   :  { %v11062_v46 = vpop.permute.xlu2 %4003 }
 0x2e3   :  { %v2701_v5 = vpop.f32.mrf.mxu2  ;;  %v11060_v36 = vpop.permute.xlu1 %3980 }
 0x2e4   :  { %v2702_v8 = vadd.f32 %v2701_v5, %v2373_v1  ;;  %v3030_v9 = vpop.f32.mrf.mxu3  ;;  %v2045_v14 = vpop.f32.mrf.mxu0  ;;  %13177 = vst [vmem:[#allocation31_spill] sm:$0xff] %v11060_v36 }
 0x2e5   :  { %v2374_v18 = vpop.f32.mrf.mxu1 }
 0x2e6   :  { %v3031_v24 = vadd.f32 %v3030_v9, %v2702_v8  ;;  %v2375_v38 = vadd.f32 %v2374_v18, %v2045_v14 }
 0x2e8   :  { %3428 = vrot.lane.b32.xlu1 %v3031_v24, %s10613_s30 }
 0x2ea   :  { %v3376_v42 = vpop.permute.xlu0 %3375 }
 0x2eb   :  { %3400 = vst.msk [vmem:[#allocation2] sm:$0xff] %vm3399_vm6, %v3376_v42  ;;  %v2703_v45 = vpop.f32.mrf.mxu2 }
 0x2ec   :  { %v2704_v51 = vadd.f32 %v2703_v45, %v2375_v38  ;;  %v3032_v23 = vpop.f32.mrf.mxu3  ;;  %v2048_v7 = vpop.f32.mrf.mxu0 }
 0x2ed   :  { %v2377_v52 = vpop.f32.mrf.mxu1 }
 0x2ee   :  { %v3033_v53 = vadd.f32 %v3032_v23, %v2704_v51  ;;  %2087 = vmatmul.bf16.gmra.mxu0 %v8713_v22  ;;  %2416 = vmatmul.bf16.gmra.mxu1 %v8717_v13  ;;  %v2378_v54 = vadd.f32 %v2377_v52, %v2048_v7  ;;  %v8729_v22 = vor.u32 %v10074_v27, %v8728_v26  ;;  %v8744_v27 = vld [vmem:[#allocation7 + $0x440] sm:$0xf] }
 0x2ef   :  { %2745 = vmatmul.bf16.gmra.mxu2 %v8721_v39  ;;  %3074 = vmatmul.bf16.gmra.mxu3 %v8725_v50  ;;  %v8737_v39 = vor.u32 %v10075_v31, %v8736_v29  ;;  %v8741_v50 = vor.u32 %v10073_v32, %v8738_v35  ;;  %v8746_v29 = vld [vmem:[#allocation7 + $0x450] sm:$0xf0]  ;;  %v8752_v31 = vld [vmem:[#allocation7 + $0x448] sm:$0xf]  ;;  %v10077_v32 = vld [vmem:[#allocation7 + $0x44c] sm:$0xf] }
 0x2f0   :  { %4044 = vrot.lane.b32.xlu1 %v3031_v24, %s10614_s0  ;;  %3430 = vrot.lane.b32.xlu2 %v3033_v53, %s10613_s30  ;;  %v8730_v24 = vld [vmem:[#allocation7 + $0x430] sm:$0xf0]  ;;  %v8754_v35 = vld [vmem:[#allocation7 + $0x458] sm:$0xf0]  ;;  %s10627_s30 = smov 12  }
 0x2f1   :  { %v8733_v13 = vor.u32 %v10072_v28, %v8730_v24  ;;  %v10078_v28 = vld [vmem:[#allocation7 + $0x44c] sm:$0xf0]  ;;  %v10076_v24 = vld [vmem:[#allocation7 + $0x444] sm:$0xf] }
 0x2f2   :  { %v11067_v55 = vpop.permute.xlu0 %4001  ;;  %v3378_v56 = vpop.permute.xlu1 %3377 }
 0x2f3   :  { %3401 = vst.msk [vmem:[#allocation2 + $0x8] sm:$0xff] %vm3399_vm6, %v3378_v56  ;;  %v3384_v1 = vpop.permute.xlu2 %3383  ;;  %v2706_v5 = vpop.f32.mrf.mxu2 }
 0x2f4   :  { %3404 = vst.msk [vmem:[#allocation2 + $0x20] sm:$0xff] %vm3399_vm6, %v3384_v1  ;;  %v2707_v8 = vadd.f32 %v2706_v5, %v2378_v54  ;;  %v3035_v9 = vpop.f32.mrf.mxu3  ;;  %v2050_v14 = vpop.f32.mrf.mxu0 }
 0x2f5   :  { %v2379_v18 = vpop.f32.mrf.mxu1 }
 0x2f6   :  { %v3036_v25 = vadd.f32 %v3035_v9, %v2707_v8  ;;  %v2380_v38 = vadd.f32 %v2379_v18, %v2050_v14 }
 0x2f8   :  { %4046 = vrot.lane.b32.xlu2 %v3033_v53, %s10614_s0  ;;  %3457 = vrot.lane.b32.xlu1 %v3036_v25, %s10615_s19  ;;  %s10628_s0 = smov 28  }
 0x2fa   :  { %v3380_v42 = vpop.permute.xlu0 %3379 }
 0x2fb   :  { %3402 = vst.msk [vmem:[#allocation2 + $0x10] sm:$0xff] %vm3399_vm6, %v3380_v42  ;;  %v2708_v45 = vpop.f32.mrf.mxu2  ;;  %v11074_v54 = vpop.permute.xlu2 %4007 }
 0x2fc   :  { %v2709_v51 = vadd.f32 %v2708_v45, %v2380_v38  ;;  %v3037_v23 = vpop.f32.mrf.mxu3  ;;  %v2053_v7 = vpop.f32.mrf.mxu0  ;;  %13178 = vst [vmem:[#allocation32_spill] sm:$0xff] %v11074_v54  ;;  %v8749_v45 = vor.u32 %v10076_v24, %v8746_v29  ;;  %v8760_v24 = vld [vmem:[#allocation7 + $0x460] sm:$0xf]  ;;  %v10082_v29 = vld [vmem:[#allocation7 + $0x46c] sm:$0xf0] }
 0x2fd   :  { %v2382_v52 = vpop.f32.mrf.mxu1 }
 0x2fe   :  { %v3038_v53 = vadd.f32 %v3037_v23, %v2709_v51  ;;  %2092 = vmatmul.bf16.gmra.mxu0 %v8729_v22  ;;  %2421 = vmatmul.bf16.gmra.mxu1 %v8733_v13  ;;  %v2383_v56 = vadd.f32 %v2382_v52, %v2053_v7  ;;  %v8745_v13 = vor.u32 %v10078_v28, %v8744_v27 }
 0x2ff   :  { %2750 = vmatmul.bf16.gmra.mxu2 %v8737_v39  ;;  %3079 = vmatmul.bf16.gmra.mxu3 %v8741_v50  ;;  %v8757_v51 = vor.u32 %v10077_v32, %v8754_v35  ;;  %v8768_v32 = vld [vmem:[#allocation7 + $0x468] sm:$0xf]  ;;  %v10083_v35 = vld [vmem:[#allocation7 + $0x474] sm:$0xf0] }
 0x300   :  { %4065 = vrot.lane.b32.xlu2 %v3036_v25, %s10616_s1  ;;  %4067 = vrot.lane.b32.xlu0 %v3038_v53, %s10616_s1  ;;  %v10079_v25 = vld [vmem:[#allocation7 + $0x454] sm:$0xf0] }
 0x301   :  { %v8753_v50 = vor.u32 %v10079_v25, %v8752_v31  ;;  %v10080_v31 = vld [vmem:[#allocation7 + $0x464] sm:$0xf]  ;;  %v8762_v25 = vld [vmem:[#allocation7 + $0x470] sm:$0xf0] }
 0x302   :  { %v3382_v1 = vpop.permute.xlu1 %3381  ;;  %v11082_v38 = vpop.permute.xlu0 %4005 }
 0x303   :  { %3403 = vst.msk [vmem:[#allocation2 + $0x18] sm:$0xff] %vm3399_vm6, %v3382_v1  ;;  %v2711_v5 = vpop.f32.mrf.mxu2  ;;  %v11084_v42 = vpop.permute.xlu2 %4011 }
 0x304   :  { %v2712_v8 = vadd.f32 %v2711_v5, %v2383_v56  ;;  %v3040_v9 = vpop.f32.mrf.mxu3  ;;  %v2055_v14 = vpop.f32.mrf.mxu0  ;;  %13179 = vst [vmem:[#allocation33_spill] sm:$0xff] %v11084_v42 }
 0x305   :  { %v2384_v18 = vpop.f32.mrf.mxu1 }
 0x306   :  { %v3041_v26 = vadd.f32 %v3040_v9, %v2712_v8  ;;  %v2385_v22 = vadd.f32 %v2384_v18, %v2055_v14 }
 0x308   :  { %3459 = vrot.lane.b32.xlu2 %v3038_v53, %s10615_s19  ;;  %4069 = vrot.lane.b32.xlu0 %v3041_v26, %s10616_s1 }
 0x309   :  { %3461 = vrot.lane.b32.xlu1 %v3041_v26, %s10615_s19 }
 0x30b   :  { %v2713_v39 = vpop.f32.mrf.mxu2 }
 0x30c   :  { %v2714_v23 = vadd.f32 %v2713_v39, %v2385_v22  ;;  %v3042_v7 = vpop.f32.mrf.mxu3  ;;  %v2058_v52 = vpop.f32.mrf.mxu0  ;;  %v10081_v22 = vld [vmem:[#allocation7 + $0x46c] sm:$0xf] }
 0x30d   :  { %v2387_v53 = vpop.f32.mrf.mxu1 }
 0x30e   :  { %v3043_v56 = vadd.f32 %v3042_v7, %v2714_v23  ;;  %2097 = vmatmul.bf16.gmra.mxu0 %v8745_v13  ;;  %2426 = vmatmul.bf16.gmra.mxu1 %v8749_v45  ;;  %v2388_v1 = vadd.f32 %v2387_v53, %v2058_v52  ;;  %v8770_v13 = vld [vmem:[#allocation7 + $0x478] sm:$0xf0]  ;;  %v8765_v23 = vor.u32 %v10080_v31, %v8762_v25 }
 0x30f   :  { %2755 = vmatmul.bf16.gmra.mxu2 %v8753_v50  ;;  %3084 = vmatmul.bf16.gmra.mxu3 %v8757_v51  ;;  %v8761_v51 = vor.u32 %v10082_v29, %v8760_v24  ;;  %v8769_v52 = vor.u32 %v10083_v35, %v8768_v32  ;;  %v8773_v53 = vor.u32 %v10081_v22, %v8770_v13  ;;  %v8776_v35 = vld [vmem:[#allocation7 + $0x480] sm:$0xf]  ;;  %v10086_v22 = vld [vmem:[#allocation7 + $0x48c] sm:$0xf0]  ;;  %v10084_v13 = vld [vmem:[#allocation7 + $0x484] sm:$0xf] }
 0x310   :  { %3463 = vrot.lane.b32.xlu2 %v3043_v56, %s10615_s19 }
 0x311   :  { %4071 = vrot.lane.b32.xlu1 %v3043_v56, %s10616_s1 }
 0x312   :  { %v3386_v5 = vpop.permute.xlu0 %3385  ;;  %v3417_v8 = vpop.permute.xlu2 %3416 }
 0x313   :  { %3405 = vst.msk [vmem:[#allocation2 + $0x28] sm:$0xff] %vm3399_vm6, %v3386_v5  ;;  %v2716_v9 = vpop.f32.mrf.mxu2 }
 0x314   :  { %3441 = vst.msk [vmem:[#allocation2] sm:$0xff] %vm3440_vm7, %v3417_v8  ;;  %v2717_v14 = vadd.f32 %v2716_v9, %v2388_v1  ;;  %v3045_v18 = vpop.f32.mrf.mxu3  ;;  %v2060_v26 = vpop.f32.mrf.mxu0 }
 0x315   :  { %v2389_v27 = vpop.f32.mrf.mxu1 }
 0x316   :  { %v3046_v28 = vadd.f32 %v3045_v18, %v2717_v14  ;;  %v2390_v45 = vadd.f32 %v2389_v27, %v2060_v26 }
 0x318   :  { %4073 = vrot.lane.b32.xlu0 %v3046_v28, %s10616_s1  ;;  %3465 = vrot.lane.b32.xlu2 %v3046_v28, %s10615_s19 }
 0x31a   :  { %v11092_v39 = vpop.permute.xlu0 %4009  ;;  %v11094_v50 = vpop.permute.xlu2 %4032 }
 0x31b   :  { %13180 = vst [vmem:[#allocation34_spill] sm:$0xff] %v11092_v39  ;;  %v2718_v7 = vpop.f32.mrf.mxu2 }
 0x31c   :  { %v2719_v56 = vadd.f32 %v2718_v7, %v2390_v45  ;;  %v3047_v1 = vpop.f32.mrf.mxu3  ;;  %v2063_v5 = vpop.f32.mrf.mxu0  ;;  %v8778_v45 = vld [vmem:[#allocation7 + $0x490] sm:$0xf0]  ;;  %v10085_v7 = vld [vmem:[#allocation7 + $0x48c] sm:$0xf] }
 0x31d   :  { %v2392_v8 = vpop.f32.mrf.mxu1 }
 0x31e   :  { %v3048_v9 = vadd.f32 %v3047_v1, %v2719_v56  ;;  %2102 = vmatmul.bf16.gmra.mxu0 %v8761_v51  ;;  %2431 = vmatmul.bf16.gmra.mxu1 %v8765_v23  ;;  %v2393_v14 = vadd.f32 %v2392_v8, %v2063_v5  ;;  %v8784_v51 = vld [vmem:[#allocation7 + $0x488] sm:$0xf]  ;;  %v10087_v23 = vld [vmem:[#allocation7 + $0x494] sm:$0xf0]  ;;  %v8777_v1 = vor.u32 %v10086_v22, %v8776_v35 }
 0x31f   :  { %2760 = vmatmul.bf16.gmra.mxu2 %v8769_v52  ;;  %3089 = vmatmul.bf16.gmra.mxu3 %v8773_v53  ;;  %v8786_v52 = vld [vmem:[#allocation7 + $0x498] sm:$0xf0]  ;;  %v8781_v5 = vor.u32 %v10084_v13, %v8778_v45 }
 0x320   :  { %4075 = vrot.lane.b32.xlu1 %v3048_v9, %s10616_s1  ;;  %3467 = vrot.lane.b32.xlu0 %v3048_v9, %s10615_s19 }
 0x322   :  { %v3388_v18 = vpop.permute.xlu0 %3387  ;;  %v3390_v26 = vpop.permute.xlu1 %3389 }
 0x323   :  { %3406 = vst.msk [vmem:[#allocation2 + $0x30] sm:$0xff] %vm3399_vm6, %v3388_v18  ;;  %v3421_v27 = vpop.permute.xlu2 %3420  ;;  %v2721_v28 = vpop.f32.mrf.mxu2  ;;  %v8789_v18 = vor.u32 %v10085_v7, %v8786_v52  ;;  %v8792_v7 = vld [vmem:[#allocation7 + $0x4a0] sm:$0xf]  ;;  %v10090_v52 = vld [vmem:[#allocation7 + $0x4ac] sm:$0xf0] }
 0x324   :  { %3407 = vst.msk [vmem:[#allocation2 + $0x38] sm:$0xff] %vm3399_vm6, %v3390_v26  ;;  %v2722_v24 = vadd.f32 %v2721_v28, %v2393_v14  ;;  %v3050_v29 = vpop.f32.mrf.mxu3  ;;  %v2065_v31 = vpop.f32.mrf.mxu0  ;;  %v8785_v14 = vor.u32 %v10087_v23, %v8784_v51  ;;  %vm3850_vm6 = vcmask 130168  }
 0x325   :  { %3443 = vst.msk [vmem:[#allocation2 + $0x10] sm:$0xff] %vm3440_vm7, %v3421_v27  ;;  %v2394_v25 = vpop.f32.mrf.mxu1 }
 0x326   :  { %v3051_v32 = vadd.f32 %v3050_v29, %v2722_v24  ;;  %v2395_v53 = vadd.f32 %v2394_v25, %v2065_v31 }
 0x328   :  { %4077 = vrot.lane.b32.xlu0 %v3051_v32, %s10616_s1  ;;  %3469 = vrot.lane.b32.xlu2 %v3051_v32, %s10615_s19 }
 0x32a   :  { %v11103_v56 = vpop.permute.xlu0 %4013 }
 0x32b   :  { %13181 = vst [vmem:[#allocation35_spill] sm:$0xff] %v11103_v56  ;;  %v11105_v8 = vpop.permute.xlu2 %4038  ;;  %v2723_v9 = vpop.f32.mrf.mxu2 }
 0x32c   :  { %v2724_v26 = vadd.f32 %v2723_v9, %v2395_v53  ;;  %v3052_v27 = vpop.f32.mrf.mxu3  ;;  %v2068_v28 = vpop.f32.mrf.mxu0  ;;  %v10088_v53 = vld [vmem:[#allocation7 + $0x4a4] sm:$0xf]  ;;  %v10091_v9 = vld [vmem:[#allocation7 + $0x4b4] sm:$0xf0] }
 0x32d   :  { %v2397_v24 = vpop.f32.mrf.mxu1 }
 0x32e   :  { %v3053_v29 = vadd.f32 %v3052_v27, %v2724_v26  ;;  %2107 = vmatmul.bf16.gmra.mxu0 %v8777_v1  ;;  %2436 = vmatmul.bf16.gmra.mxu1 %v8781_v5  ;;  %v2398_v32 = vadd.f32 %v2397_v24, %v2068_v28  ;;  %v8794_v1 = vld [vmem:[#allocation7 + $0x4b0] sm:$0xf0]  ;;  %v8800_v5 = vld [vmem:[#allocation7 + $0x4a8] sm:$0xf]  ;;  %v8793_v28 = vor.u32 %v10090_v52, %v8792_v7 }
 0x32f   :  { %2765 = vmatmul.bf16.gmra.mxu2 %v8785_v14  ;;  %3094 = vmatmul.bf16.gmra.mxu3 %v8789_v18  ;;  %v10089_v14 = vld [vmem:[#allocation7 + $0x4ac] sm:$0xf]  ;;  %v8802_v18 = vld [vmem:[#allocation7 + $0x4b8] sm:$0xf0]  ;;  %v8797_v24 = vor.u32 %v10088_v53, %v8794_v1 }
 0x330   :  { %4079 = vrot.lane.b32.xlu1 %v3053_v29, %s10616_s1  ;;  %3471 = vrot.lane.b32.xlu0 %v3053_v29, %s10615_s19  ;;  %s10629_s19 = smov 13   ;;  %s10630_s1 = smov 14  }
 0x332   :  { %v3419_v31 = vpop.permute.xlu0 %3418 }
 0x333   :  { %3442 = vst.msk [vmem:[#allocation2 + $0x8] sm:$0xff] %vm3440_vm7, %v3419_v31  ;;  %v3425_v25 = vpop.permute.xlu2 %3424  ;;  %v2726_v35 = vpop.f32.mrf.mxu2  ;;  %v8805_v31 = vor.u32 %v10089_v14, %v8802_v18  ;;  %v8808_v14 = vld [vmem:[#allocation7 + $0x4c0] sm:$0xf]  ;;  %v10094_v18 = vld [vmem:[#allocation7 + $0x4cc] sm:$0xf0] }
 0x334   :  { %3445 = vst.msk [vmem:[#allocation2 + $0x20] sm:$0xff] %vm3440_vm7, %v3425_v25  ;;  %v2727_v22 = vadd.f32 %v2726_v35, %v2398_v32  ;;  %v3055_v13 = vpop.f32.mrf.mxu3  ;;  %v2070_v45 = vpop.f32.mrf.mxu0  ;;  %v8801_v32 = vor.u32 %v10091_v9, %v8800_v5 }
 0x335   :  { %v2399_v51 = vpop.f32.mrf.mxu1 }
 0x336   :  { %v3056_v23 = vadd.f32 %v3055_v13, %v2727_v22  ;;  %v2400_v26 = vadd.f32 %v2399_v51, %v2070_v45 }
 0x338   :  { %4098 = vrot.lane.b32.xlu2 %v3056_v23, %s10617_s20  ;;  %3498 = vrot.lane.b32.xlu0 %v3056_v23, %s10618_s27 }
 0x33a   :  { %v11113_v27 = vpop.permute.xlu0 %4034 }
 0x33b   :  { %v2728_v29 = vpop.f32.mrf.mxu2  ;;  %v11117_v45 = vpop.permute.xlu2 %4042 }
 0x33c   :  { %v2729_v25 = vadd.f32 %v2728_v29, %v2400_v26  ;;  %v3057_v35 = vpop.f32.mrf.mxu3  ;;  %v2073_v22 = vpop.f32.mrf.mxu0  ;;  %13182 = vst [vmem:[#allocation36_spill] sm:$0xff] %v11117_v45  ;;  %v10092_v26 = vld [vmem:[#allocation7 + $0x4c4] sm:$0xf]  ;;  %v10093_v29 = vld [vmem:[#allocation7 + $0x4cc] sm:$0xf] }
 0x33d   :  { %v2402_v13 = vpop.f32.mrf.mxu1 }
 0x33e   :  { %v3058_v42 = vadd.f32 %v3057_v35, %v2729_v25  ;;  %2112 = vmatmul.bf16.gmra.mxu0 %v8793_v28  ;;  %2441 = vmatmul.bf16.gmra.mxu1 %v8797_v24  ;;  %v2403_v23 = vadd.f32 %v2402_v13, %v2073_v22  ;;  %v8810_v28 = vld [vmem:[#allocation7 + $0x4d0] sm:$0xf0]  ;;  %v8816_v24 = vld [vmem:[#allocation7 + $0x4c8] sm:$0xf]  ;;  %v8809_v22 = vor.u32 %v10094_v18, %v8808_v14 }
 0x33f   :  { %2770 = vmatmul.bf16.gmra.mxu2 %v8801_v32  ;;  %3099 = vmatmul.bf16.gmra.mxu3 %v8805_v31  ;;  %v8818_v32 = vld [vmem:[#allocation7 + $0x4d8] sm:$0xf0]  ;;  %v11122_v31 = vpop.permute.xlu1 %4036  ;;  %v8813_v13 = vor.u32 %v10092_v26, %v8810_v28 }
 0x340   :  { %4100 = vrot.lane.b32.xlu0 %v3058_v42, %s10617_s20  ;;  %3500 = vrot.lane.b32.xlu1 %v3058_v42, %s10618_s27  ;;  %v10095_v42 = vld [vmem:[#allocation7 + $0x4d4] sm:$0xf0] }
 0x342   :  { %v3423_v51 = vpop.permute.xlu0 %3422 }
 0x343   :  { %3444 = vst.msk [vmem:[#allocation2 + $0x18] sm:$0xff] %vm3440_vm7, %v3423_v51  ;;  %v2731_v7 = vpop.f32.mrf.mxu2  ;;  %v8817_v51 = vor.u32 %v10095_v42, %v8816_v24 }
 0x344   :  { %v2732_v52 = vadd.f32 %v2731_v7, %v2403_v23  ;;  %v3060_v53 = vpop.f32.mrf.mxu3  ;;  %v2075_v1 = vpop.f32.mrf.mxu0  ;;  %v8821_v7 = vor.u32 %v10093_v29, %v8818_v32  ;;  %v8824_v32 = vld [vmem:[#allocation7 + $0x4e0] sm:$0xf] }
 0x345   :  { %v2404_v5 = vpop.f32.mrf.mxu1 }
 0x346   :  { %v3061_v9 = vadd.f32 %v3060_v53, %v2732_v52  ;;  %v2405_v25 = vadd.f32 %v2404_v5, %v2075_v1 }
 0x348   :  { %4102 = vrot.lane.b32.xlu2 %v3061_v9, %s10617_s20  ;;  %3502 = vrot.lane.b32.xlu0 %v3061_v9, %s10618_s27 }
 0x34a   :  { %v3431_v35 = vpop.permute.xlu2 %3430  ;;  %v11127_v1 = vpop.permute.xlu1 %4040 }
 0x34b   :  { %3448 = vst.msk [vmem:[#allocation2 + $0x38] sm:$0xff] %vm3440_vm7, %v3431_v35  ;;  %v2733_v23 = vpop.f32.mrf.mxu2  ;;  %v8832_v35 = vld [vmem:[#allocation7 + $0x4e8] sm:$0xf] }
 0x34c   :  { %v2734_v52 = vadd.f32 %v2733_v23, %v2405_v25  ;;  %v3062_v53 = vpop.f32.mrf.mxu3  ;;  %v2078_v3 = vpop.f32.mrf.mxu0  ;;  %13183 = vst [vmem:[#allocation37_spill] sm:$0xff] %v11127_v1  ;;  %v10098_v25 = vld [vmem:[#allocation7 + $0x4ec] sm:$0xf0] }
 0x34d   :  { %v2407_v63 = vpop.f32.mrf.mxu1 }
 0x34e   :  { %v3063_v40 = vadd.f32 %v3062_v53, %v2734_v52  ;;  %2117 = vmatmul.bf16.gmra.mxu0 %v8809_v22  ;;  %2446 = vmatmul.bf16.gmra.mxu1 %v8813_v13  ;;  %v2408_v9 = vadd.f32 %v2407_v63, %v2078_v3  ;;  %v10096_v63 = vld [vmem:[#allocation7 + $0x4e4] sm:$0xf]  ;;  %v8826_v3 = vld [vmem:[#allocation7 + $0x4f0] sm:$0xf0]  ;;  %v10097_v22 = vld [vmem:[#allocation7 + $0x4ec] sm:$0xf]  ;;  %v8825_v52 = vor.u32 %v10098_v25, %v8824_v32 }
 0x34f   :  { %2775 = vmatmul.bf16.gmra.mxu2 %v8817_v51  ;;  %3104 = vmatmul.bf16.gmra.mxu3 %v8821_v7  ;;  %v8834_v13 = vld [vmem:[#allocation7 + $0x4f8] sm:$0xf0]  ;;  %v8829_v53 = vor.u32 %v10096_v63, %v8826_v3 }
 0x350   :  { %4104 = vrot.lane.b32.xlu0 %v3063_v40, %s10617_s20  ;;  %3504 = vrot.lane.b32.xlu1 %v3063_v40, %s10618_s27  ;;  %v10099_v40 = vld [vmem:[#allocation7 + $0x4f4] sm:$0xf0] }
 0x352   :  { %v3427_v5 = vpop.permute.xlu0 %3426  ;;  %v11129_v14 = vpop.permute.xlu2 %4046 }
 0x353   :  { %13184 = vst [vmem:[#allocation38_spill] sm:$0xff] %v11129_v14  ;;  %v2736_v18 = vpop.f32.mrf.mxu2 }
 0x354   :  { %3446 = vst.msk [vmem:[#allocation2 + $0x28] sm:$0xff] %vm3440_vm7, %v3427_v5  ;;  %v2737_v26 = vadd.f32 %v2736_v18, %v2408_v9  ;;  %v3065_v28 = vpop.f32.mrf.mxu3  ;;  %v2080_v24 = vpop.f32.mrf.mxu0  ;;  %v8833_v5 = vor.u32 %v10099_v40, %v8832_v35  ;;  %v8837_v18 = vor.u32 %v10097_v22, %v8834_v13  ;;  %v8840_v13 = vld [vmem:[#allocation7 + $0x500] sm:$0xf] }
 0x355   :  { %v2409_v42 = vpop.f32.mrf.mxu1 }
 0x356   :  { %v3066_v29 = vadd.f32 %v3065_v28, %v2737_v26  ;;  %v2410_v23 = vadd.f32 %v2409_v42, %v2080_v24 }
 0x358   :  { %3506 = vrot.lane.b32.xlu2 %v3066_v29, %s10618_s27 }
 0x35a   :  { %v3429_v51 = vpop.permute.xlu1 %3428  ;;  %v11133_v7 = vpop.permute.xlu2 %4065 }
 0x35b   :  { %3447 = vst.msk [vmem:[#allocation2 + $0x30] sm:$0xff] %vm3440_vm7, %v3429_v51  ;;  %v2738_v9 = vpop.f32.mrf.mxu2  ;;  %v10100_v51 = vld [vmem:[#allocation7 + $0x504] sm:$0xf]  ;;  %vm3891_vm7 = vcmask 138368  }
 0x35c   :  { %v2739_v26 = vadd.f32 %v2738_v9, %v2410_v23  ;;  %v3067_v28 = vpop.f32.mrf.mxu3  ;;  %v2083_v11 = vpop.f32.mrf.mxu0  ;;  %v10102_v23 = vld [vmem:[#allocation7 + $0x50c] sm:$0xf0] }
 0x35d   :  { %v2412_v14 = vpop.f32.mrf.mxu1 }
 0x35e   :  { %v3068_v56 = vadd.f32 %v3067_v28, %v2739_v26  ;;  %2122 = vmatmul.bf16.gmra.mxu0 %v8825_v52  ;;  %2451 = vmatmul.bf16.gmra.mxu1 %v8829_v53  ;;  %v2413_v24 = vadd.f32 %v2412_v14, %v2083_v11  ;;  %v8842_v11 = vld [vmem:[#allocation7 + $0x510] sm:$0xf0]  ;;  %v8848_v14 = vld [vmem:[#allocation7 + $0x508] sm:$0xf]  ;;  %v10101_v52 = vld [vmem:[#allocation7 + $0x50c] sm:$0xf]  ;;  %v8841_v26 = vor.u32 %v10102_v23, %v8840_v13 }
 0x35f   :  { %2780 = vmatmul.bf16.gmra.mxu2 %v8833_v5  ;;  %3109 = vmatmul.bf16.gmra.mxu3 %v8837_v18  ;;  %v8850_v53 = vld [vmem:[#allocation7 + $0x518] sm:$0xf0]  ;;  %v8845_v28 = vor.u32 %v10100_v51, %v8842_v11 }
 0x360   :  { %4106 = vrot.lane.b32.xlu2 %v3066_v29, %s10617_s20  ;;  %3508 = vrot.lane.b32.xlu0 %v3068_v56, %s10618_s27  ;;  %v10103_v29 = vld [vmem:[#allocation7 + $0x514] sm:$0xf0] }
 0x362   :  { %v11138_v42 = vpop.permute.xlu1 %4044  ;;  %v3460_v32 = vpop.permute.xlu2 %3459 }
 0x363   :  { %13185 = vst [vmem:[#allocation39_spill] sm:$0xff] %v11138_v42  ;;  %v2741_v25 = vpop.f32.mrf.mxu2 }
 0x364   :  { %3483 = vst.msk [vmem:[#allocation2 + $0x8] sm:$0xff] %vm3481_vm8, %v3460_v32  ;;  %v2742_v63 = vadd.f32 %v2741_v25, %v2413_v24  ;;  %v3070_v3 = vpop.f32.mrf.mxu3  ;;  %v2085_v35 = vpop.f32.mrf.mxu0  ;;  %v8849_v32 = vor.u32 %v10103_v29, %v8848_v14  ;;  %v8853_v25 = vor.u32 %v10101_v52, %v8850_v53  ;;  %v8856_v52 = vld [vmem:[#allocation7 + $0x520] sm:$0xf]  ;;  %v10106_v53 = vld [vmem:[#allocation7 + $0x52c] sm:$0xf0] }
 0x365   :  { %v2414_v40 = vpop.f32.mrf.mxu1 }
 0x366   :  { %v3071_v22 = vadd.f32 %v3070_v3, %v2742_v63  ;;  %v2415_v9 = vadd.f32 %v2414_v40, %v2085_v35 }
 0x368   :  { %4108 = vrot.lane.b32.xlu0 %v3068_v56, %s10617_s20  ;;  %4110 = vrot.lane.b32.xlu2 %v3071_v22, %s10617_s20 }
 0x36a   :  { %v3458_v5 = vpop.permute.xlu1 %3457  ;;  %v3464_v18 = vpop.permute.xlu2 %3463 }
 0x36b   :  { %3482 = vst.msk [vmem:[#allocation2] sm:$0xff] %vm3481_vm8, %v3458_v5  ;;  %v2743_v24 = vpop.f32.mrf.mxu2  ;;  %v8858_v5 = vld [vmem:[#allocation7 + $0x530] sm:$0xf0] }
 0x36c   :  { %3485 = vst.msk [vmem:[#allocation2 + $0x18] sm:$0xff] %vm3481_vm8, %v3464_v18  ;;  %v2744_v63 = vadd.f32 %v2743_v24, %v2415_v9  ;;  %v3072_v3 = vpop.f32.mrf.mxu3  ;;  %v2088_v56 = vpop.f32.mrf.mxu0  ;;  %v10104_v9 = vld [vmem:[#allocation7 + $0x524] sm:$0xf]  ;;  %v8864_v18 = vld [vmem:[#allocation7 + $0x528] sm:$0xf] }
 0x36d   :  { %v2417_v42 = vpop.f32.mrf.mxu1 }
 0x36e   :  { %v3073_v36 = vadd.f32 %v3072_v3, %v2744_v63  ;;  %2127 = vmatmul.bf16.gmra.mxu0 %v8841_v26  ;;  %2456 = vmatmul.bf16.gmra.mxu1 %v8845_v28  ;;  %v2418_v35 = vadd.f32 %v2417_v42, %v2088_v56  ;;  %v10107_v42 = vld [vmem:[#allocation7 + $0x534] sm:$0xf0]  ;;  %v8866_v28 = vld [vmem:[#allocation7 + $0x538] sm:$0xf0] }
 0x36f   :  { %2785 = vmatmul.bf16.gmra.mxu2 %v8849_v32  ;;  %3114 = vmatmul.bf16.gmra.mxu3 %v8853_v25  ;;  %v8857_v32 = vor.u32 %v10106_v53, %v8856_v52  ;;  %v8861_v25 = vor.u32 %v10104_v9, %v8858_v5  ;;  %v8865_v56 = vor.u32 %v10107_v42, %v8864_v18 }
 0x370   :  { %3510 = vrot.lane.b32.xlu0 %v3071_v22, %s10618_s27  ;;  %3512 = vrot.lane.b32.xlu1 %v3073_v36, %s10618_s27  ;;  %v10105_v22 = vld [vmem:[#allocation7 + $0x52c] sm:$0xf]  ;;  %s10632_s27 = smov 30  }
 0x372   :  { %v3466_v40 = vpop.permute.xlu2 %3465  ;;  %v11148_v26 = vpop.permute.xlu0 %4067 }
 0x373   :  { %3486 = vst.msk [vmem:[#allocation2 + $0x20] sm:$0xff] %vm3481_vm8, %v3466_v40  ;;  %v2746_v13 = vpop.f32.mrf.mxu2 }
 0x374   :  { %v2747_v23 = vadd.f32 %v2746_v13, %v2418_v35  ;;  %v3075_v51 = vpop.f32.mrf.mxu3  ;;  %v2090_v11 = vpop.f32.mrf.mxu0  ;;  %v8869_v35 = vor.u32 %v10105_v22, %v8866_v28  ;;  %v8872_v22 = vld [vmem:[#allocation7 + $0x540] sm:$0xf]  ;;  %v10110_v28 = vld [vmem:[#allocation7 + $0x54c] sm:$0xf0] }
 0x375   :  { %v2419_v14 = vpop.f32.mrf.mxu1 }
 0x376   :  { %v3076_v29 = vadd.f32 %v3075_v51, %v2747_v23  ;;  %v2420_v24 = vadd.f32 %v2419_v14, %v2090_v11 }
 0x378   :  { %4112 = vrot.lane.b32.xlu0 %v3073_v36, %s10617_s20  ;;  %3539 = vrot.lane.b32.xlu2 %v3076_v29, %s10604_s25  ;;  %s10631_s20 = smov 29  }
 0x37a   :  { %v11155_v11 = vpop.permute.xlu0 %4069 }
 0x37b   :  { %v3462_v63 = vpop.permute.xlu1 %3461  ;;  %v2748_v3 = vpop.f32.mrf.mxu2 }
 0x37c   :  { %3484 = vst.msk [vmem:[#allocation2 + $0x10] sm:$0xff] %vm3481_vm8, %v3462_v63  ;;  %v2749_v40 = vadd.f32 %v2748_v3, %v2420_v24  ;;  %v3077_v13 = vpop.f32.mrf.mxu3  ;;  %v2093_v23 = vpop.f32.mrf.mxu0  ;;  %v10108_v24 = vld [vmem:[#allocation7 + $0x544] sm:$0xf]  ;;  %v10109_v63 = vld [vmem:[#allocation7 + $0x54c] sm:$0xf] }
 0x37d   :  { %v2422_v51 = vpop.f32.mrf.mxu1  ;;  %v8882_v3 = vld [vmem:[#allocation7 + $0x558] sm:$0xf0] }
 0x37e   :  { %2132 = vmatmul.bf16.gmra.mxu0 %v8857_v32  ;;  %2461 = vmatmul.bf16.gmra.mxu1 %v8861_v25  ;;  %v3078_v36 = vadd.f32 %v3077_v13, %v2749_v40  ;;  %v2423_v21 = vadd.f32 %v2422_v51, %v2093_v23  ;;  %v8874_v32 = vld [vmem:[#allocation7 + $0x550] sm:$0xf0]  ;;  %v8880_v25 = vld [vmem:[#allocation7 + $0x548] sm:$0xf]  ;;  %v8885_v51 = vor.u32 %v10109_v63, %v8882_v3  ;;  %v10112_v63 = vld [vmem:[#allocation7 + $0x564] sm:$0xf] }
 0x37f   :  { %2790 = vmatmul.bf16.gmra.mxu2 %v8865_v56  ;;  %3119 = vmatmul.bf16.gmra.mxu3 %v8869_v35  ;;  %v8873_v35 = vor.u32 %v10110_v28, %v8872_v22  ;;  %v8877_v40 = vor.u32 %v10108_v24, %v8874_v32  ;;  %v8890_v3 = vld [vmem:[#allocation7 + $0x570] sm:$0xf0] }
 0x380   :  { %4131 = vrot.lane.b32.xlu2 %v3076_v29, %s10619_s21  ;;  %3541 = vrot.lane.b32.xlu0 %v3078_v36, %s10604_s25  ;;  %v10111_v29 = vld [vmem:[#allocation7 + $0x554] sm:$0xf0] }
 0x381   :  { %v8881_v23 = vor.u32 %v10111_v29, %v8880_v25  ;;  %v8888_v25 = vld [vmem:[#allocation7 + $0x560] sm:$0xf]  ;;  %v10114_v29 = vld [vmem:[#allocation7 + $0x56c] sm:$0xf0] }
 0x382   :  { %v3470_v14 = vpop.permute.xlu2 %3469 }
 0x383   :  { %3488 = vst.msk [vmem:[#allocation2 + $0x30] sm:$0xff] %vm3481_vm8, %v3470_v14  ;;  %v2751_v52 = vpop.f32.mrf.mxu2 }
 0x384   :  { %v2752_v53 = vadd.f32 %v2751_v52, %v2423_v21  ;;  %v3080_v9 = vpop.f32.mrf.mxu3  ;;  %v2095_v5 = vpop.f32.mrf.mxu0 }
 0x385   :  { %v2424_v18 = vpop.f32.mrf.mxu1 }
 0x386   :  { %v3081_v42 = vadd.f32 %v3080_v9, %v2752_v53  ;;  %v2425_v56 = vadd.f32 %v2424_v18, %v2095_v5 }
 0x388   :  { %4133 = vrot.lane.b32.xlu0 %v3078_v36, %s10619_s21  ;;  %4135 = vrot.lane.b32.xlu1 %v3081_v42, %s10619_s21 }
 0x389   :  { %3543 = vrot.lane.b32.xlu2 %v3081_v42, %s10604_s25 }
 0x38a   :  { %v11161_v21 = vpop.permute.xlu0 %4073 }
 0x38b   :  { %13186 = vst [vmem:[#allocation40_spill] sm:$0xff] %v11161_v21  ;;  %v2753_v13 = vpop.f32.mrf.mxu2 }
 0x38c   :  { %v2754_v14 = vadd.f32 %v2753_v13, %v2425_v56  ;;  %v3082_v52 = vpop.f32.mrf.mxu3  ;;  %v2098_v53 = vpop.f32.mrf.mxu0  ;;  %v8896_v56 = vld [vmem:[#allocation7 + $0x568] sm:$0xf]  ;;  %v8898_v13 = vld [vmem:[#allocation7 + $0x578] sm:$0xf0] }
 0x38d   :  { %v2427_v9 = vpop.f32.mrf.mxu1 }
 0x38e   :  { %v3083_v36 = vadd.f32 %v3082_v52, %v2754_v14  ;;  %2137 = vmatmul.bf16.gmra.mxu0 %v8873_v35  ;;  %2466 = vmatmul.bf16.gmra.mxu1 %v8877_v40  ;;  %v2428_v60 = vadd.f32 %v2427_v9, %v2098_v53  ;;  %v10115_v35 = vld [vmem:[#allocation7 + $0x574] sm:$0xf0]  ;;  %v10113_v40 = vld [vmem:[#allocation7 + $0x56c] sm:$0xf]  ;;  %v8889_v14 = vor.u32 %v10114_v29, %v8888_v25 }
 0x38f   :  { %2795 = vmatmul.bf16.gmra.mxu2 %v8881_v23  ;;  %3124 = vmatmul.bf16.gmra.mxu3 %v8885_v51  ;;  %v11168_v23 = vpop.permute.xlu1 %4071  ;;  %v8893_v52 = vor.u32 %v10112_v63, %v8890_v3  ;;  %v8897_v9 = vor.u32 %v10115_v35, %v8896_v56 }
 0x390   :  { %3545 = vrot.lane.b32.xlu0 %v3083_v36, %s10604_s25 }
 0x391   :  { %4137 = vrot.lane.b32.xlu2 %v3083_v36, %s10619_s21  ;;  %v8901_v36 = vor.u32 %v10113_v40, %v8898_v13  ;;  %v8904_v13 = vld [vmem:[#allocation7 + $0x580] sm:$0xf] }
 0x392   :  { %v3468_v5 = vpop.permute.xlu0 %3467  ;;  %v11176_v25 = vpop.permute.xlu2 %4098 }
 0x393   :  { %3487 = vst.msk [vmem:[#allocation2 + $0x28] sm:$0xff] %vm3481_vm8, %v3468_v5  ;;  %v2756_v18 = vpop.f32.mrf.mxu2 }
 0x394   :  { %v2757_v42 = vadd.f32 %v2756_v18, %v2428_v60  ;;  %v3085_v22 = vpop.f32.mrf.mxu3  ;;  %v2100_v28 = vpop.f32.mrf.mxu0 }
 0x395   :  { %v2429_v24 = vpop.f32.mrf.mxu1 }
 0x396   :  { %v3086_v32 = vadd.f32 %v3085_v22, %v2757_v42  ;;  %v2430_v51 = vadd.f32 %v2429_v24, %v2100_v28 }
 0x397   :  { %v11174_v28 = vpop.permute.xlu1 %4075 }
 0x398   :  { %4139 = vrot.lane.b32.xlu1 %v3086_v32, %s10619_s21  ;;  %13188 = vst [vmem:[#allocation42_spill] sm:$0xff] %v11174_v28 }
 0x399   :  { %3547 = vrot.lane.b32.xlu2 %v3086_v32, %s10604_s25 }
 0x39a   :  { %v11170_v60 = vpop.permute.xlu0 %4077 }
 0x39b   :  { %13187 = vst [vmem:[#allocation41_spill] sm:$0xff] %v11170_v60  ;;  %v2758_v53 = vpop.f32.mrf.mxu2 }
 0x39c   :  { %v2759_v5 = vadd.f32 %v2758_v53, %v2430_v51  ;;  %v3087_v18 = vpop.f32.mrf.mxu3  ;;  %v2103_v42 = vpop.f32.mrf.mxu0  ;;  %v10118_v51 = vld [vmem:[#allocation7 + $0x58c] sm:$0xf0]  ;;  %v8912_v53 = vld [vmem:[#allocation7 + $0x588] sm:$0xf] }
 0x39d   :  { %v2432_v22 = vpop.f32.mrf.mxu1 }
 0x39e   :  { %v3088_v33 = vadd.f32 %v3087_v18, %v2759_v5  ;;  %2142 = vmatmul.bf16.gmra.mxu0 %v8889_v14  ;;  %2471 = vmatmul.bf16.gmra.mxu1 %v8893_v52  ;;  %v2433_v32 = vadd.f32 %v2432_v22, %v2103_v42  ;;  %v10116_v14 = vld [vmem:[#allocation7 + $0x584] sm:$0xf]  ;;  %v8906_v52 = vld [vmem:[#allocation7 + $0x590] sm:$0xf0]  ;;  %v8905_v22 = vor.u32 %v10118_v51, %v8904_v13 }
 0x39f   :  { %2800 = vmatmul.bf16.gmra.mxu2 %v8897_v9  ;;  %3129 = vmatmul.bf16.gmra.mxu3 %v8901_v36  ;;  %v10117_v9 = vld [vmem:[#allocation7 + $0x58c] sm:$0xf]  ;;  %v8914_v36 = vld [vmem:[#allocation7 + $0x598] sm:$0xf0] }
 0x3a0   :  { %3549 = vrot.lane.b32.xlu0 %v3088_v33, %s10604_s25 }
 0x3a1   :  { %4141 = vrot.lane.b32.xlu2 %v3088_v33, %s10619_s21  ;;  %v10119_v33 = vld [vmem:[#allocation7 + $0x594] sm:$0xf0] }
 0x3a2   :  { %v3472_v24 = vpop.permute.xlu0 %3471  ;;  %v11180_v5 = vpop.permute.xlu1 %4079 }
 0x3a3   :  { %3489 = vst.msk [vmem:[#allocation2 + $0x38] sm:$0xff] %vm3481_vm8, %v3472_v24  ;;  %v2761_v29 = vpop.f32.mrf.mxu2  ;;  %v11182_v24 = vpop.permute.xlu2 %4102  ;;  %vm3924_vm8 = vcmask 146568  }
 0x3a4   :  { %v2762_v63 = vadd.f32 %v2761_v29, %v2433_v32  ;;  %v3090_v3 = vpop.f32.mrf.mxu3  ;;  %v2105_v56 = vpop.f32.mrf.mxu0  ;;  %13189 = vst [vmem:[#allocation43_spill] sm:$0xff] %v11180_v5  ;;  %v8909_v32 = vor.u32 %v10116_v14, %v8906_v52 }
 0x3a5   :  { %v2434_v35 = vpop.f32.mrf.mxu1  ;;  %13190 = vst [vmem:[#allocation44_spill] sm:$0xff] %v11182_v24 }
 0x3a6   :  { %v3091_v40 = vadd.f32 %v3090_v3, %v2762_v63  ;;  %v2435_v18 = vadd.f32 %v2434_v35, %v2105_v56  ;;  %v8913_v63 = vor.u32 %v10119_v33, %v8912_v53  ;;  %v8917_v3 = vor.u32 %v10117_v9, %v8914_v36  ;;  %v8920_v9 = vld [vmem:[#allocation7 + $0x5a0] sm:$0xf]  ;;  %v8928_v36 = vld [vmem:[#allocation7 + $0x5a8] sm:$0xf] }
 0x3a8   :  { %3551 = vrot.lane.b32.xlu1 %v3091_v40, %s10604_s25 }
 0x3aa   :  { %v3499_v42 = vpop.permute.xlu0 %3498 }
 0x3ab   :  { %3523 = vst.msk [vmem:[#allocation2] sm:$0xff] %vm3522_vm9, %v3499_v42  ;;  %v2763_v29 = vpop.f32.mrf.mxu2  ;;  %v10121_v42 = vld [vmem:[#allocation7 + $0x5ac] sm:$0xf] }
 0x3ac   :  { %v2764_v60 = vadd.f32 %v2763_v29, %v2435_v18  ;;  %v3092_v21 = vpop.f32.mrf.mxu3  ;;  %v2108_v1 = vpop.f32.mrf.mxu0  ;;  %v10123_v18 = vld [vmem:[#allocation7 + $0x5b4] sm:$0xf0] }
 0x3ad   :  { %v2437_v54 = vpop.f32.mrf.mxu1 }
 0x3ae   :  { %2147 = vmatmul.bf16.gmra.mxu0 %v8905_v22  ;;  %2476 = vmatmul.bf16.gmra.mxu1 %v8909_v32  ;;  %v3093_v47 = vadd.f32 %v3092_v21, %v2764_v60  ;;  %v2438_v56 = vadd.f32 %v2437_v54, %v2108_v1  ;;  %v10122_v54 = vld [vmem:[#allocation7 + $0x5ac] sm:$0xf0]  ;;  %v10120_v1 = vld [vmem:[#allocation7 + $0x5a4] sm:$0xf]  ;;  %v8930_v22 = vld [vmem:[#allocation7 + $0x5b8] sm:$0xf0] }
 0x3af   :  { %2805 = vmatmul.bf16.gmra.mxu2 %v8913_v63  ;;  %3134 = vmatmul.bf16.gmra.mxu3 %v8917_v3  ;;  %v8921_v63 = vor.u32 %v10122_v54, %v8920_v9 }
 0x3b0   :  { %4143 = vrot.lane.b32.xlu1 %v3091_v40, %s10619_s21  ;;  %3553 = vrot.lane.b32.xlu2 %v3093_v47, %s10604_s25  ;;  %v8922_v40 = vld [vmem:[#allocation7 + $0x5b0] sm:$0xf0] }
 0x3b1   :  { %v8925_v3 = vor.u32 %v10120_v1, %v8922_v40 }
 0x3b2   :  { %v11187_v35 = vpop.permute.xlu0 %4100  ;;  %v3501_v13 = vpop.permute.xlu1 %3500 }
 0x3b3   :  { %3524 = vst.msk [vmem:[#allocation2 + $0x8] sm:$0xff] %vm3522_vm9, %v3501_v13  ;;  %v3507_v51 = vpop.permute.xlu2 %3506  ;;  %v2766_v14 = vpop.f32.mrf.mxu2  ;;  %v8929_v13 = vor.u32 %v10123_v18, %v8928_v36  ;;  %v8936_v18 = vld [vmem:[#allocation7 + $0x5c0] sm:$0xf] }
 0x3b4   :  { %3527 = vst.msk [vmem:[#allocation2 + $0x20] sm:$0xff] %vm3522_vm9, %v3507_v51  ;;  %v2767_v52 = vadd.f32 %v2766_v14, %v2438_v56  ;;  %v3095_v53 = vpop.f32.mrf.mxu3  ;;  %v2110_v33 = vpop.f32.mrf.mxu0  ;;  %v8933_v51 = vor.u32 %v10121_v42, %v8930_v22  ;;  %v10126_v42 = vld [vmem:[#allocation7 + $0x5cc] sm:$0xf0]  ;;  %v10124_v22 = vld [vmem:[#allocation7 + $0x5c4] sm:$0xf] }
 0x3b5   :  { %v2439_v21 = vpop.f32.mrf.mxu1 }
 0x3b6   :  { %v3096_v60 = vadd.f32 %v3095_v53, %v2767_v52  ;;  %v2440_v32 = vadd.f32 %v2439_v21, %v2110_v33 }
 0x3b8   :  { %4145 = vrot.lane.b32.xlu2 %v3093_v47, %s10619_s21  ;;  %4164 = vrot.lane.b32.xlu0 %v3096_v60, %s10620_s2 }
 0x3b9   :  { %3580 = vrot.lane.b32.xlu1 %v3096_v60, %s10621_s23 }
 0x3ba   :  { %v3503_v29 = vpop.permute.xlu0 %3502 }
 0x3bb   :  { %3525 = vst.msk [vmem:[#allocation2 + $0x10] sm:$0xff] %vm3522_vm9, %v3503_v29  ;;  %v2768_v56 = vpop.f32.mrf.mxu2  ;;  %v11195_v2 = vpop.permute.xlu2 %4106  ;;  %v8944_v29 = vld [vmem:[#allocation7 + $0x5c8] sm:$0xf] }
 0x3bc   :  { %v2769_v14 = vadd.f32 %v2768_v56, %v2440_v32  ;;  %v3097_v47 = vpop.f32.mrf.mxu3  ;;  %v2113_v52 = vpop.f32.mrf.mxu0  ;;  %13191 = vst [vmem:[#allocation45_spill] sm:$0xff] %v11195_v2  ;;  %v8938_v32 = vld [vmem:[#allocation7 + $0x5d0] sm:$0xf0]  ;;  %v8946_v56 = vld [vmem:[#allocation7 + $0x5d8] sm:$0xf0] }
 0x3bd   :  { %v2442_v53 = vpop.f32.mrf.mxu1 }
 0x3be   :  { %v3098_v5 = vadd.f32 %v3097_v47, %v2769_v14  ;;  %2152 = vmatmul.bf16.gmra.mxu0 %v8921_v63  ;;  %2481 = vmatmul.bf16.gmra.mxu1 %v8925_v3  ;;  %v2443_v33 = vadd.f32 %v2442_v53, %v2113_v52  ;;  %v10127_v63 = vld [vmem:[#allocation7 + $0x5d4] sm:$0xf0]  ;;  %v10125_v3 = vld [vmem:[#allocation7 + $0x5cc] sm:$0xf]  ;;  %v8937_v14 = vor.u32 %v10126_v42, %v8936_v18 }
 0x3bf   :  { %2810 = vmatmul.bf16.gmra.mxu2 %v8929_v13  ;;  %3139 = vmatmul.bf16.gmra.mxu3 %v8933_v51  ;;  %v8941_v47 = vor.u32 %v10124_v22, %v8938_v32  ;;  %v8945_v53 = vor.u32 %v10127_v63, %v8944_v29 }
 0x3c0   :  { %3582 = vrot.lane.b32.xlu2 %v3098_v5, %s10621_s23 }
 0x3c1   :  { %4166 = vrot.lane.b32.xlu1 %v3098_v5, %s10620_s2 }
 0x3c2   :  { %v3505_v21 = vpop.permute.xlu1 %3504  ;;  %v11201_v5 = vpop.permute.xlu0 %4104 }
 0x3c3   :  { %3526 = vst.msk [vmem:[#allocation2 + $0x18] sm:$0xff] %vm3522_vm9, %v3505_v21  ;;  %v2771_v60 = vpop.f32.mrf.mxu2  ;;  %v11203_v13 = vpop.permute.xlu2 %4110 }
 0x3c4   :  { %v2772_v9 = vadd.f32 %v2771_v60, %v2443_v33  ;;  %v3100_v54 = vpop.f32.mrf.mxu3  ;;  %v2115_v1 = vpop.f32.mrf.mxu0  ;;  %13192 = vst [vmem:[#allocation46_spill] sm:$0xff] %v11203_v13  ;;  %v8949_v33 = vor.u32 %v10125_v3, %v8946_v56  ;;  %v8952_v3 = vld [vmem:[#allocation7 + $0x5e0] sm:$0xf]  ;;  %v10130_v56 = vld [vmem:[#allocation7 + $0x5ec] sm:$0xf0] }
 0x3c5   :  { %v2444_v40 = vpop.f32.mrf.mxu1 }
 0x3c6   :  { %v3101_v36 = vadd.f32 %v3100_v54, %v2772_v9  ;;  %v2445_v51 = vadd.f32 %v2444_v40, %v2115_v1 }
 0x3c9   :  { %3584 = vrot.lane.b32.xlu1 %v3101_v36, %s10621_s23 }
 0x3cb   :  { %v2773_v52 = vpop.f32.mrf.mxu2 }
 0x3cc   :  { %v2774_v21 = vadd.f32 %v2773_v52, %v2445_v51  ;;  %v3102_v60 = vpop.f32.mrf.mxu3  ;;  %v2118_v9 = vpop.f32.mrf.mxu0  ;;  %v10128_v51 = vld [vmem:[#allocation7 + $0x5e4] sm:$0xf]  ;;  %v10129_v52 = vld [vmem:[#allocation7 + $0x5ec] sm:$0xf] }
 0x3cd   :  { %v2447_v54 = vpop.f32.mrf.mxu1 }
 0x3ce   :  { %v3103_v2 = vadd.f32 %v3102_v60, %v2774_v21  ;;  %2157 = vmatmul.bf16.gmra.mxu0 %v8937_v14  ;;  %2486 = vmatmul.bf16.gmra.mxu1 %v8941_v47  ;;  %v2448_v16 = vadd.f32 %v2447_v54, %v2118_v9  ;;  %v8954_v14 = vld [vmem:[#allocation7 + $0x5f0] sm:$0xf0]  ;;  %v8960_v47 = vld [vmem:[#allocation7 + $0x5e8] sm:$0xf]  ;;  %v8953_v60 = vor.u32 %v10130_v56, %v8952_v3 }
 0x3cf   :  { %2815 = vmatmul.bf16.gmra.mxu2 %v8945_v53  ;;  %3144 = vmatmul.bf16.gmra.mxu3 %v8949_v33  ;;  %v8962_v53 = vld [vmem:[#allocation7 + $0x5f8] sm:$0xf0]  ;;  %v8957_v9 = vor.u32 %v10128_v51, %v8954_v14 }
 0x3d0   :  { %3586 = vrot.lane.b32.xlu2 %v3103_v2, %s10621_s23 }
 0x3d1   :  { %4168 = vrot.lane.b32.xlu1 %v3101_v36, %s10620_s2  ;;  %v10131_v36 = vld [vmem:[#allocation7 + $0x5f4] sm:$0xf0] }
 0x3d2   :  { %v3509_v1 = vpop.permute.xlu0 %3508  ;;  %v3540_v40 = vpop.permute.xlu2 %3539 }
 0x3d3   :  { %3528 = vst.msk [vmem:[#allocation2 + $0x28] sm:$0xff] %vm3522_vm9, %v3509_v1  ;;  %v2776_v18 = vpop.f32.mrf.mxu2  ;;  %v8961_v1 = vor.u32 %v10131_v36, %v8960_v47 }
 0x3d4   :  { %3564 = vst.msk [vmem:[#allocation2] sm:$0xff] %vm3563_vm10, %v3540_v40  ;;  %v2777_v42 = vadd.f32 %v2776_v18, %v2448_v16  ;;  %v3105_v22 = vpop.f32.mrf.mxu3  ;;  %v2120_v32 = vpop.f32.mrf.mxu0  ;;  %v8965_v40 = vor.u32 %v10129_v52, %v8962_v53  ;;  %v8968_v53 = vld [vmem:[#allocation7 + $0x600] sm:$0xf] }
 0x3d5   :  { %v2449_v29 = vpop.f32.mrf.mxu1 }
 0x3d6   :  { %v3106_v63 = vadd.f32 %v3105_v22, %v2777_v42  ;;  %v2450_v33 = vadd.f32 %v2449_v29, %v2120_v32 }
 0x3d8   :  { %4170 = vrot.lane.b32.xlu2 %v3103_v2, %s10620_s2  ;;  %4172 = vrot.lane.b32.xlu0 %v3106_v63, %s10620_s2 }
 0x3d9   :  { %3588 = vrot.lane.b32.xlu1 %v3106_v63, %s10621_s23 }
 0x3da   :  { %v11212_v16 = vpop.permute.xlu0 %4108  ;;  %v11214_v21 = vpop.permute.xlu2 %4131 }
 0x3db   :  { %13193 = vst [vmem:[#allocation47_spill] sm:$0xff] %v11212_v16  ;;  %v2778_v54 = vpop.f32.mrf.mxu2 }
 0x3dc   :  { %13194 = vst [vmem:[#allocation48_spill] sm:$0xff] %v11214_v21  ;;  %v2779_v18 = vadd.f32 %v2778_v54, %v2450_v33  ;;  %v3107_v42 = vpop.f32.mrf.mxu3  ;;  %v2123_v2 = vpop.f32.mrf.mxu0  ;;  %v10134_v33 = vld [vmem:[#allocation7 + $0x60c] sm:$0xf0]  ;;  %v10135_v54 = vld [vmem:[#allocation7 + $0x614] sm:$0xf0] }
 0x3dd   :  { %v2452_v22 = vpop.f32.mrf.mxu1 }
 0x3de   :  { %v3108_v13 = vadd.f32 %v3107_v42, %v2779_v18  ;;  %2162 = vmatmul.bf16.gmra.mxu0 %v8953_v60  ;;  %2491 = vmatmul.bf16.gmra.mxu1 %v8957_v9  ;;  %v2453_v63 = vadd.f32 %v2452_v22, %v2123_v2  ;;  %v10132_v60 = vld [vmem:[#allocation7 + $0x604] sm:$0xf]  ;;  %v8970_v9 = vld [vmem:[#allocation7 + $0x610] sm:$0xf0]  ;;  %v8969_v2 = vor.u32 %v10134_v33, %v8968_v53 }
 0x3df   :  { %2820 = vmatmul.bf16.gmra.mxu2 %v8961_v1  ;;  %3149 = vmatmul.bf16.gmra.mxu3 %v8965_v40  ;;  %v10133_v1 = vld [vmem:[#allocation7 + $0x60c] sm:$0xf]  ;;  %v8978_v40 = vld [vmem:[#allocation7 + $0x618] sm:$0xf0]  ;;  %v8973_v22 = vor.u32 %v10132_v60, %v8970_v9 }
 0x3e0   :  { %3590 = vrot.lane.b32.xlu2 %v3108_v13, %s10621_s23 }
 0x3e1   :  { %4174 = vrot.lane.b32.xlu1 %v3108_v13, %s10620_s2  ;;  %v8976_v13 = vld [vmem:[#allocation7 + $0x608] sm:$0xf] }
 0x3e2   :  { %v3511_v32 = vpop.permute.xlu0 %3510  ;;  %v3513_v29 = vpop.permute.xlu1 %3512 }
 0x3e3   :  { %3529 = vst.msk [vmem:[#allocation2 + $0x30] sm:$0xff] %vm3522_vm9, %v3511_v32  ;;  %v3544_v3 = vpop.permute.xlu2 %3543  ;;  %v2781_v56 = vpop.f32.mrf.mxu2 }
 0x3e4   :  { %3530 = vst.msk [vmem:[#allocation2 + $0x38] sm:$0xff] %vm3522_vm9, %v3513_v29  ;;  %v2782_v51 = vadd.f32 %v2781_v56, %v2453_v63  ;;  %v3110_v14 = vpop.f32.mrf.mxu3  ;;  %v2125_v47 = vpop.f32.mrf.mxu0  ;;  %v8977_v29 = vor.u32 %v10135_v54, %v8976_v13  ;;  %vm3957_vm9 = vcmask 154768  }
 0x3e5   :  { %3566 = vst.msk [vmem:[#allocation2 + $0x10] sm:$0xff] %vm3563_vm10, %v3544_v3  ;;  %v2454_v36 = vpop.f32.mrf.mxu1  ;;  %v8981_v3 = vor.u32 %v10133_v1, %v8978_v40  ;;  %v8984_v1 = vld [vmem:[#allocation7 + $0x620] sm:$0xf]  ;;  %v10138_v40 = vld [vmem:[#allocation7 + $0x62c] sm:$0xf0] }
 0x3e6   :  { %v3111_v52 = vadd.f32 %v3110_v14, %v2782_v51  ;;  %v2455_v18 = vadd.f32 %v2454_v36, %v2125_v47 }
 0x3e8   :  { %4176 = vrot.lane.b32.xlu0 %v3111_v52, %s10620_s2 }
 0x3e9   :  { %3592 = vrot.lane.b32.xlu1 %v3111_v52, %s10621_s23 }
 0x3ea   :  { %v11223_v42 = vpop.permute.xlu0 %4112 }
 0x3eb   :  { %13195 = vst [vmem:[#allocation49_spill] sm:$0xff] %v11223_v42  ;;  %v11225_v63 = vpop.permute.xlu2 %4137  ;;  %v2783_v32 = vpop.f32.mrf.mxu2 }
 0x3ec   :  { %v2784_v56 = vadd.f32 %v2783_v32, %v2455_v18  ;;  %v3112_v51 = vpop.f32.mrf.mxu3  ;;  %v2128_v14 = vpop.f32.mrf.mxu0  ;;  %v10136_v18 = vld [vmem:[#allocation7 + $0x624] sm:$0xf]  ;;  %v8994_v32 = vld [vmem:[#allocation7 + $0x638] sm:$0xf0] }
 0x3ed   :  { %v2457_v59 = vpop.f32.mrf.mxu1 }
 0x3ee   :  { %v3113_v16 = vadd.f32 %v3112_v51, %v2784_v56  ;;  %2167 = vmatmul.bf16.gmra.mxu0 %v8969_v2  ;;  %2496 = vmatmul.bf16.gmra.mxu1 %v8973_v22  ;;  %v2458_v52 = vadd.f32 %v2457_v59, %v2128_v14  ;;  %v8986_v59 = vld [vmem:[#allocation7 + $0x630] sm:$0xf0]  ;;  %v8992_v2 = vld [vmem:[#allocation7 + $0x628] sm:$0xf]  ;;  %v10137_v22 = vld [vmem:[#allocation7 + $0x62c] sm:$0xf]  ;;  %v8985_v56 = vor.u32 %v10138_v40, %v8984_v1 }
 0x3ef   :  { %2825 = vmatmul.bf16.gmra.mxu2 %v8977_v29  ;;  %3154 = vmatmul.bf16.gmra.mxu3 %v8981_v3  ;;  %v8989_v51 = vor.u32 %v10136_v18, %v8986_v59 }
 0x3f0   :  { %3594 = vrot.lane.b32.xlu2 %v3113_v16, %s10621_s23  ;;  %s10634_s23 = smov 112  }
 0x3f1   :  { %4178 = vrot.lane.b32.xlu1 %v3113_v16, %s10620_s2  ;;  %v10139_v16 = vld [vmem:[#allocation7 + $0x634] sm:$0xf0] }
 0x3f2   :  { %v3542_v47 = vpop.permute.xlu0 %3541 }
 0x3f3   :  { %3565 = vst.msk [vmem:[#allocation2 + $0x8] sm:$0xff] %vm3563_vm10, %v3542_v47  ;;  %v3548_v36 = vpop.permute.xlu2 %3547  ;;  %v2786_v53 = vpop.f32.mrf.mxu2  ;;  %v8997_v47 = vor.u32 %v10137_v22, %v8994_v32  ;;  %v10142_v22 = vld [vmem:[#allocation7 + $0x64c] sm:$0xf0]  ;;  %v10140_v32 = vld [vmem:[#allocation7 + $0x644] sm:$0xf] }
 0x3f4   :  { %3568 = vst.msk [vmem:[#allocation2 + $0x20] sm:$0xff] %vm3563_vm10, %v3548_v36  ;;  %v2787_v33 = vadd.f32 %v2786_v53, %v2458_v52  ;;  %v3115_v60 = vpop.f32.mrf.mxu3  ;;  %v2130_v9 = vpop.f32.mrf.mxu0  ;;  %v8993_v52 = vor.u32 %v10139_v16, %v8992_v2  ;;  %v9000_v16 = vld [vmem:[#allocation7 + $0x640] sm:$0xf] }
 0x3f5   :  { %v2459_v13 = vpop.f32.mrf.mxu1 }
 0x3f6   :  { %v3116_v54 = vadd.f32 %v3115_v60, %v2787_v33  ;;  %v2460_v29 = vadd.f32 %v2459_v13, %v2130_v9 }
 0x3f8   :  { %3621 = vrot.lane.b32.xlu0 %v3116_v54, %s10622_s24 }
 0x3f9   :  { %4197 = vrot.lane.b32.xlu1 %v3116_v54, %s10623_s5 }
 0x3fa   :  { %v11233_v3 = vpop.permute.xlu0 %4133 }
 0x3fb   :  { %v2788_v14 = vpop.f32.mrf.mxu2  ;;  %v11237_v9 = vpop.permute.xlu2 %4141 }
 0x3fc   :  { %v2789_v36 = vadd.f32 %v2788_v14, %v2460_v29  ;;  %v3117_v53 = vpop.f32.mrf.mxu3  ;;  %v2133_v33 = vpop.f32.mrf.mxu0  ;;  %13196 = vst [vmem:[#allocation50_spill] sm:$0xff] %v11237_v9  ;;  %v9002_v29 = vld [vmem:[#allocation7 + $0x650] sm:$0xf0]  ;;  %v9010_v14 = vld [vmem:[#allocation7 + $0x658] sm:$0xf0] }
 0x3fd   :  { %v2462_v60 = vpop.f32.mrf.mxu1 }
 0x3fe   :  { %v3118_v42 = vadd.f32 %v3117_v53, %v2789_v36  ;;  %2172 = vmatmul.bf16.gmra.mxu0 %v8985_v56  ;;  %2501 = vmatmul.bf16.gmra.mxu1 %v8989_v51  ;;  %v2463_v28 = vadd.f32 %v2462_v60, %v2133_v33  ;;  %v9008_v56 = vld [vmem:[#allocation7 + $0x648] sm:$0xf]  ;;  %v10143_v51 = vld [vmem:[#allocation7 + $0x654] sm:$0xf0]  ;;  %v9001_v36 = vor.u32 %v10142_v22, %v9000_v16 }
 0x3ff   :  { %2830 = vmatmul.bf16.gmra.mxu2 %v8993_v52  ;;  %3159 = vmatmul.bf16.gmra.mxu3 %v8997_v47  ;;  %v11241_v52 = vpop.permute.xlu1 %4135  ;;  %v9005_v53 = vor.u32 %v10140_v32, %v9002_v29  ;;  %v9009_v60 = vor.u32 %v10143_v51, %v9008_v56 }
 0x400   :  { %4199 = vrot.lane.b32.xlu2 %v3118_v42, %s10623_s5  ;;  %13197 = vst [vmem:[#allocation51_spill] sm:$0xff] %v11241_v52 }
 0x401   :  { %3623 = vrot.lane.b32.xlu1 %v3118_v42, %s10622_s24  ;;  %v10141_v42 = vld [vmem:[#allocation7 + $0x64c] sm:$0xf] }
 0x402   :  { %v3546_v13 = vpop.permute.xlu0 %3545 }
 0x403   :  { %3567 = vst.msk [vmem:[#allocation2 + $0x18] sm:$0xff] %vm3563_vm10, %v3546_v13  ;;  %v2791_v54 = vpop.f32.mrf.mxu2  ;;  %v9013_v13 = vor.u32 %v10141_v42, %v9010_v14  ;;  %v9016_v42 = vld [vmem:[#allocation7 + $0x660] sm:$0xf]  ;;  %v10146_v14 = vld [vmem:[#allocation7 + $0x66c] sm:$0xf0] }
 0x404   :  { %v2792_v1 = vadd.f32 %v2791_v54, %v2463_v28  ;;  %v3120_v40 = vpop.f32.mrf.mxu3  ;;  %v2135_v18 = vpop.f32.mrf.mxu0 }
 0x405   :  { %v2464_v59 = vpop.f32.mrf.mxu1 }
 0x406   :  { %v3121_v2 = vadd.f32 %v3120_v40, %v2792_v1  ;;  %v2465_v47 = vadd.f32 %v2464_v59, %v2135_v18 }
 0x408   :  { %3625 = vrot.lane.b32.xlu0 %v3121_v2, %s10622_s24 }
 0x409   :  { %4201 = vrot.lane.b32.xlu1 %v3121_v2, %s10623_s5 }
 0x40a   :  { %v3554_v28 = vpop.permute.xlu2 %3553  ;;  %v11246_v18 = vpop.permute.xlu1 %4139 }
 0x40b   :  { %3571 = vst.msk [vmem:[#allocation2 + $0x38] sm:$0xff] %vm3563_vm10, %v3554_v28  ;;  %v2793_v33 = vpop.f32.mrf.mxu2  ;;  %v9024_v28 = vld [vmem:[#allocation7 + $0x668] sm:$0xf] }
 0x40c   :  { %v2794_v54 = vadd.f32 %v2793_v33, %v2465_v47  ;;  %v3122_v1 = vpop.f32.mrf.mxu3  ;;  %v2138_v40 = vpop.f32.mrf.mxu0  ;;  %13198 = vst [vmem:[#allocation52_spill] sm:$0xff] %v11246_v18  ;;  %v9018_v47 = vld [vmem:[#allocation7 + $0x670] sm:$0xf0] }
 0x40d   :  { %v2467_v9 = vpop.f32.mrf.mxu1 }
 0x40e   :  { %v3123_v45 = vadd.f32 %v3122_v1, %v2794_v54  ;;  %2177 = vmatmul.bf16.gmra.mxu0 %v9001_v36  ;;  %2506 = vmatmul.bf16.gmra.mxu1 %v9005_v53  ;;  %v2468_v52 = vadd.f32 %v2467_v9, %v2138_v40  ;;  %v10144_v9 = vld [vmem:[#allocation7 + $0x664] sm:$0xf]  ;;  %v10145_v36 = vld [vmem:[#allocation7 + $0x66c] sm:$0xf]  ;;  %v9026_v53 = vld [vmem:[#allocation7 + $0x678] sm:$0xf0] }
 0x40f   :  { %2835 = vmatmul.bf16.gmra.mxu2 %v9009_v60  ;;  %3164 = vmatmul.bf16.gmra.mxu3 %v9013_v13  ;;  %v9017_v13 = vor.u32 %v10146_v14, %v9016_v42  ;;  %v9021_v54 = vor.u32 %v10144_v9, %v9018_v47 }
 0x410   :  { %4203 = vrot.lane.b32.xlu2 %v3123_v45, %s10623_s5 }
 0x411   :  { %3627 = vrot.lane.b32.xlu1 %v3123_v45, %s10622_s24  ;;  %v10147_v45 = vld [vmem:[#allocation7 + $0x674] sm:$0xf0] }
 0x412   :  { %v3550_v59 = vpop.permute.xlu0 %3549  ;;  %v11249_v2 = vpop.permute.xlu2 %4145  ;;  %v9025_v40 = vor.u32 %v10147_v45, %v9024_v28 }
 0x413   :  { %13199 = vst [vmem:[#allocation53_spill] sm:$0xff] %v11249_v2  ;;  %v2796_v16 = vpop.f32.mrf.mxu2 }
 0x414   :  { %3569 = vst.msk [vmem:[#allocation2 + $0x28] sm:$0xff] %vm3563_vm10, %v3550_v59  ;;  %v2797_v22 = vadd.f32 %v2796_v16, %v2468_v52  ;;  %v3125_v32 = vpop.f32.mrf.mxu3  ;;  %v2140_v29 = vpop.f32.mrf.mxu0  ;;  %v9029_v59 = vor.u32 %v10145_v36, %v9026_v53  ;;  %v9032_v36 = vld [vmem:[#allocation7 + $0x680] sm:$0xf]  ;;  %v10150_v53 = vld [vmem:[#allocation7 + $0x68c] sm:$0xf0] }
 0x415   :  { %v2469_v56 = vpop.f32.mrf.mxu1 }
 0x416   :  { %v3126_v51 = vadd.f32 %v3125_v32, %v2797_v22  ;;  %v2470_v33 = vadd.f32 %v2469_v56, %v2140_v29 }
 0x418   :  { %4205 = vrot.lane.b32.xlu2 %v3126_v51, %s10623_s5  ;;  %3629 = vrot.lane.b32.xlu0 %v3126_v51, %s10622_s24 }
 0x41a   :  { %v3552_v60 = vpop.permute.xlu1 %3551  ;;  %v3583_v52 = vpop.permute.xlu2 %3582 }
 0x41b   :  { %3570 = vst.msk [vmem:[#allocation2 + $0x30] sm:$0xff] %vm3563_vm10, %v3552_v60  ;;  %v2798_v1 = vpop.f32.mrf.mxu2  ;;  %v9034_v60 = vld [vmem:[#allocation7 + $0x690] sm:$0xf0]  ;;  %vm3990_vm10 = vcmask 162968  }
 0x41c   :  { %3606 = vst.msk [vmem:[#allocation2 + $0x8] sm:$0xff] %vm3604_vm11, %v3583_v52  ;;  %v2799_v16 = vadd.f32 %v2798_v1, %v2470_v33  ;;  %v3127_v22 = vpop.f32.mrf.mxu3  ;;  %v2143_v32 = vpop.f32.mrf.mxu0  ;;  %v10148_v33 = vld [vmem:[#allocation7 + $0x684] sm:$0xf]  ;;  %v9040_v52 = vld [vmem:[#allocation7 + $0x688] sm:$0xf] }
 0x41d   :  { %v2472_v51 = vpop.f32.mrf.mxu1 }
 0x41e   :  { %v3128_v2 = vadd.f32 %v3127_v22, %v2799_v16  ;;  %2182 = vmatmul.bf16.gmra.mxu0 %v9017_v13  ;;  %2511 = vmatmul.bf16.gmra.mxu1 %v9021_v54  ;;  %v2473_v29 = vadd.f32 %v2472_v51, %v2143_v32  ;;  %v10151_v13 = vld [vmem:[#allocation7 + $0x694] sm:$0xf0]  ;;  %v10149_v54 = vld [vmem:[#allocation7 + $0x68c] sm:$0xf]  ;;  %v9037_v16 = vor.u32 %v10148_v33, %v9034_v60 }
 0x41f   :  { %2840 = vmatmul.bf16.gmra.mxu2 %v9025_v40  ;;  %3169 = vmatmul.bf16.gmra.mxu3 %v9029_v59  ;;  %v9033_v59 = vor.u32 %v10150_v53, %v9032_v36  ;;  %v9041_v51 = vor.u32 %v10151_v13, %v9040_v52 }
 0x420   :  { %4207 = vrot.lane.b32.xlu0 %v3128_v2, %s10623_s5  ;;  %3631 = vrot.lane.b32.xlu1 %v3128_v2, %s10622_s24  ;;  %v9042_v2 = vld [vmem:[#allocation7 + $0x698] sm:$0xf0] }
 0x422   :  { %v11258_v56 = vpop.permute.xlu1 %4143 }
 0x423   :  { %13200 = vst [vmem:[#allocation54_spill] sm:$0xff] %v11258_v56  ;;  %v2801_v42 = vpop.f32.mrf.mxu2 }
 0x424   :  { %v2802_v14 = vadd.f32 %v2801_v42, %v2473_v29  ;;  %v3130_v9 = vpop.f32.mrf.mxu3  ;;  %v2145_v47 = vpop.f32.mrf.mxu0  ;;  %v9045_v29 = vor.u32 %v10149_v54, %v9042_v2  ;;  %v9048_v2 = vld [vmem:[#allocation7 + $0x6a0] sm:$0xf] }
 0x425   :  { %v2474_v28 = vpop.f32.mrf.mxu1 }
 0x426   :  { %v3131_v45 = vadd.f32 %v3130_v9, %v2802_v14  ;;  %v2475_v1 = vadd.f32 %v2474_v28, %v2145_v47 }
 0x428   :  { %4209 = vrot.lane.b32.xlu2 %v3131_v45, %s10623_s5  ;;  %3633 = vrot.lane.b32.xlu1 %v3131_v45, %s10622_s24 }
 0x42a   :  { %v3587_v40 = vpop.permute.xlu2 %3586 }
 0x42b   :  { %v3581_v22 = vpop.permute.xlu1 %3580  ;;  %3608 = vst.msk [vmem:[#allocation2 + $0x18] sm:$0xff] %vm3604_vm11, %v3587_v40  ;;  %v2803_v32 = vpop.f32.mrf.mxu2  ;;  %v10152_v40 = vld [vmem:[#allocation7 + $0x6a4] sm:$0xf] }
 0x42c   :  { %3605 = vst.msk [vmem:[#allocation2] sm:$0xff] %vm3604_vm11, %v3581_v22  ;;  %v2804_v42 = vadd.f32 %v2803_v32, %v2475_v1  ;;  %v3132_v14 = vpop.f32.mrf.mxu3  ;;  %v2148_v9 = vpop.f32.mrf.mxu0  ;;  %v10154_v1 = vld [vmem:[#allocation7 + $0x6ac] sm:$0xf0]  ;;  %v10153_v22 = vld [vmem:[#allocation7 + $0x6ac] sm:$0xf] }
 0x42d   :  { %v2477_v56 = vpop.f32.mrf.mxu1  ;;  %v9058_v32 = vld [vmem:[#allocation7 + $0x6b8] sm:$0xf0] }
 0x42e   :  { %v3133_v45 = vadd.f32 %v3132_v14, %v2804_v42  ;;  %2187 = vmatmul.bf16.gmra.mxu0 %v9033_v59  ;;  %2516 = vmatmul.bf16.gmra.mxu1 %v9037_v16  ;;  %v2478_v47 = vadd.f32 %v2477_v56, %v2148_v9  ;;  %v9050_v59 = vld [vmem:[#allocation7 + $0x6b0] sm:$0xf0]  ;;  %v9056_v16 = vld [vmem:[#allocation7 + $0x6a8] sm:$0xf]  ;;  %v10155_v56 = vld [vmem:[#allocation7 + $0x6b4] sm:$0xf0]  ;;  %v9049_v42 = vor.u32 %v10154_v1, %v9048_v2 }
 0x42f   :  { %2845 = vmatmul.bf16.gmra.mxu2 %v9041_v51  ;;  %3174 = vmatmul.bf16.gmra.mxu3 %v9045_v29  ;;  %v9053_v14 = vor.u32 %v10152_v40, %v9050_v59 }
 0x430   :  { %4211 = vrot.lane.b32.xlu0 %v3133_v45, %s10623_s5  ;;  %3635 = vrot.lane.b32.xlu2 %v3133_v45, %s10622_s24  ;;  %s10636_s5 = smov 48  }
 0x432   :  { %v11266_v28 = vpop.permute.xlu2 %4170 }
 0x433   :  { %v11268_v36 = vpop.permute.xlu1 %4166  ;;  %v2806_v53 = vpop.f32.mrf.mxu2 }
 0x434   :  { %v2807_v33 = vadd.f32 %v2806_v53, %v2478_v47  ;;  %v3135_v60 = vpop.f32.mrf.mxu3  ;;  %v2150_v52 = vpop.f32.mrf.mxu0  ;;  %v9057_v47 = vor.u32 %v10155_v56, %v9056_v16  ;;  %v9061_v53 = vor.u32 %v10153_v22, %v9058_v32  ;;  %v9064_v22 = vld [vmem:[#allocation7 + $0x6c0] sm:$0xf]  ;;  %v10158_v32 = vld [vmem:[#allocation7 + $0x6cc] sm:$0xf0] }
 0x435   :  { %v2479_v13 = vpop.f32.mrf.mxu1 }
 0x436   :  { %v3136_v54 = vadd.f32 %v3135_v60, %v2807_v33  ;;  %v2480_v51 = vadd.f32 %v2479_v13, %v2150_v52 }
 0x438   :  { %3662 = vrot.lane.b32.xlu2 %v3136_v54, %s10624_s26 }
 0x43a   :  { %v3591_v29 = vpop.permute.xlu2 %3590 }
 0x43b   :  { %v3585_v9 = vpop.permute.xlu1 %3584  ;;  %3610 = vst.msk [vmem:[#allocation2 + $0x28] sm:$0xff] %vm3604_vm11, %v3591_v29  ;;  %v2808_v45 = vpop.f32.mrf.mxu2  ;;  %v9066_v29 = vld [vmem:[#allocation7 + $0x6d0] sm:$0xf0] }
 0x43c   :  { %3607 = vst.msk [vmem:[#allocation2 + $0x10] sm:$0xff] %vm3604_vm11, %v3585_v9  ;;  %v2809_v33 = vadd.f32 %v2808_v45, %v2480_v51  ;;  %v3137_v60 = vpop.f32.mrf.mxu3  ;;  %v2153_v18 = vpop.f32.mrf.mxu0  ;;  %v10156_v51 = vld [vmem:[#allocation7 + $0x6c4] sm:$0xf]  ;;  %v9065_v45 = vor.u32 %v10158_v32, %v9064_v22 }
 0x43d   :  { %v2482_v39 = vpop.f32.mrf.mxu1 }
 0x43e   :  { %v3138_v0 = vadd.f32 %v3137_v60, %v2809_v33  ;;  %2192 = vmatmul.bf16.gmra.mxu0 %v9049_v42  ;;  %2521 = vmatmul.bf16.gmra.mxu1 %v9053_v14  ;;  %v2483_v52 = vadd.f32 %v2482_v39, %v2153_v18  ;;  %v9072_v42 = vld [vmem:[#allocation7 + $0x6c8] sm:$0xf]  ;;  %v10159_v39 = vld [vmem:[#allocation7 + $0x6d4] sm:$0xf0]  ;;  %v10157_v18 = vld [vmem:[#allocation7 + $0x6cc] sm:$0xf] }
 0x43f   :  { %2850 = vmatmul.bf16.gmra.mxu2 %v9057_v47  ;;  %3179 = vmatmul.bf16.gmra.mxu3 %v9061_v53  ;;  %v9069_v47 = vor.u32 %v10156_v51, %v9066_v29  ;;  %v9073_v60 = vor.u32 %v10159_v39, %v9072_v42 }
 0x440   :  { %4230 = vrot.lane.b32.xlu2 %v3136_v54, %s10625_s13  ;;  %3664 = vrot.lane.b32.xlu0 %v3138_v0, %s10624_s26  ;;  %v9074_v54 = vld [vmem:[#allocation7 + $0x6d8] sm:$0xf0] }
 0x443   :  { %v11275_v13 = vpop.permute.xlu1 %4168  ;;  %v2811_v2 = vpop.f32.mrf.mxu2 }
 0x444   :  { %13201 = vst [vmem:[#allocation55_spill] sm:$0xff] %v11275_v13  ;;  %v2812_v1 = vadd.f32 %v2811_v2, %v2483_v52  ;;  %v3140_v40 = vpop.f32.mrf.mxu3  ;;  %v2155_v59 = vpop.f32.mrf.mxu0  ;;  %v9077_v52 = vor.u32 %v10157_v18, %v9074_v54  ;;  %v9080_v18 = vld [vmem:[#allocation7 + $0x6e0] sm:$0xf]  ;;  %v10162_v54 = vld [vmem:[#allocation7 + $0x6ec] sm:$0xf0] }
 0x445   :  { %v2484_v16 = vpop.f32.mrf.mxu1 }
 0x446   :  { %v3141_v56 = vadd.f32 %v3140_v40, %v2812_v1  ;;  %v2485_v14 = vadd.f32 %v2484_v16, %v2155_v59  ;;  %v11284_v16 = vpop.permute.xlu0 %4164 }
 0x447   :  { %13202 = vst [vmem:[#allocation56_spill] sm:$0xff] %v11284_v16 }
 0x448   :  { %4232 = vrot.lane.b32.xlu0 %v3138_v0, %s10625_s13  ;;  %4234 = vrot.lane.b32.xlu1 %v3141_v56, %s10625_s13 }
 0x449   :  { %3666 = vrot.lane.b32.xlu2 %v3141_v56, %s10624_s26 }
 0x44a   :  { %v3595_v9 = vpop.permute.xlu2 %3594 }
 0x44b   :  { %v3589_v53 = vpop.permute.xlu1 %3588  ;;  %3612 = vst.msk [vmem:[#allocation2 + $0x38] sm:$0xff] %vm3604_vm11, %v3595_v9  ;;  %v2813_v33 = vpop.f32.mrf.mxu2  ;;  %v9082_v9 = vld [vmem:[#allocation7 + $0x6f0] sm:$0xf0] }
 0x44c   :  { %3609 = vst.msk [vmem:[#allocation2 + $0x20] sm:$0xff] %vm3604_vm11, %v3589_v53  ;;  %v2814_v0 = vadd.f32 %v2813_v33, %v2485_v14  ;;  %v3142_v2 = vpop.f32.mrf.mxu3  ;;  %v2158_v1 = vpop.f32.mrf.mxu0  ;;  %v10160_v14 = vld [vmem:[#allocation7 + $0x6e4] sm:$0xf]  ;;  %v10161_v53 = vld [vmem:[#allocation7 + $0x6ec] sm:$0xf] }
 0x44d   :  { %v2487_v40 = vpop.f32.mrf.mxu1 }
 0x44e   :  { %v3143_v13 = vadd.f32 %v3142_v2, %v2814_v0  ;;  %2197 = vmatmul.bf16.gmra.mxu0 %v9065_v45  ;;  %2526 = vmatmul.bf16.gmra.mxu1 %v9069_v47  ;;  %v2488_v59 = vadd.f32 %v2487_v40, %v2158_v1  ;;  %v9088_v45 = vld [vmem:[#allocation7 + $0x6e8] sm:$0xf]  ;;  %v10163_v47 = vld [vmem:[#allocation7 + $0x6f4] sm:$0xf0]  ;;  %v11290_v33 = vpop.permute.xlu0 %4172  ;;  %v9085_v0 = vor.u32 %v10160_v14, %v9082_v9 }
 0x44f   :  { %2855 = vmatmul.bf16.gmra.mxu2 %v9073_v60  ;;  %3184 = vmatmul.bf16.gmra.mxu3 %v9077_v52  ;;  %13204 = vst [vmem:[#allocation58_spill] sm:$0xff] %v11290_v33  ;;  %v9081_v52 = vor.u32 %v10162_v54, %v9080_v18  ;;  %v9089_v40 = vor.u32 %v10163_v47, %v9088_v45 }
 0x450   :  { %3668 = vrot.lane.b32.xlu0 %v3143_v13, %s10624_s26 }
 0x451   :  { %4236 = vrot.lane.b32.xlu2 %v3143_v13, %s10625_s13  ;;  %v9090_v13 = vld [vmem:[#allocation7 + $0x6f8] sm:$0xf0] }
 0x453   :  { %v11286_v56 = vpop.permute.xlu1 %4174  ;;  %v2816_v22 = vpop.f32.mrf.mxu2 }
 0x454   :  { %13203 = vst [vmem:[#allocation57_spill] sm:$0xff] %v11286_v56  ;;  %v2817_v32 = vadd.f32 %v2816_v22, %v2488_v59  ;;  %v3145_v51 = vpop.f32.mrf.mxu3  ;;  %v2160_v29 = vpop.f32.mrf.mxu0  ;;  %v9093_v59 = vor.u32 %v10161_v53, %v9090_v13  ;;  %v9096_v53 = vld [vmem:[#allocation7 + $0x700] sm:$0xf]  ;;  %v10166_v13 = vld [vmem:[#allocation7 + $0x70c] sm:$0xf0] }
 0x455   :  { %v2489_v42 = vpop.f32.mrf.mxu1 }
 0x456   :  { %v3146_v39 = vadd.f32 %v3145_v51, %v2817_v32  ;;  %v2490_v60 = vadd.f32 %v2489_v42, %v2160_v29 }
 0x458   :  { %4238 = vrot.lane.b32.xlu1 %v3146_v39, %s10625_s13 }
 0x459   :  { %3670 = vrot.lane.b32.xlu2 %v3146_v39, %s10624_s26 }
 0x45a   :  { %v11295_v29 = vpop.permute.xlu0 %4176 }
 0x45b   :  { %v3593_v2 = vpop.permute.xlu1 %3592  ;;  %v2818_v1 = vpop.f32.mrf.mxu2  ;;  %13205 = vst [vmem:[#allocation59_spill] sm:$0xff] %v11295_v29 }
 0x45c   :  { %3611 = vst.msk [vmem:[#allocation2 + $0x30] sm:$0xff] %vm3604_vm11, %v3593_v2  ;;  %v2819_v22 = vadd.f32 %v2818_v1, %v2490_v60  ;;  %v3147_v32 = vpop.f32.mrf.mxu3  ;;  %v2163_v51 = vpop.f32.mrf.mxu0  ;;  %v10164_v60 = vld [vmem:[#allocation7 + $0x704] sm:$0xf]  ;;  %v10165_v2 = vld [vmem:[#allocation7 + $0x70c] sm:$0xf]  ;;  %vm4023_vm11 = vcmask 171168  }
 0x45d   :  { %v2492_v56 = vpop.f32.mrf.mxu1  ;;  %v9106_v1 = vld [vmem:[#allocation7 + $0x718] sm:$0xf0] }
 0x45e   :  { %v3148_v16 = vadd.f32 %v3147_v32, %v2819_v22  ;;  %2202 = vmatmul.bf16.gmra.mxu0 %v9081_v52  ;;  %2531 = vmatmul.bf16.gmra.mxu1 %v9085_v0  ;;  %v2493_v39 = vadd.f32 %v2492_v56, %v2163_v51  ;;  %v9098_v52 = vld [vmem:[#allocation7 + $0x710] sm:$0xf0]  ;;  %v9104_v56 = vld [vmem:[#allocation7 + $0x708] sm:$0xf]  ;;  %v11299_v0 = vpop.permute.xlu2 %4199  ;;  %v9097_v22 = vor.u32 %v10166_v13, %v9096_v53 }
 0x45f   :  { %2860 = vmatmul.bf16.gmra.mxu2 %v9089_v40  ;;  %3189 = vmatmul.bf16.gmra.mxu3 %v9093_v59  ;;  %v9101_v32 = vor.u32 %v10164_v60, %v9098_v52 }
 0x460   :  { %3672 = vrot.lane.b32.xlu0 %v3148_v16, %s10624_s26 }
 0x461   :  { %4240 = vrot.lane.b32.xlu2 %v3148_v16, %s10625_s13  ;;  %v10167_v16 = vld [vmem:[#allocation7 + $0x714] sm:$0xf0] }
 0x463   :  { %v11297_v42 = vpop.permute.xlu1 %4178  ;;  %v2821_v18 = vpop.f32.mrf.mxu2 }
 0x464   :  { %13206 = vst [vmem:[#allocation60_spill] sm:$0xff] %v11297_v42  ;;  %v2822_v54 = vadd.f32 %v2821_v18, %v2493_v39  ;;  %v3150_v14 = vpop.f32.mrf.mxu3  ;;  %v2165_v9 = vpop.f32.mrf.mxu0  ;;  %v9105_v18 = vor.u32 %v10167_v16, %v9104_v56 }
 0x465   :  { %v2494_v45 = vpop.f32.mrf.mxu1 }
 0x466   :  { %v3151_v47 = vadd.f32 %v3150_v14, %v2822_v54  ;;  %v2495_v40 = vadd.f32 %v2494_v45, %v2165_v9  ;;  %v9109_v54 = vor.u32 %v10165_v2, %v9106_v1  ;;  %v9112_v2 = vld [vmem:[#allocation7 + $0x720] sm:$0xf]  ;;  %v10170_v1 = vld [vmem:[#allocation7 + $0x72c] sm:$0xf0] }
 0x468   :  { %3674 = vrot.lane.b32.xlu1 %v3151_v47, %s10624_s26 }
 0x46a   :  { %v3622_v59 = vpop.permute.xlu0 %3621  ;;  %v11305_v9 = vpop.permute.xlu2 %4203 }
 0x46b   :  { %v11302_v51 = vpop.permute.xlu1 %4197  ;;  %3646 = vst.msk [vmem:[#allocation2] sm:$0xff] %vm3645_vm13, %v3622_v59  ;;  %v2823_v39 = vpop.f32.mrf.mxu2  ;;  %v9114_v59 = vld [vmem:[#allocation7 + $0x730] sm:$0xf0] }
 0x46c   :  { %13207 = vst [vmem:[#allocation61_spill] sm:$0xff] %v11302_v51  ;;  %v2824_v14 = vadd.f32 %v2823_v39, %v2495_v40  ;;  %v3152_v29 = vpop.f32.mrf.mxu3  ;;  %v2168_v42 = vpop.f32.mrf.mxu0  ;;  %v10168_v40 = vld [vmem:[#allocation7 + $0x724] sm:$0xf] }
 0x46d   :  { %v2497_v33 = vpop.f32.mrf.mxu1 }
 0x46e   :  { %v3153_v57 = vadd.f32 %v3152_v29, %v2824_v14  ;;  %2207 = vmatmul.bf16.gmra.mxu0 %v9097_v22  ;;  %2536 = vmatmul.bf16.gmra.mxu1 %v9101_v32  ;;  %v2498_v45 = vadd.f32 %v2497_v33, %v2168_v42  ;;  %v9120_v22 = vld [vmem:[#allocation7 + $0x728] sm:$0xf]  ;;  %v10171_v33 = vld [vmem:[#allocation7 + $0x734] sm:$0xf0]  ;;  %v10169_v42 = vld [vmem:[#allocation7 + $0x72c] sm:$0xf]  ;;  %v9117_v14 = vor.u32 %v10168_v40, %v9114_v59 }
 0x46f   :  { %2865 = vmatmul.bf16.gmra.mxu2 %v9105_v18  ;;  %3194 = vmatmul.bf16.gmra.mxu3 %v9109_v54  ;;  %v9113_v54 = vor.u32 %v10170_v1, %v9112_v2 }
 0x470   :  { %4242 = vrot.lane.b32.xlu1 %v3151_v47, %s10625_s13  ;;  %3676 = vrot.lane.b32.xlu2 %v3153_v57, %s10624_s26  ;;  %v9122_v47 = vld [vmem:[#allocation7 + $0x738] sm:$0xf0] }
 0x472   :  { %v11313_v32 = vpop.permute.xlu2 %4205 }
 0x473   :  { %v3624_v53 = vpop.permute.xlu1 %3623  ;;  %v2826_v13 = vpop.f32.mrf.mxu2  ;;  %13208 = vst [vmem:[#allocation62_spill] sm:$0xff] %v11313_v32 }
 0x474   :  { %3647 = vst.msk [vmem:[#allocation2 + $0x8] sm:$0xff] %vm3645_vm13, %v3624_v53  ;;  %v2827_v60 = vadd.f32 %v2826_v13, %v2498_v45  ;;  %v3155_v52 = vpop.f32.mrf.mxu3  ;;  %v2170_v56 = vpop.f32.mrf.mxu0  ;;  %v9121_v53 = vor.u32 %v10171_v33, %v9120_v22  ;;  %v9125_v13 = vor.u32 %v10169_v42, %v9122_v47  ;;  %v9128_v42 = vld [vmem:[#allocation7 + $0x740] sm:$0xf]  ;;  %v10174_v47 = vld [vmem:[#allocation7 + $0x74c] sm:$0xf0] }
 0x475   :  { %v2499_v16 = vpop.f32.mrf.mxu1 }
 0x476   :  { %v3156_v29 = vadd.f32 %v3155_v52, %v2827_v60  ;;  %v2500_v39 = vadd.f32 %v2499_v16, %v2170_v56 }
 0x478   :  { %4244 = vrot.lane.b32.xlu2 %v3153_v57, %s10625_s13  ;;  %4263 = vrot.lane.b32.xlu0 %v3156_v29, %s10626_s29 }
 0x479   :  { %3703 = vrot.lane.b32.xlu1 %v3156_v29, %s10627_s30 }
 0x47a   :  { %v3626_v18 = vpop.permute.xlu0 %3625 }
 0x47b   :  { %v11315_v45 = vpop.permute.xlu1 %4201  ;;  %3648 = vst.msk [vmem:[#allocation2 + $0x10] sm:$0xff] %vm3645_vm13, %v3626_v18  ;;  %v2828_v57 = vpop.f32.mrf.mxu2  ;;  %v9130_v18 = vld [vmem:[#allocation7 + $0x750] sm:$0xf0] }
 0x47c   :  { %13209 = vst [vmem:[#allocation63_spill] sm:$0xff] %v11315_v45  ;;  %v2829_v60 = vadd.f32 %v2828_v57, %v2500_v39  ;;  %v3157_v52 = vpop.f32.mrf.mxu3  ;;  %v2173_v51 = vpop.f32.mrf.mxu0  ;;  %v10172_v39 = vld [vmem:[#allocation7 + $0x744] sm:$0xf] }
 0x47d   :  { %v2502_v6 = vpop.f32.mrf.mxu1 }
 0x47e   :  { %v3158_v12 = vadd.f32 %v3157_v52, %v2829_v60  ;;  %2212 = vmatmul.bf16.gmra.mxu0 %v9113_v54  ;;  %2541 = vmatmul.bf16.gmra.mxu1 %v9117_v14  ;;  %v2503_v56 = vadd.f32 %v2502_v6, %v2173_v51  ;;  %v9136_v6 = vld [vmem:[#allocation7 + $0x748] sm:$0xf]  ;;  %v10175_v51 = vld [vmem:[#allocation7 + $0x754] sm:$0xf0]  ;;  %v10173_v54 = vld [vmem:[#allocation7 + $0x74c] sm:$0xf]  ;;  %v9133_v60 = vor.u32 %v10172_v39, %v9130_v18 }
 0x47f   :  { %2870 = vmatmul.bf16.gmra.mxu2 %v9121_v53  ;;  %3199 = vmatmul.bf16.gmra.mxu3 %v9125_v13  ;;  %v9138_v14 = vld [vmem:[#allocation7 + $0x758] sm:$0xf0]  ;;  %v9129_v13 = vor.u32 %v10174_v47, %v9128_v42 }
 0x480   :  { %3705 = vrot.lane.b32.xlu2 %v3158_v12, %s10627_s30 }
 0x481   :  { %4265 = vrot.lane.b32.xlu1 %v3158_v12, %s10626_s29 }
 0x482   :  { %v11320_v16 = vpop.permute.xlu2 %4209 }
 0x483   :  { %13210 = vst [vmem:[#allocation64_spill] sm:$0xff] %v11320_v16  ;;  %v3628_v29 = vpop.permute.xlu1 %3627  ;;  %v2831_v2 = vpop.f32.mrf.mxu2 }
 0x484   :  { %3649 = vst.msk [vmem:[#allocation2 + $0x18] sm:$0xff] %vm3645_vm13, %v3628_v29  ;;  %v2832_v1 = vadd.f32 %v2831_v2, %v2503_v56  ;;  %v3160_v40 = vpop.f32.mrf.mxu3  ;;  %v2175_v59 = vpop.f32.mrf.mxu0  ;;  %v9137_v56 = vor.u32 %v10175_v51, %v9136_v6  ;;  %v9141_v29 = vor.u32 %v10173_v54, %v9138_v14  ;;  %v9144_v14 = vld [vmem:[#allocation7 + $0x760] sm:$0xf] }
 0x485   :  { %v2504_v22 = vpop.f32.mrf.mxu1 }
 0x486   :  { %v3161_v33 = vadd.f32 %v3160_v40, %v2832_v1  ;;  %v2505_v12 = vadd.f32 %v2504_v22, %v2175_v59 }
 0x489   :  { %3707 = vrot.lane.b32.xlu1 %v3161_v33, %s10627_s30 }
 0x48a   :  { %v3630_v57 = vpop.permute.xlu0 %3629  ;;  %v3636_v53 = vpop.permute.xlu2 %3635 }
 0x48b   :  { %3650 = vst.msk [vmem:[#allocation2 + $0x20] sm:$0xff] %vm3645_vm13, %v3630_v57  ;;  %v2833_v52 = vpop.f32.mrf.mxu2  ;;  %v9146_v57 = vld [vmem:[#allocation7 + $0x770] sm:$0xf0] }
 0x48c   :  { %3653 = vst.msk [vmem:[#allocation2 + $0x38] sm:$0xff] %vm3645_vm13, %v3636_v53  ;;  %v2834_v2 = vadd.f32 %v2833_v52, %v2505_v12  ;;  %v3162_v1 = vpop.f32.mrf.mxu3  ;;  %v2178_v40 = vpop.f32.mrf.mxu0  ;;  %v10178_v12 = vld [vmem:[#allocation7 + $0x76c] sm:$0xf0]  ;;  %v9152_v53 = vld [vmem:[#allocation7 + $0x768] sm:$0xf] }
 0x48d   :  { %v2507_v16 = vpop.f32.mrf.mxu1 }
 0x48e   :  { %v3163_v32 = vadd.f32 %v3162_v1, %v2834_v2  ;;  %2217 = vmatmul.bf16.gmra.mxu0 %v9129_v13  ;;  %2546 = vmatmul.bf16.gmra.mxu1 %v9133_v60  ;;  %v2508_v59 = vadd.f32 %v2507_v16, %v2178_v40  ;;  %v10176_v16 = vld [vmem:[#allocation7 + $0x764] sm:$0xf]  ;;  %v10177_v13 = vld [vmem:[#allocation7 + $0x76c] sm:$0xf]  ;;  %v9154_v60 = vld [vmem:[#allocation7 + $0x778] sm:$0xf0] }
 0x48f   :  { %2875 = vmatmul.bf16.gmra.mxu2 %v9137_v56  ;;  %3204 = vmatmul.bf16.gmra.mxu3 %v9141_v29  ;;  %v9145_v29 = vor.u32 %v10178_v12, %v9144_v14  ;;  %v9149_v2 = vor.u32 %v10176_v16, %v9146_v57 }
 0x490   :  { %3709 = vrot.lane.b32.xlu2 %v3163_v32, %s10627_s30 }
 0x491   :  { %4267 = vrot.lane.b32.xlu1 %v3161_v33, %s10626_s29  ;;  %v10179_v33 = vld [vmem:[#allocation7 + $0x774] sm:$0xf0] }
 0x492   :  { %v3632_v22 = vpop.permute.xlu1 %3631  ;;  %v3663_v42 = vpop.permute.xlu2 %3662 }
 0x493   :  { %3651 = vst.msk [vmem:[#allocation2 + $0x28] sm:$0xff] %vm3645_vm13, %v3632_v22  ;;  %v2836_v47 = vpop.f32.mrf.mxu2  ;;  %v9157_v22 = vor.u32 %v10177_v13, %v9154_v60  ;;  %v9160_v13 = vld [vmem:[#allocation7 + $0x780] sm:$0xf]  ;;  %v10182_v60 = vld [vmem:[#allocation7 + $0x78c] sm:$0xf0] }
 0x494   :  { %3687 = vst.msk [vmem:[#allocation2] sm:$0xff] %vm3686_vm15, %v3663_v42  ;;  %v2837_v39 = vadd.f32 %v2836_v47, %v2508_v59  ;;  %v3165_v18 = vpop.f32.mrf.mxu3  ;;  %v2180_v6 = vpop.f32.mrf.mxu0  ;;  %v9153_v59 = vor.u32 %v10179_v33, %v9152_v53 }
 0x495   :  { %v2509_v51 = vpop.f32.mrf.mxu1 }
 0x496   :  { %v3166_v54 = vadd.f32 %v3165_v18, %v2837_v39  ;;  %v2510_v52 = vadd.f32 %v2509_v51, %v2180_v6  ;;  %v11338_v51 = vpop.permute.xlu0 %4207 }
 0x497   :  { %13212 = vst [vmem:[#allocation66_spill] sm:$0xff] %v11338_v51 }
 0x498   :  { %4269 = vrot.lane.b32.xlu2 %v3163_v32, %s10626_s29  ;;  %4271 = vrot.lane.b32.xlu0 %v3166_v54, %s10626_s29 }
 0x499   :  { %3711 = vrot.lane.b32.xlu1 %v3166_v54, %s10627_s30 }
 0x49a   :  { %v3634_v56 = vpop.permute.xlu1 %3633  ;;  %v11334_v1 = vpop.permute.xlu2 %4230 }
 0x49b   :  { %3652 = vst.msk [vmem:[#allocation2 + $0x30] sm:$0xff] %vm3645_vm13, %v3634_v56  ;;  %v2838_v40 = vpop.f32.mrf.mxu2  ;;  %v9162_v56 = vld [vmem:[#allocation7 + $0x790] sm:$0xf0]  ;;  %vm13154_vm13 = vcmask 179368  }
 0x49c   :  { %13211 = vst [vmem:[#allocation65_spill] sm:$0xff] %v11334_v1  ;;  %v2839_v42 = vadd.f32 %v2838_v40, %v2510_v52  ;;  %v3167_v32 = vpop.f32.mrf.mxu3  ;;  %v2183_v47 = vpop.f32.mrf.mxu0  ;;  %v10180_v52 = vld [vmem:[#allocation7 + $0x784] sm:$0xf]  ;;  %v10181_v40 = vld [vmem:[#allocation7 + $0x78c] sm:$0xf] }
 0x49d   :  { %v2512_v39 = vpop.f32.mrf.mxu1 }
 0x49e   :  { %v3168_v18 = vadd.f32 %v3167_v32, %v2839_v42  ;;  %2222 = vmatmul.bf16.gmra.mxu0 %v9145_v29  ;;  %2551 = vmatmul.bf16.gmra.mxu1 %v9149_v2  ;;  %v2513_v6 = vadd.f32 %v2512_v39, %v2183_v47  ;;  %v9168_v29 = vld [vmem:[#allocation7 + $0x788] sm:$0xf]  ;;  %v10183_v2 = vld [vmem:[#allocation7 + $0x794] sm:$0xf0]  ;;  %v9161_v32 = vor.u32 %v10182_v60, %v9160_v13 }
 0x49f   :  { %2880 = vmatmul.bf16.gmra.mxu2 %v9153_v59  ;;  %3209 = vmatmul.bf16.gmra.mxu3 %v9157_v22  ;;  %v9170_v59 = vld [vmem:[#allocation7 + $0x798] sm:$0xf0]  ;;  %v9165_v47 = vor.u32 %v10180_v52, %v9162_v56 }
 0x4a0   :  { %3713 = vrot.lane.b32.xlu2 %v3168_v18, %s10627_s30 }
 0x4a1   :  { %4273 = vrot.lane.b32.xlu1 %v3168_v18, %s10626_s29 }
 0x4a2   :  { %v11343_v22 = vpop.permute.xlu0 %4211 }
 0x4a3   :  { %v3667_v54 = vpop.permute.xlu2 %3666  ;;  %v2841_v14 = vpop.f32.mrf.mxu2  ;;  %13213 = vst [vmem:[#allocation67_spill] sm:$0xff] %v11343_v22 }
 0x4a4   :  { %3689 = vst.msk [vmem:[#allocation2 + $0x10] sm:$0xff] %vm3686_vm15, %v3667_v54  ;;  %v2842_v12 = vadd.f32 %v2841_v14, %v2513_v6  ;;  %v3170_v16 = vpop.f32.mrf.mxu3  ;;  %v2185_v57 = vpop.f32.mrf.mxu0  ;;  %v9169_v6 = vor.u32 %v10183_v2, %v9168_v29  ;;  %v9173_v54 = vor.u32 %v10181_v40, %v9170_v59  ;;  %v9176_v40 = vld [vmem:[#allocation7 + $0x7a0] sm:$0xf]  ;;  %v10186_v59 = vld [vmem:[#allocation7 + $0x7ac] sm:$0xf0] }
 0x4a5   :  { %v2514_v53 = vpop.f32.mrf.mxu1 }
 0x4a6   :  { %v3171_v33 = vadd.f32 %v3170_v16, %v2842_v12  ;;  %v2515_v42 = vadd.f32 %v2514_v53, %v2185_v57 }
 0x4a8   :  { %4275 = vrot.lane.b32.xlu0 %v3171_v33, %s10626_s29 }
 0x4a9   :  { %3715 = vrot.lane.b32.xlu1 %v3171_v33, %s10627_s30 }
 0x4ab   :  { %v11345_v39 = vpop.permute.xlu2 %4236  ;;  %v2843_v18 = vpop.f32.mrf.mxu2 }
 0x4ac   :  { %v2844_v14 = vadd.f32 %v2843_v18, %v2515_v42  ;;  %v3172_v12 = vpop.f32.mrf.mxu3  ;;  %v2188_v16 = vpop.f32.mrf.mxu0  ;;  %v10184_v42 = vld [vmem:[#allocation7 + $0x7a4] sm:$0xf]  ;;  %v9186_v18 = vld [vmem:[#allocation7 + $0x7b8] sm:$0xf0] }
 0x4ad   :  { %v2517_v51 = vpop.f32.mrf.mxu1 }
 0x4ae   :  { %v3173_v1 = vadd.f32 %v3172_v12, %v2844_v14  ;;  %2227 = vmatmul.bf16.gmra.mxu0 %v9161_v32  ;;  %2556 = vmatmul.bf16.gmra.mxu1 %v9165_v47  ;;  %v2518_v33 = vadd.f32 %v2517_v51, %v2188_v16  ;;  %v9178_v51 = vld [vmem:[#allocation7 + $0x7b0] sm:$0xf0]  ;;  %v9184_v32 = vld [vmem:[#allocation7 + $0x7a8] sm:$0xf]  ;;  %v10185_v47 = vld [vmem:[#allocation7 + $0x7ac] sm:$0xf]  ;;  %v9177_v14 = vor.u32 %v10186_v59, %v9176_v40 }
 0x4af   :  { %2885 = vmatmul.bf16.gmra.mxu2 %v9169_v6  ;;  %3214 = vmatmul.bf16.gmra.mxu3 %v9173_v54  ;;  %v9181_v12 = vor.u32 %v10184_v42, %v9178_v51 }
 0x4b0   :  { %3717 = vrot.lane.b32.xlu2 %v3173_v1, %s10627_s30 }
 0x4b1   :  { %4277 = vrot.lane.b32.xlu1 %v3173_v1, %s10626_s29  ;;  %v10187_v1 = vld [vmem:[#allocation7 + $0x7b4] sm:$0xf0] }
 0x4b2   :  { %v3665_v57 = vpop.permute.xlu0 %3664 }
 0x4b3   :  { %3688 = vst.msk [vmem:[#allocation2 + $0x8] sm:$0xff] %vm3686_vm15, %v3665_v57  ;;  %v3671_v53 = vpop.permute.xlu2 %3670  ;;  %v2846_v13 = vpop.f32.mrf.mxu2  ;;  %v9189_v57 = vor.u32 %v10185_v47, %v9186_v18  ;;  %v9192_v47 = vld [vmem:[#allocation7 + $0x7c0] sm:$0xf]  ;;  %v10190_v18 = vld [vmem:[#allocation7 + $0x7cc] sm:$0xf0] }
 0x4b4   :  { %3691 = vst.msk [vmem:[#allocation2 + $0x20] sm:$0xff] %vm3686_vm15, %v3671_v53  ;;  %v2847_v60 = vadd.f32 %v2846_v13, %v2518_v33  ;;  %v3175_v52 = vpop.f32.mrf.mxu3  ;;  %v2190_v56 = vpop.f32.mrf.mxu0  ;;  %v9185_v33 = vor.u32 %v10187_v1, %v9184_v32 }
 0x4b5   :  { %v2519_v29 = vpop.f32.mrf.mxu1 }
 0x4b6   :  { %v3176_v2 = vadd.f32 %v3175_v52, %v2847_v60  ;;  %v2520_v6 = vadd.f32 %v2519_v29, %v2190_v56 }
 0x4b8   :  { %4296 = vrot.lane.b32.xlu2 %v3176_v2, %s10628_s0  ;;  %3744 = vrot.lane.b32.xlu0 %v3176_v2, %s10629_s19 }
 0x4ba   :  { %v11353_v54 = vpop.permute.xlu0 %4232 }
 0x4bb   :  { %v2848_v16 = vpop.f32.mrf.mxu2  ;;  %v11359_v56 = vpop.permute.xlu2 %4240 }
 0x4bc   :  { %v2849_v53 = vadd.f32 %v2848_v16, %v2520_v6  ;;  %v3177_v13 = vpop.f32.mrf.mxu3  ;;  %v2193_v60 = vpop.f32.mrf.mxu0  ;;  %13214 = vst [vmem:[#allocation68_spill] sm:$0xff] %v11359_v56  ;;  %v10188_v6 = vld [vmem:[#allocation7 + $0x7c4] sm:$0xf]  ;;  %v10191_v16 = vld [vmem:[#allocation7 + $0x7d4] sm:$0xf0] }
 0x4bd   :  { %v2522_v52 = vpop.f32.mrf.mxu1 }
 0x4be   :  { %v11355_v22 = vadd.f32 %v3177_v13, %v2849_v53  ;;  %2232 = vmatmul.bf16.gmra.mxu0 %v9177_v14  ;;  %2561 = vmatmul.bf16.gmra.mxu1 %v9181_v12  ;;  %v2523_v2 = vadd.f32 %v2522_v52, %v2193_v60  ;;  %v9194_v14 = vld [vmem:[#allocation7 + $0x7d0] sm:$0xf0]  ;;  %v9200_v12 = vld [vmem:[#allocation7 + $0x7c8] sm:$0xf]  ;;  %v11364_v53 = vpop.permute.xlu1 %4234  ;;  %v9193_v52 = vor.u32 %v10190_v18, %v9192_v47 }
 0x4bf   :  { %2890 = vmatmul.bf16.gmra.mxu2 %v9185_v33  ;;  %3219 = vmatmul.bf16.gmra.mxu3 %v9189_v57  ;;  %v10189_v33 = vld [vmem:[#allocation7 + $0x7cc] sm:$0xf]  ;;  %v9202_v57 = vld [vmem:[#allocation7 + $0x7d8] sm:$0xf0]  ;;  %13215 = vst [vmem:[#allocation69_spill] sm:$0xff] %v11364_v53 }
 0x4c0   :  { %3746 = vrot.lane.b32.xlu1 %v11355_v22, %s10629_s19 }
 0x4c2   :  { %v3669_v29 = vpop.permute.xlu0 %3668 }
 0x4c3   :  { %3690 = vst.msk [vmem:[#allocation2 + $0x18] sm:$0xff] %vm3686_vm15, %v3669_v29  ;;  %v2851_v40 = vpop.f32.mrf.mxu2 }
 0x4c4   :  { %v2852_v59 = vadd.f32 %v2851_v40, %v2523_v2  ;;  %v3180_v42 = vpop.f32.mrf.mxu3  ;;  %v2195_v51 = vpop.f32.mrf.mxu0  ;;  %v9197_v2 = vor.u32 %v10188_v6, %v9194_v14  ;;  %v9201_v40 = vor.u32 %v10191_v16, %v9200_v12 }
 0x4c5   :  { %v2524_v32 = vpop.f32.mrf.mxu1 }
 0x4c6   :  { %v3181_v1 = vadd.f32 %v3180_v42, %v2852_v59  ;;  %v2525_v13 = vadd.f32 %v2524_v32, %v2195_v51  ;;  %v9205_v59 = vor.u32 %v10189_v33, %v9202_v57  ;;  %v9208_v33 = vld [vmem:[#allocation7 + $0x7e0] sm:$0xf]  ;;  %v10194_v57 = vld [vmem:[#allocation7 + $0x7ec] sm:$0xf0] }
 0x4c8   :  { %4300 = vrot.lane.b32.xlu2 %v3181_v1, %s10628_s0  ;;  %3748 = vrot.lane.b32.xlu0 %v3181_v1, %s10629_s19 }
 0x4ca   :  { %v3677_v60 = vpop.permute.xlu2 %3676  ;;  %v11369_v51 = vpop.permute.xlu1 %4238 }
 0x4cb   :  { %3694 = vst.msk [vmem:[#allocation2 + $0x38] sm:$0xff] %vm3686_vm15, %v3677_v60  ;;  %v2853_v29 = vpop.f32.mrf.mxu2  ;;  %v10193_v60 = vld [vmem:[#allocation7 + $0x7ec] sm:$0xf] }
 0x4cc   :  { %v2854_v42 = vadd.f32 %v2853_v29, %v2525_v13  ;;  %v3182_v56 = vpop.f32.mrf.mxu3  ;;  %v2198_v45 = vpop.f32.mrf.mxu0  ;;  %13216 = vst [vmem:[#allocation70_spill] sm:$0xff] %v11369_v51  ;;  %v9216_v13 = vld [vmem:[#allocation7 + $0x7e8] sm:$0xf] }
 0x4cd   :  { %v2527_v21 = vpop.f32.mrf.mxu1 }
 0x4ce   :  { %v3183_v24 = vadd.f32 %v3182_v56, %v2854_v42  ;;  %2237 = vmatmul.bf16.gmra.mxu0 %v9193_v52  ;;  %2566 = vmatmul.bf16.gmra.mxu1 %v9197_v2  ;;  %v2528_v1 = vadd.f32 %v2527_v21, %v2198_v45  ;;  %v10192_v21 = vld [vmem:[#allocation7 + $0x7e4] sm:$0xf]  ;;  %v9210_v45 = vld [vmem:[#allocation7 + $0x7f0] sm:$0xf0]  ;;  %v9218_v52 = vld [vmem:[#allocation7 + $0x7f8] sm:$0xf0] }
 0x4cf   :  { %2895 = vmatmul.bf16.gmra.mxu2 %v9201_v40  ;;  %3224 = vmatmul.bf16.gmra.mxu3 %v9205_v59  ;;  %v9209_v59 = vor.u32 %v10194_v57, %v9208_v33  ;;  %v9213_v42 = vor.u32 %v10192_v21, %v9210_v45 }
 0x4d0   :  { %4302 = vrot.lane.b32.xlu0 %v3183_v24, %s10628_s0  ;;  %3750 = vrot.lane.b32.xlu1 %v3183_v24, %s10629_s19  ;;  %v10195_v24 = vld [vmem:[#allocation7 + $0x7f4] sm:$0xf0] }
 0x4d2   :  { %v3673_v32 = vpop.permute.xlu0 %3672  ;;  %v11371_v47 = vpop.permute.xlu2 %4244 }
 0x4d3   :  { %13217 = vst [vmem:[#allocation71_spill] sm:$0xff] %v11371_v47  ;;  %v2856_v18 = vpop.f32.mrf.mxu2 }
 0x4d4   :  { %3692 = vst.msk [vmem:[#allocation2 + $0x28] sm:$0xff] %vm3686_vm15, %v3673_v32  ;;  %v2857_v6 = vadd.f32 %v2856_v18, %v2528_v1  ;;  %v3185_v14 = vpop.f32.mrf.mxu3  ;;  %v2200_v56 = vpop.f32.mrf.mxu0  ;;  %v9217_v32 = vor.u32 %v10195_v24, %v9216_v13  ;;  %v9221_v18 = vor.u32 %v10193_v60, %v9218_v52 }
 0x4d5   :  { %v2529_v12 = vpop.f32.mrf.mxu1 }
 0x4d6   :  { %v3186_v16 = vadd.f32 %v3185_v14, %v2857_v6  ;;  %v2530_v2 = vadd.f32 %v2529_v12, %v2200_v56 }
 0x4d8   :  { %3752 = vrot.lane.b32.xlu0 %v3186_v16, %s10629_s19 }
 0x4da   :  { %v3675_v29 = vpop.permute.xlu1 %3674  ;;  %v3706_v40 = vpop.permute.xlu2 %3705 }
 0x4db   :  { %3693 = vst.msk [vmem:[#allocation2 + $0x30] sm:$0xff] %vm3686_vm15, %v3675_v29  ;;  %v2858_v1 = vpop.f32.mrf.mxu2  ;;  %vm13151_vm15 = vcmask 187568  }
 0x4dc   :  { %3729 = vst.msk [vmem:[#allocation2 + $0x8] sm:$0xff] %vm3727_vm3, %v3706_v40  ;;  %v2859_v6 = vadd.f32 %v2858_v1, %v2530_v2  ;;  %v3187_v14 = vpop.f32.mrf.mxu3  ;;  %v2203_v47 = vpop.f32.mrf.mxu0 }
 0x4dd   :  { %v2532_v51 = vpop.f32.mrf.mxu1 }
 0x4de   :  { %v3188_v53 = vadd.f32 %v3187_v14, %v2859_v6  ;;  %2242 = vmatmul.bf16.gmra.mxu0 %v9209_v59  ;;  %2571 = vmatmul.bf16.gmra.mxu1 %v9213_v42  ;;  %v2533_v56 = vadd.f32 %v2532_v51, %v2203_v47 }
 0x4df   :  { %2900 = vmatmul.bf16.gmra.mxu2 %v9217_v32  ;;  %3229 = vmatmul.bf16.gmra.mxu3 %v9221_v18 }
 0x4e0   :  { %4304 = vrot.lane.b32.xlu0 %v3186_v16, %s10628_s0  ;;  %3754 = vrot.lane.b32.xlu1 %v3188_v53, %s10629_s19 }
 0x4e2   :  { %v11379_v12 = vpop.permute.xlu1 %4242 }
 0x4e3   :  { %13218 = vst [vmem:[#allocation72_spill] sm:$0xff] %v11379_v12  ;;  %v2861_v33 = vpop.f32.mrf.mxu2 }
 0x4e4   :  { %v2862_v57 = vadd.f32 %v2861_v33, %v2533_v56  ;;  %v3190_v21 = vpop.f32.mrf.mxu3  ;;  %v2205_v45 = vpop.f32.mrf.mxu0 }
 0x4e5   :  { %v2534_v13 = vpop.f32.mrf.mxu1 }
 0x4e6   :  { %v3191_v24 = vadd.f32 %v3190_v21, %v2862_v57  ;;  %v2535_v60 = vadd.f32 %v2534_v13, %v2205_v45 }
 0x4e8   :  { %4306 = vrot.lane.b32.xlu1 %v3188_v53, %s10628_s0  ;;  %4308 = vrot.lane.b32.xlu2 %v3191_v24, %s10628_s0 }
 0x4e9   :  { %3756 = vrot.lane.b32.xlu0 %v3191_v24, %s10629_s19 }
 0x4ea   :  { %v3710_v51 = vpop.permute.xlu2 %3709 }
 0x4eb   :  { %v3704_v47 = vpop.permute.xlu1 %3703  ;;  %3731 = vst.msk [vmem:[#allocation2 + $0x18] sm:$0xff] %vm3727_vm3, %v3710_v51  ;;  %v2863_v16 = vpop.f32.mrf.mxu2 }
 0x4ec   :  { %3728 = vst.msk [vmem:[#allocation2] sm:$0xff] %vm3727_vm3, %v3704_v47  ;;  %v2864_v52 = vadd.f32 %v2863_v16, %v2535_v60  ;;  %v3192_v2 = vpop.f32.mrf.mxu3  ;;  %v2208_v29 = vpop.f32.mrf.mxu0 }
 0x4ed   :  { %v2537_v40 = vpop.f32.mrf.mxu1 }
 0x4ee   :  { %v3193_v59 = vadd.f32 %v3192_v2, %v2864_v52  ;;  %v2538_v42 = vadd.f32 %v2537_v40, %v2208_v29 }
 0x4f0   :  { %3758 = vrot.lane.b32.xlu1 %v3193_v59, %s10629_s19 }
 0x4f1   :  { %4310 = vrot.lane.b32.xlu0 %v3193_v59, %s10628_s0 }
 0x4f2   :  { %v11388_v53 = vpop.permute.xlu2 %4269 }
 0x4f3   :  { %v11390_v1 = vpop.permute.xlu1 %4265  ;;  %v2866_v32 = vpop.f32.mrf.mxu2 }
 0x4f4   :  { %v2867_v18 = vadd.f32 %v2866_v32, %v2538_v42  ;;  %v3195_v6 = vpop.f32.mrf.mxu3  ;;  %v2210_v14 = vpop.f32.mrf.mxu0 }
 0x4f5   :  { %v2539_v56 = vpop.f32.mrf.mxu1 }
 0x4f6   :  { %v11392_v33 = vadd.f32 %v3195_v6, %v2867_v18  ;;  %v2540_v57 = vadd.f32 %v2539_v56, %v2210_v14 }
 0x4f8   :  { %3785 = vrot.lane.b32.xlu2 %v11392_v33, %s10630_s1 }
 0x4fa   :  { %v3714_v21 = vpop.permute.xlu2 %3713 }
 0x4fb   :  { %v3708_v45 = vpop.permute.xlu1 %3707  ;;  %3733 = vst.msk [vmem:[#allocation2 + $0x28] sm:$0xff] %vm3727_vm3, %v3714_v21  ;;  %v2868_v13 = vpop.f32.mrf.mxu2 }
 0x4fc   :  { %3730 = vst.msk [vmem:[#allocation2 + $0x10] sm:$0xff] %vm3727_vm3, %v3708_v45  ;;  %v2869_v24 = vadd.f32 %v2868_v13, %v2540_v57  ;;  %v3197_v60 = vpop.f32.mrf.mxu3  ;;  %v2213_v51 = vpop.f32.mrf.mxu0 }
 0x4fd   :  { %v2542_v47 = vpop.f32.mrf.mxu1 }
 0x4fe   :  { %v11398_v16 = vadd.f32 %v3197_v60, %v2869_v24  ;;  %v2543_v52 = vadd.f32 %v2542_v47, %v2213_v51  ;;  %v11410_v47 = vpop.permute.xlu0 %4263 }
 0x4ff   :  { %13220 = vst [vmem:[#allocation74_spill] sm:$0xff] %v11410_v47 }
 0x500   :  { %3787 = vrot.lane.b32.xlu0 %v11398_v16, %s10630_s1 }
 0x503   :  { %v11402_v2 = vpop.permute.xlu1 %4267  ;;  %v2871_v29 = vpop.f32.mrf.mxu2 }
 0x504   :  { %13219 = vst [vmem:[#allocation73_spill] sm:$0xff] %v11402_v2  ;;  %v2872_v40 = vadd.f32 %v2871_v29, %v2543_v52  ;;  %v3200_v59 = vpop.f32.mrf.mxu3  ;;  %v2215_v42 = vpop.f32.mrf.mxu0 }
 0x505   :  { %v2544_v32 = vpop.f32.mrf.mxu1 }
 0x506   :  { %v3201_v18 = vadd.f32 %v3200_v59, %v2872_v40  ;;  %v2545_v6 = vadd.f32 %v2544_v32, %v2215_v42 }
 0x508   :  { %4333 = vrot.lane.b32.xlu0 %v3201_v18, %s10631_s20  ;;  %3789 = vrot.lane.b32.xlu2 %v3201_v18, %s10630_s1 }
 0x50a   :  { %v3718_v14 = vpop.permute.xlu2 %3717 }
 0x50b   :  { %v3712_v56 = vpop.permute.xlu1 %3711  ;;  %3735 = vst.msk [vmem:[#allocation2 + $0x38] sm:$0xff] %vm3727_vm3, %v3718_v14  ;;  %v2873_v57 = vpop.f32.mrf.mxu2 }
 0x50c   :  { %3732 = vst.msk [vmem:[#allocation2 + $0x20] sm:$0xff] %vm3727_vm3, %v3712_v56  ;;  %v2874_v21 = vadd.f32 %v2873_v57, %v2545_v6  ;;  %v3202_v45 = vpop.f32.mrf.mxu3  ;;  %v2218_v13 = vpop.f32.mrf.mxu0 }
 0x50d   :  { %v2547_v24 = vpop.f32.mrf.mxu1  ;;  %v11416_v6 = vpop.permute.xlu0 %4271 }
 0x50e   :  { %v3203_v60 = vadd.f32 %v3202_v45, %v2874_v21  ;;  %v2548_v51 = vadd.f32 %v2547_v24, %v2218_v13  ;;  %13222 = vst [vmem:[#allocation76_spill] sm:$0xff] %v11416_v6 }
 0x510   :  { %4335 = vrot.lane.b32.xlu1 %v3203_v60, %s10631_s20  ;;  %3791 = vrot.lane.b32.xlu0 %v3203_v60, %s10630_s1 }
 0x513   :  { %v11412_v52 = vpop.permute.xlu1 %4273  ;;  %v2876_v29 = vpop.f32.mrf.mxu2 }
 0x514   :  { %13221 = vst [vmem:[#allocation75_spill] sm:$0xff] %v11412_v52  ;;  %v2877_v40 = vadd.f32 %v2876_v29, %v2548_v51  ;;  %v3205_v59 = vpop.f32.mrf.mxu3  ;;  %v2220_v42 = vpop.f32.mrf.mxu0 }
 0x515   :  { %v2549_v32 = vpop.f32.mrf.mxu1 }
 0x516   :  { %v3206_v18 = vadd.f32 %v3205_v59, %v2877_v40  ;;  %v2550_v14 = vadd.f32 %v2549_v32, %v2220_v42 }
 0x518   :  { %4337 = vrot.lane.b32.xlu0 %v3206_v18, %s10631_s20  ;;  %3793 = vrot.lane.b32.xlu2 %v3206_v18, %s10630_s1 }
 0x51a   :  { %v11421_v29 = vpop.permute.xlu0 %4275 }
 0x51b   :  { %v3716_v56 = vpop.permute.xlu1 %3715  ;;  %v2878_v57 = vpop.f32.mrf.mxu2  ;;  %13223 = vst [vmem:[#allocation77_spill] sm:$0xff] %v11421_v29 }
 0x51c   :  { %3734 = vst.msk [vmem:[#allocation2 + $0x30] sm:$0xff] %vm3727_vm3, %v3716_v56  ;;  %v2879_v21 = vadd.f32 %v2878_v57, %v2550_v14  ;;  %v3207_v45 = vpop.f32.mrf.mxu3  ;;  %v2223_v13 = vpop.f32.mrf.mxu0  ;;  %vm13155_vm3 = vcmask 195768  }
 0x51d   :  { %v2552_v24 = vpop.f32.mrf.mxu1 }
 0x51e   :  { %v3208_v60 = vadd.f32 %v3207_v45, %v2879_v21  ;;  %v2553_v51 = vadd.f32 %v2552_v24, %v2223_v13 }
 0x520   :  { %4339 = vrot.lane.b32.xlu1 %v3208_v60, %s10631_s20  ;;  %3795 = vrot.lane.b32.xlu0 %v3208_v60, %s10630_s1 }
 0x523   :  { %v2881_v40 = vpop.f32.mrf.mxu2  ;;  %v11425_v14 = vpop.permute.xlu1 %4277 }
 0x524   :  { %v2882_v59 = vadd.f32 %v2881_v40, %v2553_v51  ;;  %v3210_v18 = vpop.f32.mrf.mxu3  ;;  %v2225_v42 = vpop.f32.mrf.mxu0  ;;  %13224 = vst [vmem:[#allocation78_spill] sm:$0xff] %v11425_v14 }
 0x525   :  { %v2554_v32 = vpop.f32.mrf.mxu1 }
 0x526   :  { %v3211_v12 = vadd.f32 %v3210_v18, %v2882_v59  ;;  %v2555_v56 = vadd.f32 %v2554_v32, %v2225_v42 }
 0x528   :  { %4341 = vrot.lane.b32.xlu1 %v3211_v12, %s10631_s20  ;;  %3797 = vrot.lane.b32.xlu2 %v3211_v12, %s10630_s1 }
 0x52a   :  { %v3745_v57 = vpop.permute.xlu0 %3744 }
 0x52b   :  { %3769 = vst.msk [vmem:[#allocation2] sm:$0xff] %vm3768_vm4, %v3745_v57  ;;  %v2883_v21 = vpop.f32.mrf.mxu2 }
 0x52c   :  { %v2884_v45 = vadd.f32 %v2883_v21, %v2555_v56  ;;  %v3212_v13 = vpop.f32.mrf.mxu3  ;;  %v2228_v24 = vpop.f32.mrf.mxu0 }
 0x52d   :  { %v2557_v60 = vpop.f32.mrf.mxu1 }
 0x52e   :  { %v3213_v51 = vadd.f32 %v3212_v13, %v2884_v45  ;;  %v2558_v40 = vadd.f32 %v2557_v60, %v2228_v24  ;;  %v11435_v45 = vpop.permute.xlu2 %4296 }
 0x52f   :  { %13225 = vst [vmem:[#allocation79_spill] sm:$0xff] %v11435_v45 }
 0x530   :  { %4343 = vrot.lane.b32.xlu2 %v3213_v51, %s10631_s20  ;;  %3799 = vrot.lane.b32.xlu0 %v3213_v51, %s10630_s1 }
 0x532   :  { %v3747_v59 = vpop.permute.xlu1 %3746 }
 0x533   :  { %3770 = vst.msk [vmem:[#allocation2 + $0x8] sm:$0xff] %vm3768_vm4, %v3747_v59  ;;  %v2886_v12 = vpop.f32.mrf.mxu2 }
 0x534   :  { %v2887_v18 = vadd.f32 %v2886_v12, %v2558_v40  ;;  %v3215_v42 = vpop.f32.mrf.mxu3  ;;  %v2230_v32 = vpop.f32.mrf.mxu0 }
 0x535   :  { %v2559_v29 = vpop.f32.mrf.mxu1 }
 0x536   :  { %v11431_v57 = vadd.f32 %v3215_v42, %v2887_v18  ;;  %v2560_v56 = vadd.f32 %v2559_v29, %v2230_v32  ;;  %v11444_v29 = vpop.permute.xlu2 %4300 }
 0x537   :  { %13226 = vst [vmem:[#allocation80_spill] sm:$0xff] %v11444_v29 }
 0x538   :  { %3826 = vrot.lane.b32.xlu1 %v11431_v57, %s10605_s3 }
 0x53a   :  { %v3749_v21 = vpop.permute.xlu0 %3748 }
 0x53b   :  { %3771 = vst.msk [vmem:[#allocation2 + $0x10] sm:$0xff] %vm3768_vm4, %v3749_v21  ;;  %v2888_v13 = vpop.f32.mrf.mxu2 }
 0x53c   :  { %v2889_v24 = vadd.f32 %v2888_v13, %v2560_v56  ;;  %v3217_v60 = vpop.f32.mrf.mxu3  ;;  %v2233_v51 = vpop.f32.mrf.mxu0 }
 0x53d   :  { %v2562_v59 = vpop.f32.mrf.mxu1 }
 0x53e   :  { %v11438_v40 = vadd.f32 %v3217_v60, %v2889_v24  ;;  %v2563_v12 = vadd.f32 %v2562_v59, %v2233_v51 }
 0x540   :  { %3828 = vrot.lane.b32.xlu2 %v11438_v40, %s10605_s3 }
 0x542   :  { %v11442_v18 = vpop.permute.xlu0 %4302  ;;  %v3751_v42 = vpop.permute.xlu1 %3750 }
 0x543   :  { %3772 = vst.msk [vmem:[#allocation2 + $0x18] sm:$0xff] %vm3768_vm4, %v3751_v42  ;;  %v2891_v32 = vpop.f32.mrf.mxu2  ;;  %v11448_v51 = vpop.permute.xlu2 %4308 }
 0x544   :  { %v2892_v21 = vadd.f32 %v2891_v32, %v2563_v12  ;;  %v3220_v14 = vpop.f32.mrf.mxu3  ;;  %v2235_v56 = vpop.f32.mrf.mxu0  ;;  %13227 = vst [vmem:[#allocation81_spill] sm:$0xff] %v11448_v51 }
 0x545   :  { %v2564_v13 = vpop.f32.mrf.mxu1 }
 0x546   :  { %v3221_v52 = vadd.f32 %v3220_v14, %v2892_v21  ;;  %v2565_v24 = vadd.f32 %v2564_v13, %v2235_v56 }
 0x548   :  { %3830 = vrot.lane.b32.xlu1 %v3221_v52, %s10605_s3 }
 0x54a   :  { %v3753_v60 = vpop.permute.xlu0 %3752 }
 0x54b   :  { %3773 = vst.msk [vmem:[#allocation2 + $0x20] sm:$0xff] %vm3768_vm4, %v3753_v60  ;;  %v2893_v59 = vpop.f32.mrf.mxu2 }
 0x54c   :  { %v2894_v45 = vadd.f32 %v2893_v59, %v2565_v24  ;;  %v3222_v6 = vpop.f32.mrf.mxu3  ;;  %v2238_v47 = vpop.f32.mrf.mxu0 }
 0x54d   :  { %v2567_v29 = vpop.f32.mrf.mxu1 }
 0x54e   :  { %v3223_v42 = vadd.f32 %v3222_v6, %v2894_v45  ;;  %v2568_v2 = vadd.f32 %v2567_v29, %v2238_v47 }
 0x550   :  { %4366 = vrot.lane.b32.xlu1 %v3221_v52, %s10632_s27  ;;  %3832 = vrot.lane.b32.xlu2 %v3223_v42, %s10605_s3 }
 0x552   :  { %v11453_v14 = vpop.permute.xlu0 %4304  ;;  %v3755_v12 = vpop.permute.xlu1 %3754 }
 0x553   :  { %3774 = vst.msk [vmem:[#allocation2 + $0x28] sm:$0xff] %vm3768_vm4, %v3755_v12  ;;  %v3786_v32 = vpop.permute.xlu2 %3785  ;;  %v2896_v21 = vpop.f32.mrf.mxu2 }
 0x554   :  { %3810 = vst.msk [vmem:[#allocation2] sm:$0xff] %vm3809_vm5, %v3786_v32  ;;  %v2897_v56 = vadd.f32 %v2896_v21, %v2568_v2  ;;  %v3225_v13 = vpop.f32.mrf.mxu3  ;;  %v2240_v24 = vpop.f32.mrf.mxu0 }
 0x555   :  { %v2569_v6 = vpop.f32.mrf.mxu1 }
 0x556   :  { %v3226_v47 = vadd.f32 %v3225_v13, %v2897_v56  ;;  %v2570_v52 = vadd.f32 %v2569_v6, %v2240_v24 }
 0x558   :  { %4368 = vrot.lane.b32.xlu2 %v3223_v42, %s10632_s27  ;;  %4370 = vrot.lane.b32.xlu0 %v3226_v47, %s10632_s27 }
 0x559   :  { %3834 = vrot.lane.b32.xlu1 %v3226_v47, %s10605_s3 }
 0x55a   :  { %v11460_v45 = vpop.permute.xlu1 %4306 }
 0x55b   :  { %v3757_v29 = vpop.permute.xlu0 %3756  ;;  %v2898_v60 = vpop.f32.mrf.mxu2 }
 0x55c   :  { %3775 = vst.msk [vmem:[#allocation2 + $0x30] sm:$0xff] %vm3768_vm4, %v3757_v29  ;;  %v2899_v59 = vadd.f32 %v2898_v60, %v2570_v52  ;;  %v3227_v12 = vpop.f32.mrf.mxu3  ;;  %v2243_v2 = vpop.f32.mrf.mxu0 }
 0x55d   :  { %v2572_v32 = vpop.f32.mrf.mxu1 }
 0x55e   :  { %v3228_v21 = vadd.f32 %v3227_v12, %v2899_v59  ;;  %v2573_v51 = vadd.f32 %v2572_v32, %v2243_v2 }
 0x560   :  { %3836 = vrot.lane.b32.xlu2 %v3228_v21, %s10605_s3 }
 0x561   :  { %4372 = vrot.lane.b32.xlu1 %v3228_v21, %s10632_s27 }
 0x562   :  { %v3759_v42 = vpop.permute.xlu1 %3758  ;;  %v3790_v56 = vpop.permute.xlu2 %3789 }
 0x563   :  { %3776 = vst.msk [vmem:[#allocation2 + $0x38] sm:$0xff] %vm3768_vm4, %v3759_v42  ;;  %v2901_v13 = vpop.f32.mrf.mxu2  ;;  %v11469_v60 = vpop.permute.xlu0 %4310  ;;  %vm4155_vm4 = vcmask 203968  }
 0x564   :  { %3812 = vst.msk [vmem:[#allocation2 + $0x10] sm:$0xff] %vm3809_vm5, %v3790_v56  ;;  %v2902_v24 = vadd.f32 %v2901_v13, %v2573_v51  ;;  %v3230_v6 = vpop.f32.mrf.mxu3  ;;  %v2245_v52 = vpop.f32.mrf.mxu0 }
 0x565   :  { %v2574_v29 = vpop.f32.mrf.mxu1 }
 0x566   :  { %v3231_v47 = vadd.f32 %v3230_v6, %v2902_v24  ;;  %v2575_v59 = vadd.f32 %v2574_v29, %v2245_v52  ;;  %v13262_v52 = vld [vmem:[#allocation37_spill] sm:$0xff]  ;;  %v13263_v29 = vld [vmem:[#allocation40_spill] sm:$0xff] }
 0x568   :  { %4374 = vrot.lane.b32.xlu0 %v3231_v47, %s10632_s27 }
 0x569   :  { %3838 = vrot.lane.b32.xlu1 %v3231_v47, %s10605_s3 }
 0x56b   :  { %v2903_v12 = vpop.f32.mrf.mxu2 }
 0x56c   :  { %v2904_v2 = vadd.f32 %v2903_v12, %v2575_v59  ;;  %v3232_v32 = vpop.f32.mrf.mxu3  ;;  %v13265_v59 = vld [vmem:[#allocation45_spill] sm:$0xff]  ;;  %v13266_v12 = vld [vmem:[#allocation52_spill] sm:$0xff] }
 0x56e   :  { %v3233_v21 = vadd.f32 %v3232_v32, %v2904_v2  ;;  %v13267_v2 = vld [vmem:[#allocation58_spill] sm:$0xff] }
 0x56f   :  { %v13268_v32 = vld [vmem:[#allocation62_spill] sm:$0xff] }
 0x570   :  { %4298 = vrot.lane.b32.xlu0 %v11355_v22, %s10628_s0  ;;  %3840 = vrot.lane.b32.xlu2 %v3233_v21, %s10605_s3  ;;  %s10637_s0 = smov 64  }
 0x571   :  { %4329 = vrot.lane.b32.xlu1 %v11392_v33, %s10631_s20 }
 0x572   :  { %v3788_v51 = vpop.permute.xlu0 %3787  ;;  %v3794_v42 = vpop.permute.xlu2 %3793 }
 0x573   :  { %3811 = vst.msk [vmem:[#allocation2 + $0x8] sm:$0xff] %vm3809_vm5, %v3788_v51  ;;  %v13270_v51 = vld [vmem:[#allocation68_spill] sm:$0xff] }
 0x574   :  { %3814 = vst.msk [vmem:[#allocation2 + $0x20] sm:$0xff] %vm3809_vm5, %v3794_v42 }
 0x578   :  { %4362 = vrot.lane.b32.xlu0 %v11431_v57, %s10632_s27  ;;  %4331 = vrot.lane.b32.xlu2 %v11398_v16, %s10631_s20 }
 0x579   :  { %4364 = vrot.lane.b32.xlu1 %v11438_v40, %s10632_s27 }
 0x57a   :  { %v11484_v22 = vpop.permute.xlu0 %4333 }
 0x581   :  { %4376 = vrot.lane.b32.xlu1 %v3233_v21, %s10632_s27  ;;  %v13269_v21 = vld [vmem:[#allocation70_spill] sm:$0xff]  ;;  %s10639_s27 = smov 96  }
 0x582   :  { %v3792_v33 = vpop.permute.xlu0 %3791  ;;  %v3798_v56 = vpop.permute.xlu2 %3797 }
 0x583   :  { %3813 = vst.msk [vmem:[#allocation2 + $0x18] sm:$0xff] %vm3809_vm5, %v3792_v33  ;;  %v11491_v24 = vpop.permute.xlu1 %4335  ;;  %v13272_v33 = vld [vmem:[#allocation79_spill] sm:$0xff] }
 0x584   :  { %3816 = vst.msk [vmem:[#allocation2 + $0x30] sm:$0xff] %vm3809_vm5, %v3798_v56  ;;  %v13273_v56 = vld [vmem:[#allocation19_spill] sm:$0xff] }
 0x58a   :  { %v11489_v13 = vpop.permute.xlu0 %4337  ;;  %v11493_v57 = vpop.permute.xlu2 %4343 }
 0x592   :  { %v3796_v16 = vpop.permute.xlu0 %3795  ;;  %v11496_v40 = vpop.permute.xlu1 %4339 }
 0x593   :  { %3815 = vst.msk [vmem:[#allocation2 + $0x28] sm:$0xff] %vm3809_vm5, %v3796_v16 }
 0x59a   :  { %v3829_v6 = vpop.permute.xlu2 %3828 }
 0x59b   :  { %3852 = vst.msk [vmem:[#allocation2 + $0x8] sm:$0xff] %vm3850_vm6, %v3829_v6  ;;  %v13275_v6 = vld [vmem:[#allocation26_spill] sm:$0xff] }
 0x59c   :  { %3893 = vst.msk [vmem:[#allocation2 + $0x8] sm:$0xff] %vm3891_vm7, %v10923_v37  ;;  %v11511_v37 = vpop.permute.xlu1 %4341 }
 0x59d   :  { %3926 = vst.msk [vmem:[#allocation2 + $0x8] sm:$0xff] %vm3924_vm8, %v10947_v49 }
 0x59e   :  { %3959 = vst.msk [vmem:[#allocation2 + $0x8] sm:$0xff] %vm3957_vm9, %v10990_v20 }
 0x59f   :  { %3992 = vst.msk [vmem:[#allocation2 + $0x8] sm:$0xff] %vm3990_vm10, %v11028_v15  ;;  %v13235_v15 = vld [vmem:[#allocation29_spill] sm:$0xff] }
 0x5a0   :  { %4025 = vst.msk [vmem:[#allocation2 + $0x8] sm:$0xff] %vm4023_vm11, %v11067_v55  ;;  %v13240_v55 = vld [vmem:[#allocation51_spill] sm:$0xff] }
 0x5a1   :  { %4058 = vst.msk [vmem:[#allocation2 + $0x8] sm:$0xff] %vm13154_vm13, %v11113_v27  ;;  %v13243_v27 = vld [vmem:[#allocation63_spill] sm:$0xff] }
 0x5a2   :  { %v3800_v47 = vpop.permute.xlu0 %3799  ;;  %4091 = vst.msk [vmem:[#allocation2 + $0x8] sm:$0xff] %vm13151_vm15, %v11148_v26  ;;  %v13246_v26 = vld [vmem:[#allocation80_spill] sm:$0xff] }
 0x5a3   :  { %3817 = vst.msk [vmem:[#allocation2 + $0x38] sm:$0xff] %vm3809_vm5, %v3800_v47  ;;  %vm4320_vm5 = vcmask 244968   ;;  %v13276_v47 = vld [vmem:[#allocation31_spill] sm:$0xff] }
 0x5a4   :  { %4124 = vst.msk [vmem:[#allocation2 + $0x8] sm:$0xff] %vm13155_vm3, %v11187_v35  ;;  %v13252_v35 = vld [vmem:[#allocation65_spill] sm:$0xff] }
 0x5a5   :  { %4157 = vst.msk [vmem:[#allocation2 + $0x8] sm:$0xff] %vm4155_vm4, %v11233_v3  ;;  %v13254_v3 = vld [vmem:[#allocation74_spill] sm:$0xff] }
 0x5a6   :  { %4190 = vst.msk [vmem:[#allocation2 + $0x8] sm:$0xff] %vm4188_vm1, %v11268_v36 }
 0x5a7   :  { %4223 = vst.msk [vmem:[#allocation2 + $0x8] sm:$0xff] %vm4221_vm14, %v11299_v0  ;;  %v13256_v0 = vld [vmem:[#allocation20_spill] sm:$0xff] }
 0x5a8   :  { %4256 = vst.msk [vmem:[#allocation2 + $0x8] sm:$0xff] %vm4254_vm12, %v11353_v54  ;;  %v13258_v54 = vld [vmem:[#allocation25_spill] sm:$0xff] }
 0x5a9   :  { %4289 = vst.msk [vmem:[#allocation2 + $0x8] sm:$0xff] %vm4287_vm2, %v11390_v1 }
 0x5aa   :  { %v3827_v49 = vpop.permute.xlu1 %3826  ;;  %v3833_v20 = vpop.permute.xlu2 %3832 }
 0x5ab   :  { %3851 = vst.msk [vmem:[#allocation2] sm:$0xff] %vm3850_vm6, %v3827_v49  ;;  %v13277_v49 = vld [vmem:[#allocation35_spill] sm:$0xff] }
 0x5ac   :  { %3892 = vst.msk [vmem:[#allocation2] sm:$0xff] %vm3891_vm7, %v10916_v34 }
 0x5ad   :  { %3925 = vst.msk [vmem:[#allocation2] sm:$0xff] %vm3924_vm8, %v10932_v10 }
 0x5ae   :  { %3958 = vst.msk [vmem:[#allocation2] sm:$0xff] %vm3957_vm9, %v10981_v58  ;;  %v13231_v58 = vld [vmem:[#allocation48_spill] sm:$0xff] }
 0x5af   :  { %3991 = vst.msk [vmem:[#allocation2] sm:$0xff] %vm3990_vm10, %v11023_v48  ;;  %v13234_v48 = vld [vmem:[#allocation24_spill] sm:$0xff] }
 0x5b0   :  { %4024 = vst.msk [vmem:[#allocation2] sm:$0xff] %vm4023_vm11, %v11057_v4  ;;  %v13238_v4 = vld [vmem:[#allocation42_spill] sm:$0xff] }
 0x5b1   :  { %4057 = vst.msk [vmem:[#allocation2] sm:$0xff] %vm13154_vm13, %v11094_v50  ;;  %v13242_v50 = vld [vmem:[#allocation55_spill] sm:$0xff] }
 0x5b2   :  { %4090 = vst.msk [vmem:[#allocation2] sm:$0xff] %vm13151_vm15, %v11133_v7  ;;  %v4369_v34 = vpop.permute.xlu2 %4368  ;;  %v13245_v7 = vld [vmem:[#allocation73_spill] sm:$0xff] }
 0x5b3   :  { %3854 = vst.msk [vmem:[#allocation2 + $0x18] sm:$0xff] %vm3850_vm6, %v3833_v20  ;;  %v13278_v20 = vld [vmem:[#allocation38_spill] sm:$0xff] }
 0x5b4   :  { %3895 = vst.msk [vmem:[#allocation2 + $0x18] sm:$0xff] %vm3891_vm7, %v10929_v61 }
 0x5b5   :  { %3928 = vst.msk [vmem:[#allocation2 + $0x18] sm:$0xff] %vm3924_vm8, %v10963_v41  ;;  %v13230_v41 = vld [vmem:[#allocation44_spill] sm:$0xff] }
 0x5b6   :  { %3961 = vst.msk [vmem:[#allocation2 + $0x18] sm:$0xff] %vm3957_vm9, %v10995_v43  ;;  %v13233_v43 = vld [vmem:[#allocation22_spill] sm:$0xff] }
 0x5b7   :  { %3994 = vst.msk [vmem:[#allocation2 + $0x18] sm:$0xff] %vm3990_vm10, %v11039_v62  ;;  %v13236_v62 = vld [vmem:[#allocation34_spill] sm:$0xff] }
 0x5b8   :  { %4027 = vst.msk [vmem:[#allocation2 + $0x18] sm:$0xff] %vm4023_vm11, %v11082_v38  ;;  %v13241_v38 = vld [vmem:[#allocation56_spill] sm:$0xff] }
 0x5b9   :  { %4060 = vst.msk [vmem:[#allocation2 + $0x18] sm:$0xff] %vm13154_vm13, %v11105_v8 }
 0x5ba   :  { %4093 = vst.msk [vmem:[#allocation2 + $0x18] sm:$0xff] %vm13151_vm15, %v11168_v23  ;;  %vm13152_vm15 = vcmask 261368   ;;  %v3831_v61 = vpop.permute.xlu1 %3830  ;;  %v13250_v23 = vld [vmem:[#allocation61_spill] sm:$0xff] }
 0x5bb   :  { %4126 = vst.msk [vmem:[#allocation2 + $0x18] sm:$0xff] %vm13155_vm3, %v11201_v5 }
 0x5bc   :  { %4159 = vst.msk [vmem:[#allocation2 + $0x18] sm:$0xff] %vm4155_vm4, %v11225_v63  ;;  %v13253_v63 = vld [vmem:[#allocation66_spill] sm:$0xff] }
 0x5bd   :  { %4192 = vst.msk [vmem:[#allocation2 + $0x18] sm:$0xff] %vm4188_vm1, %v11266_v28  ;;  %v13255_v28 = vld [vmem:[#allocation16_spill] sm:$0xff] }
 0x5be   :  { %4225 = vst.msk [vmem:[#allocation2 + $0x18] sm:$0xff] %vm4221_vm14, %v11305_v9 }
 0x5bf   :  { %4258 = vst.msk [vmem:[#allocation2 + $0x18] sm:$0xff] %vm4254_vm12, %v11345_v39 }
 0x5c0   :  { %4291 = vst.msk [vmem:[#allocation2 + $0x18] sm:$0xff] %vm4287_vm2, %v11388_v53  ;;  %v13259_v53 = vld [vmem:[#allocation28_spill] sm:$0xff] }
 0x5c1   :  { %4324 = vst.msk [vmem:[#allocation2 + $0x18] sm:$0xff] %vm4320_vm5, %v11442_v18  ;;  %v13261_v18 = vld [vmem:[#allocation32_spill] sm:$0xff] }
 0x5c2   :  { %4357 = vst.msk [vmem:[#allocation2 + $0x18] sm:$0xff] %vm13153_vm0, %v11491_v24  ;;  %vm13229_vm0 = vcmask 187568   ;;  %v4367_v8 = vpop.permute.xlu1 %4366  ;;  %v13274_v24 = vld [vmem:[#allocation23_spill] sm:$0xff] }
 0x5c3   :  { %4390 = vst.msk [vmem:[#allocation2 + $0x18] sm:$0xff] %vm13152_vm15, %v4369_v34  ;;  %vm13228_vm15 = vcmask 261120   ;;  %v13279_v34 = vld [vmem:[#allocation43_spill] sm:$0xff] }
 0x5c4   :  { %4123 = vst.msk [vmem:[#allocation2] sm:$0xff] %vm13155_vm3, %v11176_v25  ;;  %v13251_v25 = vld [vmem:[#allocation57_spill] sm:$0xff] }
 0x5c5   :  { %3853 = vst.msk [vmem:[#allocation2 + $0x10] sm:$0xff] %vm3850_vm6, %v3831_v61  ;;  %v13281_v61 = vld [vmem:[#allocation49_spill] sm:$0xff] }
 0x5c6   :  { %3894 = vst.msk [vmem:[#allocation2 + $0x10] sm:$0xff] %vm3891_vm7, %v10920_v44 }
 0x5c7   :  { %3927 = vst.msk [vmem:[#allocation2 + $0x10] sm:$0xff] %vm3924_vm8, %v10939_v30  ;;  %v3837_v30 = vpop.permute.xlu2 %3836 }
 0x5c8   :  { %3960 = vst.msk [vmem:[#allocation2 + $0x10] sm:$0xff] %vm3957_vm9, %v10988_v19  ;;  %v13232_v19 = vld [vmem:[#allocation18_spill] sm:$0xff] }
 0x5c9   :  { %3993 = vst.msk [vmem:[#allocation2 + $0x10] sm:$0xff] %vm3990_vm10, %v11042_v17  ;;  %v13237_v17 = vld [vmem:[#allocation36_spill] sm:$0xff] }
 0x5ca   :  { %4026 = vst.msk [vmem:[#allocation2 + $0x10] sm:$0xff] %vm4023_vm11, %v11062_v46  ;;  %v11588_v10 = vld [vmem:[#allocation2 + $0x18] sm:$0xff]  ;;  %v13239_v46 = vld [vmem:[#allocation47_spill] sm:$0xff] }
 0x5cb   :  { %4059 = vst.msk [vmem:[#allocation2 + $0x10] sm:$0xff] %vm13154_vm13, %v11122_v31  ;;  %v4428_v44 = vsel %vm13228_vm15, %v11588_v10, 0.0  ;;  %v13244_v31 = vld [vmem:[#allocation69_spill] sm:$0xff]  ;;  %vm13247_vm15 = vcmask 253168   ;;  %v3835_v5 = vpop.permute.xlu1 %3834 }
 0x5cc   :  { %4092 = vst.msk [vmem:[#allocation2 + $0x10] sm:$0xff] %vm13229_vm0, %v11155_v11  ;;  %4429 = vadd.xlane.f32.xlu1 %v4428_v44  ;;  %v13249_v11 = vld [vmem:[#allocation50_spill] sm:$0xff]  ;;  %v13282_v44 = vld [vmem:[#allocation75_spill] sm:$0xff] }
 0x5cd   :  { %4125 = vst.msk [vmem:[#allocation2 + $0x10] sm:$0xff] %vm13155_vm3, %v13230_v41 }
 0x5ce   :  { %4156 = vst.msk [vmem:[#allocation2] sm:$0xff] %vm4155_vm4, %v13231_v58  ;;  %v13285_v58 = vld [vmem:[#allocation53_spill] sm:$0xff] }
 0x5cf   :  { %3856 = vst.msk [vmem:[#allocation2 + $0x28] sm:$0xff] %vm3850_vm6, %v3837_v30  ;;  %v3841_v42 = vpop.permute.xlu2 %3840  ;;  %v4371_v30 = vpop.permute.xlu0 %4370 }
 0x5d0   :  { %3897 = vst.msk [vmem:[#allocation2 + $0x28] sm:$0xff] %vm3891_vm7, %v13232_v19  ;;  %v13287_v19 = vld [vmem:[#allocation60_spill] sm:$0xff] }
 0x5d1   :  { %3930 = vst.msk [vmem:[#allocation2 + $0x28] sm:$0xff] %vm3924_vm8, %v13233_v43  ;;  %v13291_v43 = vld [vmem:[#allocation78_spill] sm:$0xff] }
 0x5d2   :  { %3963 = vst.msk [vmem:[#allocation2 + $0x28] sm:$0xff] %vm3957_vm9, %v13234_v48 }
 0x5d3   :  { %3996 = vst.msk [vmem:[#allocation2 + $0x28] sm:$0xff] %vm3990_vm10, %v13235_v15  ;;  %v4373_v16 = vpop.permute.xlu1 %4372  ;;  %v13293_v15 = vld [vmem:[#allocation17_spill] sm:$0xff] }
 0x5d4   :  { %4029 = vst.msk [vmem:[#allocation2 + $0x28] sm:$0xff] %vm4023_vm11, %v13236_v62 }
 0x5d5   :  { %4062 = vst.msk [vmem:[#allocation2 + $0x28] sm:$0xff] %vm13154_vm13, %v13237_v17  ;;  %v13294_v17 = vld [vmem:[#allocation21_spill] sm:$0xff] }
 0x5d6   :  { %4095 = vst.msk [vmem:[#allocation2 + $0x28] sm:$0xff] %vm13229_vm0, %v13238_v4  ;;  %vm13248_vm0 = vcmask 261368   ;;  %v13295_v4 = vld [vmem:[#allocation27_spill] sm:$0xff] }
 0x5d7   :  { %4128 = vst.msk [vmem:[#allocation2 + $0x28] sm:$0xff] %vm13155_vm3, %v13239_v46 }
 0x5d8   :  { %4158 = vst.msk [vmem:[#allocation2 + $0x10] sm:$0xff] %vm4155_vm4, %v13240_v55  ;;  %v13296_v55 = vld [vmem:[#allocation30_spill] sm:$0xff] }
 0x5d9   :  { %4189 = vst.msk [vmem:[#allocation2] sm:$0xff] %vm4188_vm1, %v13241_v38 }
 0x5da   :  { %4191 = vst.msk [vmem:[#allocation2 + $0x10] sm:$0xff] %vm4188_vm1, %v13242_v50 }
 0x5db   :  { %4224 = vst.msk [vmem:[#allocation2 + $0x10] sm:$0xff] %vm4221_vm14, %v13243_v27  ;;  %v3839_v41 = vpop.permute.xlu1 %3838  ;;  %v13299_v27 = vld [vmem:[#allocation39_spill] sm:$0xff] }
 0x5dc   :  { %4257 = vst.msk [vmem:[#allocation2 + $0x10] sm:$0xff] %vm4254_vm12, %v13244_v31 }
 0x5dd   :  { %4290 = vst.msk [vmem:[#allocation2 + $0x10] sm:$0xff] %vm4287_vm2, %v13245_v7  ;;  %v13302_v7 = vld [vmem:[#allocation41_spill] sm:$0xff] }
 0x5de   :  { %4323 = vst.msk [vmem:[#allocation2 + $0x10] sm:$0xff] %vm4320_vm5, %v13246_v26  ;;  %v13304_v26 = vld [vmem:[#allocation46_spill] sm:$0xff] }
 0x5df   :  { %4356 = vst.msk [vmem:[#allocation2 + $0x10] sm:$0xff] %vm13247_vm15, %v11484_v22  ;;  %vm13257_vm15 = vcmask 261120   ;;  %v13271_v22 = vld [vmem:[#allocation76_spill] sm:$0xff] }
 0x5e0   :  { %4389 = vst.msk [vmem:[#allocation2 + $0x10] sm:$0xff] %vm13248_vm0, %v4367_v8  ;;  %vm13260_vm0 = vmmov %vm13257_vm15  ;;  %v13298_v8 = vld [vmem:[#allocation33_spill] sm:$0xff] }
 0x5e1   :  { %4161 = vst.msk [vmem:[#allocation2 + $0x28] sm:$0xff] %vm4155_vm4, %v13249_v11 }
 0x5e2   :  { %4222 = vst.msk [vmem:[#allocation2] sm:$0xff] %vm4221_vm14, %v13250_v23  ;;  %v13306_v23 = vld [vmem:[#allocation54_spill] sm:$0xff] }
 0x5e3   :  { %4194 = vst.msk [vmem:[#allocation2 + $0x28] sm:$0xff] %vm4188_vm1, %v13251_v25  ;;  %v4330_v62 = vpop.permute.xlu1 %4329 }
 0x5e4   :  { %4255 = vst.msk [vmem:[#allocation2] sm:$0xff] %vm4254_vm12, %v13252_v35  ;;  %v13307_v35 = vld [vmem:[#allocation59_spill] sm:$0xff] }
 0x5e5   :  { %4227 = vst.msk [vmem:[#allocation2 + $0x28] sm:$0xff] %vm4221_vm14, %v13253_v63 }
 0x5e6   :  { %4288 = vst.msk [vmem:[#allocation2] sm:$0xff] %vm4287_vm2, %v13254_v3  ;;  %v13309_v3 = vld [vmem:[#allocation72_spill] sm:$0xff] }
 0x5e7   :  { %3855 = vst.msk [vmem:[#allocation2 + $0x20] sm:$0xff] %vm3850_vm6, %v3835_v5  ;;  %v11649_v36 = vld [vmem:[#allocation2 + $0x10] sm:$0xff] }
 0x5e8   :  { %3896 = vst.msk [vmem:[#allocation2 + $0x20] sm:$0xff] %vm3891_vm7, %v13255_v28  ;;  %v4425_v9 = vsel %vm13257_vm15, %v11649_v36, 0.0  ;;  %v4453_v39 = vmul.f32 %v11649_v36, %v11649_v36  ;;  %vm13264_vm15 = vcmask 187568   ;;  %v13308_v5 = vld [vmem:[#allocation64_spill] sm:$0xff] }
 0x5e9   :  { %3929 = vst.msk [vmem:[#allocation2 + $0x20] sm:$0xff] %vm3924_vm8, %v13256_v0  ;;  %4426 = vadd.xlane.f32.xlu0 %v4425_v9  ;;  %v13311_v0 = vld [vmem:[#allocation77_spill] sm:$0xff] }
 0x5ea   :  { %3962 = vst.msk [vmem:[#allocation2 + $0x20] sm:$0xff] %vm3957_vm9, %v13258_v54  ;;  %v4465_v1 = vsel %vm13260_vm0, %v4453_v39, 0.0  ;;  %vm13280_vm0 = vmmov %vm13264_vm15  ;;  %v13312_v9 = vld [vmem:[#allocation81_spill] sm:$0xff]  ;;  %v4332_v39 = vpop.permute.xlu2 %4331 }
 0x5eb   :  { %3995 = vst.msk [vmem:[#allocation2 + $0x20] sm:$0xff] %vm3990_vm10, %v13259_v53  ;;  %4466 = vadd.xlane.f32.xlu2 %v4465_v1  ;;  %v4365_v63 = vpop.permute.xlu1 %4364 }
 0x5ec   :  { %4028 = vst.msk [vmem:[#allocation2 + $0x20] sm:$0xff] %vm4023_vm11, %v13261_v18 }
 0x5ed   :  { %4061 = vst.msk [vmem:[#allocation2 + $0x20] sm:$0xff] %vm13154_vm13, %v13262_v52 }
 0x5ee   :  { %4094 = vst.msk [vmem:[#allocation2 + $0x20] sm:$0xff] %vm13264_vm15, %v13263_v29  ;;  %vm13283_vm15 = vcmask 253168  }
 0x5ef   :  { %4127 = vst.msk [vmem:[#allocation2 + $0x20] sm:$0xff] %vm13155_vm3, %v13265_v59 }
 0x5f0   :  { %4160 = vst.msk [vmem:[#allocation2 + $0x20] sm:$0xff] %vm4155_vm4, %v13266_v12  ;;  %v4454_v12 = vmul.f32 %v11588_v10, %v11588_v10 }
 0x5f1   :  { %4193 = vst.msk [vmem:[#allocation2 + $0x20] sm:$0xff] %vm4188_vm1, %v13267_v2 }
 0x5f2   :  { %4226 = vst.msk [vmem:[#allocation2 + $0x20] sm:$0xff] %vm4221_vm14, %v13268_v32 }
 0x5f3   :  { %4259 = vst.msk [vmem:[#allocation2 + $0x20] sm:$0xff] %vm4254_vm12, %v13269_v21 }
 0x5f4   :  { %4260 = vst.msk [vmem:[#allocation2 + $0x28] sm:$0xff] %vm4254_vm12, %v13270_v51 }
 0x5f5   :  { %4292 = vst.msk [vmem:[#allocation2 + $0x20] sm:$0xff] %vm4287_vm2, %v13271_v22 }
 0x5f6   :  { %4321 = vst.msk [vmem:[#allocation2] sm:$0xff] %vm4320_vm5, %v13272_v33 }
 0x5f7   :  { %3858 = vst.msk [vmem:[#allocation2 + $0x38] sm:$0xff] %vm3850_vm6, %v3841_v42 }
 0x5f8   :  { %3899 = vst.msk [vmem:[#allocation2 + $0x38] sm:$0xff] %vm3891_vm7, %v13273_v56 }
 0x5f9   :  { %3932 = vst.msk [vmem:[#allocation2 + $0x38] sm:$0xff] %vm3924_vm8, %v13274_v24 }
 0x5fa   :  { %3965 = vst.msk [vmem:[#allocation2 + $0x38] sm:$0xff] %vm3957_vm9, %v13275_v6 }
 0x5fb   :  { %3998 = vst.msk [vmem:[#allocation2 + $0x38] sm:$0xff] %vm3990_vm10, %v13276_v47 }
 0x5fc   :  { %4031 = vst.msk [vmem:[#allocation2 + $0x38] sm:$0xff] %vm4023_vm11, %v13277_v49 }
 0x5fd   :  { %4064 = vst.msk [vmem:[#allocation2 + $0x38] sm:$0xff] %vm13154_vm13, %v13278_v20  ;;  %vm13284_vm13 = vcmask 261368  }
 0x5fe   :  { %4097 = vst.msk [vmem:[#allocation2 + $0x38] sm:$0xff] %vm13280_vm0, %v13279_v34  ;;  %vm13286_vm0 = vmmov %vm13283_vm15 }
 0x5ff   :  { %4130 = vst.msk [vmem:[#allocation2 + $0x38] sm:$0xff] %vm13155_vm3, %v13281_v61  ;;  %vm13288_vm3 = vmmov %vm13284_vm13 }
 0x600   :  { %4293 = vst.msk [vmem:[#allocation2 + $0x28] sm:$0xff] %vm4287_vm2, %v13282_v44 }
 0x601   :  { %4325 = vst.msk [vmem:[#allocation2 + $0x20] sm:$0xff] %vm4320_vm5, %v11453_v14  ;;  %v13289_v14 = vld [vmem:[#allocation67_spill] sm:$0xff] }
 0x602   :  { %4326 = vst.msk [vmem:[#allocation2 + $0x28] sm:$0xff] %vm4320_vm5, %v11460_v45  ;;  %v13290_v45 = vld [vmem:[#allocation71_spill] sm:$0xff] }
 0x603   :  { %4359 = vst.msk [vmem:[#allocation2 + $0x28] sm:$0xff] %vm13283_vm15, %v11496_v40  ;;  %v4375_v40 = vpop.permute.xlu0 %4374  ;;  %vm13318_vm15 = vmmov %vm13288_vm3 }
 0x604   :  { %4392 = vst.msk [vmem:[#allocation2 + $0x28] sm:$0xff] %vm13284_vm13, %v4373_v16  ;;  %vm13292_vm13 = vcmask 261120  }
 0x605   :  { %4163 = vst.msk [vmem:[#allocation2 + $0x38] sm:$0xff] %vm4155_vm4, %v13285_v58 }
 0x606   :  { %4358 = vst.msk [vmem:[#allocation2 + $0x20] sm:$0xff] %vm13286_vm0, %v11489_v13 }
 0x607   :  { %4196 = vst.msk [vmem:[#allocation2 + $0x38] sm:$0xff] %vm4188_vm1, %v13287_v19 }
 0x608   :  { %4391 = vst.msk [vmem:[#allocation2 + $0x20] sm:$0xff] %vm13288_vm3, %v4371_v30 }
 0x609   :  { %4229 = vst.msk [vmem:[#allocation2 + $0x38] sm:$0xff] %vm4221_vm14, %v13289_v14 }
 0x60a   :  { %4262 = vst.msk [vmem:[#allocation2 + $0x38] sm:$0xff] %vm4254_vm12, %v13290_v45  ;;  %v4405_v45 = vld [vmem:[%s13132_s6 + $0x10] sm:$0xff] }
 0x60b   :  { %4295 = vst.msk [vmem:[#allocation2 + $0x38] sm:$0xff] %vm4287_vm2, %v13291_v43  ;;  %v11723_v48 = vld [vmem:[#allocation2 + $0x28] sm:$0xff]  ;;  %v4299_v25 = vpop.permute.xlu0 %4298  ;;  %v10633_v43 = vmov 0  }
 0x60c   :  { %3857 = vst.msk [vmem:[#allocation2 + $0x30] sm:$0xff] %vm3850_vm6, %v3839_v41  ;;  %v4434_v13 = vsel %vm13292_vm13, %v11723_v48, 0.0  ;;  %vm13297_vm6 = vmmov %vm13292_vm13  ;;  %v4456_v11 = vmul.f32 %v11723_v48, %v11723_v48  ;;  %10420 = vset.pattern.permute.xlu0 %v10633_v43  ;;  %10419 = vset.pattern.permute.xlu2 %v10633_v43 }
 0x60d   :  { %3898 = vst.msk [vmem:[#allocation2 + $0x30] sm:$0xff] %vm3891_vm7, %v13293_v15  ;;  %4435 = vadd.xlane.f32.xlu0 %v4434_v13  ;;  %vm13300_vm7 = vcmask 179368   ;;  %10418 = vset.pattern.permute.xlu1 %v10633_v43 }
 0x60e   :  { %3931 = vst.msk [vmem:[#allocation2 + $0x30] sm:$0xff] %vm3924_vm8, %v13294_v17  ;;  %vm13301_vm8 = vmmov %vm13297_vm6 }
 0x60f   :  { %3964 = vst.msk [vmem:[#allocation2 + $0x30] sm:$0xff] %vm3957_vm9, %v13295_v4  ;;  %v11734_v46 = vld [vmem:[#allocation2 + $0x20] sm:$0xff]  ;;  %vm13303_vm9 = vcmask 187568  }
 0x610   :  { %3997 = vst.msk [vmem:[#allocation2 + $0x30] sm:$0xff] %vm3990_vm10, %v13296_v55  ;;  %v4431_v38 = vsel %vm13297_vm6, %v11734_v46, 0.0  ;;  %v4455_v50 = vmul.f32 %v11734_v46, %v11734_v46  ;;  %vm13305_vm10 = vcmask 195768  }
 0x611   :  { %4030 = vst.msk [vmem:[#allocation2 + $0x30] sm:$0xff] %vm4023_vm11, %v13298_v8  ;;  %4432 = vadd.xlane.f32.xlu2 %v4431_v38  ;;  %vm13310_vm11 = vmmov %vm13297_vm6  ;;  %v4418_v8 = vld [vmem:[%s13133_s7 + $0x38] sm:$0xff] }
 0x612   :  { %4063 = vst.msk [vmem:[#allocation2 + $0x30] sm:$0xff] %vm13300_vm7, %v13299_v27  ;;  %v4471_v31 = vsel %vm13301_vm8, %v4455_v50, 0.0  ;;  %v4474_v28 = vsel %vm13310_vm11, %v4456_v11, 0.0 }
 0x613   :  { %4096 = vst.msk [vmem:[#allocation2 + $0x30] sm:$0xff] %vm13303_vm9, %v13302_v7  ;;  %4472 = vadd.xlane.f32.xlu1 %v4471_v31  ;;  %v4363_v54 = vpop.permute.xlu0 %4362 }
 0x614   :  { %4129 = vst.msk [vmem:[#allocation2 + $0x30] sm:$0xff] %vm13305_vm10, %v13304_v26  ;;  %v4417_v26 = vld [vmem:[%s13133_s7 + $0x30] sm:$0xff] }
 0x615   :  { %4162 = vst.msk [vmem:[#allocation2 + $0x30] sm:$0xff] %vm4155_vm4, %v13306_v23  ;;  %vm13317_vm4 = vmmov %vm13288_vm3  ;;  %v4416_v23 = vld [vmem:[%s13133_s7 + $0x28] sm:$0xff] }
 0x616   :  { %4195 = vst.msk [vmem:[#allocation2 + $0x30] sm:$0xff] %vm4188_vm1, %v13307_v35  ;;  %vm13313_vm1 = vmmov %vm13286_vm0 }
 0x617   :  { %4228 = vst.msk [vmem:[#allocation2 + $0x30] sm:$0xff] %vm4221_vm14, %v13308_v5  ;;  %vm13314_vm14 = vmmov %vm13286_vm0 }
 0x618   :  { %4261 = vst.msk [vmem:[#allocation2 + $0x30] sm:$0xff] %vm4254_vm12, %v13309_v3  ;;  %vm13315_vm12 = vmmov %vm13286_vm0 }
 0x619   :  { %4294 = vst.msk [vmem:[#allocation2 + $0x30] sm:$0xff] %vm4287_vm2, %v13311_v0  ;;  %4475 = vadd.xlane.f32.xlu2 %v4474_v28  ;;  %vm13316_vm2 = vmmov %vm13286_vm0 }
 0x61a   :  { %4328 = vst.msk [vmem:[#allocation2 + $0x38] sm:$0xff] %vm4320_vm5, %v11469_v60  ;;  %v4377_v60 = vpop.permute.xlu1 %4376  ;;  %vm13319_vm0 = vmmov %vm13288_vm3 }
 0x61b   :  { %4327 = vst.msk [vmem:[#allocation2 + $0x30] sm:$0xff] %vm4320_vm5, %v13312_v9 }
 0x61c   :  { %4361 = vst.msk [vmem:[#allocation2 + $0x38] sm:$0xff] %vm13313_vm1, %v11493_v57 }
 0x61d   :  { %4322 = vst.msk [vmem:[#allocation2 + $0x8] sm:$0xff] %vm4320_vm5, %v4299_v25  ;;  %vm13320_vm5 = vmmov %vm13297_vm6 }
 0x61e   :  { %4355 = vst.msk [vmem:[#allocation2 + $0x8] sm:$0xff] %vm13314_vm14, %v4332_v39  ;;  %vm13321_vm13 = vmmov %vm13320_vm5 }
 0x61f   :  { %4360 = vst.msk [vmem:[#allocation2 + $0x30] sm:$0xff] %vm13315_vm12, %v11511_v37  ;;  %vm13322_vm6 = vmmov %vm13320_vm5 }
 0x620   :  { %4354 = vst.msk [vmem:[#allocation2] sm:$0xff] %vm13316_vm2, %v4330_v62  ;;  %vm13323_vm7 = vmmov %vm13320_vm5 }
 0x621   :  { %4393 = vst.msk [vmem:[#allocation2 + $0x30] sm:$0xff] %vm13288_vm3, %v4375_v40  ;;  %vm13324_vm8 = vmmov %vm13320_vm5 }
 0x622   :  { %4387 = vst.msk [vmem:[#allocation2] sm:$0xff] %vm13317_vm4, %v4363_v54  ;;  %vm13325_vm9 = vmmov %vm13320_vm5 }
 0x623   :  { %4388 = vst.msk [vmem:[#allocation2 + $0x8] sm:$0xff] %vm13318_vm15, %v4365_v63  ;;  %v4468_v21 = vsel %vm13325_vm9, %v4454_v12, 0.0  ;;  %vm13326_vm10 = vmmov %vm13320_vm5 }
 0x624   :  { %4394 = vst.msk [vmem:[#allocation2 + $0x38] sm:$0xff] %vm13319_vm0, %v4377_v60  ;;  %vm13327_vm11 = vmmov %vm13320_vm5 }
 0x625   :  { %vm13328_vm1 = vmmov %vm13320_vm5 }
 0x628   :  { %v11779_v57 = vld [vmem:[#allocation2 + $0x30] sm:$0xff] }
 0x629   :  { %v4437_v53 = vsel %vm13320_vm5, %v11779_v57, 0.0  ;;  %v4457_v37 = vmul.f32 %v11779_v57, %v11779_v57  ;;  %v11792_v59 = vld [vmem:[#allocation2] sm:$0xff] }
 0x62a   :  { %4438 = vadd.xlane.f32.xlu2 %v4437_v53  ;;  %v11790_v29 = vld [vmem:[#allocation2 + $0x8] sm:$0xff]  ;;  %v4419_v32 = vsel %vm13324_vm8, %v11792_v59, 0.0  ;;  %v4451_v22 = vmul.f32 %v11792_v59, %v11792_v59 }
 0x62b   :  { %v4477_v1 = vsel %vm13321_vm13, %v4457_v37, 0.0  ;;  %v11786_v18 = vld [vmem:[#allocation2 + $0x38] sm:$0xff]  ;;  %v4422_v2 = vsel %vm13323_vm7, %v11790_v29, 0.0  ;;  %v4452_v42 = vmul.f32 %v11790_v29, %v11790_v29 }
 0x62c   :  { %4478 = vadd.xlane.f32.xlu1 %v4477_v1  ;;  %v4440_v52 = vsel %vm13322_vm6, %v11786_v18, 0.0  ;;  %v4458_v51 = vmul.f32 %v11786_v18, %v11786_v18  ;;  %v4459_v24 = vsel %vm13328_vm1, %v4451_v22, 0.0 }
 0x62d   :  { %4441 = vadd.xlane.f32.xlu0 %v4440_v52  ;;  %v4462_v56 = vsel %vm13327_vm11, %v4452_v42, 0.0 }
 0x62e   :  { %v4480_v33 = vsel %vm13326_vm10, %v4458_v51, 0.0  ;;  %v4408_v51 = vld [vmem:[%s13132_s6 + $0x28] sm:$0xff] }
 0x632   :  { %4423 = vadd.xlane.f32.xlu2 %v4422_v2 }
 0x634   :  { %4420 = vadd.xlane.f32.xlu1 %v4419_v32 }
 0x635   :  { %4469 = vadd.xlane.f32.xlu0 %v4468_v21 }
 0x63a   :  { %4481 = vadd.xlane.f32.xlu2 %v4480_v33 }
 0x63c   :  { %4463 = vadd.xlane.f32.xlu1 %v4462_v56  ;;  %v4415_v56 = vld [vmem:[%s13133_s7 + $0x20] sm:$0xff] }
 0x63d   :  { %4460 = vadd.xlane.f32.xlu0 %v4459_v24 }
 0x63f   :  { %v4430_v27 = vpop.xlane.xlu1 %4429 }
 0x640   :  { %v11841_v22 = vmul.f32 0.03125, %v4430_v27 }
 0x652   :  { %4704 = vperm.xlu2 %10419, %v4418_v8  }
 0x655   :  { %4699 = vperm.xlu1 %10418, %v4417_v26  }
 0x65a   :  { %4694 = vperm.xlu2 %10419, %v4416_v23  }
 0x65c   :  { %v4427_v16 = vpop.xlane.xlu0 %4426 }
 0x65d   :  { %v11810_v6 = vmul.f32 0.03125, %v4427_v16  ;;  %4689 = vperm.xlu1 %10418, %v4415_v56  }
 0x65e   :  { %v4467_v47 = vpop.xlane.xlu2 %4466 }
 0x65f   :  { %v4493_v49 = vmul.f32 %v11810_v6, %v11810_v6  ;;  %v4485_v20 = vmul.f32 0.03125, %v4467_v47 }
 0x661   :  { %v4501_v34 = vsub.f32 %v4485_v20, %v4493_v49 }
 0x663   :  { %v4509_v61 = vmax.f32 %v4501_v34, 0.0 }
 0x665   :  { %v4517_v44 = vadd.f32 1e-05, %v4509_v61  ;;  %v4494_v61 = vmul.f32 %v11841_v22, %v11841_v22 }
 0x667   :  { %10429 = vrsqrt.f32 %v4517_v44  ;;  %vm4549_vm12 = vweird.f32 %v4517_v44 }
 0x66d   :  { %v10430_v30 = vpop.eup %10429 }
 0x66e   :  { %v4544_v41 = vmul.f32 %v10430_v30, %v4517_v44  ;;  %vm4550_vm14 = vweird.f32 %v10430_v30 }
 0x66f   :  { %vm4551_vm2 = vmor %vm4549_vm12, %vm4550_vm14 }
 0x670   :  { %v4545_v58 = vmul.f32 %v10430_v30, %v4544_v41 }
 0x672   :  { %v4546_v19 = vmul.f32 0.5, %v4545_v58 }
 0x674   :  { %v4547_v14 = vsub.f32 1.5, %v4546_v19 }
 0x676   :  { %v4548_v40 = vmul.f32 %v10430_v30, %v4547_v14 }
 0x678   :  { %v4552_v15 = vsel %vm4551_vm2, %v10430_v30, %v4548_v40 }
 0x679   :  { %v4605_v62 = vmul.f32 %v4552_v15, %v4405_v45 }
 0x67b   :  { %4631 = vperm.xlu0 %10420, %v4605_v62  }
 0x680   :  { %v4436_v17 = vpop.xlane.xlu0 %4435 }
 0x681   :  { %v11817_v4 = vmul.f32 0.03125, %v4436_v17 }
 0x683   :  { %v4496_v38 = vmul.f32 %v11817_v4, %v11817_v4 }
 0x684   :  { %v4433_v13 = vpop.xlane.xlu2 %4432 }
 0x685   :  { %v11830_v25 = vmul.f32 0.03125, %v4433_v13 }
 0x686   :  { %v4473_v35 = vpop.xlane.xlu1 %4472 }
 0x687   :  { %v4495_v63 = vmul.f32 %v11830_v25, %v11830_v25  ;;  %v4487_v3 = vmul.f32 0.03125, %v4473_v35 }
 0x689   :  { %v4503_v54 = vsub.f32 %v4487_v3, %v4495_v63 }
 0x68b   :  { %v4511_v32 = vmax.f32 %v4503_v54, 0.0 }
 0x68c   :  { %v4476_v55 = vpop.xlane.xlu2 %4475 }
 0x68d   :  { %v4488_v50 = vmul.f32 0.03125, %v4476_v55  ;;  %v11846_v47 = vadd.f32 1e-05, %v4511_v32 }
 0x68f   :  { %v4504_v31 = vsub.f32 %v4488_v50, %v4496_v38  ;;  %vm4569_vm14 = vweird.f32 %v11846_v47 }
 0x691   :  { %v4512_v7 = vmax.f32 %v4504_v31, 0.0 }
 0x693   :  { %v4520_v11 = vadd.f32 1e-05, %v4512_v7 }
 0x695   :  { %10431 = vrsqrt.f32 %v4520_v11  ;;  %vm4579_vm4 = vweird.f32 %v4520_v11 }
 0x69b   :  { %v10432_v5 = vpop.eup %10431 }
 0x69c   :  { %v4574_v28 = vmul.f32 %v10432_v5, %v4520_v11  ;;  %vm4580_vm3 = vweird.f32 %v10432_v5 }
 0x69d   :  { %v4439_v0 = vpop.xlane.xlu2 %4438  ;;  %vm4581_vm15 = vmor %vm4579_vm4, %vm4580_vm3 }
 0x69e   :  { %v4575_v9 = vmul.f32 %v10432_v5, %v4574_v28  ;;  %v11834_v39 = vmul.f32 0.03125, %v4439_v0 }
 0x69f   :  { %v4479_v60 = vpop.xlane.xlu1 %4478 }
 0x6a0   :  { %v4576_v53 = vmul.f32 0.5, %v4575_v9  ;;  %v4497_v37 = vmul.f32 %v11834_v39, %v11834_v39  ;;  %v4489_v1 = vmul.f32 0.03125, %v4479_v60  ;;  %v4442_v52 = vpop.xlane.xlu0 %4441 }
 0x6a1   :  { %v11850_v30 = vmul.f32 0.03125, %v4442_v52 }
 0x6a2   :  { %v4577_v12 = vsub.f32 1.5, %v4576_v53  ;;  %v4505_v2 = vsub.f32 %v4489_v1, %v4497_v37  ;;  %v4409_v37 = vld [vmem:[%s13132_s6 + $0x30] sm:$0xff] }
 0x6a3   :  { %v4498_v43 = vmul.f32 %v11850_v30, %v11850_v30 }
 0x6a4   :  { %v4513_v21 = vmax.f32 %v4505_v2, 0.0  ;;  %v4578_v42 = vmul.f32 %v10432_v5, %v4577_v12 }
 0x6a5   :  { %v4424_v33 = vpop.xlane.xlu2 %4423 }
 0x6a6   :  { %v4521_v24 = vadd.f32 1e-05, %v4513_v21  ;;  %v4582_v16 = vsel %vm4581_vm15, %v10432_v5, %v4578_v42  ;;  %v11853_v58 = vmul.f32 0.03125, %v4424_v33 }
 0x6a7   :  { %v4421_v49 = vpop.xlane.xlu1 %4420  ;;  %v4608_v20 = vmul.f32 %v4582_v16, %v4408_v51 }
 0x6a8   :  { %10433 = vrsqrt.f32 %v4521_v24  ;;  %v4470_v34 = vpop.xlane.xlu0 %4469  ;;  %v11855_v19 = vmul.f32 0.03125, %v4421_v49  ;;  %v4492_v55 = vmul.f32 %v11853_v58, %v11853_v58  ;;  %vm4589_vm5 = vweird.f32 %v4521_v24 }
 0x6a9   :  { %v4486_v44 = vmul.f32 0.03125, %v4470_v34  ;;  %4646 = vperm.xlu2 %10419, %v4608_v20   ;;  %10435 = vrsqrt.f32 %v11846_v47 }
 0x6aa   :  { %v4491_v7 = vmul.f32 %v11855_v19, %v11855_v19 }
 0x6ab   :  { %v4502_v41 = vsub.f32 %v4486_v44, %v4494_v61 }
 0x6ad   :  { %v4510_v14 = vmax.f32 %v4502_v41, 0.0  ;;  %v4482_v45 = vpop.xlane.xlu2 %4481  ;;  %v4406_v41 = vld [vmem:[%s13132_s6 + $0x18] sm:$0xff] }
 0x6ae   :  { %v10434_v40 = vpop.eup %10433  ;;  %v4490_v13 = vmul.f32 0.03125, %v4482_v45 }
 0x6af   :  { %v4584_v15 = vmul.f32 %v10434_v40, %v4521_v24  ;;  %v4518_v62 = vadd.f32 1e-05, %v4510_v14  ;;  %v4464_v17 = vpop.xlane.xlu1 %4463  ;;  %v11861_v27 = vpop.eup %10435  ;;  %vm4590_vm0 = vweird.f32 %v10434_v40 }
 0x6b0   :  { %v4506_v38 = vsub.f32 %v4490_v13, %v4498_v43  ;;  %v4484_v50 = vmul.f32 0.03125, %v4464_v17  ;;  %v4461_v8 = vpop.xlane.xlu0 %4460  ;;  %v4564_v63 = vmul.f32 %v11861_v27, %v11846_v47  ;;  %vm4591_vm13 = vmor %vm4589_vm5, %vm4590_vm0  ;;  %v4413_v43 = vld [vmem:[%s13133_s7 + $0x10] sm:$0xff]  ;;  %vm4570_vm10 = vweird.f32 %v11861_v27 }
 0x6b1   :  { %v4585_v31 = vmul.f32 %v10434_v40, %v4584_v15  ;;  %10437 = vrsqrt.f32 %v4518_v62  ;;  %v4483_v26 = vmul.f32 0.03125, %v4461_v8  ;;  %vm4559_vm7 = vweird.f32 %v4518_v62  ;;  %vm4571_vm2 = vmor %vm4569_vm14, %vm4570_vm10 }
 0x6b2   :  { %v4514_v11 = vmax.f32 %v4506_v38, 0.0  ;;  %v4500_v23 = vsub.f32 %v4484_v50, %v4492_v55  ;;  %v4565_v52 = vmul.f32 %v11861_v27, %v4564_v63  ;;  %v4407_v63 = vld [vmem:[%s13132_s6 + $0x20] sm:$0xff]  ;;  %vm5111_vm10 = vcmask 650752  }
 0x6b3   :  { %v4586_v35 = vmul.f32 0.5, %v4585_v31  ;;  %v4499_v5 = vsub.f32 %v4483_v26, %v4491_v7  ;;  %v4410_v31 = vld [vmem:[%s13132_s6 + $0x38] sm:$0xff]  ;;  %vm5161_vm14 = vcmask 913152  }
 0x6b4   :  { %v4522_v3 = vadd.f32 1e-05, %v4514_v11  ;;  %v4508_v28 = vmax.f32 %v4500_v23, 0.0  ;;  %v4566_v42 = vmul.f32 0.5, %v4565_v52  ;;  %v4404_v11 = vld [vmem:[%s13132_s6 + $0x8] sm:$0xff] }
 0x6b5   :  { %v4587_v0 = vsub.f32 1.5, %v4586_v35  ;;  %v4507_v9 = vmax.f32 %v4499_v5, 0.0  ;;  %v4705_v52 = vpop.permute.xlu2 %4704 }
 0x6b6   :  { %10439 = vrsqrt.f32 %v4522_v3  ;;  %v4516_v54 = vadd.f32 1e-05, %v4508_v28  ;;  %v4567_v61 = vsub.f32 1.5, %v4566_v42  ;;  %vm4599_vm11 = vweird.f32 %v4522_v3 }
 0x6b7   :  { %v10438_v60 = vpop.eup %10437  ;;  %v11867_v53 = vadd.f32 1e-05, %v4507_v9  ;;  %v4588_v1 = vmul.f32 %v10434_v40, %v4587_v0 }
 0x6b8   :  { %v4554_v12 = vmul.f32 %v10438_v60, %v4518_v62  ;;  %10441 = vrsqrt.f32 %v4516_v54  ;;  %vm4560_vm6 = vweird.f32 %v10438_v60  ;;  %v4568_v50 = vmul.f32 %v11861_v27, %v4567_v61 }
 0x6b9   :  { %10443 = vrsqrt.f32 %v11867_v53  ;;  %v4592_v2 = vsel %vm4591_vm13, %v10434_v40, %v4588_v1  ;;  %vm4561_vm8 = vmor %vm4559_vm7, %vm4560_vm6  ;;  %vm4539_vm3 = vweird.f32 %v4516_v54  ;;  %vm4529_vm0 = vweird.f32 %v11867_v53  ;;  %v4411_v1 = vld [vmem:[%s13133_s7] sm:$0xff] }
 0x6ba   :  { %v4555_v32 = vmul.f32 %v10438_v60, %v4554_v12  ;;  %v4609_v21 = vmul.f32 %v4592_v2, %v4409_v37  ;;  %vm4853_vm13 = vcmask 523264   ;;  %vm5011_vm6 = vcmask 125952  }
 0x6bb   :  { %vm5036_vm7 = vcmask 257152  }
 0x6bc   :  { %v10440_v51 = vpop.eup %10439  ;;  %v4556_v33 = vmul.f32 0.5, %v4555_v32  ;;  %4651 = vperm.xlu2 %10419, %v4609_v21  }
 0x6bd   :  { %v4594_v56 = vmul.f32 %v10440_v51, %v4522_v3  ;;  %vm4600_vm9 = vweird.f32 %v10440_v51  ;;  %v4572_v3 = vsel %vm4571_vm2, %v11861_v27, %v4568_v50  ;;  %v4695_v12 = vpop.permute.xlu2 %4694 }
 0x6be   :  { %v10442_v24 = vpop.eup %10441  ;;  %v4557_v16 = vsub.f32 1.5, %v4556_v33  ;;  %vm4601_vm12 = vmor %vm4599_vm11, %vm4600_vm9  ;;  %v4607_v0 = vmul.f32 %v4572_v3, %v4407_v63  ;;  %v4617_v33 = vsub.f32 %v11779_v57, %v11834_v39  ;;  %vm5086_vm9 = vcmask 519552  }
 0x6bf   :  { %v10444_v49 = vpop.eup %10443  ;;  %v4595_v20 = vmul.f32 %v10440_v51, %v4594_v56  ;;  %v4534_v34 = vmul.f32 %v10442_v24, %v4516_v54  ;;  %vm4540_vm1 = vweird.f32 %v10442_v24  ;;  %v4414_v54 = vld [vmem:[%s13133_s7 + $0x18] sm:$0xff]  ;;  %vm5136_vm11 = vcmask 781952  }
 0x6c0   :  { %v4524_v44 = vmul.f32 %v10444_v49, %v11867_v53  ;;  %v4558_v14 = vmul.f32 %v10438_v60, %v4557_v16  ;;  %vm4541_vm4 = vmor %vm4539_vm3, %vm4540_vm1  ;;  %vm4530_vm15 = vweird.f32 %v10444_v49  ;;  %v4412_v53 = vld [vmem:[%s13133_s7 + $0x8] sm:$0xff]  ;;  %v4616_v16 = vsub.f32 %v11723_v48, %v11817_v4  ;;  %s10635_s7 = smov 32  }
 0x6c1   :  { %v4596_v45 = vmul.f32 0.5, %v4595_v20  ;;  %v4535_v40 = vmul.f32 %v10442_v24, %v4534_v34  ;;  %vm4531_vm5 = vmor %vm4529_vm0, %vm4530_vm15  ;;  %vm5455_vm1 = vcmask 130048  }
 0x6c2   :  { %v4525_v13 = vmul.f32 %v10444_v49, %v4524_v44  ;;  %v4562_v15 = vsel %vm4561_vm8, %v10438_v60, %v4558_v14  ;;  %v4403_v60 = vld [vmem:[%s13132_s6] sm:$0xff]  ;;  %v4613_v14 = vsub.f32 %v11649_v36, %v11810_v6  ;;  %vm5061_vm8 = vcmask 388352   ;;  %s10642_s6 = smov 68  }
 0x6c3   :  { %v4597_v17 = vsub.f32 1.5, %v4596_v45  ;;  %v4536_v55 = vmul.f32 0.5, %v4535_v40  ;;  %v4606_v62 = vmul.f32 %v4562_v15, %v4406_v41  ;;  %v4615_v41 = vsub.f32 %v11734_v46, %v11830_v25 }
 0x6c4   :  { %v4526_v38 = vmul.f32 0.5, %v4525_v13  ;;  %4679 = vperm.xlu2 %10419, %v4413_v43  }
 0x6c5   :  { %v4537_v8 = vsub.f32 1.5, %v4536_v55  ;;  %4636 = vperm.xlu1 %10418, %v4606_v62   ;;  %v4598_v7 = vmul.f32 %v10440_v51, %v4597_v17 }
 0x6c6   :  { %v4527_v35 = vsub.f32 1.5, %v4526_v38 }
 0x6c7   :  { %v4602_v26 = vsel %vm4601_vm12, %v10440_v51, %v4598_v7  ;;  %v4538_v23 = vmul.f32 %v10442_v24, %v4537_v8  ;;  %v4700_v2 = vpop.permute.xlu1 %4699  ;;  %vm5186_vm12 = vcmask 1044352  }
 0x6c8   :  { %v4610_v5 = vmul.f32 %v4602_v26, %v4410_v31  ;;  %v4528_v9 = vmul.f32 %v10444_v49, %v4527_v35  ;;  %v4611_v31 = vsub.f32 %v11792_v59, %v11855_v19  ;;  %v4612_v26 = vsub.f32 %v11790_v29, %v11853_v58  ;;  %v10196_v59 = vld [vmem:[%s13134_s8] sm:$0xff]  ;;  %v10197_v29 = vld [vmem:[%s13134_s8 + $0x8] sm:$0xff]  ;;  %v10198_v58 = vld [vmem:[%s13134_s8 + $0x10] sm:$0xff] }
 0x6c9   :  { %v4542_v28 = vsel %vm4541_vm4, %v10442_v24, %v4538_v23  ;;  %v10199_v19 = vld [vmem:[%s13134_s8 + $0x18] sm:$0xff] }
 0x6ca   :  { %4656 = vperm.xlu0 %10420, %v4610_v5   ;;  %v4604_v47 = vmul.f32 %v4542_v28, %v4404_v11  ;;  %v4532_v27 = vsel %vm4531_vm5, %v10444_v49, %v4528_v9  ;;  %v4618_v49 = vsub.f32 %v11786_v18, %v11850_v30  ;;  %v4614_v18 = vsub.f32 %v11588_v10, %v11841_v22  ;;  %v10201_v9 = vld [vmem:[%s13134_s8 + $0x28] sm:$0xff] }
 0x6cb   :  { %v4603_v37 = vmul.f32 %v4532_v27, %v4403_v60  ;;  %v10203_v60 = vld [vmem:[%s13134_s8 + $0x38] sm:$0xff]  ;;  %v10204_v27 = vld [vmem:[%s13134_s8 + $0x40] sm:$0xff] }
 0x6cc   :  { %4626 = vperm.xlu2 %10419, %v4604_v47  }
 0x6cd   :  { %4641 = vperm.xlu1 %10418, %v4607_v0   ;;  %v10200_v0 = vld [vmem:[%s13134_s8 + $0x20] sm:$0xff] }
 0x6cf   :  { %v4690_v21 = vpop.permute.xlu1 %4689 }
 0x6d2   :  { %4684 = vperm.xlu0 %10420, %v4414_v54   ;;  %v10202_v54 = vld [vmem:[%s13134_s8 + $0x30] sm:$0xff] }
 0x6d5   :  { %4621 = vperm.xlu1 %10418, %v4603_v37  }
 0x6da   :  { %4669 = vperm.xlu0 %10420, %v4411_v1  }
 0x6dd   :  { %4674 = vperm.xlu1 %10418, %v4412_v53  }
 0x6ed   :  { %v4632_v51 = vpop.permute.xlu0 %4631 }
 0x6ee   :  { %v4661_v13 = vmul.f32 %v4632_v51, %v4613_v14 }
 0x703   :  { %v4647_v32 = vpop.permute.xlu2 %4646 }
 0x704   :  { %v4664_v20 = vmul.f32 %v4647_v32, %v4616_v16 }
 0x706   :  { %v4712_v39 = vadd.f32 %v4695_v12, %v4664_v20  ;;  %v10205_v12 = vld [vmem:[%s13134_s8 + $0x48] sm:$0xff] }
 0x708   :  { %v4720_v25 = vmax.f32 %v4712_v39, 0.0 }
 0x716   :  { %v4652_v42 = vpop.permute.xlu2 %4651 }
 0x717   :  { %v4665_v24 = vmul.f32 %v4652_v42, %v4617_v33  ;;  %v10206_v42 = vld [vmem:[%s13134_s8 + $0x50] sm:$0xff] }
 0x719   :  { %v4713_v61 = vadd.f32 %v4700_v2, %v4665_v24 }
 0x71b   :  { %v4721_v48 = vmax.f32 %v4713_v61, 0.0 }
 0x71e   :  { %v4680_v40 = vpop.permute.xlu2 %4679 }
 0x71f   :  { %v4709_v15 = vadd.f32 %v4680_v40, %v4661_v13  ;;  %v10209_v40 = vld [vmem:[%s13134_s8 + $0x68] sm:$0xff] }
 0x721   :  { %v4717_v6 = vmax.f32 %v4709_v15, 0.0 }
 0x726   :  { %v4627_v22 = vpop.permute.xlu2 %4626 }
 0x727   :  { %v4660_v23 = vmul.f32 %v4627_v22, %v4612_v26 }
 0x737   :  { %v4637_v56 = vpop.permute.xlu1 %4636 }
 0x738   :  { %v4662_v17 = vmul.f32 %v4637_v56, %v4614_v18 }
 0x73c   :  { %v4657_v34 = vpop.permute.xlu0 %4656 }
 0x73d   :  { %v4666_v44 = vmul.f32 %v4657_v34, %v4618_v49  ;;  %v10207_v49 = vld [vmem:[%s13134_s8 + $0x58] sm:$0xff] }
 0x73f   :  { %v4714_v45 = vadd.f32 %v4705_v52, %v4666_v44  ;;  %v4642_v57 = vpop.permute.xlu1 %4641 }
 0x740   :  { %v4663_v43 = vmul.f32 %v4642_v57, %v4615_v41  ;;  %v10208_v41 = vld [vmem:[%s13134_s8 + $0x60] sm:$0xff] }
 0x741   :  { %v4722_v4 = vmax.f32 %v4714_v45, 0.0 }
 0x742   :  { %v4711_v30 = vadd.f32 %v4690_v21, %v4663_v43 }
 0x743   :  { %v4762_v55 = vpack.c.bf16 %v4722_v4, %v4721_v48  ;;  %v10210_v4 = vld [vmem:[%s13134_s8 + $0x70] sm:$0xff] }
 0x744   :  { %v4685_v62 = vpop.permute.xlu0 %4684  ;;  %v4719_v46 = vmax.f32 %v4711_v30, 0.0 }
 0x745   :  { %v4710_v38 = vadd.f32 %v4685_v62, %v4662_v17  ;;  %4912 = vmatpush.bf16.msrb.mxu0 %v4762_v55  ;;  %v10211_v62 = vld [vmem:[%s13134_s8 + $0x78] sm:$0xff] }
 0x746   :  { %v4761_v36 = vpack.c.bf16 %v4720_v25, %v4719_v46 }
 0x747   :  { %v4718_v50 = vmax.f32 %v4710_v38, 0.0  ;;  %v4622_v8 = vpop.permute.xlu1 %4621 }
 0x748   :  { %v4659_v10 = vmul.f32 %v4622_v8, %v4611_v31 }
 0x749   :  { %4913 = vmatpush.bf16.msrb.mxu0 %v4761_v36  ;;  %v4760_v7 = vpack.c.bf16 %v4718_v50, %v4717_v6 }
 0x74c   :  { %v4670_v11 = vpop.permute.xlu0 %4669 }
 0x74d   :  { %4914 = vmatpush.bf16.msrb.mxu0 %v4760_v7  ;;  %v4707_v35 = vadd.f32 %v4670_v11, %v4659_v10  ;;  %v10212_v7 = vld [vmem:[%s13134_s8 + $0x80] sm:$0xff] }
 0x74f   :  { %v4675_v5 = vpop.permute.xlu1 %4674  ;;  %v4715_v3 = vmax.f32 %v4707_v35, 0.0  ;;  %v10213_v35 = vld [vmem:[%s13134_s8 + $0x88] sm:$0xff]  ;;  %s10638_s8 = smov 80  }
 0x750   :  { %v4708_v63 = vadd.f32 %v4675_v5, %v4660_v23 }
 0x752   :  { %v4716_v28 = vmax.f32 %v4708_v63, 0.0 }
 0x754   :  { %v4759_v47 = vpack.c.bf16 %v4716_v28, %v4715_v3 }
 0x756   :  { %4915 = vmatpush.bf16.msrb.mxu0 %v4759_v47 }
 0x759   :  { %9294 = vmatmul.msk.bf16.vlgmr.msrb.gmra.mxu0 %vm4853_vm13, %v10196_v59 }
 0x769   :  { %9295 = vmatmul.msk.bf16.gmra.mxu0 %vm4853_vm13, %v10197_v29 }
 0x779   :  { %9296 = vmatmul.msk.bf16.gmra.mxu0 %vm4853_vm13, %v10198_v58 }
 0x789   :  { %9297 = vmatmul.msk.bf16.gmra.mxu0 %vm4853_vm13, %v10199_v19 }
 0x799   :  { %9298 = vmatmul.msk.bf16.gmra.mxu0 %vm4853_vm13, %v10200_v0 }
 0x7a9   :  { %9299 = vmatmul.msk.bf16.gmra.mxu0 %vm4853_vm13, %v10201_v9 }
 0x7b9   :  { %9300 = vmatmul.msk.bf16.gmra.mxu0 %vm4853_vm13, %v10202_v54 }
 0x7c9   :  { %9301 = vmatmul.msk.bf16.gmra.mxu0 %vm4853_vm13, %v10203_v60 }
 0x7d6   :  { %v4917_v37 = vpop.f32.mrf.mxu0 }
 0x7d7   :  { %v5007_v1 = vpack.c.bf16 %v4917_v37, %v4917_v37 }
 0x7d9   :  { %5012 = vst.msk [vmem:[#allocation3] sm:$0xf] %vm5011_vm6, %v5007_v1  ;;  %9302 = vmatmul.msk.bf16.gmra.mxu0 %vm4853_vm13, %v10204_v27  ;;  %5203 = vrot.lane.b32.xlu0 %v5007_v1, %s10634_s23 }
 0x7de   :  { %v4919_v53 = vpop.f32.mrf.mxu0 }
 0x7df   :  { %v5008_v52 = vpack.c.bf16 %v4919_v53, %v4919_v53 }
 0x7e1   :  { %5013 = vst.msk [vmem:[#allocation3 + $0x8] sm:$0xf] %vm5011_vm6, %v5008_v52  ;;  %5205 = vrot.lane.b32.xlu1 %v5008_v52, %s10634_s23 }
 0x7e6   :  { %v4922_v2 = vpop.f32.mrf.mxu0 }
 0x7e7   :  { %v5009_v32 = vpack.c.bf16 %v4922_v2, %v4922_v2 }
 0x7e9   :  { %5014 = vst.msk [vmem:[#allocation3 + $0x10] sm:$0xf] %vm5011_vm6, %v5009_v32  ;;  %9303 = vmatmul.msk.bf16.gmra.mxu0 %vm4853_vm13, %v10205_v12  ;;  %5207 = vrot.lane.b32.xlu1 %v5009_v32, %s10634_s23 }
 0x7ee   :  { %v4924_v21 = vpop.f32.mrf.mxu0 }
 0x7ef   :  { %v5010_v51 = vpack.c.bf16 %v4924_v21, %v4924_v21 }
 0x7f1   :  { %5015 = vst.msk [vmem:[#allocation3 + $0x18] sm:$0xf] %vm5011_vm6, %v5010_v51  ;;  %5209 = vrot.lane.b32.xlu2 %v5010_v51, %s10634_s23 }
 0x7f6   :  { %v4927_v33 = vpop.f32.mrf.mxu0 }
 0x7f7   :  { %v5016_v56 = vpack.c.bf16 %v4927_v33, %v4927_v33 }
 0x7f9   :  { %9304 = vmatmul.msk.bf16.gmra.mxu0 %vm4853_vm13, %v10206_v42  ;;  %5024 = vrot.lane.b32.xlu2 %v5016_v56, %s10601_s22 }
 0x7fe   :  { %v4929_v24 = vpop.f32.mrf.mxu0 }
 0x7ff   :  { %v5017_v16 = vpack.c.bf16 %v4929_v24, %v4929_v24 }
 0x801   :  { %5026 = vrot.lane.b32.xlu0 %v5017_v16, %s10601_s22 }
 0x806   :  { %v4932_v20 = vpop.f32.mrf.mxu0 }
 0x807   :  { %v11980_v34 = vpack.c.bf16 %v4932_v20, %v4932_v20 }
 0x809   :  { %9305 = vmatmul.msk.bf16.gmra.mxu0 %vm4853_vm13, %v10207_v49  ;;  %5028 = vrot.lane.b32.xlu1 %v11980_v34, %s10601_s22 }
 0x80e   :  { %v4934_v61 = vpop.f32.mrf.mxu0 }
 0x80f   :  { %v5019_v44 = vpack.c.bf16 %v4934_v61, %v4934_v61 }
 0x811   :  { %5030 = vrot.lane.b32.xlu2 %v5019_v44, %s10601_s22 }
 0x816   :  { %v4937_v14 = vpop.f32.mrf.mxu0 }
 0x817   :  { %v5041_v45 = vpack.c.bf16 %v4937_v14, %v4937_v14 }
 0x819   :  { %9306 = vmatmul.msk.bf16.gmra.mxu0 %vm4853_vm13, %v10208_v41  ;;  %5049 = vrot.lane.b32.xlu1 %v5041_v45, %s10635_s7 }
 0x81e   :  { %v4939_v57 = vpop.f32.mrf.mxu0 }
 0x81f   :  { %v5042_v39 = vpack.c.bf16 %v4939_v57, %v4939_v57 }
 0x821   :  { %5223 = vrot.lane.b32.xlu1 %v5041_v45, %s10601_s22  ;;  %5051 = vrot.lane.b32.xlu2 %v5042_v39, %s10635_s7 }
 0x826   :  { %v4942_v43 = vpop.f32.mrf.mxu0 }
 0x827   :  { %v5043_v13 = vpack.c.bf16 %v4942_v43, %v4942_v43 }
 0x829   :  { %9307 = vmatmul.msk.bf16.gmra.mxu0 %vm4853_vm13, %v10209_v40  ;;  %5225 = vrot.lane.b32.xlu2 %v5042_v39, %s10601_s22 }
 0x82a   :  { %5053 = vrot.lane.b32.xlu0 %v5043_v13, %s10635_s7 }
 0x82e   :  { %v4944_v48 = vpop.f32.mrf.mxu0 }
 0x82f   :  { %v5044_v18 = vpack.c.bf16 %v4944_v48, %v4944_v48 }
 0x831   :  { %5227 = vrot.lane.b32.xlu2 %v5043_v13, %s10601_s22  ;;  %5055 = vrot.lane.b32.xlu1 %v5044_v18, %s10635_s7 }
 0x832   :  { %5229 = vrot.lane.b32.xlu0 %v5044_v18, %s10601_s22 }
 0x836   :  { %v4947_v30 = vpop.f32.mrf.mxu0 }
 0x837   :  { %v5066_v15 = vpack.c.bf16 %v4947_v30, %v4947_v30 }
 0x839   :  { %9308 = vmatmul.msk.bf16.gmra.mxu0 %vm4853_vm13, %v10210_v4 }
 0x83a   :  { %5074 = vrot.lane.b32.xlu0 %v5066_v15, %s10636_s5 }
 0x83e   :  { %v4949_v17 = vpop.f32.mrf.mxu0 }
 0x83f   :  { %v5067_v55 = vpack.c.bf16 %v4949_v17, %v4949_v17 }
 0x841   :  { %5076 = vrot.lane.b32.xlu1 %v5067_v55, %s10636_s5 }
 0x842   :  { %5239 = vrot.lane.b32.xlu0 %v5066_v15, %s10635_s7  ;;  %v10230_v15 = vld [vmem:[%s13135_s9 + $0x40] sm:$0xff] }
 0x843   :  { %5504 = vmatpush.bf16.msrb.mxu2 %v10230_v15 }
 0x846   :  { %v4952_v46 = vpop.f32.mrf.mxu0 }
 0x847   :  { %v12012_v25 = vpack.c.bf16 %v4952_v46, %v4952_v46 }
 0x849   :  { %9309 = vmatmul.msk.bf16.gmra.mxu0 %vm4853_vm13, %v10211_v62  ;;  %5241 = vrot.lane.b32.xlu1 %v5067_v55, %s10635_s7 }
 0x84a   :  { %5078 = vrot.lane.b32.xlu2 %v12012_v25, %s10636_s5 }
 0x84b   :  { %v5204_v38 = vpop.permute.xlu0 %5203  ;;  %v5210_v36 = vpop.permute.xlu2 %5209 }
 0x84c   :  { %5215 = vst.msk [vmem:[#allocation3 + $0x20] sm:$0xf] %vm5011_vm6, %v5204_v38 }
 0x84d   :  { %5219 = vst.msk [vmem:[#allocation3 + $0x20] sm:$0xf] %vm5036_vm7, %v5016_v56 }
 0x84e   :  { %5218 = vst.msk [vmem:[#allocation3 + $0x38] sm:$0xf] %vm5011_vm6, %v5210_v36  ;;  %v4954_v6 = vpop.f32.mrf.mxu0 }
 0x84f   :  { %5222 = vst.msk [vmem:[#allocation3 + $0x38] sm:$0xf] %vm5036_vm7, %v5019_v44  ;;  %v12022_v50 = vpack.c.bf16 %v4954_v6, %v4954_v6 }
 0x851   :  { %5080 = vrot.lane.b32.xlu0 %v12022_v50, %s10636_s5 }
 0x853   :  { %v5206_v8 = vpop.permute.xlu1 %5205  ;;  %v5025_v31 = vpop.permute.xlu2 %5024 }
 0x854   :  { %5216 = vst.msk [vmem:[#allocation3 + $0x28] sm:$0xf] %vm5011_vm6, %v5206_v8 }
 0x855   :  { %5220 = vst.msk [vmem:[#allocation3 + $0x28] sm:$0xf] %vm5036_vm7, %v5017_v16 }
 0x856   :  { %5037 = vst.msk [vmem:[#allocation3] sm:$0xf] %vm5036_vm7, %v5025_v31  ;;  %v4957_v10 = vpop.f32.mrf.mxu0 }
 0x857   :  { %v5091_v22 = vpack.c.bf16 %v4957_v10, %v4957_v10 }
 0x859   :  { %9310 = vmatmul.msk.bf16.gmra.mxu0 %vm4853_vm13, %v10212_v7  ;;  %5099 = vrot.lane.b32.xlu2 %v5091_v22, %s10637_s0 }
 0x85b   :  { %v5208_v26 = vpop.permute.xlu1 %5207 }
 0x85c   :  { %5217 = vst.msk [vmem:[#allocation3 + $0x30] sm:$0xf] %vm5011_vm6, %v5208_v26 }
 0x85d   :  { %5221 = vst.msk [vmem:[#allocation3 + $0x30] sm:$0xf] %vm5036_vm7, %v11980_v34 }
 0x85e   :  { %v4959_v11 = vpop.f32.mrf.mxu0 }
 0x85f   :  { %v5092_v23 = vpack.c.bf16 %v4959_v11, %v4959_v11 }
 0x861   :  { %5255 = vrot.lane.b32.xlu2 %v5091_v22, %s10636_s5  ;;  %5101 = vrot.lane.b32.xlu0 %v5092_v23, %s10637_s0 }
 0x866   :  { %v4962_v5 = vpop.f32.mrf.mxu0 }
 0x867   :  { %v12042_v63 = vpack.c.bf16 %v4962_v5, %v4962_v5 }
 0x869   :  { %9311 = vmatmul.msk.bf16.gmra.mxu0 %vm4853_vm13, %v10213_v35  ;;  %5257 = vrot.lane.b32.xlu0 %v5092_v23, %s10636_s5 }
 0x86a   :  { %5103 = vrot.lane.b32.xlu1 %v12042_v63, %s10637_s0 }
 0x86b   :  { %v5031_v3 = vpop.permute.xlu2 %5030 }
 0x86c   :  { %5040 = vst.msk [vmem:[#allocation3 + $0x18] sm:$0xf] %vm5036_vm7, %v5031_v3 }
 0x86e   :  { %v4964_v28 = vpop.f32.mrf.mxu0 }
 0x86f   :  { %v12049_v47 = vpack.c.bf16 %v4964_v28, %v4964_v28 }
 0x871   :  { %5105 = vrot.lane.b32.xlu2 %v12049_v47, %s10637_s0 }
 0x873   :  { %v5027_v59 = vpop.permute.xlu0 %5026 }
 0x874   :  { %5038 = vst.msk [vmem:[#allocation3 + $0x8] sm:$0xf] %vm5036_vm7, %v5027_v59 }
 0x876   :  { %v4967_v29 = vpop.f32.mrf.mxu0 }
 0x877   :  { %v5116_v58 = vpack.c.bf16 %v4967_v29, %v4967_v29 }
 0x879   :  { %5124 = vrot.lane.b32.xlu1 %v5116_v58, %s10638_s8 }
 0x87b   :  { %v5029_v19 = vpop.permute.xlu1 %5028  ;;  %v5052_v0 = vpop.permute.xlu2 %5051 }
 0x87c   :  { %5039 = vst.msk [vmem:[#allocation3 + $0x10] sm:$0xf] %vm5036_vm7, %v5029_v19  ;;  %v10228_v19 = vld [vmem:[%s13135_s9 + $0x30] sm:$0xff] }
 0x87d   :  { %5063 = vst.msk [vmem:[#allocation3 + $0x8] sm:$0xf] %vm5061_vm8, %v5052_v0 }
 0x87e   :  { %v4969_v9 = vpop.f32.mrf.mxu0 }
 0x87f   :  { %v5117_v54 = vpack.c.bf16 %v4969_v9, %v4969_v9 }
 0x881   :  { %5271 = vrot.lane.b32.xlu1 %v5116_v58, %s10637_s0  ;;  %5126 = vrot.lane.b32.xlu2 %v5117_v54, %s10638_s8  ;;  %v10229_v58 = vld [vmem:[%s13135_s9 + $0x38] sm:$0xff] }
 0x882   :  { %5468 = vmatpush.bf16.msrb.mxu1 %v10229_v58 }
 0x883   :  { %v5226_v60 = vpop.permute.xlu2 %5225 }
 0x884   :  { %5236 = vst.msk [vmem:[#allocation3 + $0x28] sm:$0xf] %vm5061_vm8, %v5226_v60  ;;  %v10226_v60 = vld [vmem:[%s13135_s9 + $0x20] sm:$0xff] }
 0x886   :  { %v4972_v27 = vpop.f32.mrf.mxu0  ;;  %5469 = vmatpush.bf16.msrb.mxu1 %v10228_v19 }
 0x887   :  { %v12060_v37 = vpack.c.bf16 %v4972_v27, %v4972_v27 }
 0x889   :  { %5273 = vrot.lane.b32.xlu2 %v5117_v54, %s10637_s0  ;;  %5128 = vrot.lane.b32.xlu0 %v12060_v37, %s10638_s8  ;;  %v10227_v54 = vld [vmem:[%s13135_s9 + $0x28] sm:$0xff] }
 0x88a   :  { %5470 = vmatpush.bf16.msrb.mxu1 %v10227_v54 }
 0x88b   :  { %v5050_v1 = vpop.permute.xlu1 %5049  ;;  %v5228_v53 = vpop.permute.xlu2 %5227 }
 0x88c   :  { %5062 = vst.msk [vmem:[#allocation3] sm:$0xf] %vm5061_vm8, %v5050_v1  ;;  %v10224_v1 = vld [vmem:[%s13135_s9 + $0x10] sm:$0xff] }
 0x88d   :  { %5237 = vst.msk [vmem:[#allocation3 + $0x30] sm:$0xf] %vm5061_vm8, %v5228_v53 }
 0x88e   :  { %v4974_v52 = vpop.f32.mrf.mxu0  ;;  %5471 = vmatpush.bf16.msrb.mxu1 %v10226_v60 }
 0x88f   :  { %v12067_v12 = vpack.c.bf16 %v4974_v52, %v4974_v52 }
 0x891   :  { %5130 = vrot.lane.b32.xlu1 %v12067_v12, %s10638_s8 }
 0x893   :  { %v5224_v2 = vpop.permute.xlu1 %5223 }
 0x894   :  { %5235 = vst.msk [vmem:[#allocation3 + $0x20] sm:$0xf] %vm5061_vm8, %v5224_v2  ;;  %v10223_v2 = vld [vmem:[%s13135_s9 + $0x8] sm:$0xff] }
 0x896   :  { %v4977_v32 = vpop.f32.mrf.mxu0 }
 0x897   :  { %v5141_v21 = vpack.c.bf16 %v4977_v32, %v4977_v32  ;;  %v10222_v32 = vld [vmem:[%s13135_s9] sm:$0xff] }
 0x899   :  { %5149 = vrot.lane.b32.xlu0 %v5141_v21, %s10639_s27 }
 0x89c   :  { %v5054_v51 = vpop.permute.xlu0 %5053 }
 0x89d   :  { %5064 = vst.msk [vmem:[#allocation3 + $0x10] sm:$0xf] %vm5061_vm8, %v5054_v51 }
 0x89e   :  { %v4979_v42 = vpop.f32.mrf.mxu0 }
 0x89f   :  { %v5142_v33 = vpack.c.bf16 %v4979_v42, %v4979_v42 }
 0x8a1   :  { %5287 = vrot.lane.b32.xlu0 %v5141_v21, %s10638_s8  ;;  %5151 = vrot.lane.b32.xlu1 %v5142_v33, %s10639_s27 }
 0x8a3   :  { %v5056_v56 = vpop.permute.xlu1 %5055 }
 0x8a4   :  { %v5230_v24 = vpop.permute.xlu0 %5229  ;;  %5065 = vst.msk [vmem:[#allocation3 + $0x18] sm:$0xf] %vm5061_vm8, %v5056_v56  ;;  %v5079_v16 = vpop.permute.xlu2 %5078 }
 0x8a5   :  { %5238 = vst.msk [vmem:[#allocation3 + $0x38] sm:$0xf] %vm5061_vm8, %v5230_v24 }
 0x8a6   :  { %5089 = vst.msk [vmem:[#allocation3 + $0x10] sm:$0xf] %vm5086_vm9, %v5079_v16  ;;  %v4982_v49 = vpop.f32.mrf.mxu0 }
 0x8a7   :  { %v5143_v20 = vpack.c.bf16 %v4982_v49, %v4982_v49 }
 0x8a9   :  { %5243 = vrot.lane.b32.xlu1 %v12012_v25, %s10635_s7  ;;  %5153 = vrot.lane.b32.xlu2 %v5143_v20, %s10639_s27 }
 0x8ac   :  { %v5075_v34 = vpop.permute.xlu0 %5074 }
 0x8ad   :  { %5087 = vst.msk [vmem:[#allocation3] sm:$0xf] %vm5086_vm9, %v5075_v34 }
 0x8ae   :  { %v4984_v61 = vpop.f32.mrf.mxu0 }
 0x8af   :  { %v12083_v44 = vpack.c.bf16 %v4984_v61, %v4984_v61 }
 0x8b1   :  { %5289 = vrot.lane.b32.xlu1 %v5142_v33, %s10638_s8  ;;  %5155 = vrot.lane.b32.xlu0 %v12083_v44, %s10639_s27 }
 0x8b3   :  { %v5077_v41 = vpop.permute.xlu1 %5076  ;;  %v5100_v14 = vpop.permute.xlu2 %5099 }
 0x8b4   :  { %v5240_v45 = vpop.permute.xlu0 %5239  ;;  %5088 = vst.msk [vmem:[#allocation3 + $0x8] sm:$0xf] %vm5086_vm9, %v5077_v41 }
 0x8b5   :  { %5251 = vst.msk [vmem:[#allocation3 + $0x20] sm:$0xf] %vm5086_vm9, %v5240_v45 }
 0x8b6   :  { %5112 = vst.msk [vmem:[#allocation3] sm:$0xf] %vm5111_vm10, %v5100_v14  ;;  %v4987_v57 = vpop.f32.mrf.mxu0 }
 0x8b7   :  { %v5166_v39 = vpack.c.bf16 %v4987_v57, %v4987_v57 }
 0x8b9   :  { %5174 = vrot.lane.b32.xlu2 %v5166_v39, %s10634_s23 }
 0x8bb   :  { %v5242_v40 = vpop.permute.xlu1 %5241  ;;  %v5256_v43 = vpop.permute.xlu2 %5255 }
 0x8bc   :  { %5252 = vst.msk [vmem:[#allocation3 + $0x28] sm:$0xf] %vm5086_vm9, %v5242_v40 }
 0x8bd   :  { %5267 = vst.msk [vmem:[#allocation3 + $0x20] sm:$0xf] %vm5111_vm10, %v5256_v43 }
 0x8be   :  { %v4989_v13 = vpop.f32.mrf.mxu0 }
 0x8bf   :  { %v5167_v48 = vpack.c.bf16 %v4989_v13, %v4989_v13 }
 0x8c1   :  { %5303 = vrot.lane.b32.xlu2 %v5166_v39, %s10639_s27  ;;  %5176 = vrot.lane.b32.xlu0 %v5167_v48, %s10634_s23 }
 0x8c3   :  { %v5081_v18 = vpop.permute.xlu0 %5080 }
 0x8c4   :  { %5090 = vst.msk [vmem:[#allocation3 + $0x18] sm:$0xf] %vm5086_vm9, %v5081_v18 }
 0x8c6   :  { %v4992_v4 = vpop.f32.mrf.mxu0 }
 0x8c7   :  { %v5168_v30 = vpack.c.bf16 %v4992_v4, %v4992_v4 }
 0x8c9   :  { %5305 = vrot.lane.b32.xlu0 %v5167_v48, %s10639_s27  ;;  %5178 = vrot.lane.b32.xlu1 %v5168_v30, %s10634_s23 }
 0x8cb   :  { %v5106_v17 = vpop.permute.xlu2 %5105 }
 0x8cc   :  { %5115 = vst.msk [vmem:[#allocation3 + $0x18] sm:$0xf] %vm5111_vm10, %v5106_v17 }
 0x8ce   :  { %v4994_v55 = vpop.f32.mrf.mxu0 }
 0x8cf   :  { %v5169_v62 = vpack.c.bf16 %v4994_v55, %v4994_v55 }
 0x8d1   :  { %5259 = vrot.lane.b32.xlu0 %v12042_v63, %s10636_s5  ;;  %5261 = vrot.lane.b32.xlu1 %v12049_v47, %s10636_s5  ;;  %s10641_s5 = smov 98  }
 0x8d2   :  { %5180 = vrot.lane.b32.xlu2 %v5169_v62, %s10634_s23 }
 0x8d3   :  { %v5102_v46 = vpop.permute.xlu0 %5101 }
 0x8d4   :  { %5113 = vst.msk [vmem:[#allocation3 + $0x8] sm:$0xf] %vm5111_vm10, %v5102_v46 }
 0x8d6   :  { %v4997_v25 = vpop.f32.mrf.mxu0 }
 0x8d7   :  { %v5191_v38 = vpack.c.bf16 %v4997_v25, %v4997_v25 }
 0x8d9   :  { %5195 = vst.msk [vmem:[#allocation3 + $0x4] sm:$0xf] %vm5011_vm6, %v5191_v38  ;;  %5291 = vrot.lane.b32.xlu1 %v5143_v20, %s10638_s8 }
 0x8da   :  { %5323 = vrot.lane.b32.xlu2 %v5191_v38, %s10634_s23 }
 0x8db   :  { %v5258_v36 = vpop.permute.xlu0 %5257  ;;  %v5127_v6 = vpop.permute.xlu2 %5126 }
 0x8dc   :  { %5268 = vst.msk [vmem:[#allocation3 + $0x28] sm:$0xf] %vm5111_vm10, %v5258_v36  ;;  %v5104_v8 = vpop.permute.xlu1 %5103 }
 0x8dd   :  { %5114 = vst.msk [vmem:[#allocation3 + $0x10] sm:$0xf] %vm5111_vm10, %v5104_v8 }
 0x8de   :  { %5138 = vst.msk [vmem:[#allocation3 + $0x8] sm:$0xf] %vm5136_vm11, %v5127_v6  ;;  %v4999_v31 = vpop.f32.mrf.mxu0 }
 0x8df   :  { %v5192_v7 = vpack.c.bf16 %v4999_v31, %v4999_v31 }
 0x8e0   :  { %v10214_v11 = vld [vmem:[#allocation3 + $0x4] sm:$0xf] }
 0x8e1   :  { %5196 = vst.msk [vmem:[#allocation3 + $0xc] sm:$0xf] %vm5011_vm6, %v5192_v7  ;;  %5325 = vrot.lane.b32.xlu0 %v5192_v7, %s10634_s23 }
 0x8e2   :  { %5245 = vrot.lane.b32.xlu2 %v12022_v50, %s10635_s7  ;;  %s10645_s7 = smov 87  }
 0x8e3   :  { %v5274_v10 = vpop.permute.xlu2 %5273 }
 0x8e4   :  { %5284 = vst.msk [vmem:[#allocation3 + $0x28] sm:$0xf] %vm5136_vm11, %v5274_v10 }
 0x8e6   :  { %v5002_v22 = vpop.f32.mrf.mxu0 }
 0x8e7   :  { %v5193_v26 = vpack.c.bf16 %v5002_v22, %v5002_v22 }
 0x8e8   :  { %v9316_v23 = vld [vmem:[#allocation3 + $0x8] sm:$0xf0] }
 0x8e9   :  { %5197 = vst.msk [vmem:[#allocation3 + $0x14] sm:$0xf] %vm5011_vm6, %v5193_v26  ;;  %5277 = vrot.lane.b32.xlu0 %v12067_v12, %s10637_s0  ;;  %v9319_v35 = vor.u32 %v10214_v11, %v9316_v23 }
 0x8ea   :  { %5275 = vrot.lane.b32.xlu2 %v12060_v37, %s10637_s0  ;;  %v10225_v37 = vld [vmem:[%s13135_s9 + $0x18] sm:$0xff]  ;;  %s10640_s9 = smov 49  }
 0x8eb   :  { %v5125_v5 = vpop.permute.xlu1 %5124  ;;  %9380 = vmatmul.msk.bf16.vlgmr.msrb.gmra.mxu2 %vm5455_vm1, %v9319_v35  ;;  %5472 = vmatpush.bf16.msrb.mxu1 %v10225_v37 }
 0x8ec   :  { %5137 = vst.msk [vmem:[#allocation3] sm:$0xf] %vm5136_vm11, %v5125_v5 }
 0x8ee   :  { %v5004_v50 = vpop.f32.mrf.mxu0 }
 0x8ef   :  { %v5194_v63 = vpack.c.bf16 %v5004_v50, %v5004_v50  ;;  %5473 = vmatpush.bf16.msrb.mxu1 %v10224_v1 }
 0x8f0   :  { %v10216_v28 = vld [vmem:[#allocation3 + $0x14] sm:$0xf] }
 0x8f1   :  { %5198 = vst.msk [vmem:[#allocation3 + $0x1c] sm:$0xf] %vm5011_vm6, %v5194_v63  ;;  %5327 = vrot.lane.b32.xlu0 %v5193_v26, %s10634_s23  ;;  %5329 = vrot.lane.b32.xlu1 %v5194_v63, %s10634_s23  ;;  %s10650_s23 = smov 46  }
 0x8f2   :  { %5293 = vrot.lane.b32.xlu2 %v12083_v44, %s10638_s8  ;;  %s10643_s8 = smov 117  }
 0x8f3   :  { %v5272_v3 = vpop.permute.xlu1 %5271  ;;  %5474 = vmatpush.bf16.msrb.mxu1 %v10223_v2 }
 0x8f4   :  { %5283 = vst.msk [vmem:[#allocation3 + $0x20] sm:$0xf] %vm5136_vm11, %v5272_v3 }
 0x8f7   :  { %5475 = vmatpush.bf16.msrb.mxu1 %v10222_v32 }
 0x8f8   :  { %v9324_v47 = vld [vmem:[#allocation3 + $0x18] sm:$0xf0] }
 0x8f9   :  { %5307 = vrot.lane.b32.xlu0 %v5168_v30, %s10639_s27  ;;  %5309 = vrot.lane.b32.xlu1 %v5169_v62, %s10639_s27  ;;  %v9327_v59 = vor.u32 %v10216_v28, %v9324_v47  ;;  %s10655_s27 = smov 113  }
 0x8fb   :  { %v5129_v29 = vpop.permute.xlu0 %5128  ;;  %9381 = vmatmul.msk.bf16.gmra.mxu2 %vm5455_vm1, %v9327_v59 }
 0x8fc   :  { %5139 = vst.msk [vmem:[#allocation3 + $0x10] sm:$0xf] %vm5136_vm11, %v5129_v29 }
 0x903   :  { %v5131_v0 = vpop.permute.xlu1 %5130  ;;  %v5154_v9 = vpop.permute.xlu2 %5153 }
 0x904   :  { %5140 = vst.msk [vmem:[#allocation3 + $0x18] sm:$0xf] %vm5136_vm11, %v5131_v0 }
 0x905   :  { %5164 = vst.msk [vmem:[#allocation3 + $0x10] sm:$0xf] %vm5161_vm14, %v5154_v9 }
 0x90b   :  { %v5150_v27 = vpop.permute.xlu0 %5149 }
 0x90c   :  { %5162 = vst.msk [vmem:[#allocation3] sm:$0xf] %vm5161_vm14, %v5150_v27 }
 0x913   :  { %v5288_v53 = vpop.permute.xlu0 %5287  ;;  %v5152_v52 = vpop.permute.xlu1 %5151 }
 0x914   :  { %5299 = vst.msk [vmem:[#allocation3 + $0x20] sm:$0xf] %vm5161_vm14, %v5288_v53  ;;  %v5175_v12 = vpop.permute.xlu2 %5174 }
 0x915   :  { %5163 = vst.msk [vmem:[#allocation3 + $0x8] sm:$0xf] %vm5161_vm14, %v5152_v52 }
 0x916   :  { %5187 = vst.msk [vmem:[#allocation3] sm:$0xf] %vm5186_vm12, %v5175_v12 }
 0x91b   :  { %v5244_v21 = vpop.permute.xlu1 %5243 }
 0x91c   :  { %5253 = vst.msk [vmem:[#allocation3 + $0x30] sm:$0xf] %vm5086_vm9, %v5244_v21  ;;  %v5304_v51 = vpop.permute.xlu2 %5303 }
 0x91d   :  { %5315 = vst.msk [vmem:[#allocation3 + $0x20] sm:$0xf] %vm5186_vm12, %v5304_v51  ;;  %v9314_v34 = vld [vmem:[#allocation3] sm:$0xf] }
 0x923   :  { %v5290_v42 = vpop.permute.xlu1 %5289  ;;  %v5156_v33 = vpop.permute.xlu0 %5155 }
 0x924   :  { %5300 = vst.msk [vmem:[#allocation3 + $0x28] sm:$0xf] %vm5161_vm14, %v5290_v42  ;;  %v9330_v30 = vld [vmem:[#allocation3 + $0x20] sm:$0xf] }
 0x925   :  { %5165 = vst.msk [vmem:[#allocation3 + $0x18] sm:$0xf] %vm5161_vm14, %v5156_v33 }
 0x92c   :  { %v5181_v56 = vpop.permute.xlu2 %5180 }
 0x92d   :  { %5190 = vst.msk [vmem:[#allocation3 + $0x18] sm:$0xf] %vm5186_vm12, %v5181_v56 }
 0x933   :  { %v5177_v24 = vpop.permute.xlu0 %5176 }
 0x934   :  { %5188 = vst.msk [vmem:[#allocation3 + $0x8] sm:$0xf] %vm5186_vm12, %v5177_v24  ;;  %v5324_v16 = vpop.permute.xlu2 %5323  ;;  %v10217_v43 = vld [vmem:[#allocation3 + $0x14] sm:$0xf0] }
 0x935   :  { %5335 = vst.msk [vmem:[#allocation3 + $0x24] sm:$0xf] %vm5011_vm6, %v5324_v16 }
 0x93b   :  { %v5306_v49 = vpop.permute.xlu0 %5305  ;;  %v5179_v20 = vpop.permute.xlu1 %5178  ;;  %v10215_v61 = vld [vmem:[#allocation3 + $0x4] sm:$0xf0] }
 0x93c   :  { %5316 = vst.msk [vmem:[#allocation3 + $0x28] sm:$0xf] %vm5186_vm12, %v5306_v49  ;;  %v5246_v44 = vpop.permute.xlu2 %5245  ;;  %v9315_v41 = vor.u32 %v10215_v61, %v9314_v34  ;;  %v10218_v15 = vld [vmem:[#allocation3 + $0x24] sm:$0xf] }
 0x93d   :  { %5189 = vst.msk [vmem:[#allocation3 + $0x10] sm:$0xf] %vm5186_vm12, %v5179_v20 }
 0x93e   :  { %5254 = vst.msk [vmem:[#allocation3 + $0x38] sm:$0xf] %vm5086_vm9, %v5246_v44  ;;  %5476 = vmatmul.bf16.vlgmr.msrb.gmra.mxu1 %v9315_v41 }
 0x943   :  { %v5260_v14 = vpop.permute.xlu0 %5259  ;;  %v5262_v45 = vpop.permute.xlu1 %5261  ;;  %v10219_v18 = vld [vmem:[#allocation3 + $0x24] sm:$0xf0] }
 0x944   :  { %5269 = vst.msk [vmem:[#allocation3 + $0x30] sm:$0xf] %vm5111_vm10, %v5260_v14  ;;  %v5276_v57 = vpop.permute.xlu2 %5275  ;;  %v9322_v39 = vld [vmem:[#allocation3 + $0x10] sm:$0xf]  ;;  %v9331_v62 = vor.u32 %v10219_v18, %v9330_v30 }
 0x945   :  { %5270 = vst.msk [vmem:[#allocation3 + $0x38] sm:$0xf] %vm5111_vm10, %v5262_v45  ;;  %v9323_v13 = vor.u32 %v10217_v43, %v9322_v39 }
 0x946   :  { %5285 = vst.msk [vmem:[#allocation3 + $0x30] sm:$0xf] %vm5136_vm11, %v5276_v57 }
 0x94b   :  { %v5292_v40 = vpop.permute.xlu1 %5291 }
 0x94c   :  { %5301 = vst.msk [vmem:[#allocation3 + $0x30] sm:$0xf] %vm5161_vm14, %v5292_v40  ;;  %v5294_v55 = vpop.permute.xlu2 %5293 }
 0x94e   :  { %5481 = vmatmul.bf16.gmra.mxu1 %v9323_v13 }
 0x953   :  { %v5326_v48 = vpop.permute.xlu0 %5325 }
 0x954   :  { %5336 = vst.msk [vmem:[#allocation3 + $0x2c] sm:$0xf] %vm5011_vm6, %v5326_v48 }
 0x95b   :  { %v5278_v4 = vpop.permute.xlu0 %5277  ;;  %v9332_v17 = vld [vmem:[#allocation3 + $0x28] sm:$0xf0] }
 0x95c   :  { %5286 = vst.msk [vmem:[#allocation3 + $0x38] sm:$0xf] %vm5136_vm11, %v5278_v4  ;;  %v9335_v46 = vor.u32 %v10218_v15, %v9332_v17  ;;  %vm13329_vm11 = vcmask 261120  }
 0x95d   :  { %5302 = vst.msk [vmem:[#allocation3 + $0x38] sm:$0xf] %vm5161_vm14, %v5294_v55  ;;  %vm13330_vm14 = vmmov %vm13329_vm11 }
 0x95e   :  { %5486 = vmatmul.bf16.gmra.mxu1 %v9331_v62  ;;  %9382 = vmatmul.msk.bf16.gmra.mxu2 %vm5455_vm1, %v9335_v46 }
 0x963   :  { %v5328_v25 = vpop.permute.xlu0 %5327  ;;  %v5330_v38 = vpop.permute.xlu1 %5329 }
 0x964   :  { %5337 = vst.msk [vmem:[#allocation3 + $0x34] sm:$0xf] %vm5011_vm6, %v5328_v25 }
 0x965   :  { %5338 = vst.msk [vmem:[#allocation3 + $0x3c] sm:$0xf] %vm5011_vm6, %v5330_v38 }
 0x96b   :  { %v5308_v36 = vpop.permute.xlu0 %5307  ;;  %v5310_v6 = vpop.permute.xlu1 %5309  ;;  %v10220_v8 = vld [vmem:[#allocation3 + $0x34] sm:$0xf] }
 0x96c   :  { %5317 = vst.msk [vmem:[#allocation3 + $0x30] sm:$0xf] %vm5186_vm12, %v5308_v36  ;;  %v9340_v31 = vld [vmem:[#allocation3 + $0x38] sm:$0xf0] }
 0x96d   :  { %5318 = vst.msk [vmem:[#allocation3 + $0x38] sm:$0xf] %vm5186_vm12, %v5310_v6  ;;  %v9343_v7 = vor.u32 %v10220_v8, %v9340_v31  ;;  %vm13331_vm12 = vmmov %vm13329_vm11 }
 0x96e   :  { %v5506_v11 = vpop.f32.mrf.mxu2 }
 0x96f   :  { %9383 = vmatmul.msk.bf16.gmra.mxu2 %vm5455_vm1, %v9343_v7 }
 0x973   :  { %v9338_v10 = vld [vmem:[#allocation3 + $0x30] sm:$0xf] }
 0x974   :  { %v10221_v22 = vld [vmem:[#allocation3 + $0x34] sm:$0xf0] }
 0x975   :  { %v9339_v26 = vor.u32 %v10221_v22, %v9338_v10 }
 0x976   :  { %v5508_v5 = vpop.f32.mrf.mxu2 }
 0x977   :  { %5491 = vmatmul.bf16.gmra.mxu1 %v9339_v26 }
 0x97e   :  { %v5511_v63 = vpop.f32.mrf.mxu2 }
 0x986   :  { %v5513_v28 = vpop.f32.mrf.mxu2 }
 0x9bb   :  { %v5477_v23 = vpop.f32.mrf.mxu1 }
 0x9bc   :  { %v12190_v29 = vadd.f32 %v5506_v11, %v5477_v23 }
 0x9be   :  { %v5534_v41 = vmul.f32 %v12190_v29, %v12190_v29 }
 0x9c3   :  { %v5479_v35 = vpop.f32.mrf.mxu1 }
 0x9c4   :  { %v12212_v33 = vadd.f32 %v5508_v5, %v5479_v35 }
 0x9c6   :  { %v5535_v44 = vmul.f32 %v12212_v33, %v12212_v33 }
 0x9cb   :  { %v5482_v50 = vpop.f32.mrf.mxu1 }
 0x9cc   :  { %v12196_v60 = vadd.f32 %v5511_v63, %v5482_v50 }
 0x9ce   :  { %v5536_v1 = vmul.f32 %v12196_v60, %v12196_v60 }
 0x9d3   :  { %v5484_v3 = vpop.f32.mrf.mxu1 }
 0x9d4   :  { %v12206_v2 = vadd.f32 %v5513_v28, %v5484_v3 }
 0x9d6   :  { %v5537_v24 = vmul.f32 %v12206_v2, %v12206_v2 }
 0x9db   :  { %v5487_v47 = vpop.f32.mrf.mxu1 }
 0x9e1   :  { %v5516_v59 = vpop.f32.mrf.mxu2 }
 0x9e2   :  { %v12192_v58 = vadd.f32 %v5516_v59, %v5487_v47 }
 0x9e3   :  { %v5489_v9 = vpop.f32.mrf.mxu1 }
 0x9e4   :  { %v5538_v19 = vadd.f32 %v12192_v58, %v12190_v29  ;;  %v5542_v61 = vmul.f32 %v12192_v58, %v12192_v58 }
 0x9e6   :  { %5550 = vadd.xlane.f32.xlu0 %v5538_v19  ;;  %v5546_v45 = vadd.f32 %v5542_v61, %v5534_v41  ;;  %v5529_v61 = vld [vmem:[%s13136_s10 + $0x18] sm:$0xff] }
 0x9e9   :  { %v5518_v0 = vpop.f32.mrf.mxu2 }
 0x9ea   :  { %v12208_v51 = vadd.f32 %v5518_v0, %v5489_v9 }
 0x9ec   :  { %v5539_v20 = vadd.f32 %v12208_v51, %v12212_v33  ;;  %v5543_v34 = vmul.f32 %v12208_v51, %v12208_v51 }
 0x9ee   :  { %v5547_v14 = vadd.f32 %v5543_v34, %v5535_v44 }
 0x9f2   :  { %v5521_v54 = vpop.f32.mrf.mxu2 }
 0x9f4   :  { %v5492_v27 = vpop.f32.mrf.mxu1 }
 0x9f5   :  { %v12198_v37 = vadd.f32 %v5521_v54, %v5492_v27 }
 0x9f7   :  { %v5544_v53 = vmul.f32 %v12198_v37, %v12198_v37  ;;  %v5540_v52 = vadd.f32 %v12198_v37, %v12196_v60 }
 0x9f9   :  { %5554 = vadd.xlane.f32.xlu2 %v5540_v52  ;;  %v5548_v12 = vadd.f32 %v5544_v53, %v5536_v1  ;;  %v5528_v1 = vld [vmem:[%s13136_s10 + $0x10] sm:$0xff] }
 0x9fa   :  { %v5523_v32 = vpop.f32.mrf.mxu2 }
 0x9fb   :  { %5566 = vadd.xlane.f32.xlu1 %v5548_v12 }
 0x9fc   :  { %v5494_v21 = vpop.f32.mrf.mxu1 }
 0x9fd   :  { %v12210_v42 = vadd.f32 %v5523_v32, %v5494_v21 }
 0x9ff   :  { %v5541_v56 = vadd.f32 %v12210_v42, %v12206_v2  ;;  %v5545_v16 = vmul.f32 %v12210_v42, %v12210_v42 }
 0xa01   :  { %5556 = vadd.xlane.f32.xlu0 %v5541_v56  ;;  %v5549_v49 = vadd.f32 %v5545_v16, %v5537_v24 }
 0xa03   :  { %5568 = vadd.xlane.f32.xlu2 %v5549_v49  ;;  %5552 = vadd.xlane.f32.xlu1 %v5539_v20 }
 0xa09   :  { %5564 = vadd.xlane.f32.xlu0 %v5547_v14 }
 0xa0b   :  { %5562 = vadd.xlane.f32.xlu2 %v5546_v45 }
 0xa59   :  { %v5551_v57 = vpop.xlane.xlu0 %5550 }
 0xa5a   :  { %v12240_v6 = vmul.f32 0.010204081, %v5551_v57 }
 0xa5c   :  { %v5574_v35 = vmul.f32 %v12240_v6, %v12240_v6 }
 0xa6c   :  { %v5555_v39 = vpop.xlane.xlu2 %5554 }
 0xa6d   :  { %v12230_v40 = vmul.f32 0.010204081, %v5555_v39 }
 0xa6e   :  { %v5567_v43 = vpop.xlane.xlu1 %5566 }
 0xa6f   :  { %v5576_v13 = vmul.f32 %v12230_v40, %v12230_v40  ;;  %v5572_v48 = vmul.f32 0.010204081, %v5567_v43 }
 0xa71   :  { %v5580_v18 = vsub.f32 %v5572_v48, %v5576_v13  ;;  %v5533_v13 = vld [vmem:[%s13137_s11 + $0x18] sm:$0xff] }
 0xa73   :  { %v5584_v4 = vmax.f32 %v5580_v18, 0.0 }
 0xa74   :  { %v5557_v30 = vpop.xlane.xlu0 %5556 }
 0xa75   :  { %v5588_v15 = vadd.f32 1e-05, %v5584_v4  ;;  %v12234_v17 = vmul.f32 0.010204081, %v5557_v30 }
 0xa76   :  { %v5569_v55 = vpop.xlane.xlu2 %5568  ;;  %v5553_v62 = vpop.xlane.xlu1 %5552 }
 0xa77   :  { %10445 = vrsqrt.f32 %v5588_v15  ;;  %v5577_v46 = vmul.f32 %v12234_v17, %v12234_v17  ;;  %v5573_v25 = vmul.f32 0.010204081, %v5569_v55  ;;  %v12238_v36 = vmul.f32 0.010204081, %v5553_v62  ;;  %v5527_v62 = vld [vmem:[%s13136_s10 + $0x8] sm:$0xff] }
 0xa78   :  { %vm5616_vm3 = vweird.f32 %v5588_v15 }
 0xa79   :  { %v5581_v38 = vsub.f32 %v5573_v25, %v5577_v46  ;;  %v5575_v22 = vmul.f32 %v12238_v36, %v12238_v36 }
 0xa7b   :  { %v5585_v8 = vmax.f32 %v5581_v38, 0.0 }
 0xa7c   :  { %v5565_v31 = vpop.xlane.xlu0 %5564 }
 0xa7d   :  { %v10446_v7 = vpop.eup %10445  ;;  %v5589_v10 = vadd.f32 1e-05, %v5585_v8  ;;  %v5571_v26 = vmul.f32 0.010204081, %v5565_v31  ;;  %v5530_v8 = vld [vmem:[%s13137_s11] sm:$0xff] }
 0xa7e   :  { %v5611_v11 = vmul.f32 %v10446_v7, %v5588_v15  ;;  %v5563_v23 = vpop.xlane.xlu2 %5562  ;;  %vm5617_vm2 = vweird.f32 %v10446_v7  ;;  %v5526_v15 = vld [vmem:[%s13136_s10] sm:$0xff]  ;;  %s10644_s10 = smov 38  }
 0xa7f   :  { %10447 = vrsqrt.f32 %v5589_v10  ;;  %v5579_v5 = vsub.f32 %v5571_v26, %v5575_v22  ;;  %v5570_v50 = vmul.f32 0.010204081, %v5563_v23  ;;  %vm5618_vm4 = vmor %vm5616_vm3, %vm5617_vm2  ;;  %vm5626_vm0 = vweird.f32 %v5589_v10  ;;  %v5532_v22 = vld [vmem:[%s13137_s11 + $0x10] sm:$0xff]  ;;  %v5531_v23 = vld [vmem:[%s13137_s11 + $0x8] sm:$0xff] }
 0xa80   :  { %v5612_v63 = vmul.f32 %v10446_v7, %v5611_v11  ;;  %vm13332_vm2 = vmmov %vm13329_vm11 }
 0xa81   :  { %v5583_v3 = vmax.f32 %v5579_v5, 0.0  ;;  %v5578_v28 = vsub.f32 %v5570_v50, %v5574_v35  ;;  %vm13333_vm3 = vmmov %vm13332_vm2 }
 0xa82   :  { %v5613_v47 = vmul.f32 0.5, %v5612_v63 }
 0xa83   :  { %v5587_v59 = vadd.f32 1e-05, %v5583_v3  ;;  %v5582_v19 = vmax.f32 %v5578_v28, 0.0 }
 0xa84   :  { %v5614_v0 = vsub.f32 1.5, %v5613_v47 }
 0xa85   :  { %v10448_v9 = vpop.eup %10447  ;;  %10449 = vrsqrt.f32 %v5587_v59  ;;  %v5586_v54 = vadd.f32 1e-05, %v5582_v19  ;;  %vm5606_vm6 = vweird.f32 %v5587_v59 }
 0xa86   :  { %v5621_v27 = vmul.f32 %v10448_v9, %v5589_v10  ;;  %v5615_v53 = vmul.f32 %v10446_v7, %v5614_v0  ;;  %vm5627_vm15 = vweird.f32 %v10448_v9 }
 0xa87   :  { %10451 = vrsqrt.f32 %v5586_v54  ;;  %vm5628_vm5 = vmor %vm5626_vm0, %vm5627_vm15  ;;  %vm5596_vm9 = vweird.f32 %v5586_v54 }
 0xa88   :  { %v5622_v52 = vmul.f32 %v10448_v9, %v5621_v27  ;;  %v5619_v12 = vsel %vm5618_vm4, %v10446_v7, %v5615_v53  ;;  %vm13334_vm4 = vmmov %vm13332_vm2 }
 0xa89   :  { %v5632_v32 = vmul.f32 %v5619_v12, %v5528_v1  ;;  %vm13335_vm15 = vmmov %vm13332_vm2 }
 0xa8a   :  { %v5623_v21 = vmul.f32 0.5, %v5622_v52  ;;  %vm13336_vm0 = vmmov %vm13332_vm2 }
 0xa8b   :  { %v10450_v56 = vpop.eup %10449  ;;  %5654 = vperm.xlu1 %10418, %v5632_v32   ;;  %v5636_v10 = vmul.f32 %v5632_v32, %v12230_v40 }
 0xa8c   :  { %v5624_v24 = vsub.f32 1.5, %v5623_v21  ;;  %v5601_v16 = vmul.f32 %v10450_v56, %v5587_v59  ;;  %vm5607_vm13 = vweird.f32 %v10450_v56 }
 0xa8d   :  { %v10452_v49 = vpop.eup %10451  ;;  %vm5608_vm8 = vmor %vm5606_vm6, %vm5607_vm13  ;;  %v5640_v26 = vsub.f32 %v5532_v22, %v5636_v10  ;;  %v10241_v22 = vld [vmem:[%s13138_s12 + $0x50] sm:$0xff] }
 0xa8e   :  { %v5602_v20 = vmul.f32 %v10450_v56, %v5601_v16  ;;  %v5591_v34 = vmul.f32 %v10452_v49, %v5586_v54  ;;  %v5625_v44 = vmul.f32 %v10448_v9, %v5624_v24  ;;  %vm5597_vm7 = vweird.f32 %v10452_v49  ;;  %vm13338_vm13 = vmmov %vm13336_vm0 }
 0xa8f   :  { %vm5598_vm10 = vmor %vm5596_vm9, %vm5597_vm7 }
 0xa90   :  { %v5603_v41 = vmul.f32 0.5, %v5602_v20  ;;  %v5592_v14 = vmul.f32 %v10452_v49, %v5591_v34  ;;  %v5629_v45 = vsel %vm5628_vm5, %v10448_v9, %v5625_v44  ;;  %vm13337_vm5 = vmmov %vm13336_vm0 }
 0xa91   :  { %v5633_v57 = vmul.f32 %v5629_v45, %v5529_v61  ;;  %v10234_v45 = vld [vmem:[%s13138_s12 + $0x18] sm:$0xff]  ;;  %vm13339_vm6 = vmmov %vm13336_vm0 }
 0xa92   :  { %v5604_v39 = vsub.f32 1.5, %v5603_v41  ;;  %v5593_v43 = vmul.f32 0.5, %v5592_v14  ;;  %vm13340_vm7 = vmmov %vm13336_vm0 }
 0xa93   :  { %5659 = vperm.xlu2 %10419, %v5633_v57   ;;  %v5637_v48 = vmul.f32 %v5633_v57, %v12234_v17  ;;  %v10235_v57 = vld [vmem:[%s13138_s12 + $0x20] sm:$0xff]  ;;  %vm13342_vm9 = vmmov %vm13336_vm0 }
 0xa94   :  { %v5594_v18 = vsub.f32 1.5, %v5593_v43  ;;  %v5605_v4 = vmul.f32 %v10450_v56, %v5604_v39  ;;  %v10236_v39 = vld [vmem:[%s13138_s12 + $0x28] sm:$0xff]  ;;  %v10237_v43 = vld [vmem:[%s13138_s12 + $0x30] sm:$0xff] }
 0xa95   :  { %v5641_v30 = vsub.f32 %v5533_v13, %v5637_v48  ;;  %v10238_v13 = vld [vmem:[%s13138_s12 + $0x38] sm:$0xff]  ;;  %v10239_v48 = vld [vmem:[%s13138_s12 + $0x40] sm:$0xff] }
 0xa96   :  { %v5595_v55 = vmul.f32 %v10452_v49, %v5594_v18  ;;  %v5609_v46 = vsel %vm5608_vm8, %v10450_v56, %v5605_v4  ;;  %vm13341_vm8 = vmmov %vm13336_vm0 }
 0xa97   :  { %5687 = vperm.xlu1 %10418, %v5641_v30   ;;  %v5631_v38 = vmul.f32 %v5609_v46, %v5527_v62 }
 0xa98   :  { %v5599_v17 = vsel %vm5598_vm10, %v10452_v49, %v5595_v55  ;;  %vm13343_vm10 = vmmov %vm13336_vm0 }
 0xa99   :  { %v5630_v25 = vmul.f32 %v5599_v17, %v5526_v15  ;;  %v5635_v11 = vmul.f32 %v5631_v38, %v12238_v36 }
 0xa9b   :  { %5644 = vperm.xlu0 %10420, %v5630_v25   ;;  %5649 = vperm.xlu2 %10419, %v5631_v38   ;;  %v5634_v31 = vmul.f32 %v5630_v25, %v12240_v6  ;;  %v5639_v35 = vsub.f32 %v5531_v23, %v5635_v11  ;;  %v10240_v25 = vld [vmem:[%s13138_s12 + $0x48] sm:$0xff] }
 0xa9d   :  { %v5638_v7 = vsub.f32 %v5530_v8, %v5634_v31 }
 0xa9f   :  { %5672 = vperm.xlu1 %10418, %v5638_v7  }
 0xaa3   :  { %5682 = vperm.xlu0 %10420, %v5640_v26  }
 0xaab   :  { %5677 = vperm.xlu0 %10420, %v5639_v35  }
 0xaed   :  { %v5660_v50 = vpop.permute.xlu2 %5659 }
 0xaee   :  { %v5665_v40 = vmul.f32 %v5660_v50, %v12206_v2  ;;  %v5669_v3 = vmul.f32 %v5660_v50, %v12210_v42 }
 0xaf5   :  { %v5650_v54 = vpop.permute.xlu2 %5649 }
 0xafd   :  { %v5655_v5 = vpop.permute.xlu1 %5654 }
 0xafe   :  { %v5664_v28 = vmul.f32 %v5655_v5, %v12196_v60  ;;  %v5668_v47 = vmul.f32 %v5655_v5, %v12198_v37  ;;  %v5663_v60 = vmul.f32 %v5650_v54, %v12212_v33  ;;  %v5667_v37 = vmul.f32 %v5650_v54, %v12208_v51  ;;  %v10232_v51 = vld [vmem:[%s13138_s12 + $0x8] sm:$0xff]  ;;  %v10233_v33 = vld [vmem:[%s13138_s12 + $0x10] sm:$0xff] }
 0xb09   :  { %v5688_v63 = vpop.permute.xlu1 %5687 }
 0xb0a   :  { %v5693_v59 = vadd.f32 %v5688_v63, %v5665_v40  ;;  %v5697_v36 = vadd.f32 %v5688_v63, %v5669_v3  ;;  %v10242_v40 = vld [vmem:[%s13138_s12 + $0x58] sm:$0xff] }
 0xb0c   :  { %v5701_v27 = vmax.f32 %v5693_v59, 0.0  ;;  %v5705_v1 = vmax.f32 %v5697_v36, 0.0 }
 0xb0d   :  { %v5645_v6 = vpop.permute.xlu0 %5644 }
 0xb0e   :  { %v5662_v32 = vmul.f32 %v5645_v6, %v12190_v29  ;;  %v5666_v2 = vmul.f32 %v5645_v6, %v12192_v58  ;;  %v10231_v58 = vld [vmem:[%s13138_s12] sm:$0xff] }
 0xb11   :  { %v5673_v12 = vpop.permute.xlu1 %5672 }
 0xb12   :  { %v5690_v56 = vadd.f32 %v5673_v12, %v5662_v32  ;;  %v5694_v24 = vadd.f32 %v5673_v12, %v5666_v2  ;;  %v10244_v32 = vld [vmem:[%s13138_s12 + $0x68] sm:$0xff] }
 0xb14   :  { %v5698_v34 = vmax.f32 %v5690_v56, 0.0  ;;  %v5702_v61 = vmax.f32 %v5694_v24, 0.0 }
 0xb15   :  { %v5683_v19 = vpop.permute.xlu0 %5682 }
 0xb16   :  { %v5692_v0 = vadd.f32 %v5683_v19, %v5664_v28  ;;  %v5696_v9 = vadd.f32 %v5683_v19, %v5668_v47 }
 0xb18   :  { %v5700_v53 = vmax.f32 %v5692_v0, 0.0  ;;  %v5704_v52 = vmax.f32 %v5696_v9, 0.0  ;;  %v10243_v9 = vld [vmem:[%s13138_s12 + $0x60] sm:$0xff] }
 0xb1a   :  { %v5756_v42 = vpack.c.bf16 %v5701_v27, %v5700_v53  ;;  %v5757_v21 = vpack.c.bf16 %v5705_v1, %v5704_v52 }
 0xb1c   :  { %5892 = vmatpush.bf16.msrb.mxu3 %v5756_v42  ;;  %5981 = vmatpush.bf16.msra.mxu1 %v5757_v21 }
 0xb1d   :  { %v5678_v16 = vpop.permute.xlu0 %5677 }
 0xb1e   :  { %v5691_v49 = vadd.f32 %v5678_v16, %v5663_v60  ;;  %v5695_v20 = vadd.f32 %v5678_v16, %v5667_v37 }
 0xb20   :  { %v5699_v44 = vmax.f32 %v5691_v49, 0.0  ;;  %v5703_v41 = vmax.f32 %v5695_v20, 0.0  ;;  %v10245_v20 = vld [vmem:[%s13138_s12 + $0x70] sm:$0xff] }
 0xb22   :  { %v5754_v29 = vpack.c.bf16 %v5699_v44, %v5698_v34  ;;  %v5755_v14 = vpack.c.bf16 %v5703_v41, %v5702_v61 }
 0xb24   :  { %5893 = vmatpush.bf16.msrb.mxu3 %v5754_v29  ;;  %5982 = vmatpush.bf16.msra.mxu1 %v5755_v14 }
 0xb27   :  { %9448 = vmatmul.msk.bf16.vlgmr.msrb.gmra.mxu3 %vm13329_vm11, %v10231_v58  ;;  %9464 = vmatmul.msk.bf16.vlgmr.msra.gmra.mxu1 %vm13330_vm14, %v10231_v58  ;;  %vm13344_vm11 = vmmov %vm13336_vm0  ;;  %vm6066_vm14 = vcmask 396288  }
 0xb37   :  { %9449 = vmatmul.msk.bf16.gmra.mxu3 %vm13331_vm12, %v10232_v51  ;;  %9465 = vmatmul.msk.bf16.gmra.mxu1 %vm13332_vm2, %v10232_v51  ;;  %vm13345_vm12 = vmmov %vm13336_vm0 }
 0xb38   :  { %vm13346_vm2 = vmmov %vm13336_vm0 }
 0xb47   :  { %9450 = vmatmul.msk.bf16.gmra.mxu3 %vm13333_vm3, %v10233_v33  ;;  %9466 = vmatmul.msk.bf16.gmra.mxu1 %vm13334_vm4, %v10233_v33  ;;  %vm13347_vm3 = vmmov %vm13336_vm0  ;;  %v10246_v33 = vld [vmem:[%s13138_s12 + $0x78] sm:$0xff]  ;;  %s10646_s12 = smov 57  }
 0xb48   :  { %vm13348_vm4 = vmmov %vm13336_vm0 }
 0xb57   :  { %9451 = vmatmul.msk.bf16.gmra.mxu3 %vm13335_vm15, %v10234_v45  ;;  %9467 = vmatmul.msk.bf16.gmra.mxu1 %vm13336_vm0, %v10234_v45  ;;  %vm13349_vm15 = vmmov %vm13336_vm0 }
 0xb67   :  { %9452 = vmatmul.msk.bf16.gmra.mxu3 %vm13337_vm5, %v10235_v57  ;;  %9468 = vmatmul.msk.bf16.gmra.mxu1 %vm13338_vm13, %v10235_v57  ;;  %vm13350_vm5 = vmmov %vm13336_vm0 }
 0xb68   :  { %vm13351_vm13 = vmmov %vm13336_vm0 }
 0xb77   :  { %9453 = vmatmul.msk.bf16.gmra.mxu3 %vm13339_vm6, %v10236_v39  ;;  %9469 = vmatmul.msk.bf16.gmra.mxu1 %vm13340_vm7, %v10236_v39  ;;  %vm13352_vm6 = vmmov %vm13336_vm0 }
 0xb78   :  { %vm13353_vm7 = vmmov %vm13336_vm0 }
 0xb87   :  { %9454 = vmatmul.msk.bf16.gmra.mxu3 %vm13341_vm8, %v10237_v43  ;;  %9470 = vmatmul.msk.bf16.gmra.mxu1 %vm13342_vm9, %v10237_v43  ;;  %vm13354_vm8 = vmmov %vm13336_vm0 }
 0xb88   :  { %vm13355_vm9 = vmmov %vm13336_vm0 }
 0xb97   :  { %9455 = vmatmul.msk.bf16.gmra.mxu3 %vm13343_vm10, %v10238_v13  ;;  %9471 = vmatmul.msk.bf16.gmra.mxu1 %vm13344_vm11, %v10238_v13  ;;  %vm13356_vm10 = vmmov %vm13336_vm0 }
 0xb98   :  { %vm13357_vm11 = vmmov %vm13336_vm0 }
 0xba4   :  { %v5984_v18 = vpop.f32.mrf.mxu1 }
 0xba5   :  { %v6306_v4 = vpack.c.bf16 %v5984_v18, %v5984_v18 }
 0xba7   :  { %9456 = vmatmul.msk.bf16.gmra.mxu3 %vm13345_vm12, %v10239_v48  ;;  %6308 = vst.msk [vmem:[#allocation5 + $0x38] sm:$0xf] %vm6066_vm14, %v6306_v4  ;;  %9472 = vmatmul.msk.bf16.gmra.mxu1 %vm13346_vm2, %v10239_v48  ;;  %vm13359_vm12 = vmmov %vm13336_vm0  ;;  %vm6097_vm2 = vcmask 1044240  }
 0xbaa   :  { %v5895_v30 = vpop.f32.mrf.mxu3 }
 0xbab   :  { %v6064_v15 = vpack.c.bf16 %v5895_v30, %v5895_v30 }
 0xbac   :  { %v5986_v55 = vpop.f32.mrf.mxu1 }
 0xbad   :  { %6067 = vst.msk [vmem:[#allocation5] sm:$0xf] %vm6066_vm14, %v6064_v15  ;;  %v6307_v62 = vpack.c.bf16 %v5986_v55, %v5986_v55  ;;  %v9594_v55 = vld [vmem:[#allocation10 + $0x70] sm:$0xf] }
 0xbaf   :  { %6309 = vst.msk [vmem:[#allocation5 + $0x54] sm:$0xf] %vm6066_vm14, %v6307_v62  ;;  %v10276_v62 = vld [vmem:[#allocation10 + $0x74] sm:$0xf0] }
 0xbb2   :  { %v5897_v46 = vpop.f32.mrf.mxu3 }
 0xbb3   :  { %v6065_v17 = vpack.c.bf16 %v5897_v46, %v5897_v46  ;;  %v10275_v46 = vld [vmem:[#allocation10 + $0x74] sm:$0xf] }
 0xbb4   :  { %v5989_v38 = vpop.f32.mrf.mxu1 }
 0xbb5   :  { %6068 = vst.msk [vmem:[#allocation5 + $0x1c] sm:$0xf] %vm6066_vm14, %v6065_v17  ;;  %v6310_v59 = vpack.c.bf16 %v5989_v38, %v5989_v38  ;;  %vm13358_vm14 = vmmov %vm13336_vm0  ;;  %v9596_v38 = vld [vmem:[#allocation10 + $0x78] sm:$0xf0] }
 0xbb7   :  { %9457 = vmatmul.msk.bf16.gmra.mxu3 %vm13347_vm3, %v10240_v25  ;;  %9473 = vmatmul.msk.bf16.gmra.mxu1 %vm13348_vm4, %v10240_v25  ;;  %v9595_v25 = vor.u32 %v10276_v62, %v9594_v55  ;;  %vm6098_vm3 = vcmask 154628   ;;  %vm6092_vm4 = vcmask 801792   ;;  %v9540_v55 = vld [vmem:[#allocation10 + $0x8] sm:$0xf0] }
 0xbb9   :  { %7194 = vmatpush.bf16.msra.mxu2 %v9595_v25 }
 0xbba   :  { %v5900_v8 = vpop.f32.mrf.mxu3 }
 0xbbb   :  { %v6069_v31 = vpack.c.bf16 %v5900_v8, %v5900_v8  ;;  %v9599_v8 = vor.u32 %v10275_v46, %v9596_v38 }
 0xbbc   :  { %v5991_v7 = vpop.f32.mrf.mxu1 }
 0xbbd   :  { %6073 = vrot.lane.b32.xlu0 %v6069_v31, %s10640_s9  ;;  %v6311_v0 = vpack.c.bf16 %v5991_v7, %v5991_v7  ;;  %v9586_v31 = vld [vmem:[#allocation10 + $0x60] sm:$0xf]  ;;  %v10274_v7 = vld [vmem:[#allocation10 + $0x64] sm:$0xf0]  ;;  %7327 = vmatpush.bf16.msra.mxu3 %v9599_v8 }
 0xbc2   :  { %v5902_v10 = vpop.f32.mrf.mxu3 }
 0xbc3   :  { %v6070_v50 = vpack.c.bf16 %v5902_v10, %v5902_v10 }
 0xbc4   :  { %v5994_v26 = vpop.f32.mrf.mxu1 }
 0xbc5   :  { %v6322_v28 = vpack.c.bf16 %v5994_v26, %v5994_v26  ;;  %v9587_v26 = vor.u32 %v10274_v7, %v9586_v31 }
 0xbc7   :  { %9458 = vmatmul.msk.bf16.gmra.mxu3 %vm13349_vm15, %v10241_v22  ;;  %9474 = vmatmul.msk.bf16.gmra.mxu1 %vm13336_vm0, %v10241_v22  ;;  %v10273_v22 = vld [vmem:[#allocation10 + $0x64] sm:$0xf]  ;;  %vm6079_vm15 = vcmask 798088   ;;  %vm12395_vm0 = vmor %vm6098_vm3, %vm6097_vm2  ;;  %vm6191_vm3 = vcmask 461888  }
 0xbc8   :  { %7195 = vmatpush.bf16.msra.mxu2 %v9587_v26 }
 0xbca   :  { %v5905_v11 = vpop.f32.mrf.mxu3 }
 0xbcb   :  { %v6082_v23 = vpack.c.bf16 %v5905_v11, %v5905_v11  ;;  %v9588_v11 = vld [vmem:[#allocation10 + $0x68] sm:$0xf0] }
 0xbcc   :  { %v5996_v35 = vpop.f32.mrf.mxu1 }
 0xbcd   :  { %v6323_v5 = vpack.c.bf16 %v5996_v35, %v5996_v35  ;;  %6086 = vrot.lane.b32.xlu2 %v6082_v23, %s10641_s5  ;;  %v9591_v23 = vor.u32 %v10273_v22, %v9588_v11 }
 0xbcf   :  { %6328 = vrot.lane.b32.xlu0 %v6323_v5, %s10641_s5  ;;  %7328 = vmatpush.bf16.msra.mxu3 %v9591_v23 }
 0xbd2   :  { %v5907_v6 = vpop.f32.mrf.mxu3 }
 0xbd3   :  { %v6083_v63 = vpack.c.bf16 %v5907_v6, %v5907_v6 }
 0xbd4   :  { %v5999_v3 = vpop.f32.mrf.mxu1 }
 0xbd5   :  { %6088 = vrot.lane.b32.xlu1 %v6083_v63, %s10641_s5  ;;  %6075 = vrot.lane.b32.xlu2 %v6070_v50, %s10640_s9  ;;  %v6338_v21 = vpack.c.bf16 %v5999_v3, %v5999_v3  ;;  %v9578_v50 = vld [vmem:[#allocation10 + $0x50] sm:$0xf]  ;;  %v10272_v63 = vld [vmem:[#allocation10 + $0x54] sm:$0xf0] }
 0xbd7   :  { %9459 = vmatmul.msk.bf16.gmra.mxu3 %vm13350_vm5, %v10242_v40  ;;  %9475 = vmatmul.msk.bf16.gmra.mxu1 %vm13351_vm13, %v10242_v40  ;;  %v10271_v40 = vld [vmem:[#allocation10 + $0x54] sm:$0xf]  ;;  %vm6112_vm5 = vcmask 552088   ;;  %vm6125_vm13 = vcmask 953888  }
 0xbda   :  { %v5910_v47 = vpop.f32.mrf.mxu3 }
 0xbdb   :  { %v6102_v1 = vpack.c.bf16 %v5910_v47, %v5910_v47 }
 0xbdc   :  { %v6001_v36 = vpop.f32.mrf.mxu1 }
 0xbdd   :  { %6326 = vrot.lane.b32.xlu1 %v6322_v28, %s10641_s5  ;;  %6314 = vrot.lane.b32.xlu2 %v6310_v59, %s10640_s9  ;;  %v6339_v51 = vpack.c.bf16 %v6001_v36, %v6001_v36  ;;  %v9579_v28 = vor.u32 %v10272_v63, %v9578_v50  ;;  %v9580_v59 = vld [vmem:[#allocation10 + $0x58] sm:$0xf0] }
 0xbde   :  { %v9583_v36 = vor.u32 %v10271_v40, %v9580_v59 }
 0xbdf   :  { %7196 = vmatpush.bf16.msra.mxu2 %v9579_v28  ;;  %v9658_v28 = vld [vmem:[#allocation10 + $0xf0] sm:$0xf] }
 0xbe0   :  { %7329 = vmatpush.bf16.msra.mxu3 %v9583_v36 }
 0xbe2   :  { %v5912_v19 = vpop.f32.mrf.mxu3 }
 0xbe3   :  { %v6103_v24 = vpack.c.bf16 %v5912_v19, %v5912_v19  ;;  %v9634_v19 = vld [vmem:[#allocation10 + $0xc0] sm:$0xf] }
 0xbe4   :  { %v6004_v54 = vpop.f32.mrf.mxu1 }
 0xbe5   :  { %6316 = vrot.lane.b32.xlu1 %v6311_v0, %s10640_s9  ;;  %v6350_v13 = vpack.c.bf16 %v6004_v54, %v6004_v54  ;;  %v9570_v0 = vld [vmem:[#allocation10 + $0x40] sm:$0xf]  ;;  %s10649_s9 = smov 125  }
 0xbe7   :  { %9460 = vmatmul.msk.bf16.gmra.mxu3 %vm13352_vm6, %v10243_v9  ;;  %9476 = vmatmul.msk.bf16.gmra.mxu1 %vm13353_vm7, %v10243_v9  ;;  %v10270_v9 = vld [vmem:[#allocation10 + $0x44] sm:$0xf0]  ;;  %vm6143_vm6 = vcmask 1044392   ;;  %vm6144_vm7 = vcmask 310276  }
 0xbea   :  { %v5915_v27 = vpop.f32.mrf.mxu3 }
 0xbeb   :  { %v6115_v29 = vpack.c.bf16 %v5915_v27, %v5915_v27 }
 0xbec   :  { %v6006_v53 = vpop.f32.mrf.mxu1 }
 0xbed   :  { %6106 = vrot.lane.b32.xlu1 %v6102_v1, %s10611_s28  ;;  %v6351_v49 = vpack.c.bf16 %v6006_v53, %v6006_v53  ;;  %v10269_v1 = vld [vmem:[#allocation10 + $0x44] sm:$0xf] }
 0xbf2   :  { %v5917_v52 = vpop.f32.mrf.mxu3 }
 0xbf3   :  { %v6116_v12 = vpack.c.bf16 %v5917_v52, %v5917_v52  ;;  %v9571_v52 = vor.u32 %v10270_v9, %v9570_v0  ;;  %v10291_v9 = vld [vmem:[#allocation10 + $0xf4] sm:$0xf] }
 0xbf4   :  { %v6009_v2 = vpop.f32.mrf.mxu1 }
 0xbf5   :  { %6121 = vrot.lane.b32.xlu1 %v6116_v12, %s10642_s6  ;;  %v6362_v61 = vpack.c.bf16 %v6009_v2, %v6009_v2  ;;  %v9572_v12 = vld [vmem:[#allocation10 + $0x48] sm:$0xf0]  ;;  %7197 = vmatpush.bf16.msra.mxu2 %v9571_v52 }
 0xbf7   :  { %9461 = vmatmul.msk.bf16.gmra.mxu3 %vm13354_vm8, %v10244_v32  ;;  %9477 = vmatmul.msk.bf16.gmra.mxu1 %vm13355_vm9, %v10244_v32  ;;  %v9575_v32 = vor.u32 %v10269_v1, %v9572_v12  ;;  %v9650_v12 = vld [vmem:[#allocation10 + $0xe0] sm:$0xf]  ;;  %vm12473_vm8 = vmor %vm6144_vm7, %vm6143_vm6  ;;  %vm6138_vm9 = vcmask 957440   ;;  %vm6237_vm6 = vcmask 617688   ;;  %vm6268_vm7 = vcmask 1044456  }
 0xbf9   :  { %7330 = vmatpush.bf16.msra.mxu3 %v9575_v32  ;;  %v10290_v32 = vld [vmem:[#allocation10 + $0xe4] sm:$0xf0] }
 0xbfa   :  { %v5920_v42 = vpop.f32.mrf.mxu3 }
 0xbfb   :  { %v6128_v60 = vpack.c.bf16 %v5920_v42, %v5920_v42  ;;  %v9562_v42 = vld [vmem:[#allocation10 + $0x30] sm:$0xf] }
 0xbfc   :  { %v6011_v37 = vpop.f32.mrf.mxu1 }
 0xbfd   :  { %6132 = vrot.lane.b32.xlu0 %v6128_v60, %s10643_s8  ;;  %6342 = vrot.lane.b32.xlu1 %v6338_v21, %s10611_s28  ;;  %v6363_v45 = vpack.c.bf16 %v6011_v37, %v6011_v37  ;;  %v10268_v21 = vld [vmem:[#allocation10 + $0x34] sm:$0xf0]  ;;  %v10267_v60 = vld [vmem:[#allocation10 + $0x34] sm:$0xf] }
 0xc02   :  { %v5922_v56 = vpop.f32.mrf.mxu3 }
 0xc03   :  { %v6129_v16 = vpack.c.bf16 %v5922_v56, %v5922_v56 }
 0xc04   :  { %v12362_v34 = vpop.f32.mrf.mxu1 }
 0xc05   :  { %6108 = vrot.lane.b32.xlu0 %v6103_v24, %s10611_s28  ;;  %6356 = vrot.lane.b32.xlu1 %v6351_v49, %s10642_s6  ;;  %v6378_v6 = vpack.c.bf16 %v12362_v34, %v12362_v34  ;;  %v9563_v24 = vor.u32 %v10268_v21, %v9562_v42  ;;  %v10266_v34 = vld [vmem:[#allocation10 + $0x24] sm:$0xf0]  ;;  %v9651_v21 = vor.u32 %v10290_v32, %v9650_v12 }
 0xc06   :  { %6134 = vrot.lane.b32.xlu2 %v6129_v16, %s10643_s8  ;;  %v9564_v16 = vld [vmem:[#allocation10 + $0x38] sm:$0xf0] }
 0xc07   :  { %9462 = vmatmul.msk.bf16.gmra.mxu3 %vm13356_vm10, %v10245_v20  ;;  %9478 = vmatmul.msk.bf16.gmra.mxu1 %vm13357_vm11, %v10245_v20  ;;  %v9567_v49 = vor.u32 %v10267_v60, %v9564_v16  ;;  %v9554_v20 = vld [vmem:[#allocation10 + $0x20] sm:$0xf]  ;;  %v9652_v60 = vld [vmem:[#allocation10 + $0xe8] sm:$0xf0]  ;;  %vm6158_vm10 = vcmask 707888   ;;  %vm6176_vm11 = vcmask 1044152  }
 0xc08   :  { %7198 = vmatpush.bf16.msra.mxu2 %v9563_v24 }
 0xc09   :  { %7331 = vmatpush.bf16.msra.mxu3 %v9567_v49 }
 0xc0a   :  { %v5925_v44 = vpop.f32.mrf.mxu3 }
 0xc0b   :  { %v6148_v41 = vpack.c.bf16 %v5925_v44, %v5925_v44  ;;  %v10265_v44 = vld [vmem:[#allocation10 + $0x24] sm:$0xf] }
 0xc0c   :  { %v12368_v14 = vpop.f32.mrf.mxu1 }
 0xc0d   :  { %6366 = vrot.lane.b32.xlu0 %v6362_v61, %s10643_s8  ;;  %6152 = vrot.lane.b32.xlu1 %v6148_v41, %s10644_s10  ;;  %v6379_v37 = vpack.c.bf16 %v12368_v14, %v12368_v14  ;;  %v9555_v41 = vor.u32 %v10266_v34, %v9554_v20  ;;  %v9546_v14 = vld [vmem:[#allocation10 + $0x10] sm:$0xf]  ;;  %v10288_v34 = vld [vmem:[#allocation10 + $0xd4] sm:$0xf0] }
 0xc0e   :  { %6119 = vrot.lane.b32.xlu2 %v6115_v29, %s10642_s6  ;;  %v9556_v29 = vld [vmem:[#allocation10 + $0x28] sm:$0xf0]  ;;  %v9642_v20 = vld [vmem:[#allocation10 + $0xd0] sm:$0xf] }
 0xc0f   :  { %7199 = vmatpush.bf16.msra.mxu2 %v9555_v41  ;;  %v9643_v41 = vor.u32 %v10288_v34, %v9642_v20 }
 0xc12   :  { %v5927_v58 = vpop.f32.mrf.mxu3 }
 0xc13   :  { %v6149_v30 = vpack.c.bf16 %v5927_v58, %v5927_v58  ;;  %v9559_v58 = vor.u32 %v10265_v44, %v9556_v29  ;;  %v10287_v29 = vld [vmem:[#allocation10 + $0xd4] sm:$0xf] }
 0xc14   :  { %v6019_v57 = vpop.f32.mrf.mxu1 }
 0xc15   :  { %6344 = vrot.lane.b32.xlu0 %v6339_v51, %s10611_s28  ;;  %v6390_v5 = vpack.c.bf16 %v6019_v57, %v6019_v57  ;;  %7332 = vmatpush.bf16.msra.mxu3 %v9559_v58  ;;  %s10647_s28 = smov 106   ;;  %v9644_v58 = vld [vmem:[#allocation10 + $0xd8] sm:$0xf0] }
 0xc16   :  { %6368 = vrot.lane.b32.xlu2 %v6363_v45, %s10643_s8  ;;  %v10263_v45 = vld [vmem:[#allocation10 + $0x14] sm:$0xf]  ;;  %s10654_s8 = smov 114  }
 0xc17   :  { %9463 = vmatmul.msk.bf16.gmra.mxu3 %vm13358_vm14, %v10246_v33  ;;  %9479 = vmatmul.msk.bf16.gmra.mxu1 %vm13359_vm12, %v10246_v33  ;;  %v10264_v33 = vld [vmem:[#allocation10 + $0x14] sm:$0xf0]  ;;  %vm6177_vm14 = vcmask 64516   ;;  %vm6171_vm12 = vcmask 711680  }
 0xc18   :  { %vm12533_vm2 = vmor %vm6177_vm14, %vm6176_vm11  ;;  %vm6263_vm11 = vcmask 1022976   ;;  %vm6283_vm14 = vcmask 773488  }
 0xc1a   :  { %v5930_v39 = vpop.f32.mrf.mxu3 }
 0xc1b   :  { %v6161_v43 = vpack.c.bf16 %v5930_v39, %v5930_v39 }
 0xc1c   :  { %v6021_v48 = vpop.f32.mrf.mxu1 }
 0xc1d   :  { %v6391_v18 = vpack.c.bf16 %v6021_v48, %v6021_v48  ;;  %6165 = vrot.lane.b32.xlu0 %v6161_v43, %s10645_s7  ;;  %v9547_v43 = vor.u32 %v10264_v33, %v9546_v14  ;;  %v9647_v33 = vor.u32 %v10287_v29, %v9644_v58 }
 0xc1e   :  { %6354 = vrot.lane.b32.xlu2 %v6350_v13, %s10642_s6  ;;  %v9548_v13 = vld [vmem:[#allocation10 + $0x18] sm:$0xf0]  ;;  %s10652_s6 = smov 127  }
 0xc1f   :  { %6396 = vrot.lane.b32.xlu1 %v6391_v18, %s10645_s7  ;;  %v9551_v48 = vor.u32 %v10263_v45, %v9548_v13  ;;  %7200 = vmatpush.bf16.msra.mxu2 %v9547_v43  ;;  %v9538_v18 = vld [vmem:[#allocation10] sm:$0xf]  ;;  %v10286_v45 = vld [vmem:[#allocation10 + $0xc4] sm:$0xf0]  ;;  %v9636_v43 = vld [vmem:[#allocation10 + $0xc8] sm:$0xf0] }
 0xc21   :  { %7333 = vmatpush.bf16.msra.mxu3 %v9551_v48 }
 0xc22   :  { %v5932_v4 = vpop.f32.mrf.mxu3 }
 0xc23   :  { %v6162_v15 = vpack.c.bf16 %v5932_v4, %v5932_v4  ;;  %v10262_v4 = vld [vmem:[#allocation10 + $0x4] sm:$0xf0] }
 0xc24   :  { %v12381_v17 = vpop.f32.mrf.mxu1 }
 0xc25   :  { %6154 = vrot.lane.b32.xlu0 %v6149_v30, %s10644_s10  ;;  %v10261_v30 = vld [vmem:[#allocation10 + $0x4] sm:$0xf]  ;;  %v6406_v26 = vpack.c.bf16 %v12381_v17, %v12381_v17 }
 0xc26   :  { %6167 = vrot.lane.b32.xlu2 %v6162_v15, %s10645_s7  ;;  %v9539_v15 = vor.u32 %v10262_v4, %v9538_v18  ;;  %v9543_v62 = vor.u32 %v10261_v30, %v9540_v55  ;;  %v9626_v30 = vld [vmem:[#allocation10 + $0xb0] sm:$0xf] }
 0xc27   :  { %v6087_v10 = vpop.permute.xlu2 %6086 }
 0xc28   :  { %v6090_v47 = vrot.slane %v6087_v10, 4  ;;  %7201 = vmatpush.bf16.msra.mxu2 %v9539_v15  ;;  %7334 = vmatpush.bf16.msra.mxu3 %v9543_v62  ;;  %v10284_v15 = vld [vmem:[#allocation10 + $0xb4] sm:$0xf0] }
 0xc2a   :  { %v12385_v35 = vpop.f32.mrf.mxu3  ;;  %v6093_v53 = vsel %vm6092_vm4, %v6090_v47, %v6087_v10  ;;  %v10292_v47 = vld [vmem:[#allocation10 + $0xf4] sm:$0xf0] }
 0xc2b   :  { %v6181_v57 = vpack.c.bf16 %v12385_v35, %v12385_v35  ;;  %v9659_v0 = vor.u32 %v10292_v47, %v9658_v28  ;;  %v10279_v28 = vld [vmem:[#allocation10 + $0x94] sm:$0xf] }
 0xc2c   :  { %v12389_v3 = vpop.f32.mrf.mxu1 }
 0xc2d   :  { %6382 = vrot.lane.b32.xlu0 %v6378_v6, %s10644_s10  ;;  %7213 = vmatpush.bf16.msrb.mxu2 %v9659_v0  ;;  %v6407_v55 = vpack.c.bf16 %v12389_v3, %v12389_v3  ;;  %v9618_v3 = vld [vmem:[#allocation10 + $0xa0] sm:$0xf] }
 0xc2e   :  { %6394 = vrot.lane.b32.xlu2 %v6390_v5, %s10645_s7 }
 0xc2f   :  { %v6074_v54 = vpop.permute.xlu0 %6073  ;;  %v6076_v27 = vpop.permute.xlu2 %6075 }
 0xc30   :  { %6080 = vst.msk [vmem:[#allocation5] sm:$0xf] %vm6079_vm15, %v6074_v54  ;;  %v9660_v54 = vld [vmem:[#allocation10 + $0xf8] sm:$0xf0] }
 0xc31   :  { %6100 = vst.msk [vmem:[#allocation5] sm:$0xff] %vm12395_vm0, %v6093_v53  ;;  %v9663_v52 = vor.u32 %v10291_v9, %v9660_v54  ;;  %7214 = vmatpush.bf16.msrb.mxu2 %v9651_v21  ;;  %v9602_v9 = vld [vmem:[#allocation10 + $0x80] sm:$0xf]  ;;  %v10278_v54 = vld [vmem:[#allocation10 + $0x84] sm:$0xf0] }
 0xc32   :  { %v12403_v2 = vpop.f32.mrf.mxu3  ;;  %6081 = vst.msk [vmem:[#allocation5 + $0x1c] sm:$0xf] %vm6079_vm15, %v6076_v27  ;;  %v9603_v12 = vor.u32 %v10278_v54, %v9602_v9  ;;  %v9674_v9 = vld [vmem:[#allocation10 + $0x110] sm:$0xf] }
 0xc33   :  { %v6182_v17 = vpack.c.bf16 %v12403_v2, %v12403_v2  ;;  %v10289_v2 = vld [vmem:[#allocation10 + $0xe4] sm:$0xf]  ;;  %7346 = vmatpush.bf16.msra.mxu0 %v9663_v52 }
 0xc34   :  { %v12408_v56 = vpop.f32.mrf.mxu1  ;;  %v9655_v24 = vor.u32 %v10289_v2, %v9652_v60 }
 0xc35   :  { %7215 = vmatpush.bf16.msrb.mxu2 %v9643_v41  ;;  %v6418_v47 = vpack.c.bf16 %v12408_v56, %v12408_v56  ;;  %v9604_v56 = vld [vmem:[#allocation10 + $0x88] sm:$0xf0]  ;;  %v10306_v41 = vld [vmem:[#allocation10 + $0x164] sm:$0xf0] }
 0xc36   :  { %6384 = vrot.lane.b32.xlu2 %v6379_v37, %s10644_s10 }
 0xc37   :  { %v6315_v61 = vpop.permute.xlu2 %6314  ;;  %7347 = vmatpush.bf16.msra.mxu0 %v9655_v24  ;;  %v9722_v24 = vld [vmem:[#allocation10 + $0x170] sm:$0xf] }
 0xc38   :  { %6320 = vst.msk [vmem:[#allocation5 + $0x38] sm:$0xf] %vm6079_vm15, %v6315_v61  ;;  %v9482_v5 = vld [vmem:[#allocation5] sm:$0xf] }
 0xc3a   :  { %v12412_v51 = vpop.f32.mrf.mxu3 }
 0xc3b   :  { %v6194_v61 = vpack.c.bf16 %v12412_v51, %v12412_v51  ;;  %7348 = vmatpush.bf16.msra.mxu0 %v9647_v33 }
 0xc3c   :  { %v6031_v39 = vpop.f32.mrf.mxu1 }
 0xc3d   :  { %v6419_v27 = vpack.c.bf16 %v6031_v39, %v6031_v39  ;;  %v9635_v39 = vor.u32 %v10286_v45, %v9634_v19 }
 0xc3e   :  { %6185 = vrot.lane.b32.xlu2 %v6181_v57, %s10604_s25  ;;  %v10285_v57 = vld [vmem:[#allocation10 + $0xc4] sm:$0xf] }
 0xc3f   :  { %v9639_v48 = vor.u32 %v10285_v57, %v9636_v43  ;;  %7216 = vmatpush.bf16.msrb.mxu2 %v9635_v39 }
 0xc41   :  { %v6329_v6 = vpop.permute.xlu0 %6328  ;;  %7349 = vmatpush.bf16.msra.mxu0 %v9639_v48  ;;  %v10304_v48 = vld [vmem:[#allocation10 + $0x154] sm:$0xf0] }
 0xc42   :  { %v5942_v46 = vpop.f32.mrf.mxu3  ;;  %v6331_v53 = vrot.slane %v6329_v6, 4 }
 0xc43   :  { %v6195_v25 = vpack.c.bf16 %v5942_v46, %v5942_v46 }
 0xc44   :  { %v12417_v38 = vpop.f32.mrf.mxu1  ;;  %v6333_v37 = vsel %vm6092_vm4, %v6331_v53, %v6329_v6 }
 0xc45   :  { %v6430_v16 = vpack.c.bf16 %v12417_v38, %v12417_v38  ;;  %v10283_v38 = vld [vmem:[#allocation10 + $0xb4] sm:$0xf] }
 0xc46   :  { %6200 = vrot.lane.b32.xlu2 %v6195_v25, %s10646_s12  ;;  %v9627_v25 = vor.u32 %v10284_v15, %v9626_v30  ;;  %v10302_v15 = vld [vmem:[#allocation10 + $0x144] sm:$0xf0] }
 0xc47   :  { %v6089_v8 = vpop.permute.xlu1 %6088 }
 0xc48   :  { %v6091_v31 = vrot.slane %v6089_v8, 4  ;;  %7217 = vmatpush.bf16.msrb.mxu2 %v9627_v25 }
 0xc4a   :  { %v5945_v7 = vpop.f32.mrf.mxu3  ;;  %v6094_v10 = vsel %vm6092_vm4, %v6091_v31, %v6089_v8  ;;  %v9628_v8 = vld [vmem:[#allocation10 + $0xb8] sm:$0xf0] }
 0xc4b   :  { %v6207_v22 = vpack.c.bf16 %v5945_v7, %v5945_v7  ;;  %6101 = vst.msk [vmem:[#allocation5 + $0x1c] sm:$0xff] %vm12395_vm0, %v6094_v10  ;;  %v9631_v10 = vor.u32 %v10283_v38, %v9628_v8 }
 0xc4c   :  { %v12425_v11 = vpop.f32.mrf.mxu1 }
 0xc4d   :  { %6211 = vrot.lane.b32.xlu1 %v6207_v22, %s10647_s28  ;;  %v6431_v62 = vpack.c.bf16 %v12425_v11, %v12425_v11  ;;  %v10282_v22 = vld [vmem:[#allocation10 + $0xa4] sm:$0xf0]  ;;  %7350 = vmatpush.bf16.msra.mxu0 %v9631_v10 }
 0xc4e   :  { %6410 = vrot.lane.b32.xlu2 %v6406_v26, %s10604_s25  ;;  %v10281_v26 = vld [vmem:[#allocation10 + $0xa4] sm:$0xf] }
 0xc4f   :  { %v6327_v23 = vpop.permute.xlu1 %6326 }
 0xc50   :  { %v6330_v35 = vrot.slane %v6327_v23, 4 }
 0xc52   :  { %v5947_v50 = vpop.f32.mrf.mxu3  ;;  %v6332_v63 = vsel %vm6092_vm4, %v6330_v35, %v6327_v23  ;;  %v10250_v40 = vld [vmem:[#allocation5 + $0x18] sm:$0xf0]  ;;  %v9619_v23 = vor.u32 %v10282_v22, %v9618_v3  ;;  %v9690_v22 = vld [vmem:[#allocation10 + $0x130] sm:$0xf]  ;;  %vm6222_vm4 = vcmask 1044304  }
 0xc53   :  { %v6208_v59 = vpack.c.bf16 %v5947_v50, %v5947_v50  ;;  %v9483_v36 = vor.u32 %v10250_v40, %v9482_v5  ;;  %6336 = vst.msk [vmem:[#allocation5 + $0x38] sm:$0xff] %vm12395_vm0, %v6332_v63  ;;  %v9620_v35 = vld [vmem:[#allocation10 + $0xa8] sm:$0xf0]  ;;  %v9610_v63 = vld [vmem:[#allocation10 + $0x90] sm:$0xf] }
 0xc54   :  { %v12434_v1 = vpop.f32.mrf.mxu1  ;;  %v9623_v6 = vor.u32 %v10281_v26, %v9620_v35  ;;  %v10280_v40 = vld [vmem:[#allocation10 + $0x94] sm:$0xf0]  ;;  %7218 = vmatpush.bf16.msrb.mxu2 %v9619_v23 }
 0xc55   :  { %6213 = vrot.lane.b32.xlu0 %v6208_v59, %s10647_s28  ;;  %6187 = vrot.lane.b32.xlu1 %v6182_v17, %s10604_s25  ;;  %v9611_v17 = vor.u32 %v10280_v40, %v9610_v63  ;;  %v9612_v59 = vld [vmem:[#allocation10 + $0x98] sm:$0xf0]  ;;  %v6446_v39 = vpack.c.bf16 %v12434_v1, %v12434_v1  ;;  %v10300_v26 = vld [vmem:[#allocation10 + $0x134] sm:$0xf0]  ;;  %v10298_v40 = vld [vmem:[#allocation10 + $0x124] sm:$0xf0] }
 0xc56   :  { %7202 = vmatmul.bf16.vlgmr.msra.gmra.mxu2 %v9483_v36  ;;  %6424 = vrot.lane.b32.xlu2 %v6419_v27, %s10646_s12  ;;  %v9615_v0 = vor.u32 %v10279_v28, %v9612_v59  ;;  %v10277_v27 = vld [vmem:[#allocation10 + $0x84] sm:$0xf]  ;;  %v9691_v35 = vor.u32 %v10300_v26, %v9690_v22 }
 0xc57   :  { %v6317_v42 = vpop.permute.xlu1 %6316  ;;  %7335 = vmatmul.bf16.vlgmr.msra.gmra.mxu3 %v9483_v36  ;;  %7351 = vmatpush.bf16.msra.mxu0 %v9623_v6  ;;  %v9607_v21 = vor.u32 %v10277_v27, %v9604_v56  ;;  %v9666_v56 = vld [vmem:[#allocation10 + $0x100] sm:$0xf] }
 0xc58   :  { %6321 = vst.msk [vmem:[#allocation5 + $0x54] sm:$0xf] %vm6079_vm15, %v6317_v42  ;;  %7219 = vmatpush.bf16.msrb.mxu2 %v9611_v17  ;;  %vm6223_vm15 = vcmask 220164  }
 0xc59   :  { %6337 = vst.msk [vmem:[#allocation5 + $0x54] sm:$0xff] %vm12395_vm0, %v6333_v37  ;;  %vm6204_vm0 = vcmask 863688  }
 0xc5a   :  { %v5950_v49 = vpop.f32.mrf.mxu3  ;;  %v9510_v46 = vld [vmem:[#allocation5 + $0x38] sm:$0xf] }
 0xc5b   :  { %v6227_v44 = vpack.c.bf16 %v5950_v49, %v5950_v49  ;;  %7352 = vmatpush.bf16.msra.mxu0 %v9615_v0 }
 0xc5c   :  { %v12447_v14 = vpop.f32.mrf.mxu1  ;;  %7220 = vmatpush.bf16.msrb.mxu2 %v9603_v12 }
 0xc5d   :  { %6198 = vrot.lane.b32.xlu0 %v6194_v61, %s10646_s12  ;;  %6434 = vrot.lane.b32.xlu1 %v6430_v16, %s10647_s28  ;;  %v10308_v16 = vld [vmem:[#allocation10 + $0x174] sm:$0xf0] }
 0xc5e   :  { %6231 = vrot.lane.b32.xlu2 %v6227_v44, %s10626_s29  ;;  %v9723_v20 = vor.u32 %v10308_v16, %v9722_v24  ;;  %v9714_v44 = vld [vmem:[#allocation10 + $0x160] sm:$0xf] }
 0xc5f   :  { %v6107_v51 = vpop.permute.xlu1 %6106  ;;  %7353 = vmatpush.bf16.msra.mxu0 %v9607_v21  ;;  %v9715_v33 = vor.u32 %v10306_v41, %v9714_v44  ;;  %v6447_v44 = vpack.c.bf16 %v12447_v14, %v12447_v14  ;;  %v10324_v14 = vld [vmem:[#allocation10 + $0x1f4] sm:$0xf0]  ;;  %v9772_v21 = vld [vmem:[#allocation10 + $0x1d8] sm:$0xf0] }
 0xc60   :  { %6113 = vst.msk [vmem:[#allocation5 + $0x4] sm:$0xf] %vm6112_vm5, %v6107_v51  ;;  %v12453_v13 = vpop.permute.xlu2 %6134  ;;  %v10257_v18 = vld [vmem:[#allocation5 + $0x50] sm:$0xf0]  ;;  %7232 = vmatpush.bf16.msra.mxu2 %v9723_v20  ;;  %v9706_v51 = vld [vmem:[#allocation10 + $0x150] sm:$0xf] }
 0xc61   :  { %v9511_v7 = vor.u32 %v10257_v18, %v9510_v46  ;;  %v6137_v61 = vrot.slane %v12453_v13, 4  ;;  %v9707_v30 = vor.u32 %v10304_v48, %v9706_v51  ;;  %v10322_v51 = vld [vmem:[#allocation10 + $0x1e4] sm:$0xf0] }
 0xc62   :  { %v12455_v4 = vpop.f32.mrf.mxu3 }
 0xc63   :  { %v6140_v45 = vsel %vm6138_vm9, %v6137_v61, %v12453_v13  ;;  %v9698_v13 = vld [vmem:[#allocation10 + $0x140] sm:$0xf] }
 0xc64   :  { %v12461_v31 = vpop.f32.mrf.mxu1  ;;  %7233 = vmatpush.bf16.msra.mxu2 %v9715_v33 }
 0xc65   :  { %6436 = vrot.lane.b32.xlu0 %v6431_v62, %s10647_s28  ;;  %6412 = vrot.lane.b32.xlu1 %v6407_v55, %s10604_s25  ;;  %s10648_s25 = smov 76   ;;  %v9699_v62 = vor.u32 %v10302_v15, %v9698_v13  ;;  %v10320_v13 = vld [vmem:[#allocation10 + $0x1d4] sm:$0xf0] }
 0xc66   :  { %7207 = vmatmul.bf16.gmra.mxu2 %v9511_v7 }
 0xc67   :  { %v6122_v11 = vpop.permute.xlu1 %6121  ;;  %7340 = vmatmul.bf16.gmra.mxu3 %v9511_v7 }
 0xc68   :  { %v6120_v5 = vpop.permute.xlu2 %6119  ;;  %7234 = vmatpush.bf16.msra.mxu2 %v9707_v30  ;;  %v9770_v30 = vld [vmem:[#allocation10 + $0x1d0] sm:$0xf] }
 0xc69   :  { %6126 = vst.msk [vmem:[#allocation5 + $0x4] sm:$0xf] %vm6125_vm13, %v6120_v5 }
 0xc6a   :  { %v12466_v50 = vpop.f32.mrf.mxu3 }
 0xc6b   :  { %v6240_v54 = vpack.c.bf16 %v12466_v50, %v12466_v50 }
 0xc6c   :  { %v12470_v36 = vpop.f32.mrf.mxu1  ;;  %7235 = vmatpush.bf16.msra.mxu2 %v9699_v62 }
 0xc6d   :  { %6422 = vrot.lane.b32.xlu0 %v6418_v47, %s10646_s12  ;;  %v6459_v5 = vpack.c.bf16 %v12470_v36, %v12470_v36 }
 0xc6f   :  { %v6133_v53 = vpop.permute.xlu0 %6132  ;;  %v6343_v52 = vpop.permute.xlu1 %6342 }
 0xc70   :  { %v6136_v32 = vrot.slane %v6133_v53, 4  ;;  %6348 = vst.msk [vmem:[#allocation5 + $0x3c] sm:$0xf] %vm6112_vm5, %v6343_v52  ;;  %v12478_v42 = vpop.permute.xlu2 %6368  ;;  %7236 = vmatpush.bf16.msra.mxu2 %v9691_v35 }
 0xc71   :  { %v6371_v63 = vrot.slane %v12478_v42, 4 }
 0xc72   :  { %v5957_v60 = vpop.f32.mrf.mxu3  ;;  %v6139_v37 = vsel %vm6138_vm9, %v6136_v32, %v6133_v53  ;;  %v10296_v53 = vld [vmem:[#allocation10 + $0x114] sm:$0xf0]  ;;  %v10294_v32 = vld [vmem:[#allocation10 + $0x104] sm:$0xf0] }
 0xc73   :  { %v6241_v49 = vpack.c.bf16 %v5957_v60, %v5957_v60  ;;  %6146 = vst.msk [vmem:[#allocation5 + $0x4] sm:$0xff] %vm12473_vm8, %v6139_v37  ;;  %v6373_v36 = vsel %vm6138_vm9, %v6371_v63, %v12478_v42  ;;  %v9675_v12 = vor.u32 %v10296_v53, %v9674_v9  ;;  %v9667_v42 = vor.u32 %v10294_v32, %v9666_v56  ;;  %v10323_v63 = vld [vmem:[#allocation10 + $0x1f4] sm:$0xf]  ;;  %v10321_v9 = vld [vmem:[#allocation10 + $0x1e4] sm:$0xf] }
 0xc74   :  { %v12483_v34 = vpop.f32.mrf.mxu1  ;;  %v9746_v32 = vld [vmem:[#allocation10 + $0x1a0] sm:$0xf] }
 0xc75   :  { %6246 = vrot.lane.b32.xlu2 %v6241_v49, %s10648_s25  ;;  %v6470_v59 = vpack.c.bf16 %v12483_v34, %v12483_v34 }
 0xc77   :  { %v6109_v29 = vpop.permute.xlu0 %6108  ;;  %v6357_v58 = vpop.permute.xlu1 %6356 }
 0xc78   :  { %6114 = vst.msk [vmem:[#allocation5 + $0x20] sm:$0xf] %vm6112_vm5, %v6109_v29  ;;  %v6355_v19 = vpop.permute.xlu2 %6354 }
 0xc79   :  { %6127 = vst.msk [vmem:[#allocation5 + $0x20] sm:$0xf] %vm6125_vm13, %v6122_v11  ;;  %v6228_v11 = vpack.c.bf16 %v12455_v4, %v12455_v4  ;;  %v9682_v4 = vld [vmem:[#allocation10 + $0x120] sm:$0xf] }
 0xc7a   :  { %v5960_v57 = vpop.f32.mrf.mxu3  ;;  %6147 = vst.msk [vmem:[#allocation5 + $0x20] sm:$0xff] %vm12473_vm8, %v6140_v45  ;;  %v10247_v38 = vld [vmem:[#allocation5 + $0x4] sm:$0xf]  ;;  %v9683_v47 = vor.u32 %v10298_v40, %v9682_v4  ;;  %v9788_v4 = vld [vmem:[#allocation10 + $0x1f8] sm:$0xf0] }
 0xc7b   :  { %v6253_v43 = vpack.c.bf16 %v5960_v57, %v5960_v57  ;;  %6360 = vst.msk [vmem:[#allocation5 + $0x3c] sm:$0xf] %vm6125_vm13, %v6355_v19  ;;  %v9786_v19 = vld [vmem:[#allocation10 + $0x1f0] sm:$0xf]  ;;  %v9778_v57 = vld [vmem:[#allocation10 + $0x1e0] sm:$0xf] }
 0xc7c   :  { %v12496_v18 = vpop.f32.mrf.mxu1  ;;  %7237 = vmatpush.bf16.msra.mxu2 %v9683_v47  ;;  %v9787_v45 = vor.u32 %v10324_v14, %v9786_v19  ;;  %v9779_v48 = vor.u32 %v10322_v51, %v9778_v57  ;;  %v9762_v40 = vld [vmem:[#allocation10 + $0x1c0] sm:$0xf]  ;;  %v9791_v47 = vor.u32 %v10323_v63, %v9788_v4  ;;  %v9850_v19 = vld [vmem:[#allocation10 + $0x270] sm:$0xf]  ;;  %v10340_v14 = vld [vmem:[#allocation10 + $0x274] sm:$0xf0] }
 0xc7d   :  { %6257 = vrot.lane.b32.xlu1 %v6253_v43, %s10649_s9  ;;  %6450 = vrot.lane.b32.xlu2 %v6446_v39, %s10626_s29  ;;  %v6471_v41 = vpack.c.bf16 %v12496_v18, %v12496_v18  ;;  %v10313_v57 = vld [vmem:[#allocation10 + $0x1a4] sm:$0xf]  ;;  %v9748_v51 = vld [vmem:[#allocation10 + $0x1a8] sm:$0xf0] }
 0xc7e   :  { %7384 = vmatpush.bf16.msrb.mxu3 %v9791_v47 }
 0xc7f   :  { %v6367_v55 = vpop.permute.xlu0 %6366  ;;  %v6153_v46 = vpop.permute.xlu1 %6152 }
 0xc80   :  { %v6370_v1 = vrot.slane %v6367_v55, 4  ;;  %v12500_v25 = vpop.permute.xlu2 %6167  ;;  %6159 = vst.msk [vmem:[#allocation5 + $0x8] sm:$0xf] %vm6158_vm10, %v6153_v46  ;;  %7238 = vmatpush.bf16.msra.mxu2 %v9675_v12 }
 0xc81   :  { %v9484_v8 = vld [vmem:[#allocation5 + $0x1c] sm:$0xf0] }
 0xc82   :  { %v5962_v7 = vpop.f32.mrf.mxu3  ;;  %v6372_v10 = vsel %vm6138_vm9, %v6370_v1, %v6367_v55  ;;  %v9487_v3 = vor.u32 %v10247_v38, %v9484_v8  ;;  %v6458_v55 = vpack.c.bf16 %v12461_v31, %v12461_v31  ;;  %vm6250_vm9 = vcmask 1019488  }
 0xc83   :  { %v6254_v23 = vpack.c.bf16 %v5962_v7, %v5962_v7  ;;  %6376 = vst.msk [vmem:[#allocation5 + $0x3c] sm:$0xff] %vm12473_vm8, %v6372_v10 }
 0xc84   :  { %v12510_v6 = vpop.f32.mrf.mxu1  ;;  %7221 = vmatmul.bf16.vlgmr.msrb.gmra.mxu2 %v9487_v3  ;;  %7354 = vmatmul.bf16.vlgmr.msra.gmra.mxu0 %v9487_v3 }
 0xc85   :  { %6259 = vrot.lane.b32.xlu0 %v6254_v23, %s10649_s9  ;;  %6233 = vrot.lane.b32.xlu1 %v6228_v11, %s10626_s29 }
 0xc86   :  { %6464 = vrot.lane.b32.xlu2 %v6459_v5, %s10648_s25  ;;  %7239 = vmatpush.bf16.msra.mxu2 %v9667_v42 }
 0xc87   :  { %v6345_v28 = vpop.permute.xlu0 %6344 }
 0xc88   :  { %6349 = vst.msk [vmem:[#allocation5 + $0x58] sm:$0xf] %vm6112_vm5, %v6345_v28  ;;  %v12517_v17 = vpop.permute.xlu2 %6394  ;;  %v10318_v28 = vld [vmem:[#allocation10 + $0x1c4] sm:$0xf0]  ;;  %vm12591_vm5 = vmor %vm6223_vm15, %vm6222_vm4  ;;  %vm6296_vm4 = vcmask 777216  }
 0xc89   :  { %6361 = vst.msk [vmem:[#allocation5 + $0x58] sm:$0xf] %vm6125_vm13, %v6357_v58  ;;  %v6170_v58 = vrot.slane %v12500_v25, 4  ;;  %v6398_v46 = vrot.slane %v12517_v17, 4  ;;  %vm6217_vm13 = vcmask 867328  }
 0xc8a   :  { %v5965_v0 = vpop.f32.mrf.mxu3  ;;  %6377 = vst.msk [vmem:[#allocation5 + $0x58] sm:$0xff] %vm12473_vm8, %v6373_v36  ;;  %v10254_v37 = vld [vmem:[#allocation5 + $0x3c] sm:$0xf]  ;;  %7251 = vmatpush.bf16.msrb.mxu2 %v9787_v45  ;;  %v9754_v36 = vld [vmem:[#allocation10 + $0x1b0] sm:$0xf]  ;;  %v9851_v45 = vor.u32 %v10340_v14, %v9850_v19  ;;  %vm6269_vm8 = vcmask 375812  }
 0xc8b   :  { %v6273_v27 = vpack.c.bf16 %v5965_v0, %v5965_v0  ;;  %v6173_v43 = vsel %vm6171_vm12, %v6170_v58, %v12500_v25  ;;  %v9771_v25 = vor.u32 %v10320_v13, %v9770_v30  ;;  %v6400_v7 = vsel %vm6171_vm12, %v6398_v46, %v12517_v17  ;;  %v10316_v0 = vld [vmem:[#allocation10 + $0x1b4] sm:$0xf0]  ;;  %v10310_v58 = vld [vmem:[#allocation10 + $0x184] sm:$0xf0]  ;;  %v9834_v30 = vld [vmem:[#allocation10 + $0x250] sm:$0xf] }
 0xc8c   :  { %v12528_v52 = vpop.f32.mrf.mxu1  ;;  %v6486_v17 = vpack.c.bf16 %v12510_v6, %v12510_v6 }
 0xc8d   :  { %6244 = vrot.lane.b32.xlu0 %v6240_v54, %s10648_s25  ;;  %6474 = vrot.lane.b32.xlu1 %v6470_v59, %s10649_s9  ;;  %v9763_v59 = vor.u32 %v10318_v28, %v9762_v40  ;;  %v9780_v54 = vld [vmem:[#allocation10 + $0x1e8] sm:$0xf0] }
 0xc8e   :  { %6277 = vrot.lane.b32.xlu2 %v6273_v27, %s10650_s23  ;;  %7252 = vmatpush.bf16.msrb.mxu2 %v9779_v48  ;;  %v9755_v27 = vor.u32 %v10316_v0, %v9754_v36  ;;  %v9783_v53 = vor.u32 %v10321_v9, %v9780_v54  ;;  %v9842_v48 = vld [vmem:[#allocation10 + $0x260] sm:$0xf]  ;;  %v10339_v9 = vld [vmem:[#allocation10 + $0x274] sm:$0xf]  ;;  %v9852_v54 = vld [vmem:[#allocation10 + $0x278] sm:$0xf0] }
 0xc8f   :  { %v6166_v2 = vpop.permute.xlu0 %6165 }
 0xc90   :  { %v6169_v50 = vrot.slane %v6166_v2, 4  ;;  %v6385_v60 = vpop.permute.xlu2 %6384  ;;  %7385 = vmatpush.bf16.msrb.mxu3 %v9783_v53  ;;  %v9826_v53 = vld [vmem:[#allocation10 + $0x240] sm:$0xf] }
 0xc91   :  { %v9512_v24 = vld [vmem:[#allocation5 + $0x54] sm:$0xf0]  ;;  %v6397_v16 = vpop.permute.xlu1 %6396  ;;  %6389 = vst.msk [vmem:[#allocation5 + $0x5c] sm:$0xf] %vm6158_vm10, %v6385_v60  ;;  %v6487_v60 = vpack.c.bf16 %v12528_v52, %v12528_v52 }
 0xc92   :  { %v5967_v49 = vpop.f32.mrf.mxu3  ;;  %v6172_v20 = vsel %vm6171_vm12, %v6169_v50, %v6166_v2  ;;  %v9515_v34 = vor.u32 %v10254_v37, %v9512_v24  ;;  %v6399_v61 = vrot.slane %v6397_v16, 4  ;;  %7253 = vmatpush.bf16.msrb.mxu2 %v9771_v25  ;;  %v10314_v2 = vld [vmem:[#allocation10 + $0x1a4] sm:$0xf0]  ;;  %v10319_v50 = vld [vmem:[#allocation10 + $0x1d4] sm:$0xf] }
 0xc93   :  { %6179 = vst.msk [vmem:[#allocation5 + $0x8] sm:$0xff] %vm12533_vm2, %v6172_v20  ;;  %v6274_v11 = vpack.c.bf16 %v5967_v49, %v5967_v49  ;;  %v9747_v6 = vor.u32 %v10314_v2, %v9746_v32  ;;  %v9738_v37 = vld [vmem:[#allocation10 + $0x190] sm:$0xf]  ;;  %v10312_v24 = vld [vmem:[#allocation10 + $0x194] sm:$0xf0]  ;;  %v9855_v32 = vor.u32 %v10339_v9, %v9852_v54 }
 0xc94   :  { %v12545_v29 = vpop.f32.mrf.mxu1  ;;  %7226 = vmatmul.bf16.gmra.mxu2 %v9515_v34  ;;  %v6401_v33 = vsel %vm6171_vm12, %v6399_v61, %v6397_v16  ;;  %7359 = vmatmul.bf16.gmra.mxu0 %v9515_v34  ;;  %v9775_v16 = vor.u32 %v10319_v50, %v9772_v21  ;;  %v10317_v49 = vld [vmem:[#allocation10 + $0x1c4] sm:$0xf]  ;;  %v9764_v20 = vld [vmem:[#allocation10 + $0x1c8] sm:$0xf0]  ;;  %v9739_v34 = vor.u32 %v10312_v24, %v9738_v37  ;;  %vm6301_vm12 = vcmask 1044216  }
 0xc95   :  { %6476 = vrot.lane.b32.xlu0 %v6471_v41, %s10649_s9  ;;  %6452 = vrot.lane.b32.xlu1 %v6447_v44, %s10626_s29  ;;  %6405 = vst.msk [vmem:[#allocation5 + $0x5c] sm:$0xff] %vm12533_vm2, %v6401_v33  ;;  %s10651_s29 = smov 95   ;;  %v6498_v5 = vpack.c.bf16 %v12545_v29, %v12545_v29  ;;  %v9767_v61 = vor.u32 %v10317_v49, %v9764_v20  ;;  %v10315_v44 = vld [vmem:[#allocation10 + $0x1b4] sm:$0xf]  ;;  %v9756_v41 = vld [vmem:[#allocation10 + $0x1b8] sm:$0xf0] }
 0xc96   :  { %7254 = vmatpush.bf16.msrb.mxu2 %v9763_v59  ;;  %7386 = vmatpush.bf16.msrb.mxu3 %v9775_v16  ;;  %v9730_v29 = vld [vmem:[#allocation10 + $0x180] sm:$0xf]  ;;  %v9759_v52 = vor.u32 %v10315_v44, %v9756_v41  ;;  %v10309_v25 = vld [vmem:[#allocation10 + $0x184] sm:$0xf]  ;;  %v9844_v37 = vld [vmem:[#allocation10 + $0x268] sm:$0xf0] }
 0xc97   :  { %v6155_v39 = vpop.permute.xlu0 %6154  ;;  %v9731_v33 = vor.u32 %v10310_v58, %v9730_v29  ;;  %7403 = vmatpush.bf16.msrb.mxu0 %v9855_v32  ;;  %v9810_v20 = vld [vmem:[#allocation10 + $0x220] sm:$0xf]  ;;  %v9802_v44 = vld [vmem:[#allocation10 + $0x210] sm:$0xf]  ;;  %v10328_v41 = vld [vmem:[#allocation10 + $0x214] sm:$0xf0] }
 0xc98   :  { %6160 = vst.msk [vmem:[#allocation5 + $0x24] sm:$0xf] %vm6158_vm10, %v6155_v39  ;;  %v6186_v18 = vpop.permute.xlu2 %6185  ;;  %v9751_v39 = vor.u32 %v10313_v57, %v9748_v51  ;;  %v9803_v14 = vor.u32 %v10328_v41, %v9802_v44  ;;  %v9828_v57 = vld [vmem:[#allocation10 + $0x248] sm:$0xf0]  ;;  %v10325_v9 = vld [vmem:[#allocation10 + $0x204] sm:$0xf] }
 0xc99   :  { %6180 = vst.msk [vmem:[#allocation5 + $0x24] sm:$0xff] %vm12533_vm2, %v6173_v43  ;;  %v9796_v54 = vld [vmem:[#allocation10 + $0x208] sm:$0xf0]  ;;  %v10346_v44 = vld [vmem:[#allocation10 + $0x2a4] sm:$0xf0] }
 0xc9a   :  { %v5970_v15 = vpop.f32.mrf.mxu3  ;;  %6192 = vst.msk [vmem:[#allocation5 + $0xc] sm:$0xf] %vm6191_vm3, %v6186_v18  ;;  %v9490_v10 = vld [vmem:[#allocation5 + $0x8] sm:$0xf]  ;;  %7255 = vmatpush.bf16.msrb.mxu2 %v9755_v27  ;;  %7387 = vmatpush.bf16.msrb.mxu3 %v9767_v61  ;;  %v10338_v18 = vld [vmem:[#allocation10 + $0x264] sm:$0xf0] }
 0xc9b   :  { %v6286_v62 = vpack.c.bf16 %v5970_v15, %v5970_v15  ;;  %v9843_v13 = vor.u32 %v10338_v18, %v9842_v48  ;;  %v10336_v15 = vld [vmem:[#allocation10 + $0x254] sm:$0xf0]  ;;  %v10331_v18 = vld [vmem:[#allocation10 + $0x234] sm:$0xf]  ;;  %v9908_v32 = vld [vmem:[#allocation10 + $0x2e8] sm:$0xf0] }
 0xc9c   :  { %v6061_v1 = vpop.f32.mrf.mxu1  ;;  %v10258_v56 = vld [vmem:[#allocation5 + $0x58] sm:$0xf0]  ;;  %v9835_v46 = vor.u32 %v10336_v15, %v9834_v30  ;;  %v9820_v30 = vld [vmem:[#allocation10 + $0x238] sm:$0xf0]  ;;  %v10326_v15 = vld [vmem:[#allocation10 + $0x204] sm:$0xf0] }
 0xc9d   :  { %6462 = vrot.lane.b32.xlu0 %v6458_v55, %s10648_s25  ;;  %6290 = vrot.lane.b32.xlu1 %v6286_v62, %s10651_s29  ;;  %v6499_v38 = vpack.c.bf16 %v6061_v1, %v6061_v1  ;;  %v10311_v55 = vld [vmem:[#allocation10 + $0x194] sm:$0xf]  ;;  %v9740_v62 = vld [vmem:[#allocation10 + $0x198] sm:$0xf0]  ;;  %s8183_s25 = sshll.u32 %s13144_s18, 4  ;;  %s8184_s25 = int_to_ptr.hbm [resolvable:$true] %s8183_s25 }
 0xc9e   :  { %7256 = vmatpush.bf16.msrb.mxu2 %v9747_v6  ;;  %7388 = vmatpush.bf16.msrb.mxu3 %v9759_v52  ;;  %v9743_v1 = vor.u32 %v10311_v55, %v9740_v62  ;;  %v10332_v6 = vld [vmem:[#allocation10 + $0x234] sm:$0xf0]  ;;  %v10335_v52 = vld [vmem:[#allocation10 + $0x254] sm:$0xf]  ;;  %v9823_v55 = vor.u32 %v10331_v18, %v9820_v30 }
 0xc9f   :  { %v6383_v8 = vpop.permute.xlu0 %6382  ;;  %6504 = vrot.lane.b32.xlu2 %v6499_v38, %s10651_s29  ;;  %v9732_v38 = vld [vmem:[#allocation10 + $0x188] sm:$0xf0]  ;;  %v10351_v41 = vld [vmem:[#allocation10 + $0x2d4] sm:$0xf] }
 0xca0   :  { %v10251_v31 = vld [vmem:[#allocation5 + $0x20] sm:$0xf0]  ;;  %6388 = vst.msk [vmem:[#allocation5 + $0x40] sm:$0xf] %vm6158_vm10, %v6383_v8  ;;  %v12568_v3 = vpop.permute.xlu2 %6200  ;;  %vm12626_vm10 = vmor %vm6269_vm8, %vm6268_vm7  ;;  %vm7956_vm8 = vcmask 941056  }
 0xca1   :  { %v12570_v22 = vor.u32 %v10251_v31, %v9490_v10  ;;  %6404 = vst.msk [vmem:[#allocation5 + $0x40] sm:$0xff] %vm12533_vm2, %v6400_v7  ;;  %v9735_v7 = vor.u32 %v10309_v25, %v9732_v38  ;;  %v10347_v30 = vld [vmem:[#allocation10 + $0x2b4] sm:$0xf]  ;;  %vm6302_vm2 = vcmask 130052  }
 0xca2   :  { %v5972_v26 = vpop.f32.mrf.mxu3  ;;  %7257 = vmatpush.bf16.msrb.mxu2 %v9739_v34  ;;  %7389 = vmatpush.bf16.msrb.mxu3 %v9751_v39  ;;  %v10330_v34 = vld [vmem:[#allocation10 + $0x224] sm:$0xf0] }
 0xca3   :  { %v6287_v23 = vpack.c.bf16 %v5972_v26, %v5972_v26  ;;  %v9811_v61 = vor.u32 %v10330_v34, %v9810_v20 }
 0xca4   :  { %7240 = vmatmul.bf16.vlgmr.msra.gmra.mxu2 %v12570_v22 }
 0xca5   :  { %6292 = vrot.lane.b32.xlu0 %v6287_v23, %s10651_s29  ;;  %6279 = vrot.lane.b32.xlu1 %v6274_v11, %s10650_s23  ;;  %v10354_v11 = vld [vmem:[#allocation10 + $0x2e4] sm:$0xf0] }
 0xca6   :  { %7258 = vmatpush.bf16.msrb.mxu2 %v9731_v33  ;;  %7390 = vmatpush.bf16.msrb.mxu3 %v9743_v1  ;;  %v9836_v33 = vld [vmem:[#allocation10 + $0x258] sm:$0xf0]  ;;  %v10356_v1 = vld [vmem:[#allocation10 + $0x2f4] sm:$0xf0] }
 0xca7   :  { %v9839_v19 = vor.u32 %v10335_v52, %v9836_v33 }
 0xca8   :  { %v6411_v35 = vpop.permute.xlu2 %6410  ;;  %v9518_v12 = vld [vmem:[#allocation5 + $0x40] sm:$0xf] }
 0xca9   :  { %6416 = vst.msk [vmem:[#allocation5 + $0x44] sm:$0xf] %vm6191_vm3, %v6411_v35  ;;  %v12584_v42 = vor.u32 %v10258_v56, %v9518_v12  ;;  %v10334_v12 = vld [vmem:[#allocation10 + $0x244] sm:$0xf0]  ;;  %v9818_v56 = vld [vmem:[#allocation10 + $0x230] sm:$0xf] }
 0xcaa   :  { %7270 = vmatpush.bf16.msra.mxu2 %v9851_v45  ;;  %7391 = vmatpush.bf16.msrb.mxu3 %v9735_v7  ;;  %v9827_v2 = vor.u32 %v10334_v12, %v9826_v53  ;;  %v9819_v21 = vor.u32 %v10332_v6, %v9818_v56  ;;  %v10333_v45 = vld [vmem:[#allocation10 + $0x244] sm:$0xf]  ;;  %v9812_v7 = vld [vmem:[#allocation10 + $0x228] sm:$0xf0] }
 0xcab   :  { %v9831_v51 = vor.u32 %v10333_v45, %v9828_v57  ;;  %v10353_v56 = vld [vmem:[#allocation10 + $0x2e4] sm:$0xf] }
 0xcad   :  { %6502 = vrot.lane.b32.xlu0 %v6498_v5, %s10651_s29  ;;  %6490 = vrot.lane.b32.xlu1 %v6486_v17, %s10650_s23 }
 0xcae   :  { %7271 = vmatpush.bf16.msra.mxu2 %v9843_v13  ;;  %v9794_v13 = vld [vmem:[#allocation10 + $0x200] sm:$0xf] }
 0xcaf   :  { %v9795_v62 = vor.u32 %v10326_v15, %v9794_v13  ;;  %v9884_v13 = vld [vmem:[#allocation10 + $0x2b8] sm:$0xf0] }
 0xcb0   :  { %v6425_v8 = vpop.permute.xlu2 %6424 }
 0xcb2   :  { %7272 = vmatpush.bf16.msra.mxu2 %v9835_v46  ;;  %v9914_v46 = vld [vmem:[#allocation10 + $0x2f0] sm:$0xf] }
 0xcb3   :  { %v9915_v25 = vor.u32 %v10356_v1, %v9914_v46  ;;  %v9887_v46 = vor.u32 %v10347_v30, %v9884_v13  ;;  %v9724_v30 = vld [vmem:[#allocation10 + $0x178] sm:$0xf0]  ;;  %v10305_v13 = vld [vmem:[#allocation10 + $0x164] sm:$0xf] }
 0xcb4   :  { %7245 = vmatmul.bf16.gmra.mxu2 %v12584_v42 }
 0xcb5   :  { %6492 = vrot.lane.b32.xlu0 %v6487_v60, %s10650_s23  ;;  %v10337_v60 = vld [vmem:[#allocation10 + $0x264] sm:$0xf] }
 0xcb6   :  { %7273 = vmatpush.bf16.msra.mxu2 %v9827_v2  ;;  %v9847_v24 = vor.u32 %v10337_v60, %v9844_v37  ;;  %v9799_v2 = vor.u32 %v10325_v9, %v9796_v54  ;;  %v9911_v60 = vor.u32 %v10353_v56, %v9908_v32 }
 0xcb8   :  { %v6232_v40 = vpop.permute.xlu2 %6231  ;;  %7404 = vmatpush.bf16.msrb.mxu0 %v9847_v24 }
 0xcba   :  { %7274 = vmatpush.bf16.msra.mxu2 %v9819_v21 }
 0xcbc   :  { %7405 = vmatpush.bf16.msrb.mxu0 %v9839_v19  ;;  %v10349_v19 = vld [vmem:[#allocation10 + $0x2c4] sm:$0xf] }
 0xcbe   :  { %7275 = vmatpush.bf16.msra.mxu2 %v9811_v61  ;;  %v9874_v61 = vld [vmem:[#allocation10 + $0x2a0] sm:$0xf] }
 0xcbf   :  { %v6212_v43 = vpop.permute.xlu1 %6211  ;;  %v9875_v57 = vor.u32 %v10346_v44, %v9874_v61 }
 0xcc0   :  { %v6215_v35 = vrot.slane %v6212_v43, 4  ;;  %7406 = vmatpush.bf16.msrb.mxu0 %v9831_v51 }
 0xcc2   :  { %v6218_v4 = vsel %vm6217_vm13, %v6215_v35, %v6212_v43  ;;  %7276 = vmatpush.bf16.msra.mxu2 %v9803_v14  ;;  %v9892_v14 = vld [vmem:[#allocation10 + $0x2c8] sm:$0xf0] }
 0xcc3   :  { %v9895_v18 = vor.u32 %v10349_v19, %v9892_v14 }
 0xcc4   :  { %7407 = vmatpush.bf16.msrb.mxu0 %v9823_v55  ;;  %v9858_v55 = vld [vmem:[#allocation10 + $0x280] sm:$0xf] }
 0xcc6   :  { %7277 = vmatpush.bf16.msra.mxu2 %v9795_v62  ;;  %v10342_v62 = vld [vmem:[#allocation10 + $0x284] sm:$0xf0] }
 0xcc7   :  { %v6214_v10 = vpop.permute.xlu0 %6213  ;;  %v6188_v31 = vpop.permute.xlu1 %6187 }
 0xcc8   :  { %v6216_v26 = vrot.slane %v6214_v10, 4  ;;  %6193 = vst.msk [vmem:[#allocation5 + $0x28] sm:$0xf] %vm6191_vm3, %v6188_v31 }
 0xcc9   :  { %6206 = vst.msk [vmem:[#allocation5 + $0x28] sm:$0xf] %vm6204_vm0, %v12568_v3 }
 0xcca   :  { %v6219_v23 = vsel %vm6217_vm13, %v6216_v26, %v6214_v10  ;;  %v9906_v26 = vld [vmem:[#allocation10 + $0x2e0] sm:$0xf] }
 0xccb   :  { %6226 = vst.msk [vmem:[#allocation5 + $0x28] sm:$0xff] %vm12591_vm5, %v6219_v23  ;;  %v9898_v23 = vld [vmem:[#allocation10 + $0x2d0] sm:$0xf]  ;;  %v9907_v35 = vor.u32 %v10354_v11, %v9906_v26  ;;  %v9859_v11 = vor.u32 %v10342_v62, %v9858_v55  ;;  %v9716_v55 = vld [vmem:[#allocation10 + $0x168] sm:$0xf0] }
 0xccc   :  { %v9719_v62 = vor.u32 %v10305_v13, %v9716_v55 }
 0xccf   :  { %v6199_v5 = vpop.permute.xlu0 %6198  ;;  %v6435_v63 = vpop.permute.xlu1 %6434 }
 0xcd0   :  { %6205 = vst.msk [vmem:[#allocation5 + $0xc] sm:$0xf] %vm6204_vm0, %v6199_v5  ;;  %v12606_v36 = vpop.permute.xlu2 %6246  ;;  %v6438_v50 = vrot.slane %v6435_v63, 4  ;;  %v10352_v5 = vld [vmem:[#allocation10 + $0x2d4] sm:$0xf0] }
 0xcd1   :  { %6225 = vst.msk [vmem:[#allocation5 + $0xc] sm:$0xff] %vm12591_vm5, %v6218_v4  ;;  %v9916_v4 = vld [vmem:[#allocation10 + $0x2f8] sm:$0xf0] }
 0xcd2   :  { %6238 = vst.msk [vmem:[#allocation5 + $0x10] sm:$0xf] %vm6237_vm6, %v6232_v40  ;;  %v9492_v28 = vld [vmem:[#allocation5 + $0x24] sm:$0xf0]  ;;  %v6440_v49 = vsel %vm6217_vm13, %v6438_v50, %v6435_v63  ;;  %v10355_v63 = vld [vmem:[#allocation10 + $0x2f4] sm:$0xf]  ;;  %v9899_v40 = vor.u32 %v10352_v5, %v9898_v23 }
 0xcd7   :  { %v6437_v3 = vpop.permute.xlu0 %6436  ;;  %v6413_v47 = vpop.permute.xlu1 %6412 }
 0xcd8   :  { %v6439_v17 = vrot.slane %v6437_v3, 4  ;;  %v10248_v59 = vld [vmem:[#allocation5 + $0xc] sm:$0xf]  ;;  %6417 = vst.msk [vmem:[#allocation5 + $0x60] sm:$0xf] %vm6191_vm3, %v6413_v47  ;;  %v6451_v29 = vpop.permute.xlu2 %6450  ;;  %vm12652_vm3 = vmor %vm6302_vm2, %vm6301_vm12  ;;  %vm7748_vm12 = vcmask 121856  }
 0xcd9   :  { %v9495_v0 = vor.u32 %v10248_v59, %v9492_v28  ;;  %6429 = vst.msk [vmem:[#allocation5 + $0x60] sm:$0xf] %vm6204_vm0, %v6425_v8  ;;  %v12616_v58 = vpop.f32.mrf.mxu2  ;;  %v10329_v8 = vld [vmem:[#allocation10 + $0x224] sm:$0xf]  ;;  %v9919_v28 = vor.u32 %v10355_v63, %v9916_v4  ;;  %v10327_v47 = vld [vmem:[#allocation10 + $0x214] sm:$0xf] }
 0xcda   :  { %v6441_v27 = vsel %vm6217_vm13, %v6439_v17, %v6437_v3  ;;  %v9815_v10 = vor.u32 %v10329_v8, %v9812_v7  ;;  %v9890_v3 = vld [vmem:[#allocation10 + $0x2c0] sm:$0xf]  ;;  %v9804_v17 = vld [vmem:[#allocation10 + $0x218] sm:$0xf0]  ;;  %v10350_v59 = vld [vmem:[#allocation10 + $0x2c4] sm:$0xf0] }
 0xcdb   :  { %7259 = vmatmul.bf16.vlgmr.msrb.gmra.mxu2 %v9495_v0  ;;  %6445 = vst.msk [vmem:[#allocation5 + $0x60] sm:$0xff] %vm12591_vm5, %v6441_v27  ;;  %7392 = vmatmul.bf16.vlgmr.msrb.gmra.mxu3 %v9495_v0  ;;  %v9807_v0 = vor.u32 %v10327_v47, %v9804_v17  ;;  %v9891_v21 = vor.u32 %v10350_v59, %v9890_v3  ;;  %v10345_v7 = vld [vmem:[#allocation10 + $0x2a4] sm:$0xf]  ;;  %v9868_v3 = vld [vmem:[#allocation10 + $0x298] sm:$0xf0]  ;;  %vm7860_vm2 = vcmask 105472  }
 0xcdc   :  { %7289 = vmatpush.bf16.msrb.mxu2 %v9915_v25  ;;  %7408 = vmatpush.bf16.msrb.mxu0 %v9815_v10  ;;  %v9876_v10 = vld [vmem:[#allocation10 + $0x2a8] sm:$0xf0]  ;;  %v10341_v59 = vld [vmem:[#allocation10 + $0x284] sm:$0xf] }
 0xcdd   :  { %7422 = vmatpush.bf16.msrb.mxu1 %v9919_v28  ;;  %v9879_v63 = vor.u32 %v10345_v7, %v9876_v10 }
 0xcdf   :  { %v6423_v16 = vpop.permute.xlu0 %6422 }
 0xce0   :  { %6428 = vst.msk [vmem:[#allocation5 + $0x44] sm:$0xf] %vm6204_vm0, %v6423_v16  ;;  %7290 = vmatpush.bf16.msrb.mxu2 %v9907_v35  ;;  %7409 = vmatpush.bf16.msrb.mxu0 %v9807_v0  ;;  %v6465_v37 = vpop.permute.xlu2 %6464  ;;  %v9882_v16 = vld [vmem:[#allocation10 + $0x2b0] sm:$0xf]  ;;  %v9860_v0 = vld [vmem:[#allocation10 + $0x288] sm:$0xf0] }
 0xce1   :  { %6444 = vst.msk [vmem:[#allocation5 + $0x44] sm:$0xff] %vm12591_vm5, %v6440_v49  ;;  %v12619_v38 = vpop.f32.mrf.mxu2  ;;  %7423 = vmatpush.bf16.msrb.mxu1 %v9911_v60  ;;  %v10348_v49 = vld [vmem:[#allocation10 + $0x2b4] sm:$0xf0]  ;;  %v9863_v56 = vor.u32 %v10341_v59, %v9860_v0  ;;  %v10293_v0 = vld [vmem:[#allocation10 + $0x104] sm:$0xf] }
 0xce2   :  { %6456 = vst.msk [vmem:[#allocation5 + $0x48] sm:$0xf] %vm6237_vm6, %v6451_v29  ;;  %v9520_v43 = vld [vmem:[#allocation5 + $0x5c] sm:$0xf0]  ;;  %v9883_v34 = vor.u32 %v10348_v49, %v9882_v16  ;;  %v9900_v29 = vld [vmem:[#allocation10 + $0x2d8] sm:$0xf0] }
 0xce4   :  { %7291 = vmatpush.bf16.msrb.mxu2 %v9899_v40  ;;  %7410 = vmatpush.bf16.msrb.mxu0 %v9799_v2  ;;  %v10343_v40 = vld [vmem:[#allocation10 + $0x294] sm:$0xf] }
 0xce5   :  { %v9871_v47 = vor.u32 %v10343_v40, %v9868_v3  ;;  %v10297_v40 = vld [vmem:[#allocation10 + $0x124] sm:$0xf] }
 0xce8   :  { %v10255_v39 = vld [vmem:[#allocation5 + $0x44] sm:$0xf]  ;;  %7292 = vmatpush.bf16.msrb.mxu2 %v9891_v21 }
 0xce9   :  { %v9523_v48 = vor.u32 %v10255_v39, %v9520_v43  ;;  %v12621_v27 = vpop.f32.mrf.mxu2  ;;  %v6278_v39 = vpop.permute.xlu2 %6277  ;;  %v9866_v43 = vld [vmem:[#allocation10 + $0x290] sm:$0xf] }
 0xceb   :  { %7264 = vmatmul.bf16.gmra.mxu2 %v9523_v48  ;;  %7397 = vmatmul.bf16.gmra.mxu3 %v9523_v48  ;;  %v10344_v48 = vld [vmem:[#allocation10 + $0x294] sm:$0xf0] }
 0xcec   :  { %7293 = vmatpush.bf16.msrb.mxu2 %v9883_v34  ;;  %v9867_v15 = vor.u32 %v10344_v48, %v9866_v43  ;;  %v10358_v34 = vld [vmem:[#allocation10 + $0x304] sm:$0xf0] }
 0xcef   :  { %v6258_v31 = vpop.permute.xlu1 %6257 }
 0xcf0   :  { %v6261_v20 = vrot.slane %v6258_v31, 4  ;;  %7294 = vmatpush.bf16.msrb.mxu2 %v9875_v57 }
 0xcf1   :  { %v12637_v51 = vpop.f32.mrf.mxu2 }
 0xcf2   :  { %v6264_v45 = vsel %vm6263_vm11, %v6261_v20, %v6258_v31  ;;  %v9922_v20 = vld [vmem:[#allocation10 + $0x300] sm:$0xf] }
 0xcf3   :  { %v9923_v61 = vor.u32 %v10358_v34, %v9922_v20 }
 0xcf4   :  { %7295 = vmatpush.bf16.msrb.mxu2 %v9867_v15 }
 0xcf7   :  { %v6260_v53 = vpop.permute.xlu0 %6259  ;;  %v6234_v12 = vpop.permute.xlu1 %6233 }
 0xcf8   :  { %v6262_v6 = vrot.slane %v6260_v53, 4  ;;  %6239 = vst.msk [vmem:[#allocation5 + $0x2c] sm:$0xf] %vm6237_vm6, %v6234_v12  ;;  %7296 = vmatpush.bf16.msrb.mxu2 %v9859_v11  ;;  %v9700_v11 = vld [vmem:[#allocation10 + $0x148] sm:$0xf0] }
 0xcf9   :  { %6252 = vst.msk [vmem:[#allocation5 + $0x2c] sm:$0xf] %vm6250_vm9, %v12606_v36  ;;  %v9903_v36 = vor.u32 %v10351_v41, %v9900_v29 }
 0xcfa   :  { %v6265_v24 = vsel %vm6263_vm11, %v6262_v6, %v6260_v53 }
 0xcfb   :  { %6272 = vst.msk [vmem:[#allocation5 + $0x2c] sm:$0xff] %vm12626_vm10, %v6265_v24  ;;  %7424 = vmatpush.bf16.msrb.mxu1 %v9903_v36 }
 0xcff   :  { %v6245_v52 = vpop.permute.xlu0 %6244  ;;  %v6475_v33 = vpop.permute.xlu1 %6474  ;;  %7425 = vmatpush.bf16.msrb.mxu1 %v9895_v18  ;;  %v10307_v18 = vld [vmem:[#allocation10 + $0x174] sm:$0xf] }
 0xd00   :  { %6251 = vst.msk [vmem:[#allocation5 + $0x10] sm:$0xf] %vm6250_vm9, %v6245_v52  ;;  %v6478_v28 = vrot.slane %v6475_v33, 4  ;;  %v9727_v15 = vor.u32 %v10307_v18, %v9724_v30 }
 0xd01   :  { %6271 = vst.msk [vmem:[#allocation5 + $0x10] sm:$0xff] %vm12626_vm10, %v6264_v45 }
 0xd02   :  { %6284 = vst.msk [vmem:[#allocation5 + $0x14] sm:$0xf] %vm6283_vm14, %v6278_v39  ;;  %v10252_v25 = vld [vmem:[#allocation5 + $0x28] sm:$0xf0]  ;;  %v6480_v9 = vsel %vm6263_vm11, %v6478_v28, %v6475_v33  ;;  %v6505_v33 = vpop.permute.xlu2 %6504  ;;  %v9684_v28 = vld [vmem:[#allocation10 + $0x128] sm:$0xf0] }
 0xd03   :  { %7426 = vmatpush.bf16.msrb.mxu1 %v9887_v46  ;;  %v6507_v45 = vrot.slane %v6505_v33, 4  ;;  %v10303_v46 = vld [vmem:[#allocation10 + $0x154] sm:$0xf] }
 0xd05   :  { %v6509_v39 = vsel %vm6296_vm4, %v6507_v45, %v6505_v33 }
 0xd07   :  { %v6477_v1 = vpop.permute.xlu0 %6476  ;;  %v6453_v8 = vpop.permute.xlu1 %6452  ;;  %7427 = vmatpush.bf16.msrb.mxu1 %v9879_v63  ;;  %v10299_v63 = vld [vmem:[#allocation10 + $0x134] sm:$0xf] }
 0xd08   :  { %v6479_v31 = vrot.slane %v6477_v1, 4  ;;  %v9498_v26 = vld [vmem:[#allocation5 + $0x10] sm:$0xf]  ;;  %6457 = vst.msk [vmem:[#allocation5 + $0x64] sm:$0xf] %vm6237_vm6, %v6453_v8  ;;  %v7222_v23 = vpop.f32.mrf.mxu2 }
 0xd09   :  { %v9499_v35 = vor.u32 %v10252_v25, %v9498_v26  ;;  %6469 = vst.msk [vmem:[#allocation5 + $0x64] sm:$0xf] %vm6250_vm9, %v6465_v37  ;;  %v12645_v5 = vadd.f32 %v7222_v23, %v12616_v58  ;;  %v10301_v26 = vld [vmem:[#allocation10 + $0x144] sm:$0xf] }
 0xd0a   :  { %v6481_v4 = vsel %vm6263_vm11, %v6479_v31, %v6477_v1  ;;  %v9708_v1 = vld [vmem:[#allocation10 + $0x158] sm:$0xf0]  ;;  %v9703_v23 = vor.u32 %v10301_v26, %v9700_v11  ;;  %vm7722_vm11 = vcmask 113664  }
 0xd0b   :  { %7278 = vmatmul.bf16.vlgmr.msra.gmra.mxu2 %v9499_v35  ;;  %6485 = vst.msk [vmem:[#allocation5 + $0x64] sm:$0xff] %vm12626_vm10, %v6481_v4  ;;  %7411 = vmatmul.bf16.vlgmr.msrb.gmra.mxu0 %v9499_v35  ;;  %v9711_v10 = vor.u32 %v10303_v46, %v9708_v1  ;;  %v9692_v4 = vld [vmem:[#allocation10 + $0x138] sm:$0xf0] }
 0xd0c   :  { %7428 = vmatpush.bf16.msrb.mxu1 %v9871_v47  ;;  %7315 = vmatpush.bf16.msra.mxu2 %v9923_v61  ;;  %v9695_v3 = vor.u32 %v10299_v63, %v9692_v4  ;;  %v9687_v47 = vor.u32 %v10297_v40, %v9684_v28 }
 0xd0f   :  { %v6463_v17 = vpop.permute.xlu0 %6462  ;;  %v6291_v58 = vpop.permute.xlu1 %6290 }
 0xd10   :  { %6468 = vst.msk [vmem:[#allocation5 + $0x48] sm:$0xf] %vm6250_vm9, %v6463_v17  ;;  %v6294_v54 = vrot.slane %v6291_v58, 4  ;;  %v12656_v12 = vpop.f32.mrf.mxu2  ;;  %7429 = vmatpush.bf16.msrb.mxu1 %v9863_v56  ;;  %v10295_v17 = vld [vmem:[#allocation10 + $0x114] sm:$0xf]  ;;  %vm7934_vm9 = vcmask 932864  }
 0xd11   :  { %6484 = vst.msk [vmem:[#allocation5 + $0x48] sm:$0xff] %vm12626_vm10, %v6480_v9  ;;  %v9668_v9 = vld [vmem:[#allocation10 + $0x108] sm:$0xf0]  ;;  %v7225_v33 = vadd.f32 %v12656_v12, %v12619_v38  ;;  %vm13372_vm10 = vcmask 7168  }
 0xd12   :  { %v6297_v32 = vsel %vm6296_vm4, %v6294_v54, %v6291_v58  ;;  %v10259_v2 = vld [vmem:[#allocation5 + $0x60] sm:$0xf0]  ;;  %v9676_v58 = vld [vmem:[#allocation10 + $0x118] sm:$0xf0]  ;;  %v9671_v53 = vor.u32 %v10293_v0, %v9668_v9 }
 0xd13   :  { %6304 = vst.msk [vmem:[#allocation5 + $0x14] sm:$0xff] %vm12652_vm3, %v6297_v32  ;;  %v9679_v59 = vor.u32 %v10295_v17, %v9676_v58 }
 0xd17   :  { %v6293_v6 = vpop.permute.xlu0 %6292  ;;  %v6280_v21 = vpop.permute.xlu1 %6279 }
 0xd18   :  { %v9526_v60 = vld [vmem:[#allocation5 + $0x48] sm:$0xf]  ;;  %v6295_v37 = vrot.slane %v6293_v6, 4  ;;  %6285 = vst.msk [vmem:[#allocation5 + $0x30] sm:$0xf] %vm6283_vm14, %v6280_v21  ;;  %v7227_v24 = vpop.f32.mrf.mxu2 }
 0xd19   :  { %v9527_v16 = vor.u32 %v10259_v2, %v9526_v60  ;;  %v7228_v50 = vadd.f32 %v7227_v24, %v12621_v27  ;;  %v9924_v24 = vld [vmem:[#allocation10 + $0x308] sm:$0xf0] }
 0xd1a   :  { %v6298_v49 = vsel %vm6296_vm4, %v6295_v37, %v6293_v6  ;;  %v10249_v36 = vld [vmem:[#allocation5 + $0x14] sm:$0xf]  ;;  %v9506_v56 = vld [vmem:[#allocation5 + $0x18] sm:$0xf] }
 0xd1b   :  { %7283 = vmatmul.bf16.gmra.mxu2 %v9527_v16  ;;  %6305 = vst.msk [vmem:[#allocation5 + $0x30] sm:$0xff] %vm12652_vm3, %v6298_v49  ;;  %7416 = vmatmul.bf16.gmra.mxu0 %v9527_v16  ;;  %v10357_v37 = vld [vmem:[#allocation10 + $0x304] sm:$0xf] }
 0xd1c   :  { %v9927_v16 = vor.u32 %v10357_v37, %v9924_v24 }
 0xd1f   :  { %v6503_v44 = vpop.permute.xlu0 %6502  ;;  %v6491_v41 = vpop.permute.xlu1 %6490 }
 0xd20   :  { %v6506_v29 = vrot.slane %v6503_v44, 4  ;;  %6496 = vst.msk [vmem:[#allocation5 + $0x4c] sm:$0xf] %vm6283_vm14, %v6491_v41  ;;  %v12669_v52 = vpop.f32.mrf.mxu2 }
 0xd22   :  { %v6508_v27 = vsel %vm6296_vm4, %v6506_v29, %v6503_v44  ;;  %v9500_v19 = vld [vmem:[#allocation5 + $0x2c] sm:$0xf0]  ;;  %v10253_v54 = vld [vmem:[#allocation5 + $0x30] sm:$0xf0] }
 0xd23   :  { %v9503_v14 = vor.u32 %v10249_v36, %v9500_v19  ;;  %6512 = vst.msk [vmem:[#allocation5 + $0x4c] sm:$0xff] %vm12652_vm3, %v6508_v27  ;;  %v9507_v32 = vor.u32 %v10253_v54, %v9506_v56 }
 0xd25   :  { %7430 = vmatmul.bf16.vlgmr.msrb.gmra.mxu1 %v9503_v14 }
 0xd27   :  { %v6493_v57 = vpop.permute.xlu0 %6492 }
 0xd28   :  { %6497 = vst.msk [vmem:[#allocation5 + $0x68] sm:$0xf] %vm6283_vm14, %v6493_v57  ;;  %v7241_v43 = vpop.f32.mrf.mxu2  ;;  %v7230_v57 = vadd.f32 %v12669_v52, %v12637_v51  ;;  %v7355_v51 = vpop.f32.mrf.mxu0  ;;  %vm13373_vm14 = vmmov %vm13372_vm10 }
 0xd29   :  { %6513 = vst.msk [vmem:[#allocation5 + $0x68] sm:$0xff] %vm12652_vm3, %v6509_v39  ;;  %v7242_v48 = vadd.f32 %v7241_v43, %v12645_v5  ;;  %vm13374_vm3 = vmmov %vm13372_vm10 }
 0xd2a   :  { %v10256_v25 = vld [vmem:[#allocation5 + $0x4c] sm:$0xf]  ;;  %v9534_v2 = vld [vmem:[#allocation5 + $0x50] sm:$0xf]  ;;  %vm13375_vm4 = vmmov %vm13374_vm3 }
 0xd2b   :  { %7297 = vmatmul.bf16.vlgmr.msrb.gmra.mxu2 %v9503_v14 }
 0xd2c   :  { %7365 = vmatpush.bf16.msrb.mxu2 %v9727_v15 }
 0xd30   :  { %v9528_v8 = vld [vmem:[#allocation5 + $0x64] sm:$0xf0]  ;;  %v7243_v7 = vpop.f32.mrf.mxu2  ;;  %7366 = vmatpush.bf16.msrb.mxu2 %v9719_v62  ;;  %v10260_v6 = vld [vmem:[#allocation5 + $0x68] sm:$0xf0]  ;;  %v7357_v11 = vpop.f32.mrf.mxu0 }
 0xd31   :  { %v9531_v31 = vor.u32 %v10256_v25, %v9528_v8  ;;  %v9535_v60 = vor.u32 %v10260_v6, %v9534_v2  ;;  %v7244_v27 = vadd.f32 %v7243_v7, %v7225_v33  ;;  %v7336_v7 = vpop.f32.mrf.mxu3 }
 0xd32   :  { %v7356_v54 = vadd.f32 %v7355_v51, %v7336_v7 }
 0xd34   :  { %7367 = vmatpush.bf16.msrb.mxu2 %v9711_v10 }
 0xd35   :  { %7435 = vmatmul.bf16.gmra.mxu1 %v9531_v31 }
 0xd38   :  { %v7246_v35 = vpop.f32.mrf.mxu2  ;;  %7368 = vmatpush.bf16.msrb.mxu2 %v9703_v23  ;;  %v7360_v63 = vpop.f32.mrf.mxu0 }
 0xd39   :  { %v7247_v5 = vadd.f32 %v7246_v35, %v7228_v50 }
 0xd3b   :  { %7302 = vmatmul.bf16.gmra.mxu2 %v9531_v31  ;;  %v7338_v31 = vpop.f32.mrf.mxu3 }
 0xd3c   :  { %7369 = vmatpush.bf16.msrb.mxu2 %v9695_v3  ;;  %v7358_v37 = vadd.f32 %v7357_v11, %v7338_v31 }
 0xd40   :  { %7370 = vmatpush.bf16.msrb.mxu2 %v9687_v47  ;;  %v7248_v21 = vpop.f32.mrf.mxu2  ;;  %v7362_v3 = vpop.f32.mrf.mxu0 }
 0xd43   :  { %v7341_v35 = vpop.f32.mrf.mxu3 }
 0xd44   :  { %7371 = vmatpush.bf16.msrb.mxu2 %v9679_v59 }
 0xd48   :  { %7372 = vmatpush.bf16.msrb.mxu2 %v9671_v53 }
 0xd4b   :  { %9928 = vmatmul.msk.bf16.vlgmr.msra.gmra.mxu2 %vm5455_vm1, %v9507_v32  ;;  %v7343_v40 = vpop.f32.mrf.mxu3 }
 0xd4c   :  { %7448 = vmatpush.bf16.msra.mxu2 %v9927_v16 }
 0xd5b   :  { %9929 = vmatmul.msk.bf16.gmra.mxu2 %vm5455_vm1, %v9535_v60 }
 0xd5e   :  { %v7260_v50 = vpop.f32.mrf.mxu2  ;;  %v7393_v47 = vpop.f32.mrf.mxu3 }
 0xd5f   :  { %v7261_v49 = vadd.f32 %v7260_v50, %v7242_v48 }
 0xd66   :  { %v7262_v20 = vpop.f32.mrf.mxu2  ;;  %v7395_v0 = vpop.f32.mrf.mxu3 }
 0xd67   :  { %v7263_v36 = vadd.f32 %v7262_v20, %v7244_v27  ;;  %v7363_v20 = vadd.f32 %v7362_v3, %v7343_v40 }
 0xd6b   :  { %7373 = vmatmul.bf16.vlgmr.msrb.gmra.mxu2 %v12570_v22 }
 0xd6e   :  { %v7265_v34 = vpop.f32.mrf.mxu2 }
 0xd6f   :  { %v7266_v61 = vadd.f32 %v7265_v34, %v7247_v5 }
 0xd76   :  { %v7267_v44 = vpop.f32.mrf.mxu2 }
 0xd7b   :  { %7378 = vmatmul.bf16.gmra.mxu2 %v12584_v42  ;;  %v7249_v42 = vadd.f32 %v7248_v21, %v7230_v57  ;;  %v7398_v21 = vpop.f32.mrf.mxu3 }
 0xd7d   :  { %v7268_v39 = vadd.f32 %v7267_v44, %v7249_v42 }
 0xd83   :  { %v7400_v27 = vpop.f32.mrf.mxu3 }
 0xd88   :  { %v7412_v17 = vpop.f32.mrf.mxu0 }
 0xd8b   :  { %9930 = vmatmul.msk.bf16.vlgmr.msra.gmra.mxu2 %vm5455_vm1, %v9507_v32  ;;  %v7361_v32 = vadd.f32 %v7360_v63, %v7341_v35 }
 0xd8e   :  { %v7279_v41 = vpop.f32.mrf.mxu2 }
 0xd8f   :  { %v7280_v29 = vadd.f32 %v7279_v41, %v7261_v49 }
 0xd90   :  { %v7414_v9 = vpop.f32.mrf.mxu0 }
 0xd96   :  { %v7281_v19 = vpop.f32.mrf.mxu2 }
 0xd97   :  { %v7282_v14 = vadd.f32 %v7281_v19, %v7263_v36 }
 0xd98   :  { %v7417_v50 = vpop.f32.mrf.mxu0 }
 0xd9b   :  { %9931 = vmatmul.msk.bf16.gmra.mxu2 %vm5455_vm1, %v9535_v60 }
 0xd9e   :  { %v7284_v45 = vpop.f32.mrf.mxu2 }
 0xd9f   :  { %v7285_v22 = vadd.f32 %v7284_v45, %v7266_v61 }
 0xda2   :  { %v7431_v59 = vpop.f32.mrf.mxu1 }
 0xda6   :  { %v7286_v43 = vpop.f32.mrf.mxu2 }
 0xda7   :  { %v7287_v48 = vadd.f32 %v7286_v43, %v7268_v39 }
 0xdaa   :  { %v7433_v2 = vpop.f32.mrf.mxu1 }
 0xdae   :  { %v7298_v18 = vpop.f32.mrf.mxu2 }
 0xdaf   :  { %v7299_v30 = vadd.f32 %v7298_v18, %v7280_v29 }
 0xdb2   :  { %v7436_v41 = vpop.f32.mrf.mxu1 }
 0xdb6   :  { %v7300_v13 = vpop.f32.mrf.mxu2 }
 0xdb7   :  { %v7301_v15 = vadd.f32 %v7300_v13, %v7282_v14 }
 0xdbe   :  { %v7303_v38 = vpop.f32.mrf.mxu2 }
 0xdbf   :  { %v7304_v12 = vadd.f32 %v7303_v38, %v7285_v22 }
 0xdc6   :  { %v7305_v55 = vpop.f32.mrf.mxu2 }
 0xdc7   :  { %v7306_v62 = vadd.f32 %v7305_v55, %v7287_v48  ;;  %v7419_v48 = vpop.f32.mrf.mxu0 }
 0xdce   :  { %v7317_v46 = vpop.f32.mrf.mxu2 }
 0xdcf   :  { %v12689_v1 = vadd.f32 %v7317_v46, %v7299_v30  ;;  %v7438_v46 = vpop.f32.mrf.mxu1 }
 0xdd1   :  { %v7464_v39 = vmul.f32 %v12689_v1, %v12689_v1 }
 0xdd6   :  { %v7319_v25 = vpop.f32.mrf.mxu2 }
 0xdd7   :  { %v12691_v8 = vadd.f32 %v7319_v25, %v7301_v15 }
 0xdd9   :  { %v7466_v11 = vmul.f32 %v12691_v8, %v12691_v8 }
 0xdde   :  { %v7322_v52 = vpop.f32.mrf.mxu2 }
 0xddf   :  { %v12693_v10 = vadd.f32 %v7322_v52, %v7304_v12 }
 0xde1   :  { %v7472_v22 = vmul.f32 %v12693_v10, %v12693_v10  ;;  %v7468_v43 = vadd.f32 %v12693_v10, %v12689_v1 }
 0xde3   :  { %v7476_v55 = vadd.f32 %v7472_v22, %v7464_v39  ;;  %v7462_v22 = vld [vmem:[%s13141_s15] sm:$0xff] }
 0xde6   :  { %v7324_v26 = vpop.f32.mrf.mxu2 }
 0xde7   :  { %v12695_v23 = vadd.f32 %v7324_v26, %v7306_v62 }
 0xde9   :  { %v7474_v31 = vmul.f32 %v12695_v23, %v12695_v23  ;;  %v7470_v35 = vadd.f32 %v12695_v23, %v12691_v8 }
 0xdeb   :  { %v7478_v3 = vadd.f32 %v7474_v31, %v7466_v11 }
 0xdee   :  { %v7374_v5 = vpop.f32.mrf.mxu2 }
 0xdef   :  { %v7375_v56 = vadd.f32 %v7374_v5, %v7356_v54 }
 0xdf1   :  { %v7394_v60 = vadd.f32 %v7393_v47, %v7375_v56 }
 0xdf3   :  { %v7413_v34 = vadd.f32 %v7412_v17, %v7394_v60 }
 0xdf5   :  { %v7432_v29 = vadd.f32 %v7431_v59, %v7413_v34 }
 0xdf6   :  { %v7376_v4 = vpop.f32.mrf.mxu2 }
 0xdf7   :  { %v7377_v49 = vadd.f32 %v7376_v4, %v7358_v37 }
 0xdf9   :  { %v7396_v33 = vadd.f32 %v7395_v0, %v7377_v49 }
 0xdfb   :  { %v7415_v57 = vadd.f32 %v7414_v9, %v7396_v33 }
 0xdfd   :  { %v7434_v38 = vadd.f32 %v7433_v2, %v7415_v57 }
 0xdfe   :  { %v7379_v28 = vpop.f32.mrf.mxu2 }
 0xdff   :  { %v7380_v6 = vadd.f32 %v7379_v28, %v7361_v32 }
 0xe01   :  { %v7399_v24 = vadd.f32 %v7398_v21, %v7380_v6 }
 0xe03   :  { %v7418_v44 = vadd.f32 %v7417_v50, %v7399_v24 }
 0xe05   :  { %v7437_v19 = vadd.f32 %v7436_v41, %v7418_v44 }
 0xe06   :  { %v7381_v58 = vpop.f32.mrf.mxu2 }
 0xe07   :  { %v7382_v61 = vadd.f32 %v7381_v58, %v7363_v20 }
 0xe09   :  { %v7401_v14 = vadd.f32 %v7400_v27, %v7382_v61 }
 0xe0b   :  { %v7420_v15 = vadd.f32 %v7419_v48, %v7401_v14  ;;  %v7461_v48 = vld [vmem:[%s13140_s14 + $0x8] sm:$0xff] }
 0xe0d   :  { %v7439_v7 = vadd.f32 %v7438_v46, %v7420_v15 }
 0xe0e   :  { %v7450_v53 = vpop.f32.mrf.mxu2 }
 0xe0f   :  { %v12697_v36 = vadd.f32 %v7450_v53, %v7432_v29  ;;  %v7460_v29 = vld [vmem:[%s13140_s14] sm:$0xff] }
 0xe11   :  { %v7465_v18 = vmul.f32 %v12697_v36, %v12697_v36 }
 0xe16   :  { %v7452_v16 = vpop.f32.mrf.mxu2 }
 0xe17   :  { %v12713_v25 = vadd.f32 %v7452_v16, %v7434_v38  ;;  %v7463_v38 = vld [vmem:[%s13141_s15 + $0x8] sm:$0xff] }
 0xe19   :  { %v7467_v5 = vmul.f32 %v12713_v25, %v12713_v25 }
 0xe1e   :  { %v7455_v45 = vpop.f32.mrf.mxu2 }
 0xe1f   :  { %v12701_v42 = vadd.f32 %v7455_v45, %v7437_v19 }
 0xe21   :  { %v7469_v30 = vadd.f32 %v12701_v42, %v12697_v36  ;;  %v7473_v13 = vmul.f32 %v12701_v42, %v12701_v42 }
 0xe23   :  { %v7480_v12 = vadd.f32 %v7469_v30, %v7468_v43  ;;  %v7477_v62 = vadd.f32 %v7473_v13, %v7465_v18 }
 0xe25   :  { %7481 = vadd.xlane.f32.xlu2 %v7480_v12  ;;  %v7488_v51 = vadd.f32 %v7477_v62, %v7476_v55 }
 0xe26   :  { %v7457_v52 = vpop.f32.mrf.mxu2 }
 0xe27   :  { %v12717_v26 = vadd.f32 %v7457_v52, %v7439_v7  ;;  %7489 = vadd.xlane.f32.xlu0 %v7488_v51 }
 0xe29   :  { %v7471_v63 = vadd.f32 %v12717_v26, %v12713_v25  ;;  %v7475_v4 = vmul.f32 %v12717_v26, %v12717_v26 }
 0xe2b   :  { %v7483_v40 = vadd.f32 %v7471_v63, %v7470_v35  ;;  %v7479_v28 = vadd.f32 %v7475_v4, %v7467_v5 }
 0xe2d   :  { %7484 = vadd.xlane.f32.xlu1 %v7483_v40  ;;  %v7491_v47 = vadd.f32 %v7479_v28, %v7478_v3 }
 0xe2f   :  { %7492 = vadd.xlane.f32.xlu2 %v7491_v47 }
 0xe98   :  { %v7482_v17 = vpop.xlane.xlu2 %7481 }
 0xe99   :  { %v7486_v58 = vmul.f32 0.0025510204, %v7482_v17 }
 0xe9a   :  { %v7490_v59 = vpop.xlane.xlu0 %7489 }
 0xe9b   :  { %v7496_v0 = vmul.f32 %v7486_v58, %v7486_v58  ;;  %v7494_v9 = vmul.f32 0.0025510204, %v7490_v59 }
 0xe9d   :  { %v7498_v54 = vsub.f32 %v7494_v9, %v7496_v0 }
 0xe9f   :  { %v7500_v53 = vmax.f32 %v7498_v54, 0.0 }
 0xea0   :  { %v7485_v56 = vpop.xlane.xlu1 %7484 }
 0xea1   :  { %v7502_v32 = vadd.f32 1e-05, %v7500_v53  ;;  %v7487_v2 = vmul.f32 0.0025510204, %v7485_v56 }
 0xea2   :  { %v7493_v6 = vpop.xlane.xlu2 %7492 }
 0xea3   :  { %10453 = vrsqrt.f32 %v7502_v32  ;;  %v7497_v21 = vmul.f32 %v7487_v2, %v7487_v2  ;;  %v7495_v60 = vmul.f32 0.0025510204, %v7493_v6  ;;  %vm7510_vm0 = vweird.f32 %v7502_v32 }
 0xea5   :  { %v7499_v37 = vsub.f32 %v7495_v60, %v7497_v21 }
 0xea7   :  { %v7501_v24 = vmax.f32 %v7499_v37, 0.0 }
 0xea9   :  { %v10454_v16 = vpop.eup %10453  ;;  %v7503_v50 = vadd.f32 1e-05, %v7501_v24 }
 0xeaa   :  { %v7505_v49 = vmul.f32 %v10454_v16, %v7502_v32  ;;  %vm7511_vm15 = vweird.f32 %v10454_v16 }
 0xeab   :  { %10455 = vrsqrt.f32 %v7503_v50  ;;  %vm7512_vm5 = vmor %vm7510_vm0, %vm7511_vm15  ;;  %vm7520_vm6 = vweird.f32 %v7503_v50 }
 0xeac   :  { %v7506_v20 = vmul.f32 %v10454_v16, %v7505_v49  ;;  %vm13376_vm15 = vmmov %vm13374_vm3 }
 0xead   :  { %vm13377_vm0 = vmmov %vm13374_vm3 }
 0xeae   :  { %v7507_v34 = vmul.f32 0.5, %v7506_v20 }
 0xeb0   :  { %v7508_v61 = vsub.f32 1.5, %v7507_v34 }
 0xeb1   :  { %v10456_v44 = vpop.eup %10455 }
 0xeb2   :  { %v7515_v41 = vmul.f32 %v10456_v44, %v7503_v50  ;;  %v7509_v33 = vmul.f32 %v10454_v16, %v7508_v61  ;;  %vm7521_vm13 = vweird.f32 %v10456_v44 }
 0xeb3   :  { %vm7522_vm7 = vmor %vm7520_vm6, %vm7521_vm13 }
 0xeb4   :  { %v7516_v27 = vmul.f32 %v10456_v44, %v7515_v41  ;;  %v7513_v19 = vsel %vm7512_vm5, %v10454_v16, %v7509_v33  ;;  %vm8072_vm5 = vcmask 924672   ;;  %vm13378_vm13 = vmmov %vm13377_vm0 }
 0xeb5   :  { %v7524_v14 = vmul.f32 %v7513_v19, %v7460_v29  ;;  %vm13379_vm6 = vmmov %vm13377_vm0 }
 0xeb6   :  { %v7517_v45 = vmul.f32 0.5, %v7516_v27 }
 0xeb7   :  { %7532 = vperm.xlu1 %10418, %v7524_v14   ;;  %v7526_v57 = vmul.f32 %v7524_v14, %v7486_v58 }
 0xeb8   :  { %v7518_v39 = vsub.f32 1.5, %v7517_v45 }
 0xeb9   :  { %v7528_v43 = vsub.f32 %v7462_v22, %v7526_v57 }
 0xeba   :  { %v7519_v18 = vmul.f32 %v10456_v44, %v7518_v39  ;;  %v12857_v39 = vld [vmem:[%s13143_s17] sm:$0xff] }
 0xebb   :  { %7550 = vperm.xlu2 %10419, %v7528_v43  }
 0xebc   :  { %v7523_v30 = vsel %vm7522_vm7, %v10456_v44, %v7519_v18 }
 0xebd   :  { %v7525_v13 = vmul.f32 %v7523_v30, %v7461_v48 }
 0xebf   :  { %7537 = vperm.xlu0 %10420, %v7525_v13   ;;  %v7527_v15 = vmul.f32 %v7525_v13, %v7487_v2 }
 0xec1   :  { %v7529_v12 = vsub.f32 %v7463_v38, %v7527_v15 }
 0xec7   :  { %7555 = vperm.xlu0 %10420, %v7529_v12  }
 0xf15   :  { %v7551_v31 = vpop.permute.xlu2 %7550 }
 0xf29   :  { %v7533_v55 = vpop.permute.xlu1 %7532 }
 0xf2a   :  { %v7540_v46 = vmul.f32 %v7533_v55, %v12689_v1  ;;  %v7541_v7 = vmul.f32 %v7533_v55, %v12697_v36  ;;  %v7544_v51 = vmul.f32 %v7533_v55, %v12693_v10  ;;  %v7545_v52 = vmul.f32 %v7533_v55, %v12701_v42  ;;  %v12874_v55 = vld [vmem:[%s13143_s17 + $0x8] sm:$0xff] }
 0xf2c   :  { %v7558_v11 = vadd.f32 %v7551_v31, %v7540_v46  ;;  %v7559_v35 = vadd.f32 %v7551_v31, %v7541_v7  ;;  %v7562_v5 = vadd.f32 %v7551_v31, %v7544_v51  ;;  %v7563_v63 = vadd.f32 %v7551_v31, %v7545_v52 }
 0xf2e   :  { %v7566_v58 = vmax.f32 %v7558_v11, 0.0  ;;  %v7567_v42 = vmax.f32 %v7559_v35, 0.0  ;;  %v7570_v59 = vmax.f32 %v7562_v5, 0.0  ;;  %v7571_v0 = vmax.f32 %v7563_v63, 0.0 }
 0xf31   :  { %v7538_v62 = vpop.permute.xlu0 %7537 }
 0xf32   :  { %v7542_v4 = vmul.f32 %v7538_v62, %v12691_v8  ;;  %v7543_v40 = vmul.f32 %v7538_v62, %v12713_v25  ;;  %v7546_v3 = vmul.f32 %v7538_v62, %v12695_v23  ;;  %v7547_v28 = vmul.f32 %v7538_v62, %v12717_v26  ;;  %v10359_v23 = vld [vmem:[%s13142_s16] sm:$0xff]  ;;  %s10653_s16 = smov 115  }
 0xf39   :  { %v7556_v1 = vpop.permute.xlu0 %7555 }
 0xf3a   :  { %v7560_v47 = vadd.f32 %v7556_v1, %v7542_v4  ;;  %v7561_v36 = vadd.f32 %v7556_v1, %v7543_v40  ;;  %v7564_v17 = vadd.f32 %v7556_v1, %v7546_v3  ;;  %v7565_v10 = vadd.f32 %v7556_v1, %v7547_v28 }
 0xf3c   :  { %v7568_v9 = vmax.f32 %v7560_v47, 0.0  ;;  %v7569_v54 = vmax.f32 %v7561_v36, 0.0  ;;  %v7572_v53 = vmax.f32 %v7564_v17, 0.0  ;;  %v7573_v56 = vmax.f32 %v7565_v10, 0.0  ;;  %v12908_v10 = vld [vmem:[%s13143_s17 + $0x18] sm:$0xff] }
 0xf3e   :  { %v7592_v8 = vpack.c.bf16 %v7568_v9, %v7566_v58  ;;  %v7594_v32 = vpack.c.bf16 %v7572_v53, %v7570_v59  ;;  %v7595_v25 = vpack.c.bf16 %v7573_v56, %v7571_v0  ;;  %v7593_v2 = vpack.c.bf16 %v7569_v54, %v7567_v42 }
 0xf40   :  { %7611 = vmatpush.bf16.msra.mxu3 %v7592_v8  ;;  %7639 = vmatpush.bf16.msra.mxu0 %v7594_v32 }
 0xf41   :  { %7653 = vmatpush.bf16.msra.mxu1 %v7595_v25 }
 0xf43   :  { %9938 = vmatmul.msk.bf16.vlgmr.msra.gmra.mxu0 %vm5455_vm1, %v10359_v23  ;;  %9936 = vmatmul.msk.bf16.vlgmr.msra.gmra.mxu3 %vm5455_vm1, %v10359_v23 }
 0xf44   :  { %7625 = vmatpush.bf16.msrb.mxu3 %v7593_v2  ;;  %9939 = vmatmul.msk.bf16.vlgmr.msra.gmra.mxu1 %vm5455_vm1, %v10359_v23 }
 0xf53   :  { %9937 = vmatmul.msk.bf16.vlgmr.msrb.gmra.mxu3 %vm5455_vm1, %v10359_v23  ;;  %vm7821_vm1 = vcmask 1039360  }
 0xfc0   :  { %v12756_v26 = vpop.f32.mrf.mxu0 }
 0xfc1   :  { %v12758_v6 = vpop.f32.mrf.mxu1  ;;  %7817 = vrot.lane.b32.xlu0 %v12756_v26, %s10652_s6  ;;  %7952 = vrot.lane.b32.xlu2 %v12756_v26, %s10653_s16 }
 0xfc2   :  { %7669 = vrot.lane.b32.xlu1 %v12758_v6, %s10606_s4  ;;  %v7667_v3 = vmul.f32 %v12874_v55, %v12758_v6 }
 0xfc6   :  { %v12765_v21 = vpop.f32.mrf.mxu3 }
 0xfc8   :  { %v12779_v37 = vpop.f32.mrf.mxu0 }
 0xfc9   :  { %7954 = vrot.lane.b32.xlu0 %v12758_v6, %s10653_s16  ;;  %7675 = vrot.lane.b32.xlu2 %v12765_v21, %s10606_s4  ;;  %v12772_v60 = vpop.f32.mrf.mxu1 }
 0xfca   :  { %7679 = vrot.lane.b32.xlu1 %v12756_v26, %s10606_s4 }
 0xfce   :  { %v12796_v24 = vpop.f32.mrf.mxu3 }
 0xfd1   :  { %7930 = vrot.lane.b32.xlu0 %v12756_v26, %s10654_s8  ;;  %7710 = vrot.lane.b32.xlu2 %v12772_v60, %s10630_s1 }
 0xfd2   :  { %7819 = vrot.lane.b32.xlu1 %v12758_v6, %s10652_s6 }
 0xfd6   :  { %v7627_v16 = vpop.f32.mrf.mxu3 }
 0xfd7   :  { %v12882_v7 = vmul.f32 %v12874_v55, %v7627_v16 }
 0xfd9   :  { %7948 = vrot.lane.b32.xlu0 %v12765_v21, %s10653_s16  ;;  %7720 = vrot.lane.b32.xlu2 %v12779_v37, %s10630_s1  ;;  %v7840_v63 = vrot.slane %v12882_v7, 2 }
 0xfda   :  { %7932 = vrot.lane.b32.xlu1 %v12758_v6, %s10654_s8 }
 0xfde   :  { %v12807_v50 = vpop.f32.mrf.mxu3 }
 0xfe1   :  { %7739 = vrot.lane.b32.xlu0 %v12772_v60, %s10605_s3  ;;  %7851 = vrot.lane.b32.xlu2 %v12772_v60, %s10629_s19 }
 0xfe2   :  { %7813 = vrot.lane.b32.xlu1 %v12765_v21, %s10652_s6 }
 0xfe9   :  { %7746 = vrot.lane.b32.xlu0 %v12779_v37, %s10605_s3  ;;  %7858 = vrot.lane.b32.xlu2 %v12779_v37, %s10629_s19 }
 0xfea   :  { %7926 = vrot.lane.b32.xlu1 %v12765_v21, %s10654_s8 }
 0xff1   :  { %7716 = vrot.lane.b32.xlu0 %v12796_v24, %s10630_s1  ;;  %7994 = vrot.lane.b32.xlu2 %v12772_v60, %s10606_s4 }
 0xff2   :  { %7742 = vrot.lane.b32.xlu1 %v12796_v24, %s10605_s3 }
 0xff9   :  { %7854 = vrot.lane.b32.xlu0 %v12796_v24, %s10629_s19  ;;  %7815 = vrot.lane.b32.xlu2 %v7627_v16, %s10652_s6 }
 0xffa   :  { %7950 = vrot.lane.b32.xlu1 %v7627_v16, %s10653_s16 }
0x1001   :  { %7997 = vrot.lane.b32.xlu0 %v12796_v24, %s10606_s4  ;;  %7928 = vrot.lane.b32.xlu2 %v7627_v16, %s10654_s8 }
0x1002   :  { %7718 = vrot.lane.b32.xlu1 %v12807_v50, %s10630_s1 }
0x1009   :  { %7677 = vrot.lane.b32.xlu0 %v7627_v16, %s10606_s4  ;;  %7744 = vrot.lane.b32.xlu2 %v12807_v50, %s10605_s3 }
0x100a   :  { %8066 = vrot.lane.b32.xlu1 %v7627_v16, %s10655_s27 }
0x1011   :  { %8064 = vrot.lane.b32.xlu0 %v12765_v21, %s10655_s27  ;;  %8001 = vrot.lane.b32.xlu2 %v12779_v37, %s10606_s4 }
0x1012   :  { %8102 = vrot.lane.b32.xlu1 %v12796_v24, %s10652_s6 }
0x1019   :  { %8070 = vrot.lane.b32.xlu0 %v12758_v6, %s10655_s27  ;;  %8068 = vrot.lane.b32.xlu2 %v12756_v26, %s10655_s27  ;;  %v7664_v6 = vmul.f32 %v12857_v39, %v12765_v21 }
0x101a   :  { %7856 = vrot.lane.b32.xlu1 %v12807_v50, %s10629_s19 }
0x101b   :  { %v12825_v49 = vpop.permute.xlu2 %7952 }
0x1021   :  { %8106 = vrot.lane.b32.xlu0 %v12779_v37, %s10652_s6  ;;  %8104 = vrot.lane.b32.xlu2 %v12807_v50, %s10652_s6 }
0x1022   :  { %7999 = vrot.lane.b32.xlu1 %v12807_v50, %s10606_s4 }
0x1023   :  { %v12833_v20 = vpop.permute.xlu2 %7675 }
0x102a   :  { %8108 = vrot.lane.b32.xlu1 %v12772_v60, %s10652_s6 }
0x102b   :  { %v12837_v34 = vpop.permute.xlu2 %7710 }
0x1033   :  { %v7818_v61 = vpop.permute.xlu0 %7817  ;;  %v12839_v44 = vpop.permute.xlu2 %7720 }
0x1034   :  { %v7670_v41 = vpop.permute.xlu1 %7669  ;;  %v7725_v47 = vsel %vm7722_vm11, %v12839_v44, %v12837_v34 }
0x1035   :  { %v7688_v28 = vsel %vm13373_vm14, %v7670_v41, %v12833_v20  ;;  %v7734_v0 = vmul.f32 %v7725_v47, %v12908_v10 }
0x1036   :  { %v7689_v58 = vmul.f32 %v7688_v28, %v12857_v39 }
0x1038   :  { %v7697_v25 = vrot.slane %v7689_v58, 2 }
0x103b   :  { %v7955_v29 = vpop.permute.xlu0 %7954  ;;  %v12841_v33 = vpop.permute.xlu2 %7851 }
0x103c   :  { %v12843_v27 = vpop.permute.xlu1 %7679  ;;  %v7959_v57 = vsel %vm7956_vm8, %v12825_v49, %v7955_v29 }
0x103d   :  { %v7968_v43 = vmul.f32 %v7959_v57, %v12857_v39  ;;  %v7683_v62 = vsel %vm13372_vm10, %v12843_v27, %v7670_v41  ;;  %v12929_v41 = vld [vmem:[%s13143_s17 + $0x10] sm:$0xff]  ;;  %s10656_s17 = smov [#allocation12]  }
0x103e   :  { %v7692_v51 = vmul.f32 %v7683_v62, %v12874_v55  ;;  %s8181_s7 = sshll.u32 %s10656_s17, 4  ;;  %s8182_s7 = int_to_ptr.vmem [resolvable:$true] %s8181_s7 }
0x103f   :  { %v7976_v38 = vrot.slane %v7968_v43, 2 }
0x1040   :  { %v7700_v4 = vrot.slane %v7692_v51, 2 }
0x1042   :  { %v7708_v36 = vadd.f32 %v7700_v4, %v7667_v3 }
0x1043   :  { %v12845_v19 = vpop.permute.xlu0 %7930  ;;  %v12847_v14 = vpop.permute.xlu2 %7858 }
0x1044   :  { %v7820_v45 = vpop.permute.xlu1 %7819  ;;  %v7738_v8 = vadd.f32 %v7734_v0, %v7708_v36 }
0x1045   :  { %v12850_v22 = vsel %vm7821_vm1, %v7818_v61, %v7820_v45 }
0x104b   :  { %v12860_v48 = vpop.permute.xlu0 %7948  ;;  %v12862_v18 = vpop.permute.xlu2 %7994 }
0x104c   :  { %v7933_v30 = vpop.permute.xlu1 %7932  ;;  %v7965_v13 = vsel %vm7956_vm8, %v7955_v29, %v12860_v48  ;;  %v7705_v29 = vadd.f32 %v7697_v25, %v7664_v6 }
0x104d   :  { %v7937_v15 = vsel %vm7934_vm9, %v12845_v19, %v7933_v30  ;;  %v7969_v1 = vmul.f32 %v7965_v13, %v12874_v55 }
0x104e   :  { %v12869_v12 = vmul.f32 %v7937_v15, %v12857_v39 }
0x104f   :  { %v7977_v53 = vrot.slane %v7969_v1, 2 }
0x1050   :  { %v12879_v46 = vadd.f32 %v7976_v38, %v12869_v12 }
0x1053   :  { %v7740_v52 = vpop.permute.xlu0 %7739  ;;  %v12885_v31 = vpop.permute.xlu2 %7815 }
0x1054   :  { %v12887_v11 = vpop.permute.xlu1 %7813  ;;  %v7823_v35 = vsel %vm7821_vm1, %v12885_v31, %v7818_v61 }
0x1055   :  { %v7832_v5 = vmul.f32 %v7823_v35, %v12874_v55 }
0x1057   :  { %v12893_v40 = vadd.f32 %v7840_v63, %v7832_v5  ;;  %v7842_v5 = vrot.slane %v7667_v3, 2  ;;  %v7884_v3 = vrot.slane %v7734_v0, 2 }
0x105b   :  { %v12903_v17 = vpop.permute.xlu0 %7746  ;;  %v12941_v62 = vpop.permute.xlu2 %7928 }
0x105c   :  { %v7927_v42 = vpop.permute.xlu1 %7926  ;;  %v7751_v59 = vsel %vm7748_vm12, %v12903_v17, %v7740_v52 }
0x105d   :  { %v7943_v9 = vsel %vm7934_vm9, %v7933_v30, %v7927_v42  ;;  %v7760_v54 = vmul.f32 %v7751_v59, %v12908_v10  ;;  %v7830_v30 = vsel %vm7821_vm1, %v7820_v45, %v12887_v11  ;;  %v7863_v45 = vsel %vm7860_vm2, %v12847_v14, %v12841_v33 }
0x105e   :  { %v12917_v56 = vmul.f32 %v7943_v9, %v12874_v55  ;;  %v7834_v35 = vmul.f32 %v7830_v30, %v12874_v55  ;;  %v7872_v58 = vmul.f32 %v7863_v45, %v12908_v10 }
0x105f   :  { %v7768_v32 = vrot.slane %v7760_v54, 2 }
0x1060   :  { %v12920_v2 = vadd.f32 %v7977_v53, %v12917_v56  ;;  %v7850_v4 = vadd.f32 %v7842_v5, %v7834_v35 }
0x1061   :  { %v7776_v23 = vadd.f32 %v7768_v32, %v7738_v8  ;;  %v7822_v32 = vsel %vm7821_vm1, %v12887_v11, %v12885_v31  ;;  %v12966_v31 = vmul.f32 %v12857_v39, %v12756_v26 }
0x1062   :  { %v7876_v9 = vadd.f32 %v7872_v58, %v7850_v4 }
0x1063   :  { %v7780_v16 = vsub.f32 0.0, %v7776_v23  ;;  %v12924_v61 = vpop.permute.xlu0 %7716  ;;  %v7745_v54 = vpop.permute.xlu2 %7744 }
0x1064   :  { %v7743_v57 = vpop.permute.xlu1 %7742  ;;  %v7730_v43 = vsel %vm7722_vm11, %v12837_v34, %v12924_v61  ;;  %v7892_v8 = vadd.f32 %v7884_v3, %v7876_v9  ;;  %v7750_v45 = vsel %vm7748_vm12, %v7745_v54, %v12903_v17 }
0x1065   :  { %v7787_v13 = vmul.f32 1.442695, %v7780_v16  ;;  %v7756_v21 = vsel %vm7748_vm12, %v7740_v52, %v7743_v57  ;;  %v12938_v15 = vmul.f32 %v7730_v43, %v12929_v41  ;;  %v7831_v43 = vmul.f32 %v7822_v32, %v12857_v39 }
0x1066   :  { %v7757_v38 = vmul.f32 %v7756_v21, %v12929_v41  ;;  %v7896_v30 = vsub.f32 0.0, %v7892_v8  ;;  %v7935_v21 = vsel %vm7934_vm9, %v7927_v42, %v12941_v62  ;;  %v7749_v5 = vsel %vm7748_vm12, %v7743_v57, %v7745_v54 }
0x1067   :  { %10457 = vpow2.f32 %v7787_v13  ;;  %v7735_v51 = vadd.f32 %v12938_v15, %v7705_v29  ;;  %v7758_v17 = vmul.f32 %v7749_v5, %v12908_v10  ;;  %v7759_v54 = vmul.f32 %v7750_v45, %v12929_v41 }
0x1068   :  { %v7765_v34 = vrot.slane %v7757_v38, 2  ;;  %v7839_v38 = vrot.slane %v7664_v6, 2  ;;  %v7903_v42 = vmul.f32 1.442695, %v7896_v30  ;;  %v7881_v8 = vrot.slane %v12938_v15, 2 }
0x1069   :  { %v7767_v30 = vrot.slane %v7759_v54, 2 }
0x106a   :  { %v7773_v63 = vadd.f32 %v7765_v34, %v7735_v51  ;;  %v7847_v35 = vadd.f32 %v7839_v38, %v7831_v43  ;;  %v12973_v34 = vmul.f32 %v7935_v21, %v12857_v39  ;;  %v13027_v38 = vmul.f32 %v12929_v41, %v12796_v24 }
0x106b   :  { %v12948_v52 = vpop.permute.xlu0 %7854  ;;  %v12969_v51 = vpop.permute.xlu2 %8001  ;;  %v7936_v24 = vsel %vm7934_vm9, %v12941_v62, %v12845_v19  ;;  %vm13384_vm9 = vcmask 1041408  }
0x106c   :  { %v7777_v28 = vsub.f32 0.0, %v7773_v63  ;;  %v7951_v1 = vpop.permute.xlu1 %7950  ;;  %v7868_v29 = vsel %vm7860_vm2, %v12841_v33, %v12948_v52  ;;  %v7945_v19 = vmul.f32 %v7936_v24, %v12874_v55 }
0x106d   :  { %v10458_v47 = vpop.eup %10457  ;;  %v7957_v0 = vsel %vm7956_vm8, %v12860_v48, %v7951_v1  ;;  %v7869_v11 = vmul.f32 %v7868_v29, %v12929_v41  ;;  %v7766_v29 = vrot.slane %v7758_v17, 2 }
0x106e   :  { %v7792_v36 = vadd.f32 1.0, %v10458_v47  ;;  %v7781_v59 = vmul.f32 1.442695, %v7777_v28  ;;  %v7966_v33 = vmul.f32 %v7957_v0, %v12857_v39  ;;  %v8005_v47 = vsel %vm13377_vm0, %v12969_v51, %v12862_v18 }
0x106f   :  { %v13018_v0 = vmul.f32 %v12908_v10, %v12772_v60  ;;  %v13035_v60 = vmul.f32 %v12908_v10, %v12807_v50 }
0x1070   :  { %10459 = vrcp.f32 %v7792_v36  ;;  %v7873_v36 = vadd.f32 %v7869_v11, %v7847_v35  ;;  %v7974_v58 = vrot.slane %v7966_v33, 2 }
0x1071   :  { %10461 = vpow2.f32 %v7781_v59  ;;  %v8134_v62 = vrot.slane %v13018_v0, 2 }
0x1072   :  { %v7889_v15 = vadd.f32 %v7881_v8, %v7873_v36 }
0x1073   :  { %v12951_v53 = vpop.permute.xlu0 %7997 }
0x1074   :  { %v7719_v25 = vpop.permute.xlu1 %7718  ;;  %v8010_v4 = vsel %vm13376_vm15, %v12862_v18, %v12951_v53  ;;  %v7958_v18 = vsel %vm7956_vm8, %v7951_v1, %v12825_v49  ;;  %v7982_v49 = vadd.f32 %v7974_v58, %v12973_v34  ;;  %vm13383_vm8 = vcmask 1042434  }
0x1075   :  { %v8011_v32 = vmul.f32 %v8010_v4, %v12929_v41  ;;  %v7967_v21 = vmul.f32 %v7958_v18, %v12874_v55 }
0x1076   :  { %v10460_v23 = vpop.eup %10459  ;;  %v7990_v45 = vadd.f32 %v13027_v38, %v7982_v49 }
0x1077   :  { %v10462_v16 = vpop.eup %10461  ;;  %7804 = vst [vmem:[#allocation1 + $0x1b] sm:$0xff] %v10460_v23  ;;  %v8019_v33 = vrot.slane %v8011_v32, 2  ;;  %v7975_v50 = vrot.slane %v7967_v21, 2 }
0x1078   :  { %v7789_v13 = vadd.f32 1.0, %v10462_v16 }
0x1079   :  { %v7983_v8 = vadd.f32 %v7975_v50, %v7945_v19 }
0x107a   :  { %10463 = vrcp.f32 %v7789_v13 }
0x107b   :  { %v7678_v48 = vpop.permute.xlu0 %7677  ;;  %10465 = vpow2.f32 %v7903_v42  ;;  %v13031_v42 = vpop.permute.xlu2 %8068 }
0x107c   :  { %v12976_v6 = vpop.permute.xlu1 %8066  ;;  %v7681_v26 = vsel %vm13374_vm3, %v12833_v20, %v7678_v48  ;;  %v7682_v63 = vsel %vm13375_vm4, %v7678_v48, %v12843_v27  ;;  %v7723_v20 = vsel %vm7722_vm11, %v12924_v61, %v7719_v25  ;;  %v7724_v27 = vsel %vm7722_vm11, %v7719_v25, %v12839_v44 }
0x107d   :  { %v7690_v28 = vmul.f32 %v7681_v26, %v12874_v55  ;;  %v7691_v57 = vmul.f32 %v7682_v63, %v12857_v39  ;;  %v8014_v61 = vmul.f32 %v8005_v47, %v12908_v10  ;;  %v13004_v44 = vmul.f32 %v7723_v20, %v12908_v10 }
0x107e   :  { %v13007_v25 = vmul.f32 %v7724_v27, %v12929_v41  ;;  %v7893_v26 = vsub.f32 0.0, %v7889_v15  ;;  %v7993_v63 = vadd.f32 %v13018_v0, %v12920_v2  ;;  %v7841_v47 = vrot.slane %v12966_v31, 2 }
0x107f   :  { %v7698_v59 = vrot.slane %v7690_v28, 2  ;;  %v7699_v9 = vrot.slane %v7691_v57, 2  ;;  %v8022_v5 = vrot.slane %v8014_v61, 2  ;;  %v8132_v2 = vrot.slane %v13035_v60, 2 }
0x1080   :  { %v10464_v3 = vpop.eup %10463  ;;  %v7897_v58 = vmul.f32 1.442695, %v7893_v26  ;;  %v8074_v54 = vsel %vm8072_vm5, %v12976_v6, %v13031_v42 }
0x1081   :  { %7801 = vst [vmem:[#allocation1] sm:$0xff] %v10464_v3  ;;  %v7706_v23 = vadd.f32 %v7698_v59, %v12882_v7  ;;  %v7707_v16 = vadd.f32 %v7699_v9, %v12966_v31  ;;  %v13022_v7 = vmul.f32 %v12929_v41, %v12779_v37  ;;  %v7833_v37 = vmul.f32 %v12850_v22, %v12857_v39  ;;  %v10466_v57 = vpop.eup %10465 }
0x1082   :  { %v8027_v22 = vadd.f32 %v8019_v33, %v7990_v45  ;;  %v8030_v17 = vadd.f32 %v8022_v5, %v7993_v63  ;;  %v7908_v3 = vadd.f32 1.0, %v10466_v57  ;;  %v8083_v49 = vmul.f32 %v8074_v54, %v12874_v55 }
0x1083   :  { %v7736_v1 = vadd.f32 %v13004_v44, %v7706_v23  ;;  %v7737_v43 = vadd.f32 %v13007_v25, %v7707_v16  ;;  %v13014_v13 = vpop.permute.xlu0 %8064  ;;  %v8133_v36 = vrot.slane %v13022_v7, 2  ;;  %v7849_v59 = vadd.f32 %v7841_v47, %v7833_v37  ;;  %v8105_v21 = vpop.permute.xlu2 %8104 }
0x1084   :  { %v13029_v11 = vpop.permute.xlu1 %8102  ;;  %v13052_v9 = vadd.f32 %v13022_v7, %v12879_v46  ;;  %v8073_v18 = vsel %vm8072_vm5, %v13014_v13, %v12976_v6  ;;  %v8031_v61 = vsub.f32 0.0, %v8027_v22  ;;  %v8034_v23 = vsub.f32 0.0, %v8030_v17 }
0x1085   :  { %v7774_v35 = vadd.f32 %v7766_v29, %v7736_v1  ;;  %v7775_v48 = vadd.f32 %v7767_v30, %v7737_v43  ;;  %v7882_v1 = vrot.slane %v13004_v44, 2  ;;  %v8090_v6 = vrot.slane %v12973_v34, 2 }
0x1086   :  { %v8091_v43 = vrot.slane %v7945_v19, 2  ;;  %v8082_v30 = vmul.f32 %v8073_v18, %v12857_v39  ;;  %v7991_v5 = vadd.f32 %v13035_v60, %v7983_v8  ;;  %v8035_v37 = vmul.f32 1.442695, %v8031_v61 }
0x1087   :  { %v7778_v4 = vsub.f32 0.0, %v7774_v35  ;;  %v7779_v28 = vsub.f32 0.0, %v7775_v48  ;;  %v8110_v35 = vsel %vm7821_vm1, %v13029_v11, %v8105_v21  ;;  %v8041_v44 = vmul.f32 1.442695, %v8034_v23 }
0x1088   :  { %v8099_v45 = vadd.f32 %v8091_v43, %v8083_v49  ;;  %v8119_v57 = vmul.f32 %v8110_v35, %v12929_v41 }
0x1089   :  { %v7783_v20 = vmul.f32 1.442695, %v7778_v4  ;;  %v7785_v27 = vmul.f32 1.442695, %v7779_v28  ;;  %v8098_v28 = vadd.f32 %v8090_v6, %v8082_v30 }
0x108b   :  { %10467 = vpow2.f32 %v7783_v20  ;;  %v8071_v31 = vpop.permute.xlu0 %8070  ;;  %v8123_v61 = vadd.f32 %v8119_v57, %v8098_v28 }
0x108c   :  { %10469 = vpow2.f32 %v7785_v27  ;;  %v7857_v32 = vpop.permute.xlu1 %7856 }
0x108d   :  { %v7861_v46 = vsel %vm7860_vm2, %v12948_v52, %v7857_v32  ;;  %v7862_v16 = vsel %vm7860_vm2, %v7857_v32, %v12847_v14  ;;  %10471 = vpow2.f32 %v7897_v58  ;;  %v7883_v52 = vrot.slane %v13007_v25, 2 }
0x108e   :  { %v7870_v15 = vmul.f32 %v7861_v46, %v12908_v10  ;;  %v7871_v29 = vmul.f32 %v7862_v16, %v12929_v41  ;;  %10473 = vrcp.f32 %v7908_v3  ;;  %v8075_v32 = vsel %vm8072_vm5, %v13031_v42, %v8071_v31 }
0x108f   :  { %v8093_v16 = vrot.slane %v12917_v56, 2 }
0x1090   :  { %v7874_v33 = vadd.f32 %v7870_v15, %v12893_v40  ;;  %v7875_v14 = vadd.f32 %v7871_v29, %v7849_v59  ;;  %v8081_v40 = vsel %vm8072_vm5, %v8071_v31, %v13014_v13  ;;  %v8131_v15 = vrot.slane %v13027_v38, 2 }
0x1091   :  { %v10468_v48 = vpop.eup %10467 }
0x1092   :  { %v10470_v26 = vpop.eup %10469  ;;  %v7790_v34 = vadd.f32 1.0, %v10468_v48  ;;  %v7890_v24 = vadd.f32 %v7882_v1, %v7874_v33  ;;  %v7891_v63 = vadd.f32 %v7883_v52, %v7875_v14  ;;  %v8084_v1 = vmul.f32 %v8075_v32, %v12857_v39 }
0x1093   :  { %v7791_v4 = vadd.f32 1.0, %v10470_v26  ;;  %v8107_v25 = vpop.permute.xlu0 %8106  ;;  %v10472_v47 = vpop.eup %10471  ;;  %v8139_v43 = vadd.f32 %v8131_v15, %v8123_v61 }
0x1094   :  { %10475 = vrcp.f32 %v7790_v34  ;;  %v7894_v50 = vsub.f32 0.0, %v7890_v24  ;;  %v7895_v22 = vsub.f32 0.0, %v7891_v63  ;;  %v8000_v20 = vpop.permute.xlu1 %7999  ;;  %v8111_v27 = vsel %vm7821_vm1, %v8105_v21, %v8107_v25  ;;  %v13086_v8 = vpop.eup %10473 }
0x1095   :  { %10477 = vrcp.f32 %v7791_v4  ;;  %v8003_v17 = vsel %vm13378_vm13, %v12951_v53, %v8000_v20  ;;  %v8004_v58 = vsel %vm13379_vm6, %v8000_v20, %v12969_v51  ;;  %v8120_v19 = vmul.f32 %v8111_v27, %v12908_v10 }
0x1096   :  { %v7899_v13 = vmul.f32 1.442695, %v7894_v50  ;;  %v7901_v59 = vmul.f32 1.442695, %v7895_v22  ;;  %v8012_v54 = vmul.f32 %v8003_v17, %v12908_v10  ;;  %v8013_v3 = vmul.f32 %v8004_v58, %v12929_v41 }
0x1097   :  { %v7905_v18 = vadd.f32 1.0, %v10472_v47  ;;  %v8124_v23 = vadd.f32 %v8120_v19, %v8099_v45  ;;  %v8085_v53 = vmul.f32 %v8081_v40, %v12874_v55  ;;  %v8092_v55 = vrot.slane %v12869_v12, 2 }
0x1098   :  { %10479 = vpow2.f32 %v7899_v13  ;;  %v8020_v51 = vrot.slane %v8012_v54, 2  ;;  %v8021_v46 = vrot.slane %v8013_v3, 2  ;;  %v8143_v26 = vsub.f32 0.0, %v8139_v43 }
0x1099   :  { %10481 = vpow2.f32 %v7901_v59  ;;  %v8140_v29 = vadd.f32 %v8132_v2, %v8124_v23  ;;  %v8101_v38 = vadd.f32 %v8093_v16, %v8085_v53  ;;  %v8100_v14 = vadd.f32 %v8092_v55, %v8084_v1 }
0x109a   :  { %v10476_v49 = vpop.eup %10475  ;;  %10483 = vpow2.f32 %v8035_v37  ;;  %v8028_v42 = vadd.f32 %v8020_v51, %v7991_v5  ;;  %v8029_v31 = vadd.f32 %v8021_v46, %v13052_v9  ;;  %v7808_v9 = vlaneseq }
0x109b   :  { %v10478_v6 = vpop.eup %10477  ;;  %7802 = vst [vmem:[#allocation1 + $0x9] sm:$0xff] %v10476_v49  ;;  %10485 = vpow2.f32 %v8041_v44  ;;  %v8144_v56 = vsub.f32 0.0, %v8140_v29 }
0x109c   :  { %10487 = vrcp.f32 %v7905_v18  ;;  %7803 = vst [vmem:[#allocation1 + $0x12] sm:$0xff] %v10478_v6  ;;  %v8032_v30 = vsub.f32 0.0, %v8028_v42  ;;  %v8033_v60 = vsub.f32 0.0, %v8029_v31  ;;  %v8109_v2 = vpop.permute.xlu1 %8108  ;;  %vm13103_vm7 = vcmp.lt.s32.totalorder %v7808_v9, 512 }
0x109d   :  { %v8149_v21 = vmul.f32 1.442695, %v8144_v56  ;;  %v8112_v52 = vsel %vm7821_vm1, %v8107_v25, %v8109_v2  ;;  %v8118_v39 = vsel %vm7821_vm1, %v8109_v2, %v13029_v11  ;;  %v8147_v25 = vmul.f32 1.442695, %v8143_v26 }
0x109e   :  { %v10480_v33 = vpop.eup %10479  ;;  %v8037_v12 = vmul.f32 1.442695, %v8032_v30  ;;  %v8121_v35 = vmul.f32 %v8112_v52, %v12929_v41  ;;  %v8122_v48 = vmul.f32 %v8118_v39, %v12908_v10  ;;  %v8039_v44 = vmul.f32 1.442695, %v8033_v60 }
0x109f   :  { %v10482_v5 = vpop.eup %10481  ;;  %v7906_v37 = vadd.f32 1.0, %v10480_v33  ;;  %10489 = vpow2.f32 %v8149_v21  ;;  %vm13382_vm1 = vcmask 1040384  }
0x10a0   :  { %v10484_v34 = vpop.eup %10483  ;;  %v7907_v24 = vadd.f32 1.0, %v10482_v5  ;;  %10491 = vpow2.f32 %v8037_v12  ;;  %v8125_v63 = vadd.f32 %v8121_v35, %v8100_v14  ;;  %v8126_v45 = vadd.f32 %v8122_v48, %v8101_v38 }
0x10a1   :  { %v10486_v4 = vpop.eup %10485  ;;  %10493 = vrcp.f32 %v7906_v37  ;;  %v8043_v40 = vadd.f32 1.0, %v10484_v34 }
0x10a2   :  { %v10488_v28 = vpop.eup %10487  ;;  %10495 = vrcp.f32 %v7907_v24  ;;  %v8141_v10 = vadd.f32 %v8133_v36, %v8125_v63  ;;  %v8142_v41 = vadd.f32 %v8134_v62, %v8126_v45  ;;  %v8046_v58 = vadd.f32 1.0, %v10486_v4 }
0x10a3   :  { %10497 = vpow2.f32 %v8039_v44  ;;  %v7806_v57 = vld [vmem:[#allocation1 + $0x5] ss:$9 sm:$0xff] }
0x10a4   :  { %v8145_v47 = vsub.f32 0.0, %v8141_v10  ;;  %v8146_v50 = vsub.f32 0.0, %v8142_v41  ;;  %7812 = vst.msk [vmem:[#allocation12] ss:$4 sm:$0xf] %vm13103_vm7, %v7806_v57  ;;  %10499 = vrcp.f32 %v8043_v40 }
0x10a5   :  { %v10490_v22 = vpop.eup %10489  ;;  %7917 = vst [vmem:[#allocation1] sm:$0xff] %v10488_v28  ;;  %10501 = vpow2.f32 %v8147_v25 }
0x10a6   :  { %v10492_v20 = vpop.eup %10491  ;;  %v8151_v27 = vmul.f32 1.442695, %v8145_v47  ;;  %7920 = vst [vmem:[#allocation1 + $0x1b] sm:$0xff] %v13086_v8  ;;  %v8153_v0 = vmul.f32 1.442695, %v8146_v50  ;;  %v8156_v13 = vadd.f32 1.0, %v10490_v22 }
0x10a7   :  { %v10494_v7 = vpop.eup %10493  ;;  %v8044_v36 = vadd.f32 1.0, %v10492_v20 }
0x10a8   :  { %v10496_v62 = vpop.eup %10495  ;;  %7918 = vst [vmem:[#allocation1 + $0x9] sm:$0xff] %v10494_v7 }
0x10a9   :  { %v10498_v17 = vpop.eup %10497  ;;  %10503 = vrcp.f32 %v8044_v36  ;;  %7919 = vst [vmem:[#allocation1 + $0x12] sm:$0xff] %v10496_v62 }
0x10aa   :  { %v8045_v19 = vadd.f32 1.0, %v10498_v17  ;;  %10505 = vpow2.f32 %v8151_v27  ;;  %v10500_v59 = vpop.eup %10499 }
0x10ab   :  { %10507 = vpow2.f32 %v8153_v0  ;;  %v10502_v54 = vpop.eup %10501 }
0x10ac   :  { %10509 = vrcp.f32 %v8045_v19  ;;  %v8155_v53 = vadd.f32 1.0, %v10502_v54 }
0x10ad   :  { %10511 = vrcp.f32 %v8046_v58 }
0x10ae   :  { %10513 = vrcp.f32 %v8156_v13 }
0x10af   :  { %v10504_v3 = vpop.eup %10503 }
0x10b0   :  { %v10506_v8 = vpop.eup %10505  ;;  %v7922_v18 = vld [vmem:[#allocation1 + $0x4] ss:$9 sm:$0xff] }
0x10b1   :  { %v10508_v32 = vpop.eup %10507  ;;  %v8157_v61 = vadd.f32 1.0, %v10506_v8  ;;  %7925 = vst.msk [vmem:[#allocation12 + $0x1] ss:$4 sm:$0xf] %vm13103_vm7, %v7922_v18 }
0x10b2   :  { %v10510_v23 = vpop.eup %10509  ;;  %v8158_v51 = vadd.f32 1.0, %v10508_v32  ;;  %8055 = vst [vmem:[#allocation1] sm:$0xff] %v10500_v59 }
0x10b3   :  { %10515 = vrcp.f32 %v8157_v61  ;;  %8056 = vst [vmem:[#allocation1 + $0x9] sm:$0xff] %v10504_v3  ;;  %v10512_v46 = vpop.eup %10511 }
0x10b4   :  { %10517 = vrcp.f32 %v8158_v51  ;;  %8057 = vst [vmem:[#allocation1 + $0x12] sm:$0xff] %v10510_v23  ;;  %v10514_v16 = vpop.eup %10513 }
0x10b5   :  { %8058 = vst [vmem:[#allocation1 + $0x1b] sm:$0xff] %v10512_v46  ;;  %10519 = vrcp.f32 %v8155_v53  ;;  %v8167_v29 = vrot.slane %v10514_v16, 7 }
0x10b9   :  { %v10516_v15 = vpop.eup %10515 }
0x10ba   :  { %v10518_v49 = vpop.eup %10517  ;;  %v8168_v1 = vrot.slane %v10516_v15, 6 }
0x10bb   :  { %v8169_v42 = vrot.slane %v10518_v49, 5  ;;  %v10520_v31 = vpop.eup %10519 }
0x10bc   :  { %v8060_v6 = vld [vmem:[#allocation1 + $0x1] ss:$9 sm:$0xff]  ;;  %v8170_v55 = vsel %vm13382_vm1, %v10520_v31, %v8167_v29 }
0x10bd   :  { %8063 = vst.msk [vmem:[#allocation12 + $0x2] ss:$4 sm:$0xf] %vm13103_vm7, %v8060_v6  ;;  %v8171_v43 = vsel %vm13383_vm8, %v8168_v1, %v8169_v42 }
0x10be   :  { %v8172_v56 = vsel %vm13384_vm9, %v8170_v55, %v8171_v43 }
0x10bf   :  { %8175 = vst.msk [vmem:[#allocation12 + $0x3] ss:$4 sm:$0xf] %vm13103_vm7, %v8172_v56 }
0x10c0   :  { %8186 = dma.vmem_to_hbm [thread:$0]  %s8182_s7, 256, %s8184_s25, [#allocation9]  }
0x10c1   :  { %10597 = dma.done.wait [#allocation9], 256  }
0x10c2   :  { %10598 = vsyncadd [#allocation9], 4294967040 }
0x10c3   :  { %8191 = vsyncpa [#allocation8], 1 }
0x10c4   :  { %8192 = vsyncpa [#allocation11], 1 }
0x10c5   :  { %8193 = vsyncpa [#allocation9], 1 }

</bundles_post_ra>
